<compile_context>
chip_gen: v7x
topology: tpu7x:2x2x1
jax: 0.10.0
libtpu: 0.0.40
codegen_flags: <defaults>
</compile_context>

<pallas_src>
import functools

import jax
import jax.numpy as jnp
from jax.experimental import pallas as pl
from jax.experimental.pallas import tpu as pltpu

# Conservative knobs that are legal on v5e / v6e / v7x alike; bump _TILE_M to
# 512 and the limit towards ~48 MiB on v6e for large-M workloads.
_VMEM_LIMIT = 32 * 1024 * 1024
_TILE_M = 256


def _tile_m(M, target=_TILE_M):
    # Full-extent block when small (always satisfies the (8,128) rule);
    # otherwise an 8/128-aligned row tile (a partial last block is fine
    # because every kernel below is row-independent).
    return M if M <= target else target


def _gelu(x):
    # TODO(synk): nn.GELU() is exact erf-GELU; tanh approximation is used
    # because erf lowering is not guaranteed inside Pallas TPU kernels.
    return jax.nn.gelu(x, approximate=True)


def _ln(x, g_ref, b_ref, eps):
    mu = jnp.mean(x, axis=-1, keepdims=True)
    xc = x - mu
    var = jnp.mean(xc * xc, axis=-1, keepdims=True)
    return xc * jax.lax.rsqrt(var + eps) * g_ref[...] + b_ref[...]


# ----------------------------- Pallas kernels ------------------------------

def _fused_linear_kernel(*refs, do_ln, pre_gelu, post_gelu, add_res, eps):
    """[LayerNorm] -> [GELU] -> x @ W + b -> [GELU] -> [+ residual]."""
    it = iter(refs)
    x_ref = next(it)
    if do_ln:
        g_ref, be_ref = next(it), next(it)
    w_ref, b_ref = next(it), next(it)
    r_ref = next(it) if add_res else None
    o_ref = next(it)

    x = x_ref[...].astype(jnp.float32)
    if do_ln:
        x = _ln(x, g_ref, be_ref, eps)
    if pre_gelu:
        x = _gelu(x)
    y = jnp.dot(x.astype(jnp.bfloat16), w_ref[...],
                preferred_element_type=jnp.float32) + b_ref[...]
    if post_gelu:
        y = _gelu(y)
    if add_res:
        y = y + r_ref[...].astype(jnp.float32)
    o_ref[...] = y.astype(o_ref.dtype)


def fused_linear(x, w, b, *, ln=None, pre_gelu=False, post_gelu=False,
                 residual=None, eps=1e-6):
    """Row-tiled fused (LN?)(GELU?) x@W+b (GELU?)(+res?) kernel."""
    orig_shape = x.shape
    K = orig_shape[-1]
    N = w.shape[1]
    x2 = x.reshape(-1, K)
    M = x2.shape[0]
    TM = _tile_m(M)

    inputs = [x2]
    in_specs = [pl.BlockSpec((TM, K), lambda i: (i, 0))]
    if ln is not None:
        g, beta = ln
        inputs += [g.reshape(1, K), beta.reshape(1, K)]
        in_specs += [pl.BlockSpec((1, K), lambda i: (0, 0)),
                     pl.BlockSpec((1, K), lambda i: (0, 0))]
    inputs += [w.astype(jnp.bfloat16), b.reshape(1, N)]
    in_specs += [pl.BlockSpec((K, N), lambda i: (0, 0)),
                 pl.BlockSpec((1, N), lambda i: (0, 0))]
    if residual is not None:
        inputs.append(residual.reshape(-1, N))
        in_specs.append(pl.BlockSpec((TM, N), lambda i: (i, 0)))

    out = pl.pallas_call(
        functools.partial(_fused_linear_kernel, do_ln=ln is not None,
                          pre_gelu=pre_gelu, post_gelu=post_gelu,
                          add_res=residual is not None, eps=eps),
        out_shape=jax.ShapeDtypeStruct((M, N), jnp.float32),
        grid=(pl.cdiv(M, TM),),
        in_specs=in_specs,
        out_specs=pl.BlockSpec((TM, N), lambda i: (i, 0)),
        compiler_params=pltpu.CompilerParams(
            dimension_semantics=("parallel",),
            vmem_limit_bytes=_VMEM_LIMIT),
        cost_estimate=pl.CostEstimate(
            flops=2 * M * K * N,
            transcendentals=(M * K if pre_gelu else 0) + (M * N if post_gelu else 0),
            bytes_accessed=4 * M * K + 2 * K * N + 4 * M * N
            + (4 * M * N if residual is not None else 0)),
    )(*inputs)
    return out.reshape(orig_shape[:-1] + (N,))


def _ln_mlp_kernel(x_ref, g_ref, be_ref, w1_ref, b1_ref, w2_ref, b2_ref,
                   o_ref, *, eps):
    """y = x + fc2(GELU(fc1(LN(x)))) -- 4x-wide hidden stays in VMEM only."""
    x = x_ref[...].astype(jnp.float32)
    h = _ln(x, g_ref, be_ref, eps)
    h1 = jnp.dot(h.astype(jnp.bfloat16), w1_ref[...],
                 preferred_element_type=jnp.float32) + b1_ref[...]
    h1 = _gelu(h1)
    y = jnp.dot(h1.astype(jnp.bfloat16), w2_ref[...],
                preferred_element_type=jnp.float32) + b2_ref[...]
    o_ref[...] = (y + x).astype(o_ref.dtype)


def ln_mlp(x, p, eps=1e-6):
    B, L, D = x.shape
    H = p["fc1_w"].shape[1]
    x2 = x.reshape(-1, D)
    M = x2.shape[0]
    TM = _tile_m(M)
    out = pl.pallas_call(
        functools.partial(_ln_mlp_kernel, eps=eps),
        out_shape=jax.ShapeDtypeStruct((M, D), jnp.float32),
        grid=(pl.cdiv(M, TM),),
        in_specs=[pl.BlockSpec((TM, D), lambda i: (i, 0)),
                  pl.BlockSpec((1, D), lambda i: (0, 0)),
                  pl.BlockSpec((1, D), lambda i: (0, 0)),
                  pl.BlockSpec((D, H), lambda i: (0, 0)),
                  pl.BlockSpec((1, H), lambda i: (0, 0)),
                  pl.BlockSpec((H, D), lambda i: (0, 0)),
                  pl.BlockSpec((1, D), lambda i: (0, 0))],
        out_specs=pl.BlockSpec((TM, D), lambda i: (i, 0)),
        compiler_params=pltpu.CompilerParams(
            dimension_semantics=("parallel",),
            vmem_limit_bytes=_VMEM_LIMIT),
        cost_estimate=pl.CostEstimate(
            flops=4 * M * D * H,
            transcendentals=M * H,
            bytes_accessed=8 * M * D + 4 * D * H),
    )(x2, p["norm2_g"].reshape(1, D), p["norm2_b"].reshape(1, D),
      p["fc1_w"].astype(jnp.bfloat16), p["fc1_b"].reshape(1, H),
      p["fc2_w"].astype(jnp.bfloat16), p["fc2_b"].reshape(1, D))
    return out.reshape(B, L, D)


def _layernorm_kernel(x_ref, g_ref, b_ref, o_ref, *, eps):
    x = x_ref[...].astype(jnp.float32)
    o_ref[...] = _ln(x, g_ref, b_ref, eps).astype(o_ref.dtype)


def layernorm(x, g, b, eps=1e-6):
    orig_shape = x.shape
    D = orig_shape[-1]
    x2 = x.reshape(-1, D)
    M = x2.shape[0]
    TM = _tile_m(M)
    out = pl.pallas_call(
        functools.partial(_layernorm_kernel, eps=eps),
        out_shape=jax.ShapeDtypeStruct((M, D), jnp.float32),
        grid=(pl.cdiv(M, TM),),
        in_specs=[pl.BlockSpec((TM, D), lambda i: (i, 0)),
                  pl.BlockSpec((1, D), lambda i: (0, 0)),
                  pl.BlockSpec((1, D), lambda i: (0, 0))],
        out_specs=pl.BlockSpec((TM, D), lambda i: (i, 0)),
        compiler_params=pltpu.CompilerParams(
            dimension_semantics=("parallel",),
            vmem_limit_bytes=_VMEM_LIMIT),
    )(x2, g.reshape(1, D), b.reshape(1, D))
    return out.reshape(orig_shape)


def _self_attn_kernel(qkv_ref, o_ref, *, num_heads, scale):
    """All heads of one batch element per grid step; lane-dense (1,L,3D) block.

    Per-head outputs are concatenated in VMEM and stored with a single
    full-width (L, D) unmasked store (no per-head masked partial stores).
    """
    qkv = qkv_ref[0]                          # (L, 3D) f32
    D = qkv.shape[-1] // 3
    Dh = D // num_heads
    outs = []
    for h in range(num_heads):
        c = h * Dh
        q = qkv[:, c:c + Dh].astype(jnp.bfloat16)
        k = qkv[:, D + c:D + c + Dh].astype(jnp.bfloat16)
        v = qkv[:, 2 * D + c:2 * D + c + Dh].astype(jnp.bfloat16)
        # contract the head dim of q and k directly (no explicit k.T transpose)
        s = jax.lax.dot_general(q, k, (((1,), (1,)), ((), ())),
                                preferred_element_type=jnp.float32) * scale
        s = s - jnp.max(s, axis=-1, keepdims=True)
        p = jnp.exp(s)
        p = p * pl.reciprocal(jnp.sum(p, axis=-1, keepdims=True), approx=True)
        outs.append(jnp.dot(p.astype(jnp.bfloat16), v,
                            preferred_element_type=jnp.float32))
    o_ref[0] = jnp.concatenate(outs, axis=-1).astype(o_ref.dtype)


def multi_head_attention(qkv, num_heads):
    """qkv: (B, L, 3D) -> (B, L, D); heads split/merged in-kernel."""
    B, L, D3 = qkv.shape
    D = D3 // 3
    Dh = D // num_heads
    return pl.pallas_call(
        functools.partial(_self_attn_kernel, num_heads=num_heads,
                          scale=Dh ** -0.5),
        out_shape=jax.ShapeDtypeStruct((B, L, D), jnp.float32),
        grid=(B,),
        in_specs=[pl.BlockSpec((1, L, D3), lambda i: (i, 0, 0))],
        out_specs=pl.BlockSpec((1, L, D), lambda i: (i, 0, 0)),
        compiler_params=pltpu.CompilerParams(
            dimension_semantics=("parallel",),
            vmem_limit_bytes=_VMEM_LIMIT),
        cost_estimate=pl.CostEstimate(
            flops=4 * B * L * L * D,
            transcendentals=B * num_heads * L * L,
            bytes_accessed=4 * B * L * D3 + 4 * B * L * D),
    )(qkv)


def _cross_attn_kernel(q_ref, kv_ref, o_ref, *, num_heads, scale):
    q_all = q_ref[0]                          # (1, D)
    kv = kv_ref[0]                            # (L, 2D)
    D = q_all.shape[-1]
    Dh = D // num_heads
    outs = []
    for h in range(num_heads):
        c = h * Dh
        q = q_all[:, c:c + Dh].astype(jnp.bfloat16)
        k = kv[:, c:c + Dh].astype(jnp.bfloat16)
        v = kv[:, D + c:D + c + Dh].astype(jnp.bfloat16)
        s = jax.lax.dot_general(q, k, (((1,), (1,)), ((), ())),
                                preferred_element_type=jnp.float32) * scale
        s = s - jnp.max(s, axis=-1, keepdims=True)
        p = jnp.exp(s)
        p = p * pl.reciprocal(jnp.sum(p, axis=-1, keepdims=True), approx=True)
        outs.append(jnp.dot(p.astype(jnp.bfloat16), v,
                            preferred_element_type=jnp.float32))
    o_ref[0] = jnp.concatenate(outs, axis=-1).astype(o_ref.dtype)


def cross_attention_core(q, kv, num_heads):
    """q: (B, 1, D), kv: (B, L, 2D) -> (B, 1, D)."""
    B, _, D = q.shape
    L = kv.shape[1]
    Dh = D // num_heads
    return pl.pallas_call(
        functools.partial(_cross_attn_kernel, num_heads=num_heads,
                          scale=Dh ** -0.5),
        out_shape=jax.ShapeDtypeStruct((B, 1, D), jnp.float32),
        grid=(B,),
        in_specs=[pl.BlockSpec((1, 1, D), lambda i: (i, 0, 0)),
                  pl.BlockSpec((1, L, 2 * D), lambda i: (i, 0, 0))],
        out_specs=pl.BlockSpec((1, 1, D), lambda i: (i, 0, 0)),
        compiler_params=pltpu.CompilerParams(
            dimension_semantics=("parallel",),
            vmem_limit_bytes=_VMEM_LIMIT),
        cost_estimate=pl.CostEstimate(
            flops=4 * B * L * D,
            transcendentals=B * num_heads * L,
            bytes_accessed=4 * B * D + 8 * B * L * D + 4 * B * D),
    )(q, kv)


# ------------------------------ model glue ---------------------------------

def transformer_block(x, p, num_heads):
    # pre-norm fused into the qkv projection; residual fused into the out-proj
    qkv = fused_linear(x, p["attn"]["qkv_w"], p["attn"]["qkv_b"],
                       ln=(p["norm1_g"], p["norm1_b"]))
    a = multi_head_attention(qkv, num_heads)
    x = fused_linear(a, p["attn"]["proj_w"], p["attn"]["proj_b"], residual=x)
    # LN2 + fc1 + GELU + fc2 + residual in a single kernel
    return ln_mlp(x, p)


def cross_attention_block(x, p, num_heads):
    """crossvit CrossAttentionBlock (has_mlp=False): CLS query over all tokens."""
    # LN fused into the q / kv projections (LayerNorm is per-row, so
    # LN(x)[:, 0:1] == LN(x[:, 0:1])).
    q = fused_linear(x[:, 0:1], p["wq_w"], p["wq_b"],
                     ln=(p["norm1_g"], p["norm1_b"]))                 # (B,1,D)
    kv_w = jnp.concatenate([p["wk_w"], p["wv_w"]], axis=1)            # (D,2D)
    kv_b = jnp.concatenate([p["wk_b"], p["wv_b"]], axis=0)
    kv = fused_linear(x, kv_w, kv_b, ln=(p["norm1_g"], p["norm1_b"])) # (B,L,2D)
    o = cross_attention_core(q, kv, num_heads)                        # (B,1,D)
    return fused_linear(o, p["proj_w"], p["proj_b"], residual=x[:, 0:1])


def multi_scale_block(xs, p, num_heads):
    outs_b = [transformer_block(xs[i], p["blocks"][i], num_heads[i])
              for i in range(2)]
    # project each branch's CLS token into the other branch's embedding dim
    # (LN + GELU fused into the projection matmul)
    proj_cls = [fused_linear(outs_b[i][:, 0:1],
                             p["projs"][i]["w"], p["projs"][i]["b"],
                             ln=(p["projs"][i]["norm_g"], p["projs"][i]["norm_b"]),
                             pre_gelu=True)
                for i in range(2)]
    outs = []
    for i in range(2):
        j = 1 - i
        tmp = jnp.concatenate([proj_cls[i], outs_b[j][:, 1:]], axis=1)  # (B,Lj,Dj)
        fused_cls = cross_attention_block(tmp, p["fusion"][i], num_heads[j])
        r = fused_linear(fused_cls, p["revert"][i]["w"], p["revert"][i]["b"],
                         ln=(p["revert"][i]["norm_g"], p["revert"][i]["norm_b"]),
                         pre_gelu=True)
        outs.append(jnp.concatenate([r, outs_b[i][:, 1:]], axis=1))
    return outs


def patchify(x, p):
    # NCHW -> (B, num_patches, C*p*p), channel-major per patch (matches Conv2d
    # weight flattening of the timm patch embedding with stride == patch).
    B, C, H, W = x.shape
    gh, gw = H // p, W // p
    x = x.reshape(B, C, gh, p, gw, p).transpose(0, 2, 4, 1, 3, 5)
    return x.reshape(B, gh * gw, C * p * p)


def image_encoder_forward(x, params, cfg):
    B = x.shape[0]
    xs = []
    for i in range(2):
        # TODO(synk): real crossvit_small_240 bilinearly rescales the input to
        # 240 / 224 per branch before patch embedding; both branches share the
        # same image here.
        tok = patchify(x, cfg["patch"][i])
        tok = fused_linear(tok, params["patch_embed"][i]["w"],
                           params["patch_embed"][i]["b"])
        cls = jnp.broadcast_to(params["cls_token"][i], (B, 1, cfg["dim"][i]))
        tok = jnp.concatenate([cls, tok], axis=1) + params["pos_embed"][i]
        xs.append(tok)
    # TODO(synk): scaled down to 1 multi-scale block with 1 transformer block
    # per branch (crossvit_small_240: 3 multi-scale blocks, depths [1, 4],
    # embed dims [192, 384]); structure and dataflow are otherwise identical.
    xs = multi_scale_block(xs, params["msb"], cfg["heads"])
    # num_classes=0 head == Identity -> concat of per-branch normalized CLS
    # tokens (only the CLS rows need the final LayerNorm).
    cls_out = [layernorm(xs[i][:, 0:1], params["norm"][i]["g"],
                         params["norm"][i]["b"]) for i in range(2)]
    return jnp.concatenate([cls_out[0][:, 0], cls_out[1][:, 0]], axis=-1)


# --------------------------- parameter creation -----------------------------

def init_params(key, cfg):
    keys = iter(jax.random.split(key, 512))

    def w(*shape):
        return jax.random.normal(next(keys), shape, jnp.float32) * 0.02

    def zeros(*shape):
        return jnp.zeros(shape, jnp.float32)

    def ones(*shape):
        return jnp.ones(shape, jnp.float32)

    dims, C, mlp = cfg["dim"], cfg["in_chans"], cfg["mlp_ratio"]

    def attn_p(D):
        return dict(qkv_w=w(D, 3 * D), qkv_b=zeros(3 * D),
                    proj_w=w(D, D), proj_b=zeros(D))

    def block_p(D):
        return dict(norm1_g=ones(D), norm1_b=zeros(D), attn=attn_p(D),
                    norm2_g=ones(D), norm2_b=zeros(D),
                    fc1_w=w(D, mlp * D), fc1_b=zeros(mlp * D),
                    fc2_w=w(mlp * D, D), fc2_b=zeros(D))

    def cross_p(D):
        return dict(norm1_g=ones(D), norm1_b=zeros(D),
                    wq_w=w(D, D), wq_b=zeros(D),
                    wk_w=w(D, D), wk_b=zeros(D),
                    wv_w=w(D, D), wv_b=zeros(D),
                    proj_w=w(D, D), proj_b=zeros(D))

    return dict(
        patch_embed=[dict(w=w(C * cfg["patch"][i] ** 2, dims[i]), b=zeros(dims[i]))
                     for i in range(2)],
        cls_token=[w(1, 1, dims[i]) for i in range(2)],
        pos_embed=[w(1, cfg["num_tokens"][i] + 1, dims[i]) for i in range(2)],
        msb=dict(
            blocks=[block_p(dims[0]), block_p(dims[1])],
            projs=[dict(norm_g=ones(dims[i]), norm_b=zeros(dims[i]),
                        w=w(dims[i], dims[1 - i]), b=zeros(dims[1 - i]))
                   for i in range(2)],
            fusion=[cross_p(dims[1 - i]) for i in range(2)],
            revert=[dict(norm_g=ones(dims[1 - i]), norm_b=zeros(dims[1 - i]),
                         w=w(dims[1 - i], dims[i]), b=zeros(dims[i]))
                    for i in range(2)],
        ),
        norm=[dict(g=ones(dims[i]), b=zeros(dims[i])) for i in range(2)],
    )


# --------------------------------- main -------------------------------------

if __name__ == "__main__":
    # lane-aligned (multiple-of-128) toy embedding dims; real crossvit_small
    # is (192, 384) with heads (6, 6).
    cfg = dict(in_chans=3, img_size=16, patch=(4, 8), dim=(128, 256),
               heads=(4, 8), mlp_ratio=4)
    cfg["num_tokens"] = tuple((cfg["img_size"] // p) ** 2 for p in cfg["patch"])

    key = jax.random.PRNGKey(0)
    pkey, xkey = jax.random.split(key)
    params = init_params(pkey, cfg)
    x = jax.random.normal(
        xkey, (2, cfg["in_chans"], cfg["img_size"], cfg["img_size"]), jnp.float32)

    fwd = jax.jit(functools.partial(image_encoder_forward, cfg=cfg))
    y = fwd(x, params)
    jax.block_until_ready(y)
    assert y.shape == (2, cfg["dim"][0] + cfg["dim"][1]), y.shape
    assert jnp.all(jnp.isfinite(y))
    print("KERNEL_OK")
</pallas_src>

<mosaic_0001>
module attributes {stable_mosaic.version = 11 : i64} {
  func.func @_fused_linear_kernel(%arg0: i32, %arg1: memref<8x192xf32, #tpu.memory_space<vmem>>, %arg2: memref<192x256xbf16, #tpu.memory_space<vmem>>, %arg3: memref<1x256xf32, #tpu.memory_space<vmem>>, %arg4: memref<8x256xf32, #tpu.memory_space<vmem>>) attributes {dimension_semantics = [#tpu.dimension_semantics<parallel>], iteration_bounds = array<i64: 1>, scalar_prefetch = 0 : i64, scratch_operands = 0 : i64, tpu.core_type = #tpu.core_type<tc>, window_params = [{transform_indices = @transform_0, window_bounds = array<i64: 8, 192>}, {pipeline_mode = #tpu.pipeline_mode<synchronous>, transform_indices = @transform_1, window_bounds = array<i64: 192, 256>}, {pipeline_mode = #tpu.pipeline_mode<synchronous>, transform_indices = @transform_2, window_bounds = array<i64: 1, 256>}, {transform_indices = @transform_3, window_bounds = array<i64: 8, 256>}]} {
    %c0 = arith.constant 0 : index
    %c0_0 = arith.constant 0 : index
    %0 = vector.load %arg1[%c0, %c0_0] : memref<8x192xf32, #tpu.memory_space<vmem>>, vector<8x192xf32>
    %1 = arith.truncf %0 : vector<8x192xf32> to vector<8x192xbf16>
    %c0_1 = arith.constant 0 : index
    %c0_2 = arith.constant 0 : index
    %2 = vector.load %arg2[%c0_1, %c0_2] : memref<192x256xbf16, #tpu.memory_space<vmem>>, vector<192x256xbf16>
    %cst = arith.constant dense<0.000000e+00> : vector<8x256xf32>
    %3 = tpu.matmul %1, %2, %cst {dimension_numbers = #tpu.dot_dimension_numbers<[1], [0], [0], [1], [0, 0, 1, 1], [], []>} : vector<8x192xbf16>, vector<192x256xbf16>, vector<8x256xf32> -> vector<8x256xf32>
    %c0_3 = arith.constant 0 : index
    %c0_4 = arith.constant 0 : index
    %4 = vector.load %arg3[%c0_3, %c0_4] : memref<1x256xf32, #tpu.memory_space<vmem>>, vector<1x256xf32>
    %5 = vector.broadcast %4 : vector<1x256xf32> to vector<8x256xf32>
    %6 = arith.addf %3, %5 : vector<8x256xf32>
    %c0_5 = arith.constant 0 : index
    %c0_6 = arith.constant 0 : index
    %7 = vector.load %arg4[%c0_5, %c0_6] : memref<8x256xf32, #tpu.memory_space<vmem>>, vector<8x256xf32>
    tpu.vector_store %arg4[%c0_5, %c0_6], %6 {strides = array<i32>} : memref<8x256xf32, #tpu.memory_space<vmem>>, vector<8x256xf32>,
    return
  }
  func.func @transform_0(%arg0: i32) -> (i32, i32) {
    %c0_i32 = arith.constant 0 : i32
    %c0_i32_0 = arith.constant 0 : i32
    return %arg0, %c0_i32 : i32, i32
  }
  func.func @transform_1(%arg0: i32) -> (i32, i32) {
    %c0_i32 = arith.constant 0 : i32
    %c0_i32_0 = arith.constant 0 : i32
    %c0_i32_1 = arith.constant 0 : i32
    return %c0_i32, %c0_i32_0 : i32, i32
  }
  func.func @transform_2(%arg0: i32) -> (i32, i32) {
    %c0_i32 = arith.constant 0 : i32
    %c0_i32_0 = arith.constant 0 : i32
    %c0_i32_1 = arith.constant 0 : i32
    return %c0_i32, %c0_i32_0 : i32, i32
  }
  func.func @transform_3(%arg0: i32) -> (i32, i32) {
    %c0_i32 = arith.constant 0 : i32
    %c0_i32_0 = arith.constant 0 : i32
    return %arg0, %c0_i32 : i32, i32
  }
}

module attributes {stable_mosaic.version = 11 : i64} {
  func.func @_fused_linear_kernel(%arg0: i32, %arg1: memref<10x256xf32, #tpu.memory_space<vmem>>, %arg2: memref<1x256xf32, #tpu.memory_space<vmem>>, %arg3: memref<1x256xf32, #tpu.memory_space<vmem>>, %arg4: memref<256x768xbf16, #tpu.memory_space<vmem>>, %arg5: memref<1x768xf32, #tpu.memory_space<vmem>>, %arg6: memref<10x768xf32, #tpu.memory_space<vmem>>) attributes {dimension_semantics = [#tpu.dimension_semantics<parallel>], iteration_bounds = array<i64: 1>, scalar_prefetch = 0 : i64, scratch_operands = 0 : i64, tpu.core_type = #tpu.core_type<tc>, window_params = [{transform_indices = @transform_0, window_bounds = array<i64: 10, 256>}, {pipeline_mode = #tpu.pipeline_mode<synchronous>, transform_indices = @transform_1, window_bounds = array<i64: 1, 256>}, {pipeline_mode = #tpu.pipeline_mode<synchronous>, transform_indices = @transform_2, window_bounds = array<i64: 1, 256>}, {pipeline_mode = #tpu.pipeline_mode<synchronous>, transform_indices = @transform_3, window_bounds = array<i64: 256, 768>}, {pipeline_mode = #tpu.pipeline_mode<synchronous>, transform_indices = @transform_4, window_bounds = array<i64: 1, 768>}, {transform_indices = @transform_5, window_bounds = array<i64: 10, 768>}]} {
    %c0 = arith.constant 0 : index
    %c0_0 = arith.constant 0 : index
    %0 = vector.load %arg1[%c0, %c0_0] : memref<10x256xf32, #tpu.memory_space<vmem>>, vector<10x256xf32>
    %cst = arith.constant dense<0.000000e+00> : vector<10xf32>
    %1 = vector.multi_reduction <add>, %0, %cst [1] : vector<10x256xf32> to vector<10xf32>
    %2 = vector.shape_cast %1 : vector<10xf32> to vector<10x1xf32>
    %cst_1 = arith.constant 2.560000e+02 : f32
    %3 = vector.broadcast %cst_1 : f32 to vector<10x1xf32>
    %4 = arith.divf %2, %3 : vector<10x1xf32>
    %5 = vector.broadcast %4 : vector<10x1xf32> to vector<10x256xf32>
    %6 = arith.subf %0, %5 : vector<10x256xf32>
    %7 = arith.mulf %6, %6 : vector<10x256xf32>
    %cst_2 = arith.constant dense<0.000000e+00> : vector<10xf32>
    %8 = vector.multi_reduction <add>, %7, %cst_2 [1] : vector<10x256xf32> to vector<10xf32>
    %9 = vector.shape_cast %8 : vector<10xf32> to vector<10x1xf32>
    %cst_3 = arith.constant 2.560000e+02 : f32
    %10 = vector.broadcast %cst_3 : f32 to vector<10x1xf32>
    %11 = arith.divf %9, %10 : vector<10x1xf32>
    %cst_4 = arith.constant 9.99999997E-7 : f32
    %12 = vector.broadcast %cst_4 : f32 to vector<10x1xf32>
    %13 = arith.addf %11, %12 : vector<10x1xf32>
    %14 = math.rsqrt %13 : vector<10x1xf32>
    %15 = vector.broadcast %14 : vector<10x1xf32> to vector<10x256xf32>
    %16 = arith.mulf %6, %15 : vector<10x256xf32>
    %c0_5 = arith.constant 0 : index
    %c0_6 = arith.constant 0 : index
    %17 = vector.load %arg2[%c0_5, %c0_6] : memref<1x256xf32, #tpu.memory_space<vmem>>, vector<1x256xf32>
    %18 = vector.broadcast %17 : vector<1x256xf32> to vector<10x256xf32>
    %19 = arith.mulf %16, %18 : vector<10x256xf32>
    %c0_7 = arith.constant 0 : index
    %c0_8 = arith.constant 0 : index
    %20 = vector.load %arg3[%c0_7, %c0_8] : memref<1x256xf32, #tpu.memory_space<vmem>>, vector<1x256xf32>
    %21 = vector.broadcast %20 : vector<1x256xf32> to vector<10x256xf32>
    %22 = arith.addf %19, %21 : vector<10x256xf32>
    %23 = arith.truncf %22 : vector<10x256xf32> to vector<10x256xbf16>
    %c0_9 = arith.constant 0 : index
    %c0_10 = arith.constant 0 : index
    %24 = vector.load %arg4[%c0_9, %c0_10] : memref<256x768xbf16, #tpu.memory_space<vmem>>, vector<256x768xbf16>
    %cst_11 = arith.constant dense<0.000000e+00> : vector<10x768xf32>
    %25 = tpu.matmul %23, %24, %cst_11 {dimension_numbers = #tpu.dot_dimension_numbers<[1], [0], [0], [1], [0, 0, 1, 1], [], []>} : vector<10x256xbf16>, vector<256x768xbf16>, vector<10x768xf32> -> vector<10x768xf32>
    %c0_12 = arith.constant 0 : index
    %c0_13 = arith.constant 0 : index
    %26 = vector.load %arg5[%c0_12, %c0_13] : memref<1x768xf32, #tpu.memory_space<vmem>>, vector<1x768xf32>
    %27 = vector.broadcast %26 : vector<1x768xf32> to vector<10x768xf32>
    %28 = arith.addf %25, %27 : vector<10x768xf32>
    %c0_14 = arith.constant 0 : index
    %c0_15 = arith.constant 0 : index
    %29 = vector.load %arg6[%c0_14, %c0_15] : memref<10x768xf32, #tpu.memory_space<vmem>>, vector<10x768xf32>
    tpu.vector_store %arg6[%c0_14, %c0_15], %28 {strides = array<i32>} : memref<10x768xf32, #tpu.memory_space<vmem>>, vector<10x768xf32>,
    return
  }
  func.func @transform_0(%arg0: i32) -> (i32, i32) {
    %c0_i32 = arith.constant 0 : i32
    %c0_i32_0 = arith.constant 0 : i32
    return %arg0, %c0_i32 : i32, i32
  }
  func.func @transform_1(%arg0: i32) -> (i32, i32) {
    %c0_i32 = arith.constant 0 : i32
    %c0_i32_0 = arith.constant 0 : i32
    %c0_i32_1 = arith.constant 0 : i32
    return %c0_i32, %c0_i32_0 : i32, i32
  }
  func.func @transform_2(%arg0: i32) -> (i32, i32) {
    %c0_i32 = arith.constant 0 : i32
    %c0_i32_0 = arith.constant 0 : i32
    %c0_i32_1 = arith.constant 0 : i32
    return %c0_i32, %c0_i32_0 : i32, i32
  }
  func.func @transform_3(%arg0: i32) -> (i32, i32) {
    %c0_i32 = arith.constant 0 : i32
    %c0_i32_0 = arith.constant 0 : i32
    %c0_i32_1 = arith.constant 0 : i32
    return %c0_i32, %c0_i32_0 : i32, i32
  }
  func.func @transform_4(%arg0: i32) -> (i32, i32) {
    %c0_i32 = arith.constant 0 : i32
    %c0_i32_0 = arith.constant 0 : i32
    %c0_i32_1 = arith.constant 0 : i32
    return %c0_i32, %c0_i32_0 : i32, i32
  }
  func.func @transform_5(%arg0: i32) -> (i32, i32) {
    %c0_i32 = arith.constant 0 : i32
    %c0_i32_0 = arith.constant 0 : i32
    return %arg0, %c0_i32 : i32, i32
  }
}

module attributes {stable_mosaic.version = 11 : i64} {
  func.func @_self_attn_kernel(%arg0: i32, %arg1: memref<1x5x768xf32, #tpu.memory_space<vmem>>, %arg2: memref<1x5x256xf32, #tpu.memory_space<vmem>>) attributes {dimension_semantics = [#tpu.dimension_semantics<parallel>], iteration_bounds = array<i64: 2>, scalar_prefetch = 0 : i64, scratch_operands = 0 : i64, tpu.core_type = #tpu.core_type<tc>, window_params = [{transform_indices = @transform_0, window_bounds = array<i64: 1, 5, 768>}, {transform_indices = @transform_1, window_bounds = array<i64: 1, 5, 256>}]} {
    %c0 = arith.constant 0 : index
    %c0_0 = arith.constant 0 : index
    %c0_1 = arith.constant 0 : index
    %0 = vector.load %arg1[%c0, %c0_0, %c0_1] : memref<1x5x768xf32, #tpu.memory_space<vmem>>, vector<1x5x768xf32>
    %1 = vector.shape_cast %0 : vector<1x5x768xf32> to vector<5x768xf32>
    %2 = vector.extract_strided_slice %1 {offsets = [0, 0], sizes = [5, 32], strides = [1, 1]} : vector<5x768xf32> to vector<5x32xf32>
    %3 = arith.truncf %2 : vector<5x32xf32> to vector<5x32xbf16>
    %4 = vector.extract_strided_slice %1 {offsets = [0, 256], sizes = [5, 32], strides = [1, 1]} : vector<5x768xf32> to vector<5x32xf32>
    %5 = arith.truncf %4 : vector<5x32xf32> to vector<5x32xbf16>
    %6 = vector.extract_strided_slice %1 {offsets = [0, 512], sizes = [5, 32], strides = [1, 1]} : vector<5x768xf32> to vector<5x32xf32>
    %7 = arith.truncf %6 : vector<5x32xf32> to vector<5x32xbf16>
    %cst = arith.constant dense<0.000000e+00> : vector<5x5xf32>
    %8 = tpu.matmul %3, %5, %cst {dimension_numbers = #tpu.dot_dimension_numbers<[1], [1], [0], [0], [0, 0, 1, 0], [], []>} : vector<5x32xbf16>, vector<5x32xbf16>, vector<5x5xf32> -> vector<5x5xf32>
    %cst_2 = arith.constant 0.176776692 : f32
    %9 = vector.broadcast %cst_2 : f32 to vector<5x5xf32>
    %10 = arith.mulf %8, %9 : vector<5x5xf32>
    %cst_3 = arith.constant dense<0xFF800000> : vector<5xf32>
    %11 = vector.multi_reduction <maximumf>, %10, %cst_3 [1] : vector<5x5xf32> to vector<5xf32>
    %12 = vector.shape_cast %11 : vector<5xf32> to vector<5x1xf32>
    %13 = vector.broadcast %12 : vector<5x1xf32> to vector<5x5xf32>
    %14 = arith.subf %10, %13 : vector<5x5xf32>
    %15 = math.exp %14 : vector<5x5xf32>
    %cst_4 = arith.constant dense<0.000000e+00> : vector<5xf32>
    %16 = vector.multi_reduction <add>, %15, %cst_4 [1] : vector<5x5xf32> to vector<5xf32>
    %17 = vector.shape_cast %16 : vector<5xf32> to vector<5x1xf32>
    %18 = tpu.reciprocal %17 {approx = true} : vector<5x1xf32> -> vector<5x1xf32>
    %19 = vector.broadcast %18 : vector<5x1xf32> to vector<5x5xf32>
    %20 = arith.mulf %15, %19 : vector<5x5xf32>
    %21 = arith.truncf %20 : vector<5x5xf32> to vector<5x5xbf16>
    %cst_5 = arith.constant dense<0.000000e+00> : vector<5x32xf32>
    %22 = tpu.matmul %21, %7, %cst_5 {dimension_numbers = #tpu.dot_dimension_numbers<[1], [0], [0], [1], [0, 0, 1, 1], [], []>} : vector<5x5xbf16>, vector<5x32xbf16>, vector<5x32xf32> -> vector<5x32xf32>
    %23 = vector.extract_strided_slice %1 {offsets = [0, 32], sizes = [5, 32], strides = [1, 1]} : vector<5x768xf32> to vector<5x32xf32>
    %24 = arith.truncf %23 : vector<5x32xf32> to vector<5x32xbf16>
    %25 = vector.extract_strided_slice %1 {offsets = [0, 288], sizes = [5, 32], strides = [1, 1]} : vector<5x768xf32> to vector<5x32xf32>
    %26 = arith.truncf %25 : vector<5x32xf32> to vector<5x32xbf16>
    %27 = vector.extract_strided_slice %1 {offsets = [0, 544], sizes = [5, 32], strides = [1, 1]} : vector<5x768xf32> to vector<5x32xf32>
    %28 = arith.truncf %27 : vector<5x32xf32> to vector<5x32xbf16>
    %cst_6 = arith.constant dense<0.000000e+00> : vector<5x5xf32>
    %29 = tpu.matmul %24, %26, %cst_6 {dimension_numbers = #tpu.dot_dimension_numbers<[1], [1], [0], [0], [0, 0, 1, 0], [], []>} : vector<5x32xbf16>, vector<5x32xbf16>, vector<5x5xf32> -> vector<5x5xf32>
    %cst_7 = arith.constant 0.176776692 : f32
    %30 = vector.broadcast %cst_7 : f32 to vector<5x5xf32>
    %31 = arith.mulf %29, %30 : vector<5x5xf32>
    %cst_8 = arith.constant dense<0xFF800000> : vector<5xf32>
    %32 = vector.multi_reduction <maximumf>, %31, %cst_8 [1] : vector<5x5xf32> to vector<5xf32>
    %33 = vector.shape_cast %32 : vector<5xf32> to vector<5x1xf32>
    %34 = vector.broadcast %33 : vector<5x1xf32> to vector<5x5xf32>
    %35 = arith.subf %31, %34 : vector<5x5xf32>
    %36 = math.exp %35 : vector<5x5xf32>
    %cst_9 = arith.constant dense<0.000000e+00> : vector<5xf32>
    %37 = vector.multi_reduction <add>, %36, %cst_9 [1] : vector<5x5xf32> to vector<5xf32>
    %38 = vector.shape_cast %37 : vector<5xf32> to vector<5x1xf32>
    %39 = tpu.reciprocal %38 {approx = true} : vector<5x1xf32> -> vector<5x1xf32>
    %40 = vector.broadcast %39 : vector<5x1xf32> to vector<5x5xf32>
    %41 = arith.mulf %36, %40 : vector<5x5xf32>
    %42 = arith.truncf %41 : vector<5x5xf32> to vector<5x5xbf16>
    %cst_10 = arith.constant dense<0.000000e+00> : vector<5x32xf32>
    %43 = tpu.matmul %42, %28, %cst_10 {dimension_numbers = #tpu.dot_dimension_numbers<[1], [0], [0], [1], [0, 0, 1, 1], [], []>} : vector<5x5xbf16>, vector<5x32xbf16>, vector<5x32xf32> -> vector<5x32xf32>
    %44 = vector.extract_strided_slice %1 {offsets = [0, 64], sizes = [5, 32], strides = [1, 1]} : vector<5x768xf32> to vector<5x32xf32>
    %45 = arith.truncf %44 : vector<5x32xf32> to vector<5x32xbf16>
    %46 = vector.extract_strided_slice %1 {offsets = [0, 320], sizes = [5, 32], strides = [1, 1]} : vector<5x768xf32> to vector<5x32xf32>
    %47 = arith.truncf %46 : vector<5x32xf32> to vector<5x32xbf16>
    %48 = vector.extract_strided_slice %1 {offsets = [0, 576], sizes = [5, 32], strides = [1, 1]} : vector<5x768xf32> to vector<5x32xf32>
    %49 = arith.truncf %48 : vector<5x32xf32> to vector<5x32xbf16>
    %cst_11 = arith.constant dense<0.000000e+00> : vector<5x5xf32>
    %50 = tpu.matmul %45, %47, %cst_11 {dimension_numbers = #tpu.dot_dimension_numbers<[1], [1], [0], [0], [0, 0, 1, 0], [], []>} : vector<5x32xbf16>, vector<5x32xbf16>, vector<5x5xf32> -> vector<5x5xf32>
    %cst_12 = arith.constant 0.176776692 : f32
    %51 = vector.broadcast %cst_12 : f32 to vector<5x5xf32>
    %52 = arith.mulf %50, %51 : vector<5x5xf32>
    %cst_13 = arith.constant dense<0xFF800000> : vector<5xf32>
    %53 = vector.multi_reduction <maximumf>, %52, %cst_13 [1] : vector<5x5xf32> to vector<5xf32>
    %54 = vector.shape_cast %53 : vector<5xf32> to vector<5x1xf32>
    %55 = vector.broadcast %54 : vector<5x1xf32> to vector<5x5xf32>
    %56 = arith.subf %52, %55 : vector<5x5xf32>
    %57 = math.exp %56 : vector<5x5xf32>
    %cst_14 = arith.constant dense<0.000000e+00> : vector<5xf32>
    %58 = vector.multi_reduction <add>, %57, %cst_14 [1] : vector<5x5xf32> to vector<5xf32>
    %59 = vector.shape_cast %58 : vector<5xf32> to vector<5x1xf32>
    %60 = tpu.reciprocal %59 {approx = true} : vector<5x1xf32> -> vector<5x1xf32>
    %61 = vector.broadcast %60 : vector<5x1xf32> to vector<5x5xf32>
    %62 = arith.mulf %57, %61 : vector<5x5xf32>
    %63 = arith.truncf %62 : vector<5x5xf32> to vector<5x5xbf16>
    %cst_15 = arith.constant dense<0.000000e+00> : vector<5x32xf32>
    %64 = tpu.matmul %63, %49, %cst_15 {dimension_numbers = #tpu.dot_dimension_numbers<[1], [0], [0], [1], [0, 0, 1, 1], [], []>} : vector<5x5xbf16>, vector<5x32xbf16>, vector<5x32xf32> -> vector<5x32xf32>
    %65 = vector.extract_strided_slice %1 {offsets = [0, 96], sizes = [5, 32], strides = [1, 1]} : vector<5x768xf32> to vector<5x32xf32>
    %66 = arith.truncf %65 : vector<5x32xf32> to vector<5x32xbf16>
    %67 = vector.extract_strided_slice %1 {offsets = [0, 352], sizes = [5, 32], strides = [1, 1]} : vector<5x768xf32> to vector<5x32xf32>
    %68 = arith.truncf %67 : vector<5x32xf32> to vector<5x32xbf16>
    %69 = vector.extract_strided_slice %1 {offsets = [0, 608], sizes = [5, 32], strides = [1, 1]} : vector<5x768xf32> to vector<5x32xf32>
    %70 = arith.truncf %69 : vector<5x32xf32> to vector<5x32xbf16>
    %cst_16 = arith.constant dense<0.000000e+00> : vector<5x5xf32>
    %71 = tpu.matmul %66, %68, %cst_16 {dimension_numbers = #tpu.dot_dimension_numbers<[1], [1], [0], [0], [0, 0, 1, 0], [], []>} : vector<5x32xbf16>, vector<5x32xbf16>, vector<5x5xf32> -> vector<5x5xf32>
    %cst_17 = arith.constant 0.176776692 : f32
    %72 = vector.broadcast %cst_17 : f32 to vector<5x5xf32>
    %73 = arith.mulf %71, %72 : vector<5x5xf32>
    %cst_18 = arith.constant dense<0xFF800000> : vector<5xf32>
    %74 = vector.multi_reduction <maximumf>, %73, %cst_18 [1] : vector<5x5xf32> to vector<5xf32>
    %75 = vector.shape_cast %74 : vector<5xf32> to vector<5x1xf32>
    %76 = vector.broadcast %75 : vector<5x1xf32> to vector<5x5xf32>
    %77 = arith.subf %73, %76 : vector<5x5xf32>
    %78 = math.exp %77 : vector<5x5xf32>
    %cst_19 = arith.constant dense<0.000000e+00> : vector<5xf32>
    %79 = vector.multi_reduction <add>, %78, %cst_19 [1] : vector<5x5xf32> to vector<5xf32>
    %80 = vector.shape_cast %79 : vector<5xf32> to vector<5x1xf32>
    %81 = tpu.reciprocal %80 {approx = true} : vector<5x1xf32> -> vector<5x1xf32>
    %82 = vector.broadcast %81 : vector<5x1xf32> to vector<5x5xf32>
    %83 = arith.mulf %78, %82 : vector<5x5xf32>
    %84 = arith.truncf %83 : vector<5x5xf32> to vector<5x5xbf16>
    %cst_20 = arith.constant dense<0.000000e+00> : vector<5x32xf32>
    %85 = tpu.matmul %84, %70, %cst_20 {dimension_numbers = #tpu.dot_dimension_numbers<[1], [0], [0], [1], [0, 0, 1, 1], [], []>} : vector<5x5xbf16>, vector<5x32xbf16>, vector<5x32xf32> -> vector<5x32xf32>
    %86 = vector.extract_strided_slice %1 {offsets = [0, 128], sizes = [5, 32], strides = [1, 1]} : vector<5x768xf32> to vector<5x32xf32>
    %87 = arith.truncf %86 : vector<5x32xf32> to vector<5x32xbf16>
    %88 = vector.extract_strided_slice %1 {offsets = [0, 384], sizes = [5, 32], strides = [1, 1]} : vector<5x768xf32> to vector<5x32xf32>
    %89 = arith.truncf %88 : vector<5x32xf32> to vector<5x32xbf16>
    %90 = vector.extract_strided_slice %1 {offsets = [0, 640], sizes = [5, 32], strides = [1, 1]} : vector<5x768xf32> to vector<5x32xf32>
    %91 = arith.truncf %90 : vector<5x32xf32> to vector<5x32xbf16>
    %cst_21 = arith.constant dense<0.000000e+00> : vector<5x5xf32>
    %92 = tpu.matmul %87, %89, %cst_21 {dimension_numbers = #tpu.dot_dimension_numbers<[1], [1], [0], [0], [0, 0, 1, 0], [], []>} : vector<5x32xbf16>, vector<5x32xbf16>, vector<5x5xf32> -> vector<5x5xf32>
    %cst_22 = arith.constant 0.176776692 : f32
    %93 = vector.broadcast %cst_22 : f32 to vector<5x5xf32>
    %94 = arith.mulf %92, %93 : vector<5x5xf32>
    %cst_23 = arith.constant dense<0xFF800000> : vector<5xf32>
    %95 = vector.multi_reduction <maximumf>, %94, %cst_23 [1] : vector<5x5xf32> to vector<5xf32>
    %96 = vector.shape_cast %95 : vector<5xf32> to vector<5x1xf32>
    %97 = vector.broadcast %96 : vector<5x1xf32> to vector<5x5xf32>
    %98 = arith.subf %94, %97 : vector<5x5xf32>
    %99 = math.exp %98 : vector<5x5xf32>
    %cst_24 = arith.constant dense<0.000000e+00> : vector<5xf32>
    %100 = vector.multi_reduction <add>, %99, %cst_24 [1] : vector<5x5xf32> to vector<5xf32>
    %101 = vector.shape_cast %100 : vector<5xf32> to vector<5x1xf32>
    %102 = tpu.reciprocal %101 {approx = true} : vector<5x1xf32> -> vector<5x1xf32>
    %103 = vector.broadcast %102 : vector<5x1xf32> to vector<5x5xf32>
    %104 = arith.mulf %99, %103 : vector<5x5xf32>
    %105 = arith.truncf %104 : vector<5x5xf32> to vector<5x5xbf16>
    %cst_25 = arith.constant dense<0.000000e+00> : vector<5x32xf32>
    %106 = tpu.matmul %105, %91, %cst_25 {dimension_numbers = #tpu.dot_dimension_numbers<[1], [0], [0], [1], [0, 0, 1, 1], [], []>} : vector<5x5xbf16>, vector<5x32xbf16>, vector<5x32xf32> -> vector<5x32xf32>
    %107 = vector.extract_strided_slice %1 {offsets = [0, 160], sizes = [5, 32], strides = [1, 1]} : vector<5x768xf32> to vector<5x32xf32>
    %108 = arith.truncf %107 : vector<5x32xf32> to vector<5x32xbf16>
    %109 = vector.extract_strided_slice %1 {offsets = [0, 416], sizes = [5, 32], strides = [1, 1]} : vector<5x768xf32> to vector<5x32xf32>
    %110 = arith.truncf %109 : vector<5x32xf32> to vector<5x32xbf16>
    %111 = vector.extract_strided_slice %1 {offsets = [0, 672], sizes = [5, 32], strides = [1, 1]} : vector<5x768xf32> to vector<5x32xf32>
    %112 = arith.truncf %111 : vector<5x32xf32> to vector<5x32xbf16>
    %cst_26 = arith.constant dense<0.000000e+00> : vector<5x5xf32>
    %113 = tpu.matmul %108, %110, %cst_26 {dimension_numbers = #tpu.dot_dimension_numbers<[1], [1], [0], [0], [0, 0, 1, 0], [], []>} : vector<5x32xbf16>, vector<5x32xbf16>, vector<5x5xf32> -> vector<5x5xf32>
    %cst_27 = arith.constant 0.176776692 : f32
    %114 = vector.broadcast %cst_27 : f32 to vector<5x5xf32>
    %115 = arith.mulf %113, %114 : vector<5x5xf32>
    %cst_28 = arith.constant dense<0xFF800000> : vector<5xf32>
    %116 = vector.multi_reduction <maximumf>, %115, %cst_28 [1] : vector<5x5xf32> to vector<5xf32>
    %117 = vector.shape_cast %116 : vector<5xf32> to vector<5x1xf32>
    %118 = vector.broadcast %117 : vector<5x1xf32> to vector<5x5xf32>
    %119 = arith.subf %115, %118 : vector<5x5xf32>
    %120 = math.exp %119 : vector<5x5xf32>
    %cst_29 = arith.constant dense<0.000000e+00> : vector<5xf32>
    %121 = vector.multi_reduction <add>, %120, %cst_29 [1] : vector<5x5xf32> to vector<5xf32>
    %122 = vector.shape_cast %121 : vector<5xf32> to vector<5x1xf32>
    %123 = tpu.reciprocal %122 {approx = true} : vector<5x1xf32> -> vector<5x1xf32>
    %124 = vector.broadcast %123 : vector<5x1xf32> to vector<5x5xf32>
    %125 = arith.mulf %120, %124 : vector<5x5xf32>
    %126 = arith.truncf %125 : vector<5x5xf32> to vector<5x5xbf16>
    %cst_30 = arith.constant dense<0.000000e+00> : vector<5x32xf32>
    %127 = tpu.matmul %126, %112, %cst_30 {dimension_numbers = #tpu.dot_dimension_numbers<[1], [0], [0], [1], [0, 0, 1, 1], [], []>} : vector<5x5xbf16>, vector<5x32xbf16>, vector<5x32xf32> -> vector<5x32xf32>
    %128 = vector.extract_strided_slice %1 {offsets = [0, 192], sizes = [5, 32], strides = [1, 1]} : vector<5x768xf32> to vector<5x32xf32>
    %129 = arith.truncf %128 : vector<5x32xf32> to vector<5x32xbf16>
    %130 = vector.extract_strided_slice %1 {offsets = [0, 448], sizes = [5, 32], strides = [1, 1]} : vector<5x768xf32> to vector<5x32xf32>
    %131 = arith.truncf %130 : vector<5x32xf32> to vector<5x32xbf16>
    %132 = vector.extract_strided_slice %1 {offsets = [0, 704], sizes = [5, 32], strides = [1, 1]} : vector<5x768xf32> to vector<5x32xf32>
    %133 = arith.truncf %132 : vector<5x32xf32> to vector<5x32xbf16>
    %cst_31 = arith.constant dense<0.000000e+00> : vector<5x5xf32>
    %134 = tpu.matmul %129, %131, %cst_31 {dimension_numbers = #tpu.dot_dimension_numbers<[1], [1], [0], [0], [0, 0, 1, 0], [], []>} : vector<5x32xbf16>, vector<5x32xbf16>, vector<5x5xf32> -> vector<5x5xf32>
    %cst_32 = arith.constant 0.176776692 : f32
    %135 = vector.broadcast %cst_32 : f32 to vector<5x5xf32>
    %136 = arith.mulf %134, %135 : vector<5x5xf32>
    %cst_33 = arith.constant dense<0xFF800000> : vector<5xf32>
    %137 = vector.multi_reduction <maximumf>, %136, %cst_33 [1] : vector<5x5xf32> to vector<5xf32>
    %138 = vector.shape_cast %137 : vector<5xf32> to vector<5x1xf32>
    %139 = vector.broadcast %138 : vector<5x1xf32> to vector<5x5xf32>
    %140 = arith.subf %136, %139 : vector<5x5xf32>
    %141 = math.exp %140 : vector<5x5xf32>
    %cst_34 = arith.constant dense<0.000000e+00> : vector<5xf32>
    %142 = vector.multi_reduction <add>, %141, %cst_34 [1] : vector<5x5xf32> to vector<5xf32>
    %143 = vector.shape_cast %142 : vector<5xf32> to vector<5x1xf32>
    %144 = tpu.reciprocal %143 {approx = true} : vector<5x1xf32> -> vector<5x1xf32>
    %145 = vector.broadcast %144 : vector<5x1xf32> to vector<5x5xf32>
    %146 = arith.mulf %141, %145 : vector<5x5xf32>
    %147 = arith.truncf %146 : vector<5x5xf32> to vector<5x5xbf16>
    %cst_35 = arith.constant dense<0.000000e+00> : vector<5x32xf32>
    %148 = tpu.matmul %147, %133, %cst_35 {dimension_numbers = #tpu.dot_dimension_numbers<[1], [0], [0], [1], [0, 0, 1, 1], [], []>} : vector<5x5xbf16>, vector<5x32xbf16>, vector<5x32xf32> -> vector<5x32xf32>
    %149 = vector.extract_strided_slice %1 {offsets = [0, 224], sizes = [5, 32], strides = [1, 1]} : vector<5x768xf32> to vector<5x32xf32>
    %150 = arith.truncf %149 : vector<5x32xf32> to vector<5x32xbf16>
    %151 = vector.extract_strided_slice %1 {offsets = [0, 480], sizes = [5, 32], strides = [1, 1]} : vector<5x768xf32> to vector<5x32xf32>
    %152 = arith.truncf %151 : vector<5x32xf32> to vector<5x32xbf16>
    %153 = vector.extract_strided_slice %1 {offsets = [0, 736], sizes = [5, 32], strides = [1, 1]} : vector<5x768xf32> to vector<5x32xf32>
    %154 = arith.truncf %153 : vector<5x32xf32> to vector<5x32xbf16>
    %cst_36 = arith.constant dense<0.000000e+00> : vector<5x5xf32>
    %155 = tpu.matmul %150, %152, %cst_36 {dimension_numbers = #tpu.dot_dimension_numbers<[1], [1], [0], [0], [0, 0, 1, 0], [], []>} : vector<5x32xbf16>, vector<5x32xbf16>, vector<5x5xf32> -> vector<5x5xf32>
    %cst_37 = arith.constant 0.176776692 : f32
    %156 = vector.broadcast %cst_37 : f32 to vector<5x5xf32>
    %157 = arith.mulf %155, %156 : vector<5x5xf32>
    %cst_38 = arith.constant dense<0xFF800000> : vector<5xf32>
    %158 = vector.multi_reduction <maximumf>, %157, %cst_38 [1] : vector<5x5xf32> to vector<5xf32>
    %159 = vector.shape_cast %158 : vector<5xf32> to vector<5x1xf32>
    %160 = vector.broadcast %159 : vector<5x1xf32> to vector<5x5xf32>
    %161 = arith.subf %157, %160 : vector<5x5xf32>
    %162 = math.exp %161 : vector<5x5xf32>
    %cst_39 = arith.constant dense<0.000000e+00> : vector<5xf32>
    %163 = vector.multi_reduction <add>, %162, %cst_39 [1] : vector<5x5xf32> to vector<5xf32>
    %164 = vector.shape_cast %163 : vector<5xf32> to vector<5x1xf32>
    %165 = tpu.reciprocal %164 {approx = true} : vector<5x1xf32> -> vector<5x1xf32>
    %166 = vector.broadcast %165 : vector<5x1xf32> to vector<5x5xf32>
    %167 = arith.mulf %162, %166 : vector<5x5xf32>
    %168 = arith.truncf %167 : vector<5x5xf32> to vector<5x5xbf16>
    %cst_40 = arith.constant dense<0.000000e+00> : vector<5x32xf32>
    %169 = tpu.matmul %168, %154, %cst_40 {dimension_numbers = #tpu.dot_dimension_numbers<[1], [0], [0], [1], [0, 0, 1, 1], [], []>} : vector<5x5xbf16>, vector<5x32xbf16>, vector<5x32xf32> -> vector<5x32xf32>
    %170 = tpu.concatenate %22, %43, %64, %85, %106, %127, %148, %169 in 1 : vector<5x32xf32>, vector<5x32xf32>, vector<5x32xf32>, vector<5x32xf32>, vector<5x32xf32>, vector<5x32xf32>, vector<5x32xf32>, vector<5x32xf32> -> vector<5x256xf32>
    %c0_41 = arith.constant 0 : index
    %c0_42 = arith.constant 0 : index
    %c0_43 = arith.constant 0 : index
    %171 = vector.load %arg2[%c0_41, %c0_42, %c0_43] : memref<1x5x256xf32, #tpu.memory_space<vmem>>, vector<1x5x256xf32>
    %172 = vector.shape_cast %171 : vector<1x5x256xf32> to vector<5x256xf32>
    %173 = vector.shape_cast %170 : vector<5x256xf32> to vector<1x5x256xf32>
    tpu.vector_store %arg2[%c0_41, %c0_42, %c0_43], %173 {strides = array<i32>} : memref<1x5x256xf32, #tpu.memory_space<vmem>>, vector<1x5x256xf32>,
    return
  }
  func.func @transform_0(%arg0: i32) -> (i32, i32, i32) {
    %c0_i32 = arith.constant 0 : i32
    %c0_i32_0 = arith.constant 0 : i32
    %c0_i32_1 = arith.constant 0 : i32
    return %arg0, %c0_i32, %c0_i32_0 : i32, i32, i32
  }
  func.func @transform_1(%arg0: i32) -> (i32, i32, i32) {
    %c0_i32 = arith.constant 0 : i32
    %c0_i32_0 = arith.constant 0 : i32
    %c0_i32_1 = arith.constant 0 : i32
    return %arg0, %c0_i32, %c0_i32_0 : i32, i32, i32
  }
}

module attributes {stable_mosaic.version = 11 : i64} {
  func.func @_fused_linear_kernel(%arg0: i32, %arg1: memref<10x256xf32, #tpu.memory_space<vmem>>, %arg2: memref<256x256xbf16, #tpu.memory_space<vmem>>, %arg3: memref<1x256xf32, #tpu.memory_space<vmem>>, %arg4: memref<10x256xf32, #tpu.memory_space<vmem>>, %arg5: memref<10x256xf32, #tpu.memory_space<vmem>>) attributes {dimension_semantics = [#tpu.dimension_semantics<parallel>], iteration_bounds = array<i64: 1>, scalar_prefetch = 0 : i64, scratch_operands = 0 : i64, tpu.core_type = #tpu.core_type<tc>, window_params = [{transform_indices = @transform_0, window_bounds = array<i64: 10, 256>}, {pipeline_mode = #tpu.pipeline_mode<synchronous>, transform_indices = @transform_1, window_bounds = array<i64: 256, 256>}, {pipeline_mode = #tpu.pipeline_mode<synchronous>, transform_indices = @transform_2, window_bounds = array<i64: 1, 256>}, {transform_indices = @transform_3, window_bounds = array<i64: 10, 256>}, {transform_indices = @transform_4, window_bounds = array<i64: 10, 256>}]} {
    %c0 = arith.constant 0 : index
    %c0_0 = arith.constant 0 : index
    %0 = vector.load %arg1[%c0, %c0_0] : memref<10x256xf32, #tpu.memory_space<vmem>>, vector<10x256xf32>
    %1 = arith.truncf %0 : vector<10x256xf32> to vector<10x256xbf16>
    %c0_1 = arith.constant 0 : index
    %c0_2 = arith.constant 0 : index
    %2 = vector.load %arg2[%c0_1, %c0_2] : memref<256x256xbf16, #tpu.memory_space<vmem>>, vector<256x256xbf16>
    %cst = arith.constant dense<0.000000e+00> : vector<10x256xf32>
    %3 = tpu.matmul %1, %2, %cst {dimension_numbers = #tpu.dot_dimension_numbers<[1], [0], [0], [1], [0, 0, 1, 1], [], []>} : vector<10x256xbf16>, vector<256x256xbf16>, vector<10x256xf32> -> vector<10x256xf32>
    %c0_3 = arith.constant 0 : index
    %c0_4 = arith.constant 0 : index
    %4 = vector.load %arg3[%c0_3, %c0_4] : memref<1x256xf32, #tpu.memory_space<vmem>>, vector<1x256xf32>
    %5 = vector.broadcast %4 : vector<1x256xf32> to vector<10x256xf32>
    %6 = arith.addf %3, %5 : vector<10x256xf32>
    %c0_5 = arith.constant 0 : index
    %c0_6 = arith.constant 0 : index
    %7 = vector.load %arg4[%c0_5, %c0_6] : memref<10x256xf32, #tpu.memory_space<vmem>>, vector<10x256xf32>
    %8 = arith.addf %6, %7 : vector<10x256xf32>
    %c0_7 = arith.constant 0 : index
    %c0_8 = arith.constant 0 : index
    %9 = vector.load %arg5[%c0_7, %c0_8] : memref<10x256xf32, #tpu.memory_space<vmem>>, vector<10x256xf32>
    tpu.vector_store %arg5[%c0_7, %c0_8], %8 {strides = array<i32>} : memref<10x256xf32, #tpu.memory_space<vmem>>, vector<10x256xf32>,
    return
  }
  func.func @transform_0(%arg0: i32) -> (i32, i32) {
    %c0_i32 = arith.constant 0 : i32
    %c0_i32_0 = arith.constant 0 : i32
    return %arg0, %c0_i32 : i32, i32
  }
  func.func @transform_1(%arg0: i32) -> (i32, i32) {
    %c0_i32 = arith.constant 0 : i32
    %c0_i32_0 = arith.constant 0 : i32
    %c0_i32_1 = arith.constant 0 : i32
    return %c0_i32, %c0_i32_0 : i32, i32
  }
  func.func @transform_2(%arg0: i32) -> (i32, i32) {
    %c0_i32 = arith.constant 0 : i32
    %c0_i32_0 = arith.constant 0 : i32
    %c0_i32_1 = arith.constant 0 : i32
    return %c0_i32, %c0_i32_0 : i32, i32
  }
  func.func @transform_3(%arg0: i32) -> (i32, i32) {
    %c0_i32 = arith.constant 0 : i32
    %c0_i32_0 = arith.constant 0 : i32
    return %arg0, %c0_i32 : i32, i32
  }
  func.func @transform_4(%arg0: i32) -> (i32, i32) {
    %c0_i32 = arith.constant 0 : i32
    %c0_i32_0 = arith.constant 0 : i32
    return %arg0, %c0_i32 : i32, i32
  }
}

module attributes {stable_mosaic.version = 11 : i64} {
  func.func @_ln_mlp_kernel(%arg0: i32, %arg1: memref<10x256xf32, #tpu.memory_space<vmem>>, %arg2: memref<1x256xf32, #tpu.memory_space<vmem>>, %arg3: memref<1x256xf32, #tpu.memory_space<vmem>>, %arg4: memref<256x1024xbf16, #tpu.memory_space<vmem>>, %arg5: memref<1x1024xf32, #tpu.memory_space<vmem>>, %arg6: memref<1024x256xbf16, #tpu.memory_space<vmem>>, %arg7: memref<1x256xf32, #tpu.memory_space<vmem>>, %arg8: memref<10x256xf32, #tpu.memory_space<vmem>>) attributes {dimension_semantics = [#tpu.dimension_semantics<parallel>], iteration_bounds = array<i64: 1>, scalar_prefetch = 0 : i64, scratch_operands = 0 : i64, tpu.core_type = #tpu.core_type<tc>, window_params = [{transform_indices = @transform_0, window_bounds = array<i64: 10, 256>}, {pipeline_mode = #tpu.pipeline_mode<synchronous>, transform_indices = @transform_1, window_bounds = array<i64: 1, 256>}, {pipeline_mode = #tpu.pipeline_mode<synchronous>, transform_indices = @transform_2, window_bounds = array<i64: 1, 256>}, {pipeline_mode = #tpu.pipeline_mode<synchronous>, transform_indices = @transform_3, window_bounds = array<i64: 256, 1024>}, {pipeline_mode = #tpu.pipeline_mode<synchronous>, transform_indices = @transform_4, window_bounds = array<i64: 1, 1024>}, {pipeline_mode = #tpu.pipeline_mode<synchronous>, transform_indices = @transform_5, window_bounds = array<i64: 1024, 256>}, {pipeline_mode = #tpu.pipeline_mode<synchronous>, transform_indices = @transform_6, window_bounds = array<i64: 1, 256>}, {transform_indices = @transform_7, window_bounds = array<i64: 10, 256>}]} {
    %c0 = arith.constant 0 : index
    %c0_0 = arith.constant 0 : index
    %0 = vector.load %arg1[%c0, %c0_0] : memref<10x256xf32, #tpu.memory_space<vmem>>, vector<10x256xf32>
    %cst = arith.constant dense<0.000000e+00> : vector<10xf32>
    %1 = vector.multi_reduction <add>, %0, %cst [1] : vector<10x256xf32> to vector<10xf32>
    %2 = vector.shape_cast %1 : vector<10xf32> to vector<10x1xf32>
    %cst_1 = arith.constant 2.560000e+02 : f32
    %3 = vector.broadcast %cst_1 : f32 to vector<10x1xf32>
    %4 = arith.divf %2, %3 : vector<10x1xf32>
    %5 = vector.broadcast %4 : vector<10x1xf32> to vector<10x256xf32>
    %6 = arith.subf %0, %5 : vector<10x256xf32>
    %7 = arith.mulf %6, %6 : vector<10x256xf32>
    %cst_2 = arith.constant dense<0.000000e+00> : vector<10xf32>
    %8 = vector.multi_reduction <add>, %7, %cst_2 [1] : vector<10x256xf32> to vector<10xf32>
    %9 = vector.shape_cast %8 : vector<10xf32> to vector<10x1xf32>
    %cst_3 = arith.constant 2.560000e+02 : f32
    %10 = vector.broadcast %cst_3 : f32 to vector<10x1xf32>
    %11 = arith.divf %9, %10 : vector<10x1xf32>
    %cst_4 = arith.constant 9.99999997E-7 : f32
    %12 = vector.broadcast %cst_4 : f32 to vector<10x1xf32>
    %13 = arith.addf %11, %12 : vector<10x1xf32>
    %14 = math.rsqrt %13 : vector<10x1xf32>
    %15 = vector.broadcast %14 : vector<10x1xf32> to vector<10x256xf32>
    %16 = arith.mulf %6, %15 : vector<10x256xf32>
    %c0_5 = arith.constant 0 : index
    %c0_6 = arith.constant 0 : index
    %17 = vector.load %arg2[%c0_5, %c0_6] : memref<1x256xf32, #tpu.memory_space<vmem>>, vector<1x256xf32>
    %18 = vector.broadcast %17 : vector<1x256xf32> to vector<10x256xf32>
    %19 = arith.mulf %16, %18 : vector<10x256xf32>
    %c0_7 = arith.constant 0 : index
    %c0_8 = arith.constant 0 : index
    %20 = vector.load %arg3[%c0_7, %c0_8] : memref<1x256xf32, #tpu.memory_space<vmem>>, vector<1x256xf32>
    %21 = vector.broadcast %20 : vector<1x256xf32> to vector<10x256xf32>
    %22 = arith.addf %19, %21 : vector<10x256xf32>
    %23 = arith.truncf %22 : vector<10x256xf32> to vector<10x256xbf16>
    %c0_9 = arith.constant 0 : index
    %c0_10 = arith.constant 0 : index
    %24 = vector.load %arg4[%c0_9, %c0_10] : memref<256x1024xbf16, #tpu.memory_space<vmem>>, vector<256x1024xbf16>
    %cst_11 = arith.constant dense<0.000000e+00> : vector<10x1024xf32>
    %25 = tpu.matmul %23, %24, %cst_11 {dimension_numbers = #tpu.dot_dimension_numbers<[1], [0], [0], [1], [0, 0, 1, 1], [], []>} : vector<10x256xbf16>, vector<256x1024xbf16>, vector<10x1024xf32> -> vector<10x1024xf32>
    %c0_12 = arith.constant 0 : index
    %c0_13 = arith.constant 0 : index
    %26 = vector.load %arg5[%c0_12, %c0_13] : memref<1x1024xf32, #tpu.memory_space<vmem>>, vector<1x1024xf32>
    %27 = vector.broadcast %26 : vector<1x1024xf32> to vector<10x1024xf32>
    %28 = arith.addf %25, %27 : vector<10x1024xf32>
    %29 = arith.mulf %28, %28 : vector<10x1024xf32>
    %30 = arith.mulf %28, %29 : vector<10x1024xf32>
    %cst_14 = arith.constant 4.471500e-02 : f32
    %31 = vector.broadcast %cst_14 : f32 to vector<10x1024xf32>
    %32 = arith.mulf %31, %30 : vector<10x1024xf32>
    %33 = arith.addf %28, %32 : vector<10x1024xf32>
    %cst_15 = arith.constant 0.797884583 : f32
    %34 = vector.broadcast %cst_15 : f32 to vector<10x1024xf32>
    %35 = arith.mulf %34, %33 : vector<10x1024xf32>
    %36 = math.tanh %35 : vector<10x1024xf32>
    %cst_16 = arith.constant 1.000000e+00 : f32
    %37 = vector.broadcast %cst_16 : f32 to vector<10x1024xf32>
    %38 = arith.addf %37, %36 : vector<10x1024xf32>
    %cst_17 = arith.constant 5.000000e-01 : f32
    %39 = vector.broadcast %cst_17 : f32 to vector<10x1024xf32>
    %40 = arith.mulf %39, %38 : vector<10x1024xf32>
    %41 = arith.mulf %28, %40 : vector<10x1024xf32>
    %42 = arith.truncf %41 : vector<10x1024xf32> to vector<10x1024xbf16>
    %c0_18 = arith.constant 0 : index
    %c0_19 = arith.constant 0 : index
    %43 = vector.load %arg6[%c0_18, %c0_19] : memref<1024x256xbf16, #tpu.memory_space<vmem>>, vector<1024x256xbf16>
    %cst_20 = arith.constant dense<0.000000e+00> : vector<10x256xf32>
    %44 = tpu.matmul %42, %43, %cst_20 {dimension_numbers = #tpu.dot_dimension_numbers<[1], [0], [0], [1], [0, 0, 1, 1], [], []>} : vector<10x1024xbf16>, vector<1024x256xbf16>, vector<10x256xf32> -> vector<10x256xf32>
    %c0_21 = arith.constant 0 : index
    %c0_22 = arith.constant 0 : index
    %45 = vector.load %arg7[%c0_21, %c0_22] : memref<1x256xf32, #tpu.memory_space<vmem>>, vector<1x256xf32>
    %46 = vector.broadcast %45 : vector<1x256xf32> to vector<10x256xf32>
    %47 = arith.addf %44, %46 : vector<10x256xf32>
    %48 = arith.addf %47, %0 : vector<10x256xf32>
    %c0_23 = arith.constant 0 : index
    %c0_24 = arith.constant 0 : index
    %49 = vector.load %arg8[%c0_23, %c0_24] : memref<10x256xf32, #tpu.memory_space<vmem>>, vector<10x256xf32>
    tpu.vector_store %arg8[%c0_23, %c0_24], %48 {strides = array<i32>} : memref<10x256xf32, #tpu.memory_space<vmem>>, vector<10x256xf32>,
    return
  }
  func.func @transform_0(%arg0: i32) -> (i32, i32) {
    %c0_i32 = arith.constant 0 : i32
    %c0_i32_0 = arith.constant 0 : i32
    return %arg0, %c0_i32 : i32, i32
  }
  func.func @transform_1(%arg0: i32) -> (i32, i32) {
    %c0_i32 = arith.constant 0 : i32
    %c0_i32_0 = arith.constant 0 : i32
    %c0_i32_1 = arith.constant 0 : i32
    return %c0_i32, %c0_i32_0 : i32, i32
  }
  func.func @transform_2(%arg0: i32) -> (i32, i32) {
    %c0_i32 = arith.constant 0 : i32
    %c0_i32_0 = arith.constant 0 : i32
    %c0_i32_1 = arith.constant 0 : i32
    return %c0_i32, %c0_i32_0 : i32, i32
  }
  func.func @transform_3(%arg0: i32) -> (i32, i32) {
    %c0_i32 = arith.constant 0 : i32
    %c0_i32_0 = arith.constant 0 : i32
    %c0_i32_1 = arith.constant 0 : i32
    return %c0_i32, %c0_i32_0 : i32, i32
  }
  func.func @transform_4(%arg0: i32) -> (i32, i32) {
    %c0_i32 = arith.constant 0 : i32
    %c0_i32_0 = arith.constant 0 : i32
    %c0_i32_1 = arith.constant 0 : i32
    return %c0_i32, %c0_i32_0 : i32, i32
  }
  func.func @transform_5(%arg0: i32) -> (i32, i32) {
    %c0_i32 = arith.constant 0 : i32
    %c0_i32_0 = arith.constant 0 : i32
    %c0_i32_1 = arith.constant 0 : i32
    return %c0_i32, %c0_i32_0 : i32, i32
  }
  func.func @transform_6(%arg0: i32) -> (i32, i32) {
    %c0_i32 = arith.constant 0 : i32
    %c0_i32_0 = arith.constant 0 : i32
    %c0_i32_1 = arith.constant 0 : i32
    return %c0_i32, %c0_i32_0 : i32, i32
  }
  func.func @transform_7(%arg0: i32) -> (i32, i32) {
    %c0_i32 = arith.constant 0 : i32
    %c0_i32_0 = arith.constant 0 : i32
    return %arg0, %c0_i32 : i32, i32
  }
}

module attributes {stable_mosaic.version = 11 : i64} {
  func.func @_fused_linear_kernel(%arg0: i32, %arg1: memref<2x256xf32, #tpu.memory_space<vmem>>, %arg2: memref<1x256xf32, #tpu.memory_space<vmem>>, %arg3: memref<1x256xf32, #tpu.memory_space<vmem>>, %arg4: memref<256x128xbf16, #tpu.memory_space<vmem>>, %arg5: memref<1x128xf32, #tpu.memory_space<vmem>>, %arg6: memref<2x128xf32, #tpu.memory_space<vmem>>) attributes {dimension_semantics = [#tpu.dimension_semantics<parallel>], iteration_bounds = array<i64: 1>, scalar_prefetch = 0 : i64, scratch_operands = 0 : i64, tpu.core_type = #tpu.core_type<tc>, window_params = [{transform_indices = @transform_0, window_bounds = array<i64: 2, 256>}, {pipeline_mode = #tpu.pipeline_mode<synchronous>, transform_indices = @transform_1, window_bounds = array<i64: 1, 256>}, {pipeline_mode = #tpu.pipeline_mode<synchronous>, transform_indices = @transform_2, window_bounds = array<i64: 1, 256>}, {pipeline_mode = #tpu.pipeline_mode<synchronous>, transform_indices = @transform_3, window_bounds = array<i64: 256, 128>}, {pipeline_mode = #tpu.pipeline_mode<synchronous>, transform_indices = @transform_4, window_bounds = array<i64: 1, 128>}, {transform_indices = @transform_5, window_bounds = array<i64: 2, 128>}]} {
    %c0 = arith.constant 0 : index
    %c0_0 = arith.constant 0 : index
    %0 = vector.load %arg1[%c0, %c0_0] : memref<2x256xf32, #tpu.memory_space<vmem>>, vector<2x256xf32>
    %cst = arith.constant dense<0.000000e+00> : vector<2xf32>
    %1 = vector.multi_reduction <add>, %0, %cst [1] : vector<2x256xf32> to vector<2xf32>
    %2 = vector.shape_cast %1 : vector<2xf32> to vector<2x1xf32>
    %cst_1 = arith.constant 2.560000e+02 : f32
    %3 = vector.broadcast %cst_1 : f32 to vector<2x1xf32>
    %4 = arith.divf %2, %3 : vector<2x1xf32>
    %5 = vector.broadcast %4 : vector<2x1xf32> to vector<2x256xf32>
    %6 = arith.subf %0, %5 : vector<2x256xf32>
    %7 = arith.mulf %6, %6 : vector<2x256xf32>
    %cst_2 = arith.constant dense<0.000000e+00> : vector<2xf32>
    %8 = vector.multi_reduction <add>, %7, %cst_2 [1] : vector<2x256xf32> to vector<2xf32>
    %9 = vector.shape_cast %8 : vector<2xf32> to vector<2x1xf32>
    %cst_3 = arith.constant 2.560000e+02 : f32
    %10 = vector.broadcast %cst_3 : f32 to vector<2x1xf32>
    %11 = arith.divf %9, %10 : vector<2x1xf32>
    %cst_4 = arith.constant 9.99999997E-7 : f32
    %12 = vector.broadcast %cst_4 : f32 to vector<2x1xf32>
    %13 = arith.addf %11, %12 : vector<2x1xf32>
    %14 = math.rsqrt %13 : vector<2x1xf32>
    %15 = vector.broadcast %14 : vector<2x1xf32> to vector<2x256xf32>
    %16 = arith.mulf %6, %15 : vector<2x256xf32>
    %c0_5 = arith.constant 0 : index
    %c0_6 = arith.constant 0 : index
    %17 = vector.load %arg2[%c0_5, %c0_6] : memref<1x256xf32, #tpu.memory_space<vmem>>, vector<1x256xf32>
    %18 = vector.broadcast %17 : vector<1x256xf32> to vector<2x256xf32>
    %19 = arith.mulf %16, %18 : vector<2x256xf32>
    %c0_7 = arith.constant 0 : index
    %c0_8 = arith.constant 0 : index
    %20 = vector.load %arg3[%c0_7, %c0_8] : memref<1x256xf32, #tpu.memory_space<vmem>>, vector<1x256xf32>
    %21 = vector.broadcast %20 : vector<1x256xf32> to vector<2x256xf32>
    %22 = arith.addf %19, %21 : vector<2x256xf32>
    %23 = arith.mulf %22, %22 : vector<2x256xf32>
    %24 = arith.mulf %22, %23 : vector<2x256xf32>
    %cst_9 = arith.constant 4.471500e-02 : f32
    %25 = vector.broadcast %cst_9 : f32 to vector<2x256xf32>
    %26 = arith.mulf %25, %24 : vector<2x256xf32>
    %27 = arith.addf %22, %26 : vector<2x256xf32>
    %cst_10 = arith.constant 0.797884583 : f32
    %28 = vector.broadcast %cst_10 : f32 to vector<2x256xf32>
    %29 = arith.mulf %28, %27 : vector<2x256xf32>
    %30 = math.tanh %29 : vector<2x256xf32>
    %cst_11 = arith.constant 1.000000e+00 : f32
    %31 = vector.broadcast %cst_11 : f32 to vector<2x256xf32>
    %32 = arith.addf %31, %30 : vector<2x256xf32>
    %cst_12 = arith.constant 5.000000e-01 : f32
    %33 = vector.broadcast %cst_12 : f32 to vector<2x256xf32>
    %34 = arith.mulf %33, %32 : vector<2x256xf32>
    %35 = arith.mulf %22, %34 : vector<2x256xf32>
    %36 = arith.truncf %35 : vector<2x256xf32> to vector<2x256xbf16>
    %c0_13 = arith.constant 0 : index
    %c0_14 = arith.constant 0 : index
    %37 = vector.load %arg4[%c0_13, %c0_14] : memref<256x128xbf16, #tpu.memory_space<vmem>>, vector<256x128xbf16>
    %cst_15 = arith.constant dense<0.000000e+00> : vector<2x128xf32>
    %38 = tpu.matmul %36, %37, %cst_15 {dimension_numbers = #tpu.dot_dimension_numbers<[1], [0], [0], [1], [0, 0, 1, 1], [], []>} : vector<2x256xbf16>, vector<256x128xbf16>, vector<2x128xf32> -> vector<2x128xf32>
    %c0_16 = arith.constant 0 : index
    %c0_17 = arith.constant 0 : index
    %39 = vector.load %arg5[%c0_16, %c0_17] : memref<1x128xf32, #tpu.memory_space<vmem>>, vector<1x128xf32>
    %40 = vector.broadcast %39 : vector<1x128xf32> to vector<2x128xf32>
    %41 = arith.addf %38, %40 : vector<2x128xf32>
    %c0_18 = arith.constant 0 : index
    %c0_19 = arith.constant 0 : index
    %42 = vector.load %arg6[%c0_18, %c0_19] : memref<2x128xf32, #tpu.memory_space<vmem>>, vector<2x128xf32>
    tpu.vector_store %arg6[%c0_18, %c0_19], %41 {strides = array<i32>} : memref<2x128xf32, #tpu.memory_space<vmem>>, vector<2x128xf32>,
    return
  }
  func.func @transform_0(%arg0: i32) -> (i32, i32) {
    %c0_i32 = arith.constant 0 : i32
    %c0_i32_0 = arith.constant 0 : i32
    return %arg0, %c0_i32 : i32, i32
  }
  func.func @transform_1(%arg0: i32) -> (i32, i32) {
    %c0_i32 = arith.constant 0 : i32
    %c0_i32_0 = arith.constant 0 : i32
    %c0_i32_1 = arith.constant 0 : i32
    return %c0_i32, %c0_i32_0 : i32, i32
  }
  func.func @transform_2(%arg0: i32) -> (i32, i32) {
    %c0_i32 = arith.constant 0 : i32
    %c0_i32_0 = arith.constant 0 : i32
    %c0_i32_1 = arith.constant 0 : i32
    return %c0_i32, %c0_i32_0 : i32, i32
  }
  func.func @transform_3(%arg0: i32) -> (i32, i32) {
    %c0_i32 = arith.constant 0 : i32
    %c0_i32_0 = arith.constant 0 : i32
    %c0_i32_1 = arith.constant 0 : i32
    return %c0_i32, %c0_i32_0 : i32, i32
  }
  func.func @transform_4(%arg0: i32) -> (i32, i32) {
    %c0_i32 = arith.constant 0 : i32
    %c0_i32_0 = arith.constant 0 : i32
    %c0_i32_1 = arith.constant 0 : i32
    return %c0_i32, %c0_i32_0 : i32, i32
  }
  func.func @transform_5(%arg0: i32) -> (i32, i32) {
    %c0_i32 = arith.constant 0 : i32
    %c0_i32_0 = arith.constant 0 : i32
    return %arg0, %c0_i32 : i32, i32
  }
}

module attributes {stable_mosaic.version = 11 : i64} {
  func.func @_fused_linear_kernel(%arg0: i32, %arg1: memref<2x128xf32, #tpu.memory_space<vmem>>, %arg2: memref<1x128xf32, #tpu.memory_space<vmem>>, %arg3: memref<1x128xf32, #tpu.memory_space<vmem>>, %arg4: memref<128x128xbf16, #tpu.memory_space<vmem>>, %arg5: memref<1x128xf32, #tpu.memory_space<vmem>>, %arg6: memref<2x128xf32, #tpu.memory_space<vmem>>) attributes {dimension_semantics = [#tpu.dimension_semantics<parallel>], iteration_bounds = array<i64: 1>, scalar_prefetch = 0 : i64, scratch_operands = 0 : i64, tpu.core_type = #tpu.core_type<tc>, window_params = [{transform_indices = @transform_0, window_bounds = array<i64: 2, 128>}, {pipeline_mode = #tpu.pipeline_mode<synchronous>, transform_indices = @transform_1, window_bounds = array<i64: 1, 128>}, {pipeline_mode = #tpu.pipeline_mode<synchronous>, transform_indices = @transform_2, window_bounds = array<i64: 1, 128>}, {pipeline_mode = #tpu.pipeline_mode<synchronous>, transform_indices = @transform_3, window_bounds = array<i64: 128, 128>}, {pipeline_mode = #tpu.pipeline_mode<synchronous>, transform_indices = @transform_4, window_bounds = array<i64: 1, 128>}, {transform_indices = @transform_5, window_bounds = array<i64: 2, 128>}]} {
    %c0 = arith.constant 0 : index
    %c0_0 = arith.constant 0 : index
    %0 = vector.load %arg1[%c0, %c0_0] : memref<2x128xf32, #tpu.memory_space<vmem>>, vector<2x128xf32>
    %cst = arith.constant dense<0.000000e+00> : vector<2xf32>
    %1 = vector.multi_reduction <add>, %0, %cst [1] : vector<2x128xf32> to vector<2xf32>
    %2 = vector.shape_cast %1 : vector<2xf32> to vector<2x1xf32>
    %cst_1 = arith.constant 1.280000e+02 : f32
    %3 = vector.broadcast %cst_1 : f32 to vector<2x1xf32>
    %4 = arith.divf %2, %3 : vector<2x1xf32>
    %5 = vector.broadcast %4 : vector<2x1xf32> to vector<2x128xf32>
    %6 = arith.subf %0, %5 : vector<2x128xf32>
    %7 = arith.mulf %6, %6 : vector<2x128xf32>
    %cst_2 = arith.constant dense<0.000000e+00> : vector<2xf32>
    %8 = vector.multi_reduction <add>, %7, %cst_2 [1] : vector<2x128xf32> to vector<2xf32>
    %9 = vector.shape_cast %8 : vector<2xf32> to vector<2x1xf32>
    %cst_3 = arith.constant 1.280000e+02 : f32
    %10 = vector.broadcast %cst_3 : f32 to vector<2x1xf32>
    %11 = arith.divf %9, %10 : vector<2x1xf32>
    %cst_4 = arith.constant 9.99999997E-7 : f32
    %12 = vector.broadcast %cst_4 : f32 to vector<2x1xf32>
    %13 = arith.addf %11, %12 : vector<2x1xf32>
    %14 = math.rsqrt %13 : vector<2x1xf32>
    %15 = vector.broadcast %14 : vector<2x1xf32> to vector<2x128xf32>
    %16 = arith.mulf %6, %15 : vector<2x128xf32>
    %c0_5 = arith.constant 0 : index
    %c0_6 = arith.constant 0 : index
    %17 = vector.load %arg2[%c0_5, %c0_6] : memref<1x128xf32, #tpu.memory_space<vmem>>, vector<1x128xf32>
    %18 = vector.broadcast %17 : vector<1x128xf32> to vector<2x128xf32>
    %19 = arith.mulf %16, %18 : vector<2x128xf32>
    %c0_7 = arith.constant 0 : index
    %c0_8 = arith.constant 0 : index
    %20 = vector.load %arg3[%c0_7, %c0_8] : memref<1x128xf32, #tpu.memory_space<vmem>>, vector<1x128xf32>
    %21 = vector.broadcast %20 : vector<1x128xf32> to vector<2x128xf32>
    %22 = arith.addf %19, %21 : vector<2x128xf32>
    %23 = arith.truncf %22 : vector<2x128xf32> to vector<2x128xbf16>
    %c0_9 = arith.constant 0 : index
    %c0_10 = arith.constant 0 : index
    %24 = vector.load %arg4[%c0_9, %c0_10] : memref<128x128xbf16, #tpu.memory_space<vmem>>, vector<128x128xbf16>
    %cst_11 = arith.constant dense<0.000000e+00> : vector<2x128xf32>
    %25 = tpu.matmul %23, %24, %cst_11 {dimension_numbers = #tpu.dot_dimension_numbers<[1], [0], [0], [1], [0, 0, 1, 1], [], []>} : vector<2x128xbf16>, vector<128x128xbf16>, vector<2x128xf32> -> vector<2x128xf32>
    %c0_12 = arith.constant 0 : index
    %c0_13 = arith.constant 0 : index
    %26 = vector.load %arg5[%c0_12, %c0_13] : memref<1x128xf32, #tpu.memory_space<vmem>>, vector<1x128xf32>
    %27 = vector.broadcast %26 : vector<1x128xf32> to vector<2x128xf32>
    %28 = arith.addf %25, %27 : vector<2x128xf32>
    %c0_14 = arith.constant 0 : index
    %c0_15 = arith.constant 0 : index
    %29 = vector.load %arg6[%c0_14, %c0_15] : memref<2x128xf32, #tpu.memory_space<vmem>>, vector<2x128xf32>
    tpu.vector_store %arg6[%c0_14, %c0_15], %28 {strides = array<i32>} : memref<2x128xf32, #tpu.memory_space<vmem>>, vector<2x128xf32>,
    return
  }
  func.func @transform_0(%arg0: i32) -> (i32, i32) {
    %c0_i32 = arith.constant 0 : i32
    %c0_i32_0 = arith.constant 0 : i32
    return %arg0, %c0_i32 : i32, i32
  }
  func.func @transform_1(%arg0: i32) -> (i32, i32) {
    %c0_i32 = arith.constant 0 : i32
    %c0_i32_0 = arith.constant 0 : i32
    %c0_i32_1 = arith.constant 0 : i32
    return %c0_i32, %c0_i32_0 : i32, i32
  }
  func.func @transform_2(%arg0: i32) -> (i32, i32) {
    %c0_i32 = arith.constant 0 : i32
    %c0_i32_0 = arith.constant 0 : i32
    %c0_i32_1 = arith.constant 0 : i32
    return %c0_i32, %c0_i32_0 : i32, i32
  }
  func.func @transform_3(%arg0: i32) -> (i32, i32) {
    %c0_i32 = arith.constant 0 : i32
    %c0_i32_0 = arith.constant 0 : i32
    %c0_i32_1 = arith.constant 0 : i32
    return %c0_i32, %c0_i32_0 : i32, i32
  }
  func.func @transform_4(%arg0: i32) -> (i32, i32) {
    %c0_i32 = arith.constant 0 : i32
    %c0_i32_0 = arith.constant 0 : i32
    %c0_i32_1 = arith.constant 0 : i32
    return %c0_i32, %c0_i32_0 : i32, i32
  }
  func.func @transform_5(%arg0: i32) -> (i32, i32) {
    %c0_i32 = arith.constant 0 : i32
    %c0_i32_0 = arith.constant 0 : i32
    return %arg0, %c0_i32 : i32, i32
  }
}

module attributes {stable_mosaic.version = 11 : i64} {
  func.func @_fused_linear_kernel(%arg0: i32, %arg1: memref<32x48xf32, #tpu.memory_space<vmem>>, %arg2: memref<48x128xbf16, #tpu.memory_space<vmem>>, %arg3: memref<1x128xf32, #tpu.memory_space<vmem>>, %arg4: memref<32x128xf32, #tpu.memory_space<vmem>>) attributes {dimension_semantics = [#tpu.dimension_semantics<parallel>], iteration_bounds = array<i64: 1>, scalar_prefetch = 0 : i64, scratch_operands = 0 : i64, tpu.core_type = #tpu.core_type<tc>, window_params = [{transform_indices = @transform_0, window_bounds = array<i64: 32, 48>}, {pipeline_mode = #tpu.pipeline_mode<synchronous>, transform_indices = @transform_1, window_bounds = array<i64: 48, 128>}, {pipeline_mode = #tpu.pipeline_mode<synchronous>, transform_indices = @transform_2, window_bounds = array<i64: 1, 128>}, {transform_indices = @transform_3, window_bounds = array<i64: 32, 128>}]} {
    %c0 = arith.constant 0 : index
    %c0_0 = arith.constant 0 : index
    %0 = vector.load %arg1[%c0, %c0_0] : memref<32x48xf32, #tpu.memory_space<vmem>>, vector<32x48xf32>
    %1 = arith.truncf %0 : vector<32x48xf32> to vector<32x48xbf16>
    %c0_1 = arith.constant 0 : index
    %c0_2 = arith.constant 0 : index
    %2 = vector.load %arg2[%c0_1, %c0_2] : memref<48x128xbf16, #tpu.memory_space<vmem>>, vector<48x128xbf16>
    %cst = arith.constant dense<0.000000e+00> : vector<32x128xf32>
    %3 = tpu.matmul %1, %2, %cst {dimension_numbers = #tpu.dot_dimension_numbers<[1], [0], [0], [1], [0, 0, 1, 1], [], []>} : vector<32x48xbf16>, vector<48x128xbf16>, vector<32x128xf32> -> vector<32x128xf32>
    %c0_3 = arith.constant 0 : index
    %c0_4 = arith.constant 0 : index
    %4 = vector.load %arg3[%c0_3, %c0_4] : memref<1x128xf32, #tpu.memory_space<vmem>>, vector<1x128xf32>
    %5 = vector.broadcast %4 : vector<1x128xf32> to vector<32x128xf32>
    %6 = arith.addf %3, %5 : vector<32x128xf32>
    %c0_5 = arith.constant 0 : index
    %c0_6 = arith.constant 0 : index
    %7 = vector.load %arg4[%c0_5, %c0_6] : memref<32x128xf32, #tpu.memory_space<vmem>>, vector<32x128xf32>
    tpu.vector_store %arg4[%c0_5, %c0_6], %6 {strides = array<i32>} : memref<32x128xf32, #tpu.memory_space<vmem>>, vector<32x128xf32>,
    return
  }
  func.func @transform_0(%arg0: i32) -> (i32, i32) {
    %c0_i32 = arith.constant 0 : i32
    %c0_i32_0 = arith.constant 0 : i32
    return %arg0, %c0_i32 : i32, i32
  }
  func.func @transform_1(%arg0: i32) -> (i32, i32) {
    %c0_i32 = arith.constant 0 : i32
    %c0_i32_0 = arith.constant 0 : i32
    %c0_i32_1 = arith.constant 0 : i32
    return %c0_i32, %c0_i32_0 : i32, i32
  }
  func.func @transform_2(%arg0: i32) -> (i32, i32) {
    %c0_i32 = arith.constant 0 : i32
    %c0_i32_0 = arith.constant 0 : i32
    %c0_i32_1 = arith.constant 0 : i32
    return %c0_i32, %c0_i32_0 : i32, i32
  }
  func.func @transform_3(%arg0: i32) -> (i32, i32) {
    %c0_i32 = arith.constant 0 : i32
    %c0_i32_0 = arith.constant 0 : i32
    return %arg0, %c0_i32 : i32, i32
  }
}

module attributes {stable_mosaic.version = 11 : i64} {
  func.func @_fused_linear_kernel(%arg0: i32, %arg1: memref<34x128xf32, #tpu.memory_space<vmem>>, %arg2: memref<128x128xbf16, #tpu.memory_space<vmem>>, %arg3: memref<1x128xf32, #tpu.memory_space<vmem>>, %arg4: memref<34x128xf32, #tpu.memory_space<vmem>>, %arg5: memref<34x128xf32, #tpu.memory_space<vmem>>) attributes {dimension_semantics = [#tpu.dimension_semantics<parallel>], iteration_bounds = array<i64: 1>, scalar_prefetch = 0 : i64, scratch_operands = 0 : i64, tpu.core_type = #tpu.core_type<tc>, window_params = [{transform_indices = @transform_0, window_bounds = array<i64: 34, 128>}, {pipeline_mode = #tpu.pipeline_mode<synchronous>, transform_indices = @transform_1, window_bounds = array<i64: 128, 128>}, {pipeline_mode = #tpu.pipeline_mode<synchronous>, transform_indices = @transform_2, window_bounds = array<i64: 1, 128>}, {transform_indices = @transform_3, window_bounds = array<i64: 34, 128>}, {transform_indices = @transform_4, window_bounds = array<i64: 34, 128>}]} {
    %c0 = arith.constant 0 : index
    %c0_0 = arith.constant 0 : index
    %0 = vector.load %arg1[%c0, %c0_0] : memref<34x128xf32, #tpu.memory_space<vmem>>, vector<34x128xf32>
    %1 = arith.truncf %0 : vector<34x128xf32> to vector<34x128xbf16>
    %c0_1 = arith.constant 0 : index
    %c0_2 = arith.constant 0 : index
    %2 = vector.load %arg2[%c0_1, %c0_2] : memref<128x128xbf16, #tpu.memory_space<vmem>>, vector<128x128xbf16>
    %cst = arith.constant dense<0.000000e+00> : vector<34x128xf32>
    %3 = tpu.matmul %1, %2, %cst {dimension_numbers = #tpu.dot_dimension_numbers<[1], [0], [0], [1], [0, 0, 1, 1], [], []>} : vector<34x128xbf16>, vector<128x128xbf16>, vector<34x128xf32> -> vector<34x128xf32>
    %c0_3 = arith.constant 0 : index
    %c0_4 = arith.constant 0 : index
    %4 = vector.load %arg3[%c0_3, %c0_4] : memref<1x128xf32, #tpu.memory_space<vmem>>, vector<1x128xf32>
    %5 = vector.broadcast %4 : vector<1x128xf32> to vector<34x128xf32>
    %6 = arith.addf %3, %5 : vector<34x128xf32>
    %c0_5 = arith.constant 0 : index
    %c0_6 = arith.constant 0 : index
    %7 = vector.load %arg4[%c0_5, %c0_6] : memref<34x128xf32, #tpu.memory_space<vmem>>, vector<34x128xf32>
    %8 = arith.addf %6, %7 : vector<34x128xf32>
    %c0_7 = arith.constant 0 : index
    %c0_8 = arith.constant 0 : index
    %9 = vector.load %arg5[%c0_7, %c0_8] : memref<34x128xf32, #tpu.memory_space<vmem>>, vector<34x128xf32>
    tpu.vector_store %arg5[%c0_7, %c0_8], %8 {strides = array<i32>} : memref<34x128xf32, #tpu.memory_space<vmem>>, vector<34x128xf32>,
    return
  }
  func.func @transform_0(%arg0: i32) -> (i32, i32) {
    %c0_i32 = arith.constant 0 : i32
    %c0_i32_0 = arith.constant 0 : i32
    return %arg0, %c0_i32 : i32, i32
  }
  func.func @transform_1(%arg0: i32) -> (i32, i32) {
    %c0_i32 = arith.constant 0 : i32
    %c0_i32_0 = arith.constant 0 : i32
    %c0_i32_1 = arith.constant 0 : i32
    return %c0_i32, %c0_i32_0 : i32, i32
  }
  func.func @transform_2(%arg0: i32) -> (i32, i32) {
    %c0_i32 = arith.constant 0 : i32
    %c0_i32_0 = arith.constant 0 : i32
    %c0_i32_1 = arith.constant 0 : i32
    return %c0_i32, %c0_i32_0 : i32, i32
  }
  func.func @transform_3(%arg0: i32) -> (i32, i32) {
    %c0_i32 = arith.constant 0 : i32
    %c0_i32_0 = arith.constant 0 : i32
    return %arg0, %c0_i32 : i32, i32
  }
  func.func @transform_4(%arg0: i32) -> (i32, i32) {
    %c0_i32 = arith.constant 0 : i32
    %c0_i32_0 = arith.constant 0 : i32
    return %arg0, %c0_i32 : i32, i32
  }
}

module attributes {stable_mosaic.version = 11 : i64} {
  func.func @_self_attn_kernel(%arg0: i32, %arg1: memref<1x17x384xf32, #tpu.memory_space<vmem>>, %arg2: memref<1x17x128xf32, #tpu.memory_space<vmem>>) attributes {dimension_semantics = [#tpu.dimension_semantics<parallel>], iteration_bounds = array<i64: 2>, scalar_prefetch = 0 : i64, scratch_operands = 0 : i64, tpu.core_type = #tpu.core_type<tc>, window_params = [{transform_indices = @transform_0, window_bounds = array<i64: 1, 17, 384>}, {transform_indices = @transform_1, window_bounds = array<i64: 1, 17, 128>}]} {
    %c0 = arith.constant 0 : index
    %c0_0 = arith.constant 0 : index
    %c0_1 = arith.constant 0 : index
    %0 = vector.load %arg1[%c0, %c0_0, %c0_1] : memref<1x17x384xf32, #tpu.memory_space<vmem>>, vector<1x17x384xf32>
    %1 = vector.shape_cast %0 : vector<1x17x384xf32> to vector<17x384xf32>
    %2 = vector.extract_strided_slice %1 {offsets = [0, 0], sizes = [17, 32], strides = [1, 1]} : vector<17x384xf32> to vector<17x32xf32>
    %3 = arith.truncf %2 : vector<17x32xf32> to vector<17x32xbf16>
    %4 = vector.extract_strided_slice %1 {offsets = [0, 128], sizes = [17, 32], strides = [1, 1]} : vector<17x384xf32> to vector<17x32xf32>
    %5 = arith.truncf %4 : vector<17x32xf32> to vector<17x32xbf16>
    %6 = vector.extract_strided_slice %1 {offsets = [0, 256], sizes = [17, 32], strides = [1, 1]} : vector<17x384xf32> to vector<17x32xf32>
    %7 = arith.truncf %6 : vector<17x32xf32> to vector<17x32xbf16>
    %cst = arith.constant dense<0.000000e+00> : vector<17x17xf32>
    %8 = tpu.matmul %3, %5, %cst {dimension_numbers = #tpu.dot_dimension_numbers<[1], [1], [0], [0], [0, 0, 1, 0], [], []>} : vector<17x32xbf16>, vector<17x32xbf16>, vector<17x17xf32> -> vector<17x17xf32>
    %cst_2 = arith.constant 0.176776692 : f32
    %9 = vector.broadcast %cst_2 : f32 to vector<17x17xf32>
    %10 = arith.mulf %8, %9 : vector<17x17xf32>
    %cst_3 = arith.constant dense<0xFF800000> : vector<17xf32>
    %11 = vector.multi_reduction <maximumf>, %10, %cst_3 [1] : vector<17x17xf32> to vector<17xf32>
    %12 = vector.shape_cast %11 : vector<17xf32> to vector<17x1xf32>
    %13 = vector.broadcast %12 : vector<17x1xf32> to vector<17x17xf32>
    %14 = arith.subf %10, %13 : vector<17x17xf32>
    %15 = math.exp %14 : vector<17x17xf32>
    %cst_4 = arith.constant dense<0.000000e+00> : vector<17xf32>
    %16 = vector.multi_reduction <add>, %15, %cst_4 [1] : vector<17x17xf32> to vector<17xf32>
    %17 = vector.shape_cast %16 : vector<17xf32> to vector<17x1xf32>
    %18 = tpu.reciprocal %17 {approx = true} : vector<17x1xf32> -> vector<17x1xf32>
    %19 = vector.broadcast %18 : vector<17x1xf32> to vector<17x17xf32>
    %20 = arith.mulf %15, %19 : vector<17x17xf32>
    %21 = arith.truncf %20 : vector<17x17xf32> to vector<17x17xbf16>
    %cst_5 = arith.constant dense<0.000000e+00> : vector<17x32xf32>
    %22 = tpu.matmul %21, %7, %cst_5 {dimension_numbers = #tpu.dot_dimension_numbers<[1], [0], [0], [1], [0, 0, 1, 1], [], []>} : vector<17x17xbf16>, vector<17x32xbf16>, vector<17x32xf32> -> vector<17x32xf32>
    %23 = vector.extract_strided_slice %1 {offsets = [0, 32], sizes = [17, 32], strides = [1, 1]} : vector<17x384xf32> to vector<17x32xf32>
    %24 = arith.truncf %23 : vector<17x32xf32> to vector<17x32xbf16>
    %25 = vector.extract_strided_slice %1 {offsets = [0, 160], sizes = [17, 32], strides = [1, 1]} : vector<17x384xf32> to vector<17x32xf32>
    %26 = arith.truncf %25 : vector<17x32xf32> to vector<17x32xbf16>
    %27 = vector.extract_strided_slice %1 {offsets = [0, 288], sizes = [17, 32], strides = [1, 1]} : vector<17x384xf32> to vector<17x32xf32>
    %28 = arith.truncf %27 : vector<17x32xf32> to vector<17x32xbf16>
    %cst_6 = arith.constant dense<0.000000e+00> : vector<17x17xf32>
    %29 = tpu.matmul %24, %26, %cst_6 {dimension_numbers = #tpu.dot_dimension_numbers<[1], [1], [0], [0], [0, 0, 1, 0], [], []>} : vector<17x32xbf16>, vector<17x32xbf16>, vector<17x17xf32> -> vector<17x17xf32>
    %cst_7 = arith.constant 0.176776692 : f32
    %30 = vector.broadcast %cst_7 : f32 to vector<17x17xf32>
    %31 = arith.mulf %29, %30 : vector<17x17xf32>
    %cst_8 = arith.constant dense<0xFF800000> : vector<17xf32>
    %32 = vector.multi_reduction <maximumf>, %31, %cst_8 [1] : vector<17x17xf32> to vector<17xf32>
    %33 = vector.shape_cast %32 : vector<17xf32> to vector<17x1xf32>
    %34 = vector.broadcast %33 : vector<17x1xf32> to vector<17x17xf32>
    %35 = arith.subf %31, %34 : vector<17x17xf32>
    %36 = math.exp %35 : vector<17x17xf32>
    %cst_9 = arith.constant dense<0.000000e+00> : vector<17xf32>
    %37 = vector.multi_reduction <add>, %36, %cst_9 [1] : vector<17x17xf32> to vector<17xf32>
    %38 = vector.shape_cast %37 : vector<17xf32> to vector<17x1xf32>
    %39 = tpu.reciprocal %38 {approx = true} : vector<17x1xf32> -> vector<17x1xf32>
    %40 = vector.broadcast %39 : vector<17x1xf32> to vector<17x17xf32>
    %41 = arith.mulf %36, %40 : vector<17x17xf32>
    %42 = arith.truncf %41 : vector<17x17xf32> to vector<17x17xbf16>
    %cst_10 = arith.constant dense<0.000000e+00> : vector<17x32xf32>
    %43 = tpu.matmul %42, %28, %cst_10 {dimension_numbers = #tpu.dot_dimension_numbers<[1], [0], [0], [1], [0, 0, 1, 1], [], []>} : vector<17x17xbf16>, vector<17x32xbf16>, vector<17x32xf32> -> vector<17x32xf32>
    %44 = vector.extract_strided_slice %1 {offsets = [0, 64], sizes = [17, 32], strides = [1, 1]} : vector<17x384xf32> to vector<17x32xf32>
    %45 = arith.truncf %44 : vector<17x32xf32> to vector<17x32xbf16>
    %46 = vector.extract_strided_slice %1 {offsets = [0, 192], sizes = [17, 32], strides = [1, 1]} : vector<17x384xf32> to vector<17x32xf32>
    %47 = arith.truncf %46 : vector<17x32xf32> to vector<17x32xbf16>
    %48 = vector.extract_strided_slice %1 {offsets = [0, 320], sizes = [17, 32], strides = [1, 1]} : vector<17x384xf32> to vector<17x32xf32>
    %49 = arith.truncf %48 : vector<17x32xf32> to vector<17x32xbf16>
    %cst_11 = arith.constant dense<0.000000e+00> : vector<17x17xf32>
    %50 = tpu.matmul %45, %47, %cst_11 {dimension_numbers = #tpu.dot_dimension_numbers<[1], [1], [0], [0], [0, 0, 1, 0], [], []>} : vector<17x32xbf16>, vector<17x32xbf16>, vector<17x17xf32> -> vector<17x17xf32>
    %cst_12 = arith.constant 0.176776692 : f32
    %51 = vector.broadcast %cst_12 : f32 to vector<17x17xf32>
    %52 = arith.mulf %50, %51 : vector<17x17xf32>
    %cst_13 = arith.constant dense<0xFF800000> : vector<17xf32>
    %53 = vector.multi_reduction <maximumf>, %52, %cst_13 [1] : vector<17x17xf32> to vector<17xf32>
    %54 = vector.shape_cast %53 : vector<17xf32> to vector<17x1xf32>
    %55 = vector.broadcast %54 : vector<17x1xf32> to vector<17x17xf32>
    %56 = arith.subf %52, %55 : vector<17x17xf32>
    %57 = math.exp %56 : vector<17x17xf32>
    %cst_14 = arith.constant dense<0.000000e+00> : vector<17xf32>
    %58 = vector.multi_reduction <add>, %57, %cst_14 [1] : vector<17x17xf32> to vector<17xf32>
    %59 = vector.shape_cast %58 : vector<17xf32> to vector<17x1xf32>
    %60 = tpu.reciprocal %59 {approx = true} : vector<17x1xf32> -> vector<17x1xf32>
    %61 = vector.broadcast %60 : vector<17x1xf32> to vector<17x17xf32>
    %62 = arith.mulf %57, %61 : vector<17x17xf32>
    %63 = arith.truncf %62 : vector<17x17xf32> to vector<17x17xbf16>
    %cst_15 = arith.constant dense<0.000000e+00> : vector<17x32xf32>
    %64 = tpu.matmul %63, %49, %cst_15 {dimension_numbers = #tpu.dot_dimension_numbers<[1], [0], [0], [1], [0, 0, 1, 1], [], []>} : vector<17x17xbf16>, vector<17x32xbf16>, vector<17x32xf32> -> vector<17x32xf32>
    %65 = vector.extract_strided_slice %1 {offsets = [0, 96], sizes = [17, 32], strides = [1, 1]} : vector<17x384xf32> to vector<17x32xf32>
    %66 = arith.truncf %65 : vector<17x32xf32> to vector<17x32xbf16>
    %67 = vector.extract_strided_slice %1 {offsets = [0, 224], sizes = [17, 32], strides = [1, 1]} : vector<17x384xf32> to vector<17x32xf32>
    %68 = arith.truncf %67 : vector<17x32xf32> to vector<17x32xbf16>
    %69 = vector.extract_strided_slice %1 {offsets = [0, 352], sizes = [17, 32], strides = [1, 1]} : vector<17x384xf32> to vector<17x32xf32>
    %70 = arith.truncf %69 : vector<17x32xf32> to vector<17x32xbf16>
    %cst_16 = arith.constant dense<0.000000e+00> : vector<17x17xf32>
    %71 = tpu.matmul %66, %68, %cst_16 {dimension_numbers = #tpu.dot_dimension_numbers<[1], [1], [0], [0], [0, 0, 1, 0], [], []>} : vector<17x32xbf16>, vector<17x32xbf16>, vector<17x17xf32> -> vector<17x17xf32>
    %cst_17 = arith.constant 0.176776692 : f32
    %72 = vector.broadcast %cst_17 : f32 to vector<17x17xf32>
    %73 = arith.mulf %71, %72 : vector<17x17xf32>
    %cst_18 = arith.constant dense<0xFF800000> : vector<17xf32>
    %74 = vector.multi_reduction <maximumf>, %73, %cst_18 [1] : vector<17x17xf32> to vector<17xf32>
    %75 = vector.shape_cast %74 : vector<17xf32> to vector<17x1xf32>
    %76 = vector.broadcast %75 : vector<17x1xf32> to vector<17x17xf32>
    %77 = arith.subf %73, %76 : vector<17x17xf32>
    %78 = math.exp %77 : vector<17x17xf32>
    %cst_19 = arith.constant dense<0.000000e+00> : vector<17xf32>
    %79 = vector.multi_reduction <add>, %78, %cst_19 [1] : vector<17x17xf32> to vector<17xf32>
    %80 = vector.shape_cast %79 : vector<17xf32> to vector<17x1xf32>
    %81 = tpu.reciprocal %80 {approx = true} : vector<17x1xf32> -> vector<17x1xf32>
    %82 = vector.broadcast %81 : vector<17x1xf32> to vector<17x17xf32>
    %83 = arith.mulf %78, %82 : vector<17x17xf32>
    %84 = arith.truncf %83 : vector<17x17xf32> to vector<17x17xbf16>
    %cst_20 = arith.constant dense<0.000000e+00> : vector<17x32xf32>
    %85 = tpu.matmul %84, %70, %cst_20 {dimension_numbers = #tpu.dot_dimension_numbers<[1], [0], [0], [1], [0, 0, 1, 1], [], []>} : vector<17x17xbf16>, vector<17x32xbf16>, vector<17x32xf32> -> vector<17x32xf32>
    %86 = tpu.concatenate %22, %43, %64, %85 in 1 : vector<17x32xf32>, vector<17x32xf32>, vector<17x32xf32>, vector<17x32xf32> -> vector<17x128xf32>
    %c0_21 = arith.constant 0 : index
    %c0_22 = arith.constant 0 : index
    %c0_23 = arith.constant 0 : index
    %87 = vector.load %arg2[%c0_21, %c0_22, %c0_23] : memref<1x17x128xf32, #tpu.memory_space<vmem>>, vector<1x17x128xf32>
    %88 = vector.shape_cast %87 : vector<1x17x128xf32> to vector<17x128xf32>
    %89 = vector.shape_cast %86 : vector<17x128xf32> to vector<1x17x128xf32>
    tpu.vector_store %arg2[%c0_21, %c0_22, %c0_23], %89 {strides = array<i32>} : memref<1x17x128xf32, #tpu.memory_space<vmem>>, vector<1x17x128xf32>,
    return
  }
  func.func @transform_0(%arg0: i32) -> (i32, i32, i32) {
    %c0_i32 = arith.constant 0 : i32
    %c0_i32_0 = arith.constant 0 : i32
    %c0_i32_1 = arith.constant 0 : i32
    return %arg0, %c0_i32, %c0_i32_0 : i32, i32, i32
  }
  func.func @transform_1(%arg0: i32) -> (i32, i32, i32) {
    %c0_i32 = arith.constant 0 : i32
    %c0_i32_0 = arith.constant 0 : i32
    %c0_i32_1 = arith.constant 0 : i32
    return %arg0, %c0_i32, %c0_i32_0 : i32, i32, i32
  }
}

module attributes {stable_mosaic.version = 11 : i64} {
  func.func @_fused_linear_kernel(%arg0: i32, %arg1: memref<34x128xf32, #tpu.memory_space<vmem>>, %arg2: memref<1x128xf32, #tpu.memory_space<vmem>>, %arg3: memref<1x128xf32, #tpu.memory_space<vmem>>, %arg4: memref<128x384xbf16, #tpu.memory_space<vmem>>, %arg5: memref<1x384xf32, #tpu.memory_space<vmem>>, %arg6: memref<34x384xf32, #tpu.memory_space<vmem>>) attributes {dimension_semantics = [#tpu.dimension_semantics<parallel>], iteration_bounds = array<i64: 1>, scalar_prefetch = 0 : i64, scratch_operands = 0 : i64, tpu.core_type = #tpu.core_type<tc>, window_params = [{transform_indices = @transform_0, window_bounds = array<i64: 34, 128>}, {pipeline_mode = #tpu.pipeline_mode<synchronous>, transform_indices = @transform_1, window_bounds = array<i64: 1, 128>}, {pipeline_mode = #tpu.pipeline_mode<synchronous>, transform_indices = @transform_2, window_bounds = array<i64: 1, 128>}, {pipeline_mode = #tpu.pipeline_mode<synchronous>, transform_indices = @transform_3, window_bounds = array<i64: 128, 384>}, {pipeline_mode = #tpu.pipeline_mode<synchronous>, transform_indices = @transform_4, window_bounds = array<i64: 1, 384>}, {transform_indices = @transform_5, window_bounds = array<i64: 34, 384>}]} {
    %c0 = arith.constant 0 : index
    %c0_0 = arith.constant 0 : index
    %0 = vector.load %arg1[%c0, %c0_0] : memref<34x128xf32, #tpu.memory_space<vmem>>, vector<34x128xf32>
    %cst = arith.constant dense<0.000000e+00> : vector<34xf32>
    %1 = vector.multi_reduction <add>, %0, %cst [1] : vector<34x128xf32> to vector<34xf32>
    %2 = vector.shape_cast %1 : vector<34xf32> to vector<34x1xf32>
    %cst_1 = arith.constant 1.280000e+02 : f32
    %3 = vector.broadcast %cst_1 : f32 to vector<34x1xf32>
    %4 = arith.divf %2, %3 : vector<34x1xf32>
    %5 = vector.broadcast %4 : vector<34x1xf32> to vector<34x128xf32>
    %6 = arith.subf %0, %5 : vector<34x128xf32>
    %7 = arith.mulf %6, %6 : vector<34x128xf32>
    %cst_2 = arith.constant dense<0.000000e+00> : vector<34xf32>
    %8 = vector.multi_reduction <add>, %7, %cst_2 [1] : vector<34x128xf32> to vector<34xf32>
    %9 = vector.shape_cast %8 : vector<34xf32> to vector<34x1xf32>
    %cst_3 = arith.constant 1.280000e+02 : f32
    %10 = vector.broadcast %cst_3 : f32 to vector<34x1xf32>
    %11 = arith.divf %9, %10 : vector<34x1xf32>
    %cst_4 = arith.constant 9.99999997E-7 : f32
    %12 = vector.broadcast %cst_4 : f32 to vector<34x1xf32>
    %13 = arith.addf %11, %12 : vector<34x1xf32>
    %14 = math.rsqrt %13 : vector<34x1xf32>
    %15 = vector.broadcast %14 : vector<34x1xf32> to vector<34x128xf32>
    %16 = arith.mulf %6, %15 : vector<34x128xf32>
    %c0_5 = arith.constant 0 : index
    %c0_6 = arith.constant 0 : index
    %17 = vector.load %arg2[%c0_5, %c0_6] : memref<1x128xf32, #tpu.memory_space<vmem>>, vector<1x128xf32>
    %18 = vector.broadcast %17 : vector<1x128xf32> to vector<34x128xf32>
    %19 = arith.mulf %16, %18 : vector<34x128xf32>
    %c0_7 = arith.constant 0 : index
    %c0_8 = arith.constant 0 : index
    %20 = vector.load %arg3[%c0_7, %c0_8] : memref<1x128xf32, #tpu.memory_space<vmem>>, vector<1x128xf32>
    %21 = vector.broadcast %20 : vector<1x128xf32> to vector<34x128xf32>
    %22 = arith.addf %19, %21 : vector<34x128xf32>
    %23 = arith.truncf %22 : vector<34x128xf32> to vector<34x128xbf16>
    %c0_9 = arith.constant 0 : index
    %c0_10 = arith.constant 0 : index
    %24 = vector.load %arg4[%c0_9, %c0_10] : memref<128x384xbf16, #tpu.memory_space<vmem>>, vector<128x384xbf16>
    %cst_11 = arith.constant dense<0.000000e+00> : vector<34x384xf32>
    %25 = tpu.matmul %23, %24, %cst_11 {dimension_numbers = #tpu.dot_dimension_numbers<[1], [0], [0], [1], [0, 0, 1, 1], [], []>} : vector<34x128xbf16>, vector<128x384xbf16>, vector<34x384xf32> -> vector<34x384xf32>
    %c0_12 = arith.constant 0 : index
    %c0_13 = arith.constant 0 : index
    %26 = vector.load %arg5[%c0_12, %c0_13] : memref<1x384xf32, #tpu.memory_space<vmem>>, vector<1x384xf32>
    %27 = vector.broadcast %26 : vector<1x384xf32> to vector<34x384xf32>
    %28 = arith.addf %25, %27 : vector<34x384xf32>
    %c0_14 = arith.constant 0 : index
    %c0_15 = arith.constant 0 : index
    %29 = vector.load %arg6[%c0_14, %c0_15] : memref<34x384xf32, #tpu.memory_space<vmem>>, vector<34x384xf32>
    tpu.vector_store %arg6[%c0_14, %c0_15], %28 {strides = array<i32>} : memref<34x384xf32, #tpu.memory_space<vmem>>, vector<34x384xf32>,
    return
  }
  func.func @transform_0(%arg0: i32) -> (i32, i32) {
    %c0_i32 = arith.constant 0 : i32
    %c0_i32_0 = arith.constant 0 : i32
    return %arg0, %c0_i32 : i32, i32
  }
  func.func @transform_1(%arg0: i32) -> (i32, i32) {
    %c0_i32 = arith.constant 0 : i32
    %c0_i32_0 = arith.constant 0 : i32
    %c0_i32_1 = arith.constant 0 : i32
    return %c0_i32, %c0_i32_0 : i32, i32
  }
  func.func @transform_2(%arg0: i32) -> (i32, i32) {
    %c0_i32 = arith.constant 0 : i32
    %c0_i32_0 = arith.constant 0 : i32
    %c0_i32_1 = arith.constant 0 : i32
    return %c0_i32, %c0_i32_0 : i32, i32
  }
  func.func @transform_3(%arg0: i32) -> (i32, i32) {
    %c0_i32 = arith.constant 0 : i32
    %c0_i32_0 = arith.constant 0 : i32
    %c0_i32_1 = arith.constant 0 : i32
    return %c0_i32, %c0_i32_0 : i32, i32
  }
  func.func @transform_4(%arg0: i32) -> (i32, i32) {
    %c0_i32 = arith.constant 0 : i32
    %c0_i32_0 = arith.constant 0 : i32
    %c0_i32_1 = arith.constant 0 : i32
    return %c0_i32, %c0_i32_0 : i32, i32
  }
  func.func @transform_5(%arg0: i32) -> (i32, i32) {
    %c0_i32 = arith.constant 0 : i32
    %c0_i32_0 = arith.constant 0 : i32
    return %arg0, %c0_i32 : i32, i32
  }
}

module attributes {stable_mosaic.version = 11 : i64} {
  func.func @_ln_mlp_kernel(%arg0: i32, %arg1: memref<34x128xf32, #tpu.memory_space<vmem>>, %arg2: memref<1x128xf32, #tpu.memory_space<vmem>>, %arg3: memref<1x128xf32, #tpu.memory_space<vmem>>, %arg4: memref<128x512xbf16, #tpu.memory_space<vmem>>, %arg5: memref<1x512xf32, #tpu.memory_space<vmem>>, %arg6: memref<512x128xbf16, #tpu.memory_space<vmem>>, %arg7: memref<1x128xf32, #tpu.memory_space<vmem>>, %arg8: memref<34x128xf32, #tpu.memory_space<vmem>>) attributes {dimension_semantics = [#tpu.dimension_semantics<parallel>], iteration_bounds = array<i64: 1>, scalar_prefetch = 0 : i64, scratch_operands = 0 : i64, tpu.core_type = #tpu.core_type<tc>, window_params = [{transform_indices = @transform_0, window_bounds = array<i64: 34, 128>}, {pipeline_mode = #tpu.pipeline_mode<synchronous>, transform_indices = @transform_1, window_bounds = array<i64: 1, 128>}, {pipeline_mode = #tpu.pipeline_mode<synchronous>, transform_indices = @transform_2, window_bounds = array<i64: 1, 128>}, {pipeline_mode = #tpu.pipeline_mode<synchronous>, transform_indices = @transform_3, window_bounds = array<i64: 128, 512>}, {pipeline_mode = #tpu.pipeline_mode<synchronous>, transform_indices = @transform_4, window_bounds = array<i64: 1, 512>}, {pipeline_mode = #tpu.pipeline_mode<synchronous>, transform_indices = @transform_5, window_bounds = array<i64: 512, 128>}, {pipeline_mode = #tpu.pipeline_mode<synchronous>, transform_indices = @transform_6, window_bounds = array<i64: 1, 128>}, {transform_indices = @transform_7, window_bounds = array<i64: 34, 128>}]} {
    %c0 = arith.constant 0 : index
    %c0_0 = arith.constant 0 : index
    %0 = vector.load %arg1[%c0, %c0_0] : memref<34x128xf32, #tpu.memory_space<vmem>>, vector<34x128xf32>
    %cst = arith.constant dense<0.000000e+00> : vector<34xf32>
    %1 = vector.multi_reduction <add>, %0, %cst [1] : vector<34x128xf32> to vector<34xf32>
    %2 = vector.shape_cast %1 : vector<34xf32> to vector<34x1xf32>
    %cst_1 = arith.constant 1.280000e+02 : f32
    %3 = vector.broadcast %cst_1 : f32 to vector<34x1xf32>
    %4 = arith.divf %2, %3 : vector<34x1xf32>
    %5 = vector.broadcast %4 : vector<34x1xf32> to vector<34x128xf32>
    %6 = arith.subf %0, %5 : vector<34x128xf32>
    %7 = arith.mulf %6, %6 : vector<34x128xf32>
    %cst_2 = arith.constant dense<0.000000e+00> : vector<34xf32>
    %8 = vector.multi_reduction <add>, %7, %cst_2 [1] : vector<34x128xf32> to vector<34xf32>
    %9 = vector.shape_cast %8 : vector<34xf32> to vector<34x1xf32>
    %cst_3 = arith.constant 1.280000e+02 : f32
    %10 = vector.broadcast %cst_3 : f32 to vector<34x1xf32>
    %11 = arith.divf %9, %10 : vector<34x1xf32>
    %cst_4 = arith.constant 9.99999997E-7 : f32
    %12 = vector.broadcast %cst_4 : f32 to vector<34x1xf32>
    %13 = arith.addf %11, %12 : vector<34x1xf32>
    %14 = math.rsqrt %13 : vector<34x1xf32>
    %15 = vector.broadcast %14 : vector<34x1xf32> to vector<34x128xf32>
    %16 = arith.mulf %6, %15 : vector<34x128xf32>
    %c0_5 = arith.constant 0 : index
    %c0_6 = arith.constant 0 : index
    %17 = vector.load %arg2[%c0_5, %c0_6] : memref<1x128xf32, #tpu.memory_space<vmem>>, vector<1x128xf32>
    %18 = vector.broadcast %17 : vector<1x128xf32> to vector<34x128xf32>
    %19 = arith.mulf %16, %18 : vector<34x128xf32>
    %c0_7 = arith.constant 0 : index
    %c0_8 = arith.constant 0 : index
    %20 = vector.load %arg3[%c0_7, %c0_8] : memref<1x128xf32, #tpu.memory_space<vmem>>, vector<1x128xf32>
    %21 = vector.broadcast %20 : vector<1x128xf32> to vector<34x128xf32>
    %22 = arith.addf %19, %21 : vector<34x128xf32>
    %23 = arith.truncf %22 : vector<34x128xf32> to vector<34x128xbf16>
    %c0_9 = arith.constant 0 : index
    %c0_10 = arith.constant 0 : index
    %24 = vector.load %arg4[%c0_9, %c0_10] : memref<128x512xbf16, #tpu.memory_space<vmem>>, vector<128x512xbf16>
    %cst_11 = arith.constant dense<0.000000e+00> : vector<34x512xf32>
    %25 = tpu.matmul %23, %24, %cst_11 {dimension_numbers = #tpu.dot_dimension_numbers<[1], [0], [0], [1], [0, 0, 1, 1], [], []>} : vector<34x128xbf16>, vector<128x512xbf16>, vector<34x512xf32> -> vector<34x512xf32>
    %c0_12 = arith.constant 0 : index
    %c0_13 = arith.constant 0 : index
    %26 = vector.load %arg5[%c0_12, %c0_13] : memref<1x512xf32, #tpu.memory_space<vmem>>, vector<1x512xf32>
    %27 = vector.broadcast %26 : vector<1x512xf32> to vector<34x512xf32>
    %28 = arith.addf %25, %27 : vector<34x512xf32>
    %29 = arith.mulf %28, %28 : vector<34x512xf32>
    %30 = arith.mulf %28, %29 : vector<34x512xf32>
    %cst_14 = arith.constant 4.471500e-02 : f32
    %31 = vector.broadcast %cst_14 : f32 to vector<34x512xf32>
    %32 = arith.mulf %31, %30 : vector<34x512xf32>
    %33 = arith.addf %28, %32 : vector<34x512xf32>
    %cst_15 = arith.constant 0.797884583 : f32
    %34 = vector.broadcast %cst_15 : f32 to vector<34x512xf32>
    %35 = arith.mulf %34, %33 : vector<34x512xf32>
    %36 = math.tanh %35 : vector<34x512xf32>
    %cst_16 = arith.constant 1.000000e+00 : f32
    %37 = vector.broadcast %cst_16 : f32 to vector<34x512xf32>
    %38 = arith.addf %37, %36 : vector<34x512xf32>
    %cst_17 = arith.constant 5.000000e-01 : f32
    %39 = vector.broadcast %cst_17 : f32 to vector<34x512xf32>
    %40 = arith.mulf %39, %38 : vector<34x512xf32>
    %41 = arith.mulf %28, %40 : vector<34x512xf32>
    %42 = arith.truncf %41 : vector<34x512xf32> to vector<34x512xbf16>
    %c0_18 = arith.constant 0 : index
    %c0_19 = arith.constant 0 : index
    %43 = vector.load %arg6[%c0_18, %c0_19] : memref<512x128xbf16, #tpu.memory_space<vmem>>, vector<512x128xbf16>
    %cst_20 = arith.constant dense<0.000000e+00> : vector<34x128xf32>
    %44 = tpu.matmul %42, %43, %cst_20 {dimension_numbers = #tpu.dot_dimension_numbers<[1], [0], [0], [1], [0, 0, 1, 1], [], []>} : vector<34x512xbf16>, vector<512x128xbf16>, vector<34x128xf32> -> vector<34x128xf32>
    %c0_21 = arith.constant 0 : index
    %c0_22 = arith.constant 0 : index
    %45 = vector.load %arg7[%c0_21, %c0_22] : memref<1x128xf32, #tpu.memory_space<vmem>>, vector<1x128xf32>
    %46 = vector.broadcast %45 : vector<1x128xf32> to vector<34x128xf32>
    %47 = arith.addf %44, %46 : vector<34x128xf32>
    %48 = arith.addf %47, %0 : vector<34x128xf32>
    %c0_23 = arith.constant 0 : index
    %c0_24 = arith.constant 0 : index
    %49 = vector.load %arg8[%c0_23, %c0_24] : memref<34x128xf32, #tpu.memory_space<vmem>>, vector<34x128xf32>
    tpu.vector_store %arg8[%c0_23, %c0_24], %48 {strides = array<i32>} : memref<34x128xf32, #tpu.memory_space<vmem>>, vector<34x128xf32>,
    return
  }
  func.func @transform_0(%arg0: i32) -> (i32, i32) {
    %c0_i32 = arith.constant 0 : i32
    %c0_i32_0 = arith.constant 0 : i32
    return %arg0, %c0_i32 : i32, i32
  }
  func.func @transform_1(%arg0: i32) -> (i32, i32) {
    %c0_i32 = arith.constant 0 : i32
    %c0_i32_0 = arith.constant 0 : i32
    %c0_i32_1 = arith.constant 0 : i32
    return %c0_i32, %c0_i32_0 : i32, i32
  }
  func.func @transform_2(%arg0: i32) -> (i32, i32) {
    %c0_i32 = arith.constant 0 : i32
    %c0_i32_0 = arith.constant 0 : i32
    %c0_i32_1 = arith.constant 0 : i32
    return %c0_i32, %c0_i32_0 : i32, i32
  }
  func.func @transform_3(%arg0: i32) -> (i32, i32) {
    %c0_i32 = arith.constant 0 : i32
    %c0_i32_0 = arith.constant 0 : i32
    %c0_i32_1 = arith.constant 0 : i32
    return %c0_i32, %c0_i32_0 : i32, i32
  }
  func.func @transform_4(%arg0: i32) -> (i32, i32) {
    %c0_i32 = arith.constant 0 : i32
    %c0_i32_0 = arith.constant 0 : i32
    %c0_i32_1 = arith.constant 0 : i32
    return %c0_i32, %c0_i32_0 : i32, i32
  }
  func.func @transform_5(%arg0: i32) -> (i32, i32) {
    %c0_i32 = arith.constant 0 : i32
    %c0_i32_0 = arith.constant 0 : i32
    %c0_i32_1 = arith.constant 0 : i32
    return %c0_i32, %c0_i32_0 : i32, i32
  }
  func.func @transform_6(%arg0: i32) -> (i32, i32) {
    %c0_i32 = arith.constant 0 : i32
    %c0_i32_0 = arith.constant 0 : i32
    %c0_i32_1 = arith.constant 0 : i32
    return %c0_i32, %c0_i32_0 : i32, i32
  }
  func.func @transform_7(%arg0: i32) -> (i32, i32) {
    %c0_i32 = arith.constant 0 : i32
    %c0_i32_0 = arith.constant 0 : i32
    return %arg0, %c0_i32 : i32, i32
  }
}

module attributes {stable_mosaic.version = 11 : i64} {
  func.func @_fused_linear_kernel(%arg0: i32, %arg1: memref<34x128xf32, #tpu.memory_space<vmem>>, %arg2: memref<1x128xf32, #tpu.memory_space<vmem>>, %arg3: memref<1x128xf32, #tpu.memory_space<vmem>>, %arg4: memref<128x256xbf16, #tpu.memory_space<vmem>>, %arg5: memref<1x256xf32, #tpu.memory_space<vmem>>, %arg6: memref<34x256xf32, #tpu.memory_space<vmem>>) attributes {dimension_semantics = [#tpu.dimension_semantics<parallel>], iteration_bounds = array<i64: 1>, scalar_prefetch = 0 : i64, scratch_operands = 0 : i64, tpu.core_type = #tpu.core_type<tc>, window_params = [{transform_indices = @transform_0, window_bounds = array<i64: 34, 128>}, {pipeline_mode = #tpu.pipeline_mode<synchronous>, transform_indices = @transform_1, window_bounds = array<i64: 1, 128>}, {pipeline_mode = #tpu.pipeline_mode<synchronous>, transform_indices = @transform_2, window_bounds = array<i64: 1, 128>}, {pipeline_mode = #tpu.pipeline_mode<synchronous>, transform_indices = @transform_3, window_bounds = array<i64: 128, 256>}, {pipeline_mode = #tpu.pipeline_mode<synchronous>, transform_indices = @transform_4, window_bounds = array<i64: 1, 256>}, {transform_indices = @transform_5, window_bounds = array<i64: 34, 256>}]} {
    %c0 = arith.constant 0 : index
    %c0_0 = arith.constant 0 : index
    %0 = vector.load %arg1[%c0, %c0_0] : memref<34x128xf32, #tpu.memory_space<vmem>>, vector<34x128xf32>
    %cst = arith.constant dense<0.000000e+00> : vector<34xf32>
    %1 = vector.multi_reduction <add>, %0, %cst [1] : vector<34x128xf32> to vector<34xf32>
    %2 = vector.shape_cast %1 : vector<34xf32> to vector<34x1xf32>
    %cst_1 = arith.constant 1.280000e+02 : f32
    %3 = vector.broadcast %cst_1 : f32 to vector<34x1xf32>
    %4 = arith.divf %2, %3 : vector<34x1xf32>
    %5 = vector.broadcast %4 : vector<34x1xf32> to vector<34x128xf32>
    %6 = arith.subf %0, %5 : vector<34x128xf32>
    %7 = arith.mulf %6, %6 : vector<34x128xf32>
    %cst_2 = arith.constant dense<0.000000e+00> : vector<34xf32>
    %8 = vector.multi_reduction <add>, %7, %cst_2 [1] : vector<34x128xf32> to vector<34xf32>
    %9 = vector.shape_cast %8 : vector<34xf32> to vector<34x1xf32>
    %cst_3 = arith.constant 1.280000e+02 : f32
    %10 = vector.broadcast %cst_3 : f32 to vector<34x1xf32>
    %11 = arith.divf %9, %10 : vector<34x1xf32>
    %cst_4 = arith.constant 9.99999997E-7 : f32
    %12 = vector.broadcast %cst_4 : f32 to vector<34x1xf32>
    %13 = arith.addf %11, %12 : vector<34x1xf32>
    %14 = math.rsqrt %13 : vector<34x1xf32>
    %15 = vector.broadcast %14 : vector<34x1xf32> to vector<34x128xf32>
    %16 = arith.mulf %6, %15 : vector<34x128xf32>
    %c0_5 = arith.constant 0 : index
    %c0_6 = arith.constant 0 : index
    %17 = vector.load %arg2[%c0_5, %c0_6] : memref<1x128xf32, #tpu.memory_space<vmem>>, vector<1x128xf32>
    %18 = vector.broadcast %17 : vector<1x128xf32> to vector<34x128xf32>
    %19 = arith.mulf %16, %18 : vector<34x128xf32>
    %c0_7 = arith.constant 0 : index
    %c0_8 = arith.constant 0 : index
    %20 = vector.load %arg3[%c0_7, %c0_8] : memref<1x128xf32, #tpu.memory_space<vmem>>, vector<1x128xf32>
    %21 = vector.broadcast %20 : vector<1x128xf32> to vector<34x128xf32>
    %22 = arith.addf %19, %21 : vector<34x128xf32>
    %23 = arith.truncf %22 : vector<34x128xf32> to vector<34x128xbf16>
    %c0_9 = arith.constant 0 : index
    %c0_10 = arith.constant 0 : index
    %24 = vector.load %arg4[%c0_9, %c0_10] : memref<128x256xbf16, #tpu.memory_space<vmem>>, vector<128x256xbf16>
    %cst_11 = arith.constant dense<0.000000e+00> : vector<34x256xf32>
    %25 = tpu.matmul %23, %24, %cst_11 {dimension_numbers = #tpu.dot_dimension_numbers<[1], [0], [0], [1], [0, 0, 1, 1], [], []>} : vector<34x128xbf16>, vector<128x256xbf16>, vector<34x256xf32> -> vector<34x256xf32>
    %c0_12 = arith.constant 0 : index
    %c0_13 = arith.constant 0 : index
    %26 = vector.load %arg5[%c0_12, %c0_13] : memref<1x256xf32, #tpu.memory_space<vmem>>, vector<1x256xf32>
    %27 = vector.broadcast %26 : vector<1x256xf32> to vector<34x256xf32>
    %28 = arith.addf %25, %27 : vector<34x256xf32>
    %c0_14 = arith.constant 0 : index
    %c0_15 = arith.constant 0 : index
    %29 = vector.load %arg6[%c0_14, %c0_15] : memref<34x256xf32, #tpu.memory_space<vmem>>, vector<34x256xf32>
    tpu.vector_store %arg6[%c0_14, %c0_15], %28 {strides = array<i32>} : memref<34x256xf32, #tpu.memory_space<vmem>>, vector<34x256xf32>,
    return
  }
  func.func @transform_0(%arg0: i32) -> (i32, i32) {
    %c0_i32 = arith.constant 0 : i32
    %c0_i32_0 = arith.constant 0 : i32
    return %arg0, %c0_i32 : i32, i32
  }
  func.func @transform_1(%arg0: i32) -> (i32, i32) {
    %c0_i32 = arith.constant 0 : i32
    %c0_i32_0 = arith.constant 0 : i32
    %c0_i32_1 = arith.constant 0 : i32
    return %c0_i32, %c0_i32_0 : i32, i32
  }
  func.func @transform_2(%arg0: i32) -> (i32, i32) {
    %c0_i32 = arith.constant 0 : i32
    %c0_i32_0 = arith.constant 0 : i32
    %c0_i32_1 = arith.constant 0 : i32
    return %c0_i32, %c0_i32_0 : i32, i32
  }
  func.func @transform_3(%arg0: i32) -> (i32, i32) {
    %c0_i32 = arith.constant 0 : i32
    %c0_i32_0 = arith.constant 0 : i32
    %c0_i32_1 = arith.constant 0 : i32
    return %c0_i32, %c0_i32_0 : i32, i32
  }
  func.func @transform_4(%arg0: i32) -> (i32, i32) {
    %c0_i32 = arith.constant 0 : i32
    %c0_i32_0 = arith.constant 0 : i32
    %c0_i32_1 = arith.constant 0 : i32
    return %c0_i32, %c0_i32_0 : i32, i32
  }
  func.func @transform_5(%arg0: i32) -> (i32, i32) {
    %c0_i32 = arith.constant 0 : i32
    %c0_i32_0 = arith.constant 0 : i32
    return %arg0, %c0_i32 : i32, i32
  }
}

module attributes {stable_mosaic.version = 11 : i64} {
  func.func @_fused_linear_kernel(%arg0: i32, %arg1: memref<2x128xf32, #tpu.memory_space<vmem>>, %arg2: memref<128x128xbf16, #tpu.memory_space<vmem>>, %arg3: memref<1x128xf32, #tpu.memory_space<vmem>>, %arg4: memref<2x128xf32, #tpu.memory_space<vmem>>, %arg5: memref<2x128xf32, #tpu.memory_space<vmem>>) attributes {dimension_semantics = [#tpu.dimension_semantics<parallel>], iteration_bounds = array<i64: 1>, scalar_prefetch = 0 : i64, scratch_operands = 0 : i64, tpu.core_type = #tpu.core_type<tc>, window_params = [{transform_indices = @transform_0, window_bounds = array<i64: 2, 128>}, {pipeline_mode = #tpu.pipeline_mode<synchronous>, transform_indices = @transform_1, window_bounds = array<i64: 128, 128>}, {pipeline_mode = #tpu.pipeline_mode<synchronous>, transform_indices = @transform_2, window_bounds = array<i64: 1, 128>}, {transform_indices = @transform_3, window_bounds = array<i64: 2, 128>}, {transform_indices = @transform_4, window_bounds = array<i64: 2, 128>}]} {
    %c0 = arith.constant 0 : index
    %c0_0 = arith.constant 0 : index
    %0 = vector.load %arg1[%c0, %c0_0] : memref<2x128xf32, #tpu.memory_space<vmem>>, vector<2x128xf32>
    %1 = arith.truncf %0 : vector<2x128xf32> to vector<2x128xbf16>
    %c0_1 = arith.constant 0 : index
    %c0_2 = arith.constant 0 : index
    %2 = vector.load %arg2[%c0_1, %c0_2] : memref<128x128xbf16, #tpu.memory_space<vmem>>, vector<128x128xbf16>
    %cst = arith.constant dense<0.000000e+00> : vector<2x128xf32>
    %3 = tpu.matmul %1, %2, %cst {dimension_numbers = #tpu.dot_dimension_numbers<[1], [0], [0], [1], [0, 0, 1, 1], [], []>} : vector<2x128xbf16>, vector<128x128xbf16>, vector<2x128xf32> -> vector<2x128xf32>
    %c0_3 = arith.constant 0 : index
    %c0_4 = arith.constant 0 : index
    %4 = vector.load %arg3[%c0_3, %c0_4] : memref<1x128xf32, #tpu.memory_space<vmem>>, vector<1x128xf32>
    %5 = vector.broadcast %4 : vector<1x128xf32> to vector<2x128xf32>
    %6 = arith.addf %3, %5 : vector<2x128xf32>
    %c0_5 = arith.constant 0 : index
    %c0_6 = arith.constant 0 : index
    %7 = vector.load %arg4[%c0_5, %c0_6] : memref<2x128xf32, #tpu.memory_space<vmem>>, vector<2x128xf32>
    %8 = arith.addf %6, %7 : vector<2x128xf32>
    %c0_7 = arith.constant 0 : index
    %c0_8 = arith.constant 0 : index
    %9 = vector.load %arg5[%c0_7, %c0_8] : memref<2x128xf32, #tpu.memory_space<vmem>>, vector<2x128xf32>
    tpu.vector_store %arg5[%c0_7, %c0_8], %8 {strides = array<i32>} : memref<2x128xf32, #tpu.memory_space<vmem>>, vector<2x128xf32>,
    return
  }
  func.func @transform_0(%arg0: i32) -> (i32, i32) {
    %c0_i32 = arith.constant 0 : i32
    %c0_i32_0 = arith.constant 0 : i32
    return %arg0, %c0_i32 : i32, i32
  }
  func.func @transform_1(%arg0: i32) -> (i32, i32) {
    %c0_i32 = arith.constant 0 : i32
    %c0_i32_0 = arith.constant 0 : i32
    %c0_i32_1 = arith.constant 0 : i32
    return %c0_i32, %c0_i32_0 : i32, i32
  }
  func.func @transform_2(%arg0: i32) -> (i32, i32) {
    %c0_i32 = arith.constant 0 : i32
    %c0_i32_0 = arith.constant 0 : i32
    %c0_i32_1 = arith.constant 0 : i32
    return %c0_i32, %c0_i32_0 : i32, i32
  }
  func.func @transform_3(%arg0: i32) -> (i32, i32) {
    %c0_i32 = arith.constant 0 : i32
    %c0_i32_0 = arith.constant 0 : i32
    return %arg0, %c0_i32 : i32, i32
  }
  func.func @transform_4(%arg0: i32) -> (i32, i32) {
    %c0_i32 = arith.constant 0 : i32
    %c0_i32_0 = arith.constant 0 : i32
    return %arg0, %c0_i32 : i32, i32
  }
}

module attributes {stable_mosaic.version = 11 : i64} {
  func.func @_cross_attn_kernel(%arg0: i32, %arg1: memref<1x1x128xf32, #tpu.memory_space<vmem>>, %arg2: memref<1x17x256xf32, #tpu.memory_space<vmem>>, %arg3: memref<1x1x128xf32, #tpu.memory_space<vmem>>) attributes {dimension_semantics = [#tpu.dimension_semantics<parallel>], iteration_bounds = array<i64: 2>, scalar_prefetch = 0 : i64, scratch_operands = 0 : i64, tpu.core_type = #tpu.core_type<tc>, window_params = [{transform_indices = @transform_0, window_bounds = array<i64: 1, 1, 128>}, {transform_indices = @transform_1, window_bounds = array<i64: 1, 17, 256>}, {transform_indices = @transform_2, window_bounds = array<i64: 1, 1, 128>}]} {
    %c0 = arith.constant 0 : index
    %c0_0 = arith.constant 0 : index
    %c0_1 = arith.constant 0 : index
    %0 = vector.load %arg1[%c0, %c0_0, %c0_1] : memref<1x1x128xf32, #tpu.memory_space<vmem>>, vector<1x1x128xf32>
    %1 = vector.shape_cast %0 : vector<1x1x128xf32> to vector<1x128xf32>
    %c0_2 = arith.constant 0 : index
    %c0_3 = arith.constant 0 : index
    %c0_4 = arith.constant 0 : index
    %2 = vector.load %arg2[%c0_2, %c0_3, %c0_4] : memref<1x17x256xf32, #tpu.memory_space<vmem>>, vector<1x17x256xf32>
    %3 = vector.shape_cast %2 : vector<1x17x256xf32> to vector<17x256xf32>
    %4 = vector.extract_strided_slice %1 {offsets = [0, 0], sizes = [1, 32], strides = [1, 1]} : vector<1x128xf32> to vector<1x32xf32>
    %5 = arith.truncf %4 : vector<1x32xf32> to vector<1x32xbf16>
    %6 = vector.extract_strided_slice %3 {offsets = [0, 0], sizes = [17, 32], strides = [1, 1]} : vector<17x256xf32> to vector<17x32xf32>
    %7 = arith.truncf %6 : vector<17x32xf32> to vector<17x32xbf16>
    %8 = vector.extract_strided_slice %3 {offsets = [0, 128], sizes = [17, 32], strides = [1, 1]} : vector<17x256xf32> to vector<17x32xf32>
    %9 = arith.truncf %8 : vector<17x32xf32> to vector<17x32xbf16>
    %cst = arith.constant dense<0.000000e+00> : vector<1x17xf32>
    %10 = tpu.matmul %5, %7, %cst {dimension_numbers = #tpu.dot_dimension_numbers<[1], [1], [0], [0], [0, 0, 1, 0], [], []>} : vector<1x32xbf16>, vector<17x32xbf16>, vector<1x17xf32> -> vector<1x17xf32>
    %cst_5 = arith.constant 0.176776692 : f32
    %11 = vector.broadcast %cst_5 : f32 to vector<1x17xf32>
    %12 = arith.mulf %10, %11 : vector<1x17xf32>
    %cst_6 = arith.constant dense<0xFF800000> : vector<1xf32>
    %13 = vector.multi_reduction <maximumf>, %12, %cst_6 [1] : vector<1x17xf32> to vector<1xf32>
    %14 = vector.shape_cast %13 : vector<1xf32> to vector<1x1xf32>
    %15 = vector.broadcast %14 : vector<1x1xf32> to vector<1x17xf32>
    %16 = arith.subf %12, %15 : vector<1x17xf32>
    %17 = math.exp %16 : vector<1x17xf32>
    %cst_7 = arith.constant dense<0.000000e+00> : vector<1xf32>
    %18 = vector.multi_reduction <add>, %17, %cst_7 [1] : vector<1x17xf32> to vector<1xf32>
    %19 = vector.shape_cast %18 : vector<1xf32> to vector<1x1xf32>
    %20 = tpu.reciprocal %19 {approx = true} : vector<1x1xf32> -> vector<1x1xf32>
    %21 = vector.broadcast %20 : vector<1x1xf32> to vector<1x17xf32>
    %22 = arith.mulf %17, %21 : vector<1x17xf32>
    %23 = arith.truncf %22 : vector<1x17xf32> to vector<1x17xbf16>
    %cst_8 = arith.constant dense<0.000000e+00> : vector<1x32xf32>
    %24 = tpu.matmul %23, %9, %cst_8 {dimension_numbers = #tpu.dot_dimension_numbers<[1], [0], [0], [1], [0, 0, 1, 1], [], []>} : vector<1x17xbf16>, vector<17x32xbf16>, vector<1x32xf32> -> vector<1x32xf32>
    %25 = vector.extract_strided_slice %1 {offsets = [0, 32], sizes = [1, 32], strides = [1, 1]} : vector<1x128xf32> to vector<1x32xf32>
    %26 = arith.truncf %25 : vector<1x32xf32> to vector<1x32xbf16>
    %27 = vector.extract_strided_slice %3 {offsets = [0, 32], sizes = [17, 32], strides = [1, 1]} : vector<17x256xf32> to vector<17x32xf32>
    %28 = arith.truncf %27 : vector<17x32xf32> to vector<17x32xbf16>
    %29 = vector.extract_strided_slice %3 {offsets = [0, 160], sizes = [17, 32], strides = [1, 1]} : vector<17x256xf32> to vector<17x32xf32>
    %30 = arith.truncf %29 : vector<17x32xf32> to vector<17x32xbf16>
    %cst_9 = arith.constant dense<0.000000e+00> : vector<1x17xf32>
    %31 = tpu.matmul %26, %28, %cst_9 {dimension_numbers = #tpu.dot_dimension_numbers<[1], [1], [0], [0], [0, 0, 1, 0], [], []>} : vector<1x32xbf16>, vector<17x32xbf16>, vector<1x17xf32> -> vector<1x17xf32>
    %cst_10 = arith.constant 0.176776692 : f32
    %32 = vector.broadcast %cst_10 : f32 to vector<1x17xf32>
    %33 = arith.mulf %31, %32 : vector<1x17xf32>
    %cst_11 = arith.constant dense<0xFF800000> : vector<1xf32>
    %34 = vector.multi_reduction <maximumf>, %33, %cst_11 [1] : vector<1x17xf32> to vector<1xf32>
    %35 = vector.shape_cast %34 : vector<1xf32> to vector<1x1xf32>
    %36 = vector.broadcast %35 : vector<1x1xf32> to vector<1x17xf32>
    %37 = arith.subf %33, %36 : vector<1x17xf32>
    %38 = math.exp %37 : vector<1x17xf32>
    %cst_12 = arith.constant dense<0.000000e+00> : vector<1xf32>
    %39 = vector.multi_reduction <add>, %38, %cst_12 [1] : vector<1x17xf32> to vector<1xf32>
    %40 = vector.shape_cast %39 : vector<1xf32> to vector<1x1xf32>
    %41 = tpu.reciprocal %40 {approx = true} : vector<1x1xf32> -> vector<1x1xf32>
    %42 = vector.broadcast %41 : vector<1x1xf32> to vector<1x17xf32>
    %43 = arith.mulf %38, %42 : vector<1x17xf32>
    %44 = arith.truncf %43 : vector<1x17xf32> to vector<1x17xbf16>
    %cst_13 = arith.constant dense<0.000000e+00> : vector<1x32xf32>
    %45 = tpu.matmul %44, %30, %cst_13 {dimension_numbers = #tpu.dot_dimension_numbers<[1], [0], [0], [1], [0, 0, 1, 1], [], []>} : vector<1x17xbf16>, vector<17x32xbf16>, vector<1x32xf32> -> vector<1x32xf32>
    %46 = vector.extract_strided_slice %1 {offsets = [0, 64], sizes = [1, 32], strides = [1, 1]} : vector<1x128xf32> to vector<1x32xf32>
    %47 = arith.truncf %46 : vector<1x32xf32> to vector<1x32xbf16>
    %48 = vector.extract_strided_slice %3 {offsets = [0, 64], sizes = [17, 32], strides = [1, 1]} : vector<17x256xf32> to vector<17x32xf32>
    %49 = arith.truncf %48 : vector<17x32xf32> to vector<17x32xbf16>
    %50 = vector.extract_strided_slice %3 {offsets = [0, 192], sizes = [17, 32], strides = [1, 1]} : vector<17x256xf32> to vector<17x32xf32>
    %51 = arith.truncf %50 : vector<17x32xf32> to vector<17x32xbf16>
    %cst_14 = arith.constant dense<0.000000e+00> : vector<1x17xf32>
    %52 = tpu.matmul %47, %49, %cst_14 {dimension_numbers = #tpu.dot_dimension_numbers<[1], [1], [0], [0], [0, 0, 1, 0], [], []>} : vector<1x32xbf16>, vector<17x32xbf16>, vector<1x17xf32> -> vector<1x17xf32>
    %cst_15 = arith.constant 0.176776692 : f32
    %53 = vector.broadcast %cst_15 : f32 to vector<1x17xf32>
    %54 = arith.mulf %52, %53 : vector<1x17xf32>
    %cst_16 = arith.constant dense<0xFF800000> : vector<1xf32>
    %55 = vector.multi_reduction <maximumf>, %54, %cst_16 [1] : vector<1x17xf32> to vector<1xf32>
    %56 = vector.shape_cast %55 : vector<1xf32> to vector<1x1xf32>
    %57 = vector.broadcast %56 : vector<1x1xf32> to vector<1x17xf32>
    %58 = arith.subf %54, %57 : vector<1x17xf32>
    %59 = math.exp %58 : vector<1x17xf32>
    %cst_17 = arith.constant dense<0.000000e+00> : vector<1xf32>
    %60 = vector.multi_reduction <add>, %59, %cst_17 [1] : vector<1x17xf32> to vector<1xf32>
    %61 = vector.shape_cast %60 : vector<1xf32> to vector<1x1xf32>
    %62 = tpu.reciprocal %61 {approx = true} : vector<1x1xf32> -> vector<1x1xf32>
    %63 = vector.broadcast %62 : vector<1x1xf32> to vector<1x17xf32>
    %64 = arith.mulf %59, %63 : vector<1x17xf32>
    %65 = arith.truncf %64 : vector<1x17xf32> to vector<1x17xbf16>
    %cst_18 = arith.constant dense<0.000000e+00> : vector<1x32xf32>
    %66 = tpu.matmul %65, %51, %cst_18 {dimension_numbers = #tpu.dot_dimension_numbers<[1], [0], [0], [1], [0, 0, 1, 1], [], []>} : vector<1x17xbf16>, vector<17x32xbf16>, vector<1x32xf32> -> vector<1x32xf32>
    %67 = vector.extract_strided_slice %1 {offsets = [0, 96], sizes = [1, 32], strides = [1, 1]} : vector<1x128xf32> to vector<1x32xf32>
    %68 = arith.truncf %67 : vector<1x32xf32> to vector<1x32xbf16>
    %69 = vector.extract_strided_slice %3 {offsets = [0, 96], sizes = [17, 32], strides = [1, 1]} : vector<17x256xf32> to vector<17x32xf32>
    %70 = arith.truncf %69 : vector<17x32xf32> to vector<17x32xbf16>
    %71 = vector.extract_strided_slice %3 {offsets = [0, 224], sizes = [17, 32], strides = [1, 1]} : vector<17x256xf32> to vector<17x32xf32>
    %72 = arith.truncf %71 : vector<17x32xf32> to vector<17x32xbf16>
    %cst_19 = arith.constant dense<0.000000e+00> : vector<1x17xf32>
    %73 = tpu.matmul %68, %70, %cst_19 {dimension_numbers = #tpu.dot_dimension_numbers<[1], [1], [0], [0], [0, 0, 1, 0], [], []>} : vector<1x32xbf16>, vector<17x32xbf16>, vector<1x17xf32> -> vector<1x17xf32>
    %cst_20 = arith.constant 0.176776692 : f32
    %74 = vector.broadcast %cst_20 : f32 to vector<1x17xf32>
    %75 = arith.mulf %73, %74 : vector<1x17xf32>
    %cst_21 = arith.constant dense<0xFF800000> : vector<1xf32>
    %76 = vector.multi_reduction <maximumf>, %75, %cst_21 [1] : vector<1x17xf32> to vector<1xf32>
    %77 = vector.shape_cast %76 : vector<1xf32> to vector<1x1xf32>
    %78 = vector.broadcast %77 : vector<1x1xf32> to vector<1x17xf32>
    %79 = arith.subf %75, %78 : vector<1x17xf32>
    %80 = math.exp %79 : vector<1x17xf32>
    %cst_22 = arith.constant dense<0.000000e+00> : vector<1xf32>
    %81 = vector.multi_reduction <add>, %80, %cst_22 [1] : vector<1x17xf32> to vector<1xf32>
    %82 = vector.shape_cast %81 : vector<1xf32> to vector<1x1xf32>
    %83 = tpu.reciprocal %82 {approx = true} : vector<1x1xf32> -> vector<1x1xf32>
    %84 = vector.broadcast %83 : vector<1x1xf32> to vector<1x17xf32>
    %85 = arith.mulf %80, %84 : vector<1x17xf32>
    %86 = arith.truncf %85 : vector<1x17xf32> to vector<1x17xbf16>
    %cst_23 = arith.constant dense<0.000000e+00> : vector<1x32xf32>
    %87 = tpu.matmul %86, %72, %cst_23 {dimension_numbers = #tpu.dot_dimension_numbers<[1], [0], [0], [1], [0, 0, 1, 1], [], []>} : vector<1x17xbf16>, vector<17x32xbf16>, vector<1x32xf32> -> vector<1x32xf32>
    %88 = tpu.concatenate %24, %45, %66, %87 in 1 : vector<1x32xf32>, vector<1x32xf32>, vector<1x32xf32>, vector<1x32xf32> -> vector<1x128xf32>
    %c0_24 = arith.constant 0 : index
    %c0_25 = arith.constant 0 : index
    %c0_26 = arith.constant 0 : index
    %89 = vector.load %arg3[%c0_24, %c0_25, %c0_26] : memref<1x1x128xf32, #tpu.memory_space<vmem>>, vector<1x1x128xf32>
    %90 = vector.shape_cast %89 : vector<1x1x128xf32> to vector<1x128xf32>
    %91 = vector.shape_cast %88 : vector<1x128xf32> to vector<1x1x128xf32>
    tpu.vector_store %arg3[%c0_24, %c0_25, %c0_26], %91 {strides = array<i32>} : memref<1x1x128xf32, #tpu.memory_space<vmem>>, vector<1x1x128xf32>,
    return
  }
  func.func @transform_0(%arg0: i32) -> (i32, i32, i32) {
    %c0_i32 = arith.constant 0 : i32
    %c0_i32_0 = arith.constant 0 : i32
    %c0_i32_1 = arith.constant 0 : i32
    return %arg0, %c0_i32, %c0_i32_0 : i32, i32, i32
  }
  func.func @transform_1(%arg0: i32) -> (i32, i32, i32) {
    %c0_i32 = arith.constant 0 : i32
    %c0_i32_0 = arith.constant 0 : i32
    %c0_i32_1 = arith.constant 0 : i32
    return %arg0, %c0_i32, %c0_i32_0 : i32, i32, i32
  }
  func.func @transform_2(%arg0: i32) -> (i32, i32, i32) {
    %c0_i32 = arith.constant 0 : i32
    %c0_i32_0 = arith.constant 0 : i32
    %c0_i32_1 = arith.constant 0 : i32
    return %arg0, %c0_i32, %c0_i32_0 : i32, i32, i32
  }
}

module attributes {stable_mosaic.version = 11 : i64} {
  func.func @_fused_linear_kernel(%arg0: i32, %arg1: memref<2x128xf32, #tpu.memory_space<vmem>>, %arg2: memref<1x128xf32, #tpu.memory_space<vmem>>, %arg3: memref<1x128xf32, #tpu.memory_space<vmem>>, %arg4: memref<128x256xbf16, #tpu.memory_space<vmem>>, %arg5: memref<1x256xf32, #tpu.memory_space<vmem>>, %arg6: memref<2x256xf32, #tpu.memory_space<vmem>>) attributes {dimension_semantics = [#tpu.dimension_semantics<parallel>], iteration_bounds = array<i64: 1>, scalar_prefetch = 0 : i64, scratch_operands = 0 : i64, tpu.core_type = #tpu.core_type<tc>, window_params = [{transform_indices = @transform_0, window_bounds = array<i64: 2, 128>}, {pipeline_mode = #tpu.pipeline_mode<synchronous>, transform_indices = @transform_1, window_bounds = array<i64: 1, 128>}, {pipeline_mode = #tpu.pipeline_mode<synchronous>, transform_indices = @transform_2, window_bounds = array<i64: 1, 128>}, {pipeline_mode = #tpu.pipeline_mode<synchronous>, transform_indices = @transform_3, window_bounds = array<i64: 128, 256>}, {pipeline_mode = #tpu.pipeline_mode<synchronous>, transform_indices = @transform_4, window_bounds = array<i64: 1, 256>}, {transform_indices = @transform_5, window_bounds = array<i64: 2, 256>}]} {
    %c0 = arith.constant 0 : index
    %c0_0 = arith.constant 0 : index
    %0 = vector.load %arg1[%c0, %c0_0] : memref<2x128xf32, #tpu.memory_space<vmem>>, vector<2x128xf32>
    %cst = arith.constant dense<0.000000e+00> : vector<2xf32>
    %1 = vector.multi_reduction <add>, %0, %cst [1] : vector<2x128xf32> to vector<2xf32>
    %2 = vector.shape_cast %1 : vector<2xf32> to vector<2x1xf32>
    %cst_1 = arith.constant 1.280000e+02 : f32
    %3 = vector.broadcast %cst_1 : f32 to vector<2x1xf32>
    %4 = arith.divf %2, %3 : vector<2x1xf32>
    %5 = vector.broadcast %4 : vector<2x1xf32> to vector<2x128xf32>
    %6 = arith.subf %0, %5 : vector<2x128xf32>
    %7 = arith.mulf %6, %6 : vector<2x128xf32>
    %cst_2 = arith.constant dense<0.000000e+00> : vector<2xf32>
    %8 = vector.multi_reduction <add>, %7, %cst_2 [1] : vector<2x128xf32> to vector<2xf32>
    %9 = vector.shape_cast %8 : vector<2xf32> to vector<2x1xf32>
    %cst_3 = arith.constant 1.280000e+02 : f32
    %10 = vector.broadcast %cst_3 : f32 to vector<2x1xf32>
    %11 = arith.divf %9, %10 : vector<2x1xf32>
    %cst_4 = arith.constant 9.99999997E-7 : f32
    %12 = vector.broadcast %cst_4 : f32 to vector<2x1xf32>
    %13 = arith.addf %11, %12 : vector<2x1xf32>
    %14 = math.rsqrt %13 : vector<2x1xf32>
    %15 = vector.broadcast %14 : vector<2x1xf32> to vector<2x128xf32>
    %16 = arith.mulf %6, %15 : vector<2x128xf32>
    %c0_5 = arith.constant 0 : index
    %c0_6 = arith.constant 0 : index
    %17 = vector.load %arg2[%c0_5, %c0_6] : memref<1x128xf32, #tpu.memory_space<vmem>>, vector<1x128xf32>
    %18 = vector.broadcast %17 : vector<1x128xf32> to vector<2x128xf32>
    %19 = arith.mulf %16, %18 : vector<2x128xf32>
    %c0_7 = arith.constant 0 : index
    %c0_8 = arith.constant 0 : index
    %20 = vector.load %arg3[%c0_7, %c0_8] : memref<1x128xf32, #tpu.memory_space<vmem>>, vector<1x128xf32>
    %21 = vector.broadcast %20 : vector<1x128xf32> to vector<2x128xf32>
    %22 = arith.addf %19, %21 : vector<2x128xf32>
    %23 = arith.mulf %22, %22 : vector<2x128xf32>
    %24 = arith.mulf %22, %23 : vector<2x128xf32>
    %cst_9 = arith.constant 4.471500e-02 : f32
    %25 = vector.broadcast %cst_9 : f32 to vector<2x128xf32>
    %26 = arith.mulf %25, %24 : vector<2x128xf32>
    %27 = arith.addf %22, %26 : vector<2x128xf32>
    %cst_10 = arith.constant 0.797884583 : f32
    %28 = vector.broadcast %cst_10 : f32 to vector<2x128xf32>
    %29 = arith.mulf %28, %27 : vector<2x128xf32>
    %30 = math.tanh %29 : vector<2x128xf32>
    %cst_11 = arith.constant 1.000000e+00 : f32
    %31 = vector.broadcast %cst_11 : f32 to vector<2x128xf32>
    %32 = arith.addf %31, %30 : vector<2x128xf32>
    %cst_12 = arith.constant 5.000000e-01 : f32
    %33 = vector.broadcast %cst_12 : f32 to vector<2x128xf32>
    %34 = arith.mulf %33, %32 : vector<2x128xf32>
    %35 = arith.mulf %22, %34 : vector<2x128xf32>
    %36 = arith.truncf %35 : vector<2x128xf32> to vector<2x128xbf16>
    %c0_13 = arith.constant 0 : index
    %c0_14 = arith.constant 0 : index
    %37 = vector.load %arg4[%c0_13, %c0_14] : memref<128x256xbf16, #tpu.memory_space<vmem>>, vector<128x256xbf16>
    %cst_15 = arith.constant dense<0.000000e+00> : vector<2x256xf32>
    %38 = tpu.matmul %36, %37, %cst_15 {dimension_numbers = #tpu.dot_dimension_numbers<[1], [0], [0], [1], [0, 0, 1, 1], [], []>} : vector<2x128xbf16>, vector<128x256xbf16>, vector<2x256xf32> -> vector<2x256xf32>
    %c0_16 = arith.constant 0 : index
    %c0_17 = arith.constant 0 : index
    %39 = vector.load %arg5[%c0_16, %c0_17] : memref<1x256xf32, #tpu.memory_space<vmem>>, vector<1x256xf32>
    %40 = vector.broadcast %39 : vector<1x256xf32> to vector<2x256xf32>
    %41 = arith.addf %38, %40 : vector<2x256xf32>
    %c0_18 = arith.constant 0 : index
    %c0_19 = arith.constant 0 : index
    %42 = vector.load %arg6[%c0_18, %c0_19] : memref<2x256xf32, #tpu.memory_space<vmem>>, vector<2x256xf32>
    tpu.vector_store %arg6[%c0_18, %c0_19], %41 {strides = array<i32>} : memref<2x256xf32, #tpu.memory_space<vmem>>, vector<2x256xf32>,
    return
  }
  func.func @transform_0(%arg0: i32) -> (i32, i32) {
    %c0_i32 = arith.constant 0 : i32
    %c0_i32_0 = arith.constant 0 : i32
    return %arg0, %c0_i32 : i32, i32
  }
  func.func @transform_1(%arg0: i32) -> (i32, i32) {
    %c0_i32 = arith.constant 0 : i32
    %c0_i32_0 = arith.constant 0 : i32
    %c0_i32_1 = arith.constant 0 : i32
    return %c0_i32, %c0_i32_0 : i32, i32
  }
  func.func @transform_2(%arg0: i32) -> (i32, i32) {
    %c0_i32 = arith.constant 0 : i32
    %c0_i32_0 = arith.constant 0 : i32
    %c0_i32_1 = arith.constant 0 : i32
    return %c0_i32, %c0_i32_0 : i32, i32
  }
  func.func @transform_3(%arg0: i32) -> (i32, i32) {
    %c0_i32 = arith.constant 0 : i32
    %c0_i32_0 = arith.constant 0 : i32
    %c0_i32_1 = arith.constant 0 : i32
    return %c0_i32, %c0_i32_0 : i32, i32
  }
  func.func @transform_4(%arg0: i32) -> (i32, i32) {
    %c0_i32 = arith.constant 0 : i32
    %c0_i32_0 = arith.constant 0 : i32
    %c0_i32_1 = arith.constant 0 : i32
    return %c0_i32, %c0_i32_0 : i32, i32
  }
  func.func @transform_5(%arg0: i32) -> (i32, i32) {
    %c0_i32 = arith.constant 0 : i32
    %c0_i32_0 = arith.constant 0 : i32
    return %arg0, %c0_i32 : i32, i32
  }
}

module attributes {stable_mosaic.version = 11 : i64} {
  func.func @_layernorm_kernel(%arg0: i32, %arg1: memref<2x256xf32, #tpu.memory_space<vmem>>, %arg2: memref<1x256xf32, #tpu.memory_space<vmem>>, %arg3: memref<1x256xf32, #tpu.memory_space<vmem>>, %arg4: memref<2x256xf32, #tpu.memory_space<vmem>>) attributes {dimension_semantics = [#tpu.dimension_semantics<parallel>], iteration_bounds = array<i64: 1>, scalar_prefetch = 0 : i64, scratch_operands = 0 : i64, tpu.core_type = #tpu.core_type<tc>, window_params = [{transform_indices = @transform_0, window_bounds = array<i64: 2, 256>}, {pipeline_mode = #tpu.pipeline_mode<synchronous>, transform_indices = @transform_1, window_bounds = array<i64: 1, 256>}, {pipeline_mode = #tpu.pipeline_mode<synchronous>, transform_indices = @transform_2, window_bounds = array<i64: 1, 256>}, {transform_indices = @transform_3, window_bounds = array<i64: 2, 256>}]} {
    %c0 = arith.constant 0 : index
    %c0_0 = arith.constant 0 : index
    %0 = vector.load %arg1[%c0, %c0_0] : memref<2x256xf32, #tpu.memory_space<vmem>>, vector<2x256xf32>
    %cst = arith.constant dense<0.000000e+00> : vector<2xf32>
    %1 = vector.multi_reduction <add>, %0, %cst [1] : vector<2x256xf32> to vector<2xf32>
    %2 = vector.shape_cast %1 : vector<2xf32> to vector<2x1xf32>
    %cst_1 = arith.constant 2.560000e+02 : f32
    %3 = vector.broadcast %cst_1 : f32 to vector<2x1xf32>
    %4 = arith.divf %2, %3 : vector<2x1xf32>
    %5 = vector.broadcast %4 : vector<2x1xf32> to vector<2x256xf32>
    %6 = arith.subf %0, %5 : vector<2x256xf32>
    %7 = arith.mulf %6, %6 : vector<2x256xf32>
    %cst_2 = arith.constant dense<0.000000e+00> : vector<2xf32>
    %8 = vector.multi_reduction <add>, %7, %cst_2 [1] : vector<2x256xf32> to vector<2xf32>
    %9 = vector.shape_cast %8 : vector<2xf32> to vector<2x1xf32>
    %cst_3 = arith.constant 2.560000e+02 : f32
    %10 = vector.broadcast %cst_3 : f32 to vector<2x1xf32>
    %11 = arith.divf %9, %10 : vector<2x1xf32>
    %cst_4 = arith.constant 9.99999997E-7 : f32
    %12 = vector.broadcast %cst_4 : f32 to vector<2x1xf32>
    %13 = arith.addf %11, %12 : vector<2x1xf32>
    %14 = math.rsqrt %13 : vector<2x1xf32>
    %15 = vector.broadcast %14 : vector<2x1xf32> to vector<2x256xf32>
    %16 = arith.mulf %6, %15 : vector<2x256xf32>
    %c0_5 = arith.constant 0 : index
    %c0_6 = arith.constant 0 : index
    %17 = vector.load %arg2[%c0_5, %c0_6] : memref<1x256xf32, #tpu.memory_space<vmem>>, vector<1x256xf32>
    %18 = vector.broadcast %17 : vector<1x256xf32> to vector<2x256xf32>
    %19 = arith.mulf %16, %18 : vector<2x256xf32>
    %c0_7 = arith.constant 0 : index
    %c0_8 = arith.constant 0 : index
    %20 = vector.load %arg3[%c0_7, %c0_8] : memref<1x256xf32, #tpu.memory_space<vmem>>, vector<1x256xf32>
    %21 = vector.broadcast %20 : vector<1x256xf32> to vector<2x256xf32>
    %22 = arith.addf %19, %21 : vector<2x256xf32>
    %c0_9 = arith.constant 0 : index
    %c0_10 = arith.constant 0 : index
    %23 = vector.load %arg4[%c0_9, %c0_10] : memref<2x256xf32, #tpu.memory_space<vmem>>, vector<2x256xf32>
    tpu.vector_store %arg4[%c0_9, %c0_10], %22 {strides = array<i32>} : memref<2x256xf32, #tpu.memory_space<vmem>>, vector<2x256xf32>,
    return
  }
  func.func @transform_0(%arg0: i32) -> (i32, i32) {
    %c0_i32 = arith.constant 0 : i32
    %c0_i32_0 = arith.constant 0 : i32
    return %arg0, %c0_i32 : i32, i32
  }
  func.func @transform_1(%arg0: i32) -> (i32, i32) {
    %c0_i32 = arith.constant 0 : i32
    %c0_i32_0 = arith.constant 0 : i32
    %c0_i32_1 = arith.constant 0 : i32
    return %c0_i32, %c0_i32_0 : i32, i32
  }
  func.func @transform_2(%arg0: i32) -> (i32, i32) {
    %c0_i32 = arith.constant 0 : i32
    %c0_i32_0 = arith.constant 0 : i32
    %c0_i32_1 = arith.constant 0 : i32
    return %c0_i32, %c0_i32_0 : i32, i32
  }
  func.func @transform_3(%arg0: i32) -> (i32, i32) {
    %c0_i32 = arith.constant 0 : i32
    %c0_i32_0 = arith.constant 0 : i32
    return %arg0, %c0_i32 : i32, i32
  }
}

module attributes {stable_mosaic.version = 11 : i64} {
  func.func @_fused_linear_kernel(%arg0: i32, %arg1: memref<2x256xf32, #tpu.memory_space<vmem>>, %arg2: memref<1x256xf32, #tpu.memory_space<vmem>>, %arg3: memref<1x256xf32, #tpu.memory_space<vmem>>, %arg4: memref<256x256xbf16, #tpu.memory_space<vmem>>, %arg5: memref<1x256xf32, #tpu.memory_space<vmem>>, %arg6: memref<2x256xf32, #tpu.memory_space<vmem>>) attributes {dimension_semantics = [#tpu.dimension_semantics<parallel>], iteration_bounds = array<i64: 1>, scalar_prefetch = 0 : i64, scratch_operands = 0 : i64, tpu.core_type = #tpu.core_type<tc>, window_params = [{transform_indices = @transform_0, window_bounds = array<i64: 2, 256>}, {pipeline_mode = #tpu.pipeline_mode<synchronous>, transform_indices = @transform_1, window_bounds = array<i64: 1, 256>}, {pipeline_mode = #tpu.pipeline_mode<synchronous>, transform_indices = @transform_2, window_bounds = array<i64: 1, 256>}, {pipeline_mode = #tpu.pipeline_mode<synchronous>, transform_indices = @transform_3, window_bounds = array<i64: 256, 256>}, {pipeline_mode = #tpu.pipeline_mode<synchronous>, transform_indices = @transform_4, window_bounds = array<i64: 1, 256>}, {transform_indices = @transform_5, window_bounds = array<i64: 2, 256>}]} {
    %c0 = arith.constant 0 : index
    %c0_0 = arith.constant 0 : index
    %0 = vector.load %arg1[%c0, %c0_0] : memref<2x256xf32, #tpu.memory_space<vmem>>, vector<2x256xf32>
    %cst = arith.constant dense<0.000000e+00> : vector<2xf32>
    %1 = vector.multi_reduction <add>, %0, %cst [1] : vector<2x256xf32> to vector<2xf32>
    %2 = vector.shape_cast %1 : vector<2xf32> to vector<2x1xf32>
    %cst_1 = arith.constant 2.560000e+02 : f32
    %3 = vector.broadcast %cst_1 : f32 to vector<2x1xf32>
    %4 = arith.divf %2, %3 : vector<2x1xf32>
    %5 = vector.broadcast %4 : vector<2x1xf32> to vector<2x256xf32>
    %6 = arith.subf %0, %5 : vector<2x256xf32>
    %7 = arith.mulf %6, %6 : vector<2x256xf32>
    %cst_2 = arith.constant dense<0.000000e+00> : vector<2xf32>
    %8 = vector.multi_reduction <add>, %7, %cst_2 [1] : vector<2x256xf32> to vector<2xf32>
    %9 = vector.shape_cast %8 : vector<2xf32> to vector<2x1xf32>
    %cst_3 = arith.constant 2.560000e+02 : f32
    %10 = vector.broadcast %cst_3 : f32 to vector<2x1xf32>
    %11 = arith.divf %9, %10 : vector<2x1xf32>
    %cst_4 = arith.constant 9.99999997E-7 : f32
    %12 = vector.broadcast %cst_4 : f32 to vector<2x1xf32>
    %13 = arith.addf %11, %12 : vector<2x1xf32>
    %14 = math.rsqrt %13 : vector<2x1xf32>
    %15 = vector.broadcast %14 : vector<2x1xf32> to vector<2x256xf32>
    %16 = arith.mulf %6, %15 : vector<2x256xf32>
    %c0_5 = arith.constant 0 : index
    %c0_6 = arith.constant 0 : index
    %17 = vector.load %arg2[%c0_5, %c0_6] : memref<1x256xf32, #tpu.memory_space<vmem>>, vector<1x256xf32>
    %18 = vector.broadcast %17 : vector<1x256xf32> to vector<2x256xf32>
    %19 = arith.mulf %16, %18 : vector<2x256xf32>
    %c0_7 = arith.constant 0 : index
    %c0_8 = arith.constant 0 : index
    %20 = vector.load %arg3[%c0_7, %c0_8] : memref<1x256xf32, #tpu.memory_space<vmem>>, vector<1x256xf32>
    %21 = vector.broadcast %20 : vector<1x256xf32> to vector<2x256xf32>
    %22 = arith.addf %19, %21 : vector<2x256xf32>
    %23 = arith.truncf %22 : vector<2x256xf32> to vector<2x256xbf16>
    %c0_9 = arith.constant 0 : index
    %c0_10 = arith.constant 0 : index
    %24 = vector.load %arg4[%c0_9, %c0_10] : memref<256x256xbf16, #tpu.memory_space<vmem>>, vector<256x256xbf16>
    %cst_11 = arith.constant dense<0.000000e+00> : vector<2x256xf32>
    %25 = tpu.matmul %23, %24, %cst_11 {dimension_numbers = #tpu.dot_dimension_numbers<[1], [0], [0], [1], [0, 0, 1, 1], [], []>} : vector<2x256xbf16>, vector<256x256xbf16>, vector<2x256xf32> -> vector<2x256xf32>
    %c0_12 = arith.constant 0 : index
    %c0_13 = arith.constant 0 : index
    %26 = vector.load %arg5[%c0_12, %c0_13] : memref<1x256xf32, #tpu.memory_space<vmem>>, vector<1x256xf32>
    %27 = vector.broadcast %26 : vector<1x256xf32> to vector<2x256xf32>
    %28 = arith.addf %25, %27 : vector<2x256xf32>
    %c0_14 = arith.constant 0 : index
    %c0_15 = arith.constant 0 : index
    %29 = vector.load %arg6[%c0_14, %c0_15] : memref<2x256xf32, #tpu.memory_space<vmem>>, vector<2x256xf32>
    tpu.vector_store %arg6[%c0_14, %c0_15], %28 {strides = array<i32>} : memref<2x256xf32, #tpu.memory_space<vmem>>, vector<2x256xf32>,
    return
  }
  func.func @transform_0(%arg0: i32) -> (i32, i32) {
    %c0_i32 = arith.constant 0 : i32
    %c0_i32_0 = arith.constant 0 : i32
    return %arg0, %c0_i32 : i32, i32
  }
  func.func @transform_1(%arg0: i32) -> (i32, i32) {
    %c0_i32 = arith.constant 0 : i32
    %c0_i32_0 = arith.constant 0 : i32
    %c0_i32_1 = arith.constant 0 : i32
    return %c0_i32, %c0_i32_0 : i32, i32
  }
  func.func @transform_2(%arg0: i32) -> (i32, i32) {
    %c0_i32 = arith.constant 0 : i32
    %c0_i32_0 = arith.constant 0 : i32
    %c0_i32_1 = arith.constant 0 : i32
    return %c0_i32, %c0_i32_0 : i32, i32
  }
  func.func @transform_3(%arg0: i32) -> (i32, i32) {
    %c0_i32 = arith.constant 0 : i32
    %c0_i32_0 = arith.constant 0 : i32
    %c0_i32_1 = arith.constant 0 : i32
    return %c0_i32, %c0_i32_0 : i32, i32
  }
  func.func @transform_4(%arg0: i32) -> (i32, i32) {
    %c0_i32 = arith.constant 0 : i32
    %c0_i32_0 = arith.constant 0 : i32
    %c0_i32_1 = arith.constant 0 : i32
    return %c0_i32, %c0_i32_0 : i32, i32
  }
  func.func @transform_5(%arg0: i32) -> (i32, i32) {
    %c0_i32 = arith.constant 0 : i32
    %c0_i32_0 = arith.constant 0 : i32
    return %arg0, %c0_i32 : i32, i32
  }
}

module attributes {stable_mosaic.version = 11 : i64} {
  func.func @_fused_linear_kernel(%arg0: i32, %arg1: memref<10x256xf32, #tpu.memory_space<vmem>>, %arg2: memref<1x256xf32, #tpu.memory_space<vmem>>, %arg3: memref<1x256xf32, #tpu.memory_space<vmem>>, %arg4: memref<256x512xbf16, #tpu.memory_space<vmem>>, %arg5: memref<1x512xf32, #tpu.memory_space<vmem>>, %arg6: memref<10x512xf32, #tpu.memory_space<vmem>>) attributes {dimension_semantics = [#tpu.dimension_semantics<parallel>], iteration_bounds = array<i64: 1>, scalar_prefetch = 0 : i64, scratch_operands = 0 : i64, tpu.core_type = #tpu.core_type<tc>, window_params = [{transform_indices = @transform_0, window_bounds = array<i64: 10, 256>}, {pipeline_mode = #tpu.pipeline_mode<synchronous>, transform_indices = @transform_1, window_bounds = array<i64: 1, 256>}, {pipeline_mode = #tpu.pipeline_mode<synchronous>, transform_indices = @transform_2, window_bounds = array<i64: 1, 256>}, {pipeline_mode = #tpu.pipeline_mode<synchronous>, transform_indices = @transform_3, window_bounds = array<i64: 256, 512>}, {pipeline_mode = #tpu.pipeline_mode<synchronous>, transform_indices = @transform_4, window_bounds = array<i64: 1, 512>}, {transform_indices = @transform_5, window_bounds = array<i64: 10, 512>}]} {
    %c0 = arith.constant 0 : index
    %c0_0 = arith.constant 0 : index
    %0 = vector.load %arg1[%c0, %c0_0] : memref<10x256xf32, #tpu.memory_space<vmem>>, vector<10x256xf32>
    %cst = arith.constant dense<0.000000e+00> : vector<10xf32>
    %1 = vector.multi_reduction <add>, %0, %cst [1] : vector<10x256xf32> to vector<10xf32>
    %2 = vector.shape_cast %1 : vector<10xf32> to vector<10x1xf32>
    %cst_1 = arith.constant 2.560000e+02 : f32
    %3 = vector.broadcast %cst_1 : f32 to vector<10x1xf32>
    %4 = arith.divf %2, %3 : vector<10x1xf32>
    %5 = vector.broadcast %4 : vector<10x1xf32> to vector<10x256xf32>
    %6 = arith.subf %0, %5 : vector<10x256xf32>
    %7 = arith.mulf %6, %6 : vector<10x256xf32>
    %cst_2 = arith.constant dense<0.000000e+00> : vector<10xf32>
    %8 = vector.multi_reduction <add>, %7, %cst_2 [1] : vector<10x256xf32> to vector<10xf32>
    %9 = vector.shape_cast %8 : vector<10xf32> to vector<10x1xf32>
    %cst_3 = arith.constant 2.560000e+02 : f32
    %10 = vector.broadcast %cst_3 : f32 to vector<10x1xf32>
    %11 = arith.divf %9, %10 : vector<10x1xf32>
    %cst_4 = arith.constant 9.99999997E-7 : f32
    %12 = vector.broadcast %cst_4 : f32 to vector<10x1xf32>
    %13 = arith.addf %11, %12 : vector<10x1xf32>
    %14 = math.rsqrt %13 : vector<10x1xf32>
    %15 = vector.broadcast %14 : vector<10x1xf32> to vector<10x256xf32>
    %16 = arith.mulf %6, %15 : vector<10x256xf32>
    %c0_5 = arith.constant 0 : index
    %c0_6 = arith.constant 0 : index
    %17 = vector.load %arg2[%c0_5, %c0_6] : memref<1x256xf32, #tpu.memory_space<vmem>>, vector<1x256xf32>
    %18 = vector.broadcast %17 : vector<1x256xf32> to vector<10x256xf32>
    %19 = arith.mulf %16, %18 : vector<10x256xf32>
    %c0_7 = arith.constant 0 : index
    %c0_8 = arith.constant 0 : index
    %20 = vector.load %arg3[%c0_7, %c0_8] : memref<1x256xf32, #tpu.memory_space<vmem>>, vector<1x256xf32>
    %21 = vector.broadcast %20 : vector<1x256xf32> to vector<10x256xf32>
    %22 = arith.addf %19, %21 : vector<10x256xf32>
    %23 = arith.truncf %22 : vector<10x256xf32> to vector<10x256xbf16>
    %c0_9 = arith.constant 0 : index
    %c0_10 = arith.constant 0 : index
    %24 = vector.load %arg4[%c0_9, %c0_10] : memref<256x512xbf16, #tpu.memory_space<vmem>>, vector<256x512xbf16>
    %cst_11 = arith.constant dense<0.000000e+00> : vector<10x512xf32>
    %25 = tpu.matmul %23, %24, %cst_11 {dimension_numbers = #tpu.dot_dimension_numbers<[1], [0], [0], [1], [0, 0, 1, 1], [], []>} : vector<10x256xbf16>, vector<256x512xbf16>, vector<10x512xf32> -> vector<10x512xf32>
    %c0_12 = arith.constant 0 : index
    %c0_13 = arith.constant 0 : index
    %26 = vector.load %arg5[%c0_12, %c0_13] : memref<1x512xf32, #tpu.memory_space<vmem>>, vector<1x512xf32>
    %27 = vector.broadcast %26 : vector<1x512xf32> to vector<10x512xf32>
    %28 = arith.addf %25, %27 : vector<10x512xf32>
    %c0_14 = arith.constant 0 : index
    %c0_15 = arith.constant 0 : index
    %29 = vector.load %arg6[%c0_14, %c0_15] : memref<10x512xf32, #tpu.memory_space<vmem>>, vector<10x512xf32>
    tpu.vector_store %arg6[%c0_14, %c0_15], %28 {strides = array<i32>} : memref<10x512xf32, #tpu.memory_space<vmem>>, vector<10x512xf32>,
    return
  }
  func.func @transform_0(%arg0: i32) -> (i32, i32) {
    %c0_i32 = arith.constant 0 : i32
    %c0_i32_0 = arith.constant 0 : i32
    return %arg0, %c0_i32 : i32, i32
  }
  func.func @transform_1(%arg0: i32) -> (i32, i32) {
    %c0_i32 = arith.constant 0 : i32
    %c0_i32_0 = arith.constant 0 : i32
    %c0_i32_1 = arith.constant 0 : i32
    return %c0_i32, %c0_i32_0 : i32, i32
  }
  func.func @transform_2(%arg0: i32) -> (i32, i32) {
    %c0_i32 = arith.constant 0 : i32
    %c0_i32_0 = arith.constant 0 : i32
    %c0_i32_1 = arith.constant 0 : i32
    return %c0_i32, %c0_i32_0 : i32, i32
  }
  func.func @transform_3(%arg0: i32) -> (i32, i32) {
    %c0_i32 = arith.constant 0 : i32
    %c0_i32_0 = arith.constant 0 : i32
    %c0_i32_1 = arith.constant 0 : i32
    return %c0_i32, %c0_i32_0 : i32, i32
  }
  func.func @transform_4(%arg0: i32) -> (i32, i32) {
    %c0_i32 = arith.constant 0 : i32
    %c0_i32_0 = arith.constant 0 : i32
    %c0_i32_1 = arith.constant 0 : i32
    return %c0_i32, %c0_i32_0 : i32, i32
  }
  func.func @transform_5(%arg0: i32) -> (i32, i32) {
    %c0_i32 = arith.constant 0 : i32
    %c0_i32_0 = arith.constant 0 : i32
    return %arg0, %c0_i32 : i32, i32
  }
}

module attributes {stable_mosaic.version = 11 : i64} {
  func.func @_fused_linear_kernel(%arg0: i32, %arg1: memref<2x256xf32, #tpu.memory_space<vmem>>, %arg2: memref<256x256xbf16, #tpu.memory_space<vmem>>, %arg3: memref<1x256xf32, #tpu.memory_space<vmem>>, %arg4: memref<2x256xf32, #tpu.memory_space<vmem>>, %arg5: memref<2x256xf32, #tpu.memory_space<vmem>>) attributes {dimension_semantics = [#tpu.dimension_semantics<parallel>], iteration_bounds = array<i64: 1>, scalar_prefetch = 0 : i64, scratch_operands = 0 : i64, tpu.core_type = #tpu.core_type<tc>, window_params = [{transform_indices = @transform_0, window_bounds = array<i64: 2, 256>}, {pipeline_mode = #tpu.pipeline_mode<synchronous>, transform_indices = @transform_1, window_bounds = array<i64: 256, 256>}, {pipeline_mode = #tpu.pipeline_mode<synchronous>, transform_indices = @transform_2, window_bounds = array<i64: 1, 256>}, {transform_indices = @transform_3, window_bounds = array<i64: 2, 256>}, {transform_indices = @transform_4, window_bounds = array<i64: 2, 256>}]} {
    %c0 = arith.constant 0 : index
    %c0_0 = arith.constant 0 : index
    %0 = vector.load %arg1[%c0, %c0_0] : memref<2x256xf32, #tpu.memory_space<vmem>>, vector<2x256xf32>
    %1 = arith.truncf %0 : vector<2x256xf32> to vector<2x256xbf16>
    %c0_1 = arith.constant 0 : index
    %c0_2 = arith.constant 0 : index
    %2 = vector.load %arg2[%c0_1, %c0_2] : memref<256x256xbf16, #tpu.memory_space<vmem>>, vector<256x256xbf16>
    %cst = arith.constant dense<0.000000e+00> : vector<2x256xf32>
    %3 = tpu.matmul %1, %2, %cst {dimension_numbers = #tpu.dot_dimension_numbers<[1], [0], [0], [1], [0, 0, 1, 1], [], []>} : vector<2x256xbf16>, vector<256x256xbf16>, vector<2x256xf32> -> vector<2x256xf32>
    %c0_3 = arith.constant 0 : index
    %c0_4 = arith.constant 0 : index
    %4 = vector.load %arg3[%c0_3, %c0_4] : memref<1x256xf32, #tpu.memory_space<vmem>>, vector<1x256xf32>
    %5 = vector.broadcast %4 : vector<1x256xf32> to vector<2x256xf32>
    %6 = arith.addf %3, %5 : vector<2x256xf32>
    %c0_5 = arith.constant 0 : index
    %c0_6 = arith.constant 0 : index
    %7 = vector.load %arg4[%c0_5, %c0_6] : memref<2x256xf32, #tpu.memory_space<vmem>>, vector<2x256xf32>
    %8 = arith.addf %6, %7 : vector<2x256xf32>
    %c0_7 = arith.constant 0 : index
    %c0_8 = arith.constant 0 : index
    %9 = vector.load %arg5[%c0_7, %c0_8] : memref<2x256xf32, #tpu.memory_space<vmem>>, vector<2x256xf32>
    tpu.vector_store %arg5[%c0_7, %c0_8], %8 {strides = array<i32>} : memref<2x256xf32, #tpu.memory_space<vmem>>, vector<2x256xf32>,
    return
  }
  func.func @transform_0(%arg0: i32) -> (i32, i32) {
    %c0_i32 = arith.constant 0 : i32
    %c0_i32_0 = arith.constant 0 : i32
    return %arg0, %c0_i32 : i32, i32
  }
  func.func @transform_1(%arg0: i32) -> (i32, i32) {
    %c0_i32 = arith.constant 0 : i32
    %c0_i32_0 = arith.constant 0 : i32
    %c0_i32_1 = arith.constant 0 : i32
    return %c0_i32, %c0_i32_0 : i32, i32
  }
  func.func @transform_2(%arg0: i32) -> (i32, i32) {
    %c0_i32 = arith.constant 0 : i32
    %c0_i32_0 = arith.constant 0 : i32
    %c0_i32_1 = arith.constant 0 : i32
    return %c0_i32, %c0_i32_0 : i32, i32
  }
  func.func @transform_3(%arg0: i32) -> (i32, i32) {
    %c0_i32 = arith.constant 0 : i32
    %c0_i32_0 = arith.constant 0 : i32
    return %arg0, %c0_i32 : i32, i32
  }
  func.func @transform_4(%arg0: i32) -> (i32, i32) {
    %c0_i32 = arith.constant 0 : i32
    %c0_i32_0 = arith.constant 0 : i32
    return %arg0, %c0_i32 : i32, i32
  }
}

module attributes {stable_mosaic.version = 11 : i64} {
  func.func @_cross_attn_kernel(%arg0: i32, %arg1: memref<1x1x256xf32, #tpu.memory_space<vmem>>, %arg2: memref<1x5x512xf32, #tpu.memory_space<vmem>>, %arg3: memref<1x1x256xf32, #tpu.memory_space<vmem>>) attributes {dimension_semantics = [#tpu.dimension_semantics<parallel>], iteration_bounds = array<i64: 2>, scalar_prefetch = 0 : i64, scratch_operands = 0 : i64, tpu.core_type = #tpu.core_type<tc>, window_params = [{transform_indices = @transform_0, window_bounds = array<i64: 1, 1, 256>}, {transform_indices = @transform_1, window_bounds = array<i64: 1, 5, 512>}, {transform_indices = @transform_2, window_bounds = array<i64: 1, 1, 256>}]} {
    %c0 = arith.constant 0 : index
    %c0_0 = arith.constant 0 : index
    %c0_1 = arith.constant 0 : index
    %0 = vector.load %arg1[%c0, %c0_0, %c0_1] : memref<1x1x256xf32, #tpu.memory_space<vmem>>, vector<1x1x256xf32>
    %1 = vector.shape_cast %0 : vector<1x1x256xf32> to vector<1x256xf32>
    %c0_2 = arith.constant 0 : index
    %c0_3 = arith.constant 0 : index
    %c0_4 = arith.constant 0 : index
    %2 = vector.load %arg2[%c0_2, %c0_3, %c0_4] : memref<1x5x512xf32, #tpu.memory_space<vmem>>, vector<1x5x512xf32>
    %3 = vector.shape_cast %2 : vector<1x5x512xf32> to vector<5x512xf32>
    %4 = vector.extract_strided_slice %1 {offsets = [0, 0], sizes = [1, 32], strides = [1, 1]} : vector<1x256xf32> to vector<1x32xf32>
    %5 = arith.truncf %4 : vector<1x32xf32> to vector<1x32xbf16>
    %6 = vector.extract_strided_slice %3 {offsets = [0, 0], sizes = [5, 32], strides = [1, 1]} : vector<5x512xf32> to vector<5x32xf32>
    %7 = arith.truncf %6 : vector<5x32xf32> to vector<5x32xbf16>
    %8 = vector.extract_strided_slice %3 {offsets = [0, 256], sizes = [5, 32], strides = [1, 1]} : vector<5x512xf32> to vector<5x32xf32>
    %9 = arith.truncf %8 : vector<5x32xf32> to vector<5x32xbf16>
    %cst = arith.constant dense<0.000000e+00> : vector<1x5xf32>
    %10 = tpu.matmul %5, %7, %cst {dimension_numbers = #tpu.dot_dimension_numbers<[1], [1], [0], [0], [0, 0, 1, 0], [], []>} : vector<1x32xbf16>, vector<5x32xbf16>, vector<1x5xf32> -> vector<1x5xf32>
    %cst_5 = arith.constant 0.176776692 : f32
    %11 = vector.broadcast %cst_5 : f32 to vector<1x5xf32>
    %12 = arith.mulf %10, %11 : vector<1x5xf32>
    %cst_6 = arith.constant dense<0xFF800000> : vector<1xf32>
    %13 = vector.multi_reduction <maximumf>, %12, %cst_6 [1] : vector<1x5xf32> to vector<1xf32>
    %14 = vector.shape_cast %13 : vector<1xf32> to vector<1x1xf32>
    %15 = vector.broadcast %14 : vector<1x1xf32> to vector<1x5xf32>
    %16 = arith.subf %12, %15 : vector<1x5xf32>
    %17 = math.exp %16 : vector<1x5xf32>
    %cst_7 = arith.constant dense<0.000000e+00> : vector<1xf32>
    %18 = vector.multi_reduction <add>, %17, %cst_7 [1] : vector<1x5xf32> to vector<1xf32>
    %19 = vector.shape_cast %18 : vector<1xf32> to vector<1x1xf32>
    %20 = tpu.reciprocal %19 {approx = true} : vector<1x1xf32> -> vector<1x1xf32>
    %21 = vector.broadcast %20 : vector<1x1xf32> to vector<1x5xf32>
    %22 = arith.mulf %17, %21 : vector<1x5xf32>
    %23 = arith.truncf %22 : vector<1x5xf32> to vector<1x5xbf16>
    %cst_8 = arith.constant dense<0.000000e+00> : vector<1x32xf32>
    %24 = tpu.matmul %23, %9, %cst_8 {dimension_numbers = #tpu.dot_dimension_numbers<[1], [0], [0], [1], [0, 0, 1, 1], [], []>} : vector<1x5xbf16>, vector<5x32xbf16>, vector<1x32xf32> -> vector<1x32xf32>
    %25 = vector.extract_strided_slice %1 {offsets = [0, 32], sizes = [1, 32], strides = [1, 1]} : vector<1x256xf32> to vector<1x32xf32>
    %26 = arith.truncf %25 : vector<1x32xf32> to vector<1x32xbf16>
    %27 = vector.extract_strided_slice %3 {offsets = [0, 32], sizes = [5, 32], strides = [1, 1]} : vector<5x512xf32> to vector<5x32xf32>
    %28 = arith.truncf %27 : vector<5x32xf32> to vector<5x32xbf16>
    %29 = vector.extract_strided_slice %3 {offsets = [0, 288], sizes = [5, 32], strides = [1, 1]} : vector<5x512xf32> to vector<5x32xf32>
    %30 = arith.truncf %29 : vector<5x32xf32> to vector<5x32xbf16>
    %cst_9 = arith.constant dense<0.000000e+00> : vector<1x5xf32>
    %31 = tpu.matmul %26, %28, %cst_9 {dimension_numbers = #tpu.dot_dimension_numbers<[1], [1], [0], [0], [0, 0, 1, 0], [], []>} : vector<1x32xbf16>, vector<5x32xbf16>, vector<1x5xf32> -> vector<1x5xf32>
    %cst_10 = arith.constant 0.176776692 : f32
    %32 = vector.broadcast %cst_10 : f32 to vector<1x5xf32>
    %33 = arith.mulf %31, %32 : vector<1x5xf32>
    %cst_11 = arith.constant dense<0xFF800000> : vector<1xf32>
    %34 = vector.multi_reduction <maximumf>, %33, %cst_11 [1] : vector<1x5xf32> to vector<1xf32>
    %35 = vector.shape_cast %34 : vector<1xf32> to vector<1x1xf32>
    %36 = vector.broadcast %35 : vector<1x1xf32> to vector<1x5xf32>
    %37 = arith.subf %33, %36 : vector<1x5xf32>
    %38 = math.exp %37 : vector<1x5xf32>
    %cst_12 = arith.constant dense<0.000000e+00> : vector<1xf32>
    %39 = vector.multi_reduction <add>, %38, %cst_12 [1] : vector<1x5xf32> to vector<1xf32>
    %40 = vector.shape_cast %39 : vector<1xf32> to vector<1x1xf32>
    %41 = tpu.reciprocal %40 {approx = true} : vector<1x1xf32> -> vector<1x1xf32>
    %42 = vector.broadcast %41 : vector<1x1xf32> to vector<1x5xf32>
    %43 = arith.mulf %38, %42 : vector<1x5xf32>
    %44 = arith.truncf %43 : vector<1x5xf32> to vector<1x5xbf16>
    %cst_13 = arith.constant dense<0.000000e+00> : vector<1x32xf32>
    %45 = tpu.matmul %44, %30, %cst_13 {dimension_numbers = #tpu.dot_dimension_numbers<[1], [0], [0], [1], [0, 0, 1, 1], [], []>} : vector<1x5xbf16>, vector<5x32xbf16>, vector<1x32xf32> -> vector<1x32xf32>
    %46 = vector.extract_strided_slice %1 {offsets = [0, 64], sizes = [1, 32], strides = [1, 1]} : vector<1x256xf32> to vector<1x32xf32>
    %47 = arith.truncf %46 : vector<1x32xf32> to vector<1x32xbf16>
    %48 = vector.extract_strided_slice %3 {offsets = [0, 64], sizes = [5, 32], strides = [1, 1]} : vector<5x512xf32> to vector<5x32xf32>
    %49 = arith.truncf %48 : vector<5x32xf32> to vector<5x32xbf16>
    %50 = vector.extract_strided_slice %3 {offsets = [0, 320], sizes = [5, 32], strides = [1, 1]} : vector<5x512xf32> to vector<5x32xf32>
    %51 = arith.truncf %50 : vector<5x32xf32> to vector<5x32xbf16>
    %cst_14 = arith.constant dense<0.000000e+00> : vector<1x5xf32>
    %52 = tpu.matmul %47, %49, %cst_14 {dimension_numbers = #tpu.dot_dimension_numbers<[1], [1], [0], [0], [0, 0, 1, 0], [], []>} : vector<1x32xbf16>, vector<5x32xbf16>, vector<1x5xf32> -> vector<1x5xf32>
    %cst_15 = arith.constant 0.176776692 : f32
    %53 = vector.broadcast %cst_15 : f32 to vector<1x5xf32>
    %54 = arith.mulf %52, %53 : vector<1x5xf32>
    %cst_16 = arith.constant dense<0xFF800000> : vector<1xf32>
    %55 = vector.multi_reduction <maximumf>, %54, %cst_16 [1] : vector<1x5xf32> to vector<1xf32>
    %56 = vector.shape_cast %55 : vector<1xf32> to vector<1x1xf32>
    %57 = vector.broadcast %56 : vector<1x1xf32> to vector<1x5xf32>
    %58 = arith.subf %54, %57 : vector<1x5xf32>
    %59 = math.exp %58 : vector<1x5xf32>
    %cst_17 = arith.constant dense<0.000000e+00> : vector<1xf32>
    %60 = vector.multi_reduction <add>, %59, %cst_17 [1] : vector<1x5xf32> to vector<1xf32>
    %61 = vector.shape_cast %60 : vector<1xf32> to vector<1x1xf32>
    %62 = tpu.reciprocal %61 {approx = true} : vector<1x1xf32> -> vector<1x1xf32>
    %63 = vector.broadcast %62 : vector<1x1xf32> to vector<1x5xf32>
    %64 = arith.mulf %59, %63 : vector<1x5xf32>
    %65 = arith.truncf %64 : vector<1x5xf32> to vector<1x5xbf16>
    %cst_18 = arith.constant dense<0.000000e+00> : vector<1x32xf32>
    %66 = tpu.matmul %65, %51, %cst_18 {dimension_numbers = #tpu.dot_dimension_numbers<[1], [0], [0], [1], [0, 0, 1, 1], [], []>} : vector<1x5xbf16>, vector<5x32xbf16>, vector<1x32xf32> -> vector<1x32xf32>
    %67 = vector.extract_strided_slice %1 {offsets = [0, 96], sizes = [1, 32], strides = [1, 1]} : vector<1x256xf32> to vector<1x32xf32>
    %68 = arith.truncf %67 : vector<1x32xf32> to vector<1x32xbf16>
    %69 = vector.extract_strided_slice %3 {offsets = [0, 96], sizes = [5, 32], strides = [1, 1]} : vector<5x512xf32> to vector<5x32xf32>
    %70 = arith.truncf %69 : vector<5x32xf32> to vector<5x32xbf16>
    %71 = vector.extract_strided_slice %3 {offsets = [0, 352], sizes = [5, 32], strides = [1, 1]} : vector<5x512xf32> to vector<5x32xf32>
    %72 = arith.truncf %71 : vector<5x32xf32> to vector<5x32xbf16>
    %cst_19 = arith.constant dense<0.000000e+00> : vector<1x5xf32>
    %73 = tpu.matmul %68, %70, %cst_19 {dimension_numbers = #tpu.dot_dimension_numbers<[1], [1], [0], [0], [0, 0, 1, 0], [], []>} : vector<1x32xbf16>, vector<5x32xbf16>, vector<1x5xf32> -> vector<1x5xf32>
    %cst_20 = arith.constant 0.176776692 : f32
    %74 = vector.broadcast %cst_20 : f32 to vector<1x5xf32>
    %75 = arith.mulf %73, %74 : vector<1x5xf32>
    %cst_21 = arith.constant dense<0xFF800000> : vector<1xf32>
    %76 = vector.multi_reduction <maximumf>, %75, %cst_21 [1] : vector<1x5xf32> to vector<1xf32>
    %77 = vector.shape_cast %76 : vector<1xf32> to vector<1x1xf32>
    %78 = vector.broadcast %77 : vector<1x1xf32> to vector<1x5xf32>
    %79 = arith.subf %75, %78 : vector<1x5xf32>
    %80 = math.exp %79 : vector<1x5xf32>
    %cst_22 = arith.constant dense<0.000000e+00> : vector<1xf32>
    %81 = vector.multi_reduction <add>, %80, %cst_22 [1] : vector<1x5xf32> to vector<1xf32>
    %82 = vector.shape_cast %81 : vector<1xf32> to vector<1x1xf32>
    %83 = tpu.reciprocal %82 {approx = true} : vector<1x1xf32> -> vector<1x1xf32>
    %84 = vector.broadcast %83 : vector<1x1xf32> to vector<1x5xf32>
    %85 = arith.mulf %80, %84 : vector<1x5xf32>
    %86 = arith.truncf %85 : vector<1x5xf32> to vector<1x5xbf16>
    %cst_23 = arith.constant dense<0.000000e+00> : vector<1x32xf32>
    %87 = tpu.matmul %86, %72, %cst_23 {dimension_numbers = #tpu.dot_dimension_numbers<[1], [0], [0], [1], [0, 0, 1, 1], [], []>} : vector<1x5xbf16>, vector<5x32xbf16>, vector<1x32xf32> -> vector<1x32xf32>
    %88 = vector.extract_strided_slice %1 {offsets = [0, 128], sizes = [1, 32], strides = [1, 1]} : vector<1x256xf32> to vector<1x32xf32>
    %89 = arith.truncf %88 : vector<1x32xf32> to vector<1x32xbf16>
    %90 = vector.extract_strided_slice %3 {offsets = [0, 128], sizes = [5, 32], strides = [1, 1]} : vector<5x512xf32> to vector<5x32xf32>
    %91 = arith.truncf %90 : vector<5x32xf32> to vector<5x32xbf16>
    %92 = vector.extract_strided_slice %3 {offsets = [0, 384], sizes = [5, 32], strides = [1, 1]} : vector<5x512xf32> to vector<5x32xf32>
    %93 = arith.truncf %92 : vector<5x32xf32> to vector<5x32xbf16>
    %cst_24 = arith.constant dense<0.000000e+00> : vector<1x5xf32>
    %94 = tpu.matmul %89, %91, %cst_24 {dimension_numbers = #tpu.dot_dimension_numbers<[1], [1], [0], [0], [0, 0, 1, 0], [], []>} : vector<1x32xbf16>, vector<5x32xbf16>, vector<1x5xf32> -> vector<1x5xf32>
    %cst_25 = arith.constant 0.176776692 : f32
    %95 = vector.broadcast %cst_25 : f32 to vector<1x5xf32>
    %96 = arith.mulf %94, %95 : vector<1x5xf32>
    %cst_26 = arith.constant dense<0xFF800000> : vector<1xf32>
    %97 = vector.multi_reduction <maximumf>, %96, %cst_26 [1] : vector<1x5xf32> to vector<1xf32>
    %98 = vector.shape_cast %97 : vector<1xf32> to vector<1x1xf32>
    %99 = vector.broadcast %98 : vector<1x1xf32> to vector<1x5xf32>
    %100 = arith.subf %96, %99 : vector<1x5xf32>
    %101 = math.exp %100 : vector<1x5xf32>
    %cst_27 = arith.constant dense<0.000000e+00> : vector<1xf32>
    %102 = vector.multi_reduction <add>, %101, %cst_27 [1] : vector<1x5xf32> to vector<1xf32>
    %103 = vector.shape_cast %102 : vector<1xf32> to vector<1x1xf32>
    %104 = tpu.reciprocal %103 {approx = true} : vector<1x1xf32> -> vector<1x1xf32>
    %105 = vector.broadcast %104 : vector<1x1xf32> to vector<1x5xf32>
    %106 = arith.mulf %101, %105 : vector<1x5xf32>
    %107 = arith.truncf %106 : vector<1x5xf32> to vector<1x5xbf16>
    %cst_28 = arith.constant dense<0.000000e+00> : vector<1x32xf32>
    %108 = tpu.matmul %107, %93, %cst_28 {dimension_numbers = #tpu.dot_dimension_numbers<[1], [0], [0], [1], [0, 0, 1, 1], [], []>} : vector<1x5xbf16>, vector<5x32xbf16>, vector<1x32xf32> -> vector<1x32xf32>
    %109 = vector.extract_strided_slice %1 {offsets = [0, 160], sizes = [1, 32], strides = [1, 1]} : vector<1x256xf32> to vector<1x32xf32>
    %110 = arith.truncf %109 : vector<1x32xf32> to vector<1x32xbf16>
    %111 = vector.extract_strided_slice %3 {offsets = [0, 160], sizes = [5, 32], strides = [1, 1]} : vector<5x512xf32> to vector<5x32xf32>
    %112 = arith.truncf %111 : vector<5x32xf32> to vector<5x32xbf16>
    %113 = vector.extract_strided_slice %3 {offsets = [0, 416], sizes = [5, 32], strides = [1, 1]} : vector<5x512xf32> to vector<5x32xf32>
    %114 = arith.truncf %113 : vector<5x32xf32> to vector<5x32xbf16>
    %cst_29 = arith.constant dense<0.000000e+00> : vector<1x5xf32>
    %115 = tpu.matmul %110, %112, %cst_29 {dimension_numbers = #tpu.dot_dimension_numbers<[1], [1], [0], [0], [0, 0, 1, 0], [], []>} : vector<1x32xbf16>, vector<5x32xbf16>, vector<1x5xf32> -> vector<1x5xf32>
    %cst_30 = arith.constant 0.176776692 : f32
    %116 = vector.broadcast %cst_30 : f32 to vector<1x5xf32>
    %117 = arith.mulf %115, %116 : vector<1x5xf32>
    %cst_31 = arith.constant dense<0xFF800000> : vector<1xf32>
    %118 = vector.multi_reduction <maximumf>, %117, %cst_31 [1] : vector<1x5xf32> to vector<1xf32>
    %119 = vector.shape_cast %118 : vector<1xf32> to vector<1x1xf32>
    %120 = vector.broadcast %119 : vector<1x1xf32> to vector<1x5xf32>
    %121 = arith.subf %117, %120 : vector<1x5xf32>
    %122 = math.exp %121 : vector<1x5xf32>
    %cst_32 = arith.constant dense<0.000000e+00> : vector<1xf32>
    %123 = vector.multi_reduction <add>, %122, %cst_32 [1] : vector<1x5xf32> to vector<1xf32>
    %124 = vector.shape_cast %123 : vector<1xf32> to vector<1x1xf32>
    %125 = tpu.reciprocal %124 {approx = true} : vector<1x1xf32> -> vector<1x1xf32>
    %126 = vector.broadcast %125 : vector<1x1xf32> to vector<1x5xf32>
    %127 = arith.mulf %122, %126 : vector<1x5xf32>
    %128 = arith.truncf %127 : vector<1x5xf32> to vector<1x5xbf16>
    %cst_33 = arith.constant dense<0.000000e+00> : vector<1x32xf32>
    %129 = tpu.matmul %128, %114, %cst_33 {dimension_numbers = #tpu.dot_dimension_numbers<[1], [0], [0], [1], [0, 0, 1, 1], [], []>} : vector<1x5xbf16>, vector<5x32xbf16>, vector<1x32xf32> -> vector<1x32xf32>
    %130 = vector.extract_strided_slice %1 {offsets = [0, 192], sizes = [1, 32], strides = [1, 1]} : vector<1x256xf32> to vector<1x32xf32>
    %131 = arith.truncf %130 : vector<1x32xf32> to vector<1x32xbf16>
    %132 = vector.extract_strided_slice %3 {offsets = [0, 192], sizes = [5, 32], strides = [1, 1]} : vector<5x512xf32> to vector<5x32xf32>
    %133 = arith.truncf %132 : vector<5x32xf32> to vector<5x32xbf16>
    %134 = vector.extract_strided_slice %3 {offsets = [0, 448], sizes = [5, 32], strides = [1, 1]} : vector<5x512xf32> to vector<5x32xf32>
    %135 = arith.truncf %134 : vector<5x32xf32> to vector<5x32xbf16>
    %cst_34 = arith.constant dense<0.000000e+00> : vector<1x5xf32>
    %136 = tpu.matmul %131, %133, %cst_34 {dimension_numbers = #tpu.dot_dimension_numbers<[1], [1], [0], [0], [0, 0, 1, 0], [], []>} : vector<1x32xbf16>, vector<5x32xbf16>, vector<1x5xf32> -> vector<1x5xf32>
    %cst_35 = arith.constant 0.176776692 : f32
    %137 = vector.broadcast %cst_35 : f32 to vector<1x5xf32>
    %138 = arith.mulf %136, %137 : vector<1x5xf32>
    %cst_36 = arith.constant dense<0xFF800000> : vector<1xf32>
    %139 = vector.multi_reduction <maximumf>, %138, %cst_36 [1] : vector<1x5xf32> to vector<1xf32>
    %140 = vector.shape_cast %139 : vector<1xf32> to vector<1x1xf32>
    %141 = vector.broadcast %140 : vector<1x1xf32> to vector<1x5xf32>
    %142 = arith.subf %138, %141 : vector<1x5xf32>
    %143 = math.exp %142 : vector<1x5xf32>
    %cst_37 = arith.constant dense<0.000000e+00> : vector<1xf32>
    %144 = vector.multi_reduction <add>, %143, %cst_37 [1] : vector<1x5xf32> to vector<1xf32>
    %145 = vector.shape_cast %144 : vector<1xf32> to vector<1x1xf32>
    %146 = tpu.reciprocal %145 {approx = true} : vector<1x1xf32> -> vector<1x1xf32>
    %147 = vector.broadcast %146 : vector<1x1xf32> to vector<1x5xf32>
    %148 = arith.mulf %143, %147 : vector<1x5xf32>
    %149 = arith.truncf %148 : vector<1x5xf32> to vector<1x5xbf16>
    %cst_38 = arith.constant dense<0.000000e+00> : vector<1x32xf32>
    %150 = tpu.matmul %149, %135, %cst_38 {dimension_numbers = #tpu.dot_dimension_numbers<[1], [0], [0], [1], [0, 0, 1, 1], [], []>} : vector<1x5xbf16>, vector<5x32xbf16>, vector<1x32xf32> -> vector<1x32xf32>
    %151 = vector.extract_strided_slice %1 {offsets = [0, 224], sizes = [1, 32], strides = [1, 1]} : vector<1x256xf32> to vector<1x32xf32>
    %152 = arith.truncf %151 : vector<1x32xf32> to vector<1x32xbf16>
    %153 = vector.extract_strided_slice %3 {offsets = [0, 224], sizes = [5, 32], strides = [1, 1]} : vector<5x512xf32> to vector<5x32xf32>
    %154 = arith.truncf %153 : vector<5x32xf32> to vector<5x32xbf16>
    %155 = vector.extract_strided_slice %3 {offsets = [0, 480], sizes = [5, 32], strides = [1, 1]} : vector<5x512xf32> to vector<5x32xf32>
    %156 = arith.truncf %155 : vector<5x32xf32> to vector<5x32xbf16>
    %cst_39 = arith.constant dense<0.000000e+00> : vector<1x5xf32>
    %157 = tpu.matmul %152, %154, %cst_39 {dimension_numbers = #tpu.dot_dimension_numbers<[1], [1], [0], [0], [0, 0, 1, 0], [], []>} : vector<1x32xbf16>, vector<5x32xbf16>, vector<1x5xf32> -> vector<1x5xf32>
    %cst_40 = arith.constant 0.176776692 : f32
    %158 = vector.broadcast %cst_40 : f32 to vector<1x5xf32>
    %159 = arith.mulf %157, %158 : vector<1x5xf32>
    %cst_41 = arith.constant dense<0xFF800000> : vector<1xf32>
    %160 = vector.multi_reduction <maximumf>, %159, %cst_41 [1] : vector<1x5xf32> to vector<1xf32>
    %161 = vector.shape_cast %160 : vector<1xf32> to vector<1x1xf32>
    %162 = vector.broadcast %161 : vector<1x1xf32> to vector<1x5xf32>
    %163 = arith.subf %159, %162 : vector<1x5xf32>
    %164 = math.exp %163 : vector<1x5xf32>
    %cst_42 = arith.constant dense<0.000000e+00> : vector<1xf32>
    %165 = vector.multi_reduction <add>, %164, %cst_42 [1] : vector<1x5xf32> to vector<1xf32>
    %166 = vector.shape_cast %165 : vector<1xf32> to vector<1x1xf32>
    %167 = tpu.reciprocal %166 {approx = true} : vector<1x1xf32> -> vector<1x1xf32>
    %168 = vector.broadcast %167 : vector<1x1xf32> to vector<1x5xf32>
    %169 = arith.mulf %164, %168 : vector<1x5xf32>
    %170 = arith.truncf %169 : vector<1x5xf32> to vector<1x5xbf16>
    %cst_43 = arith.constant dense<0.000000e+00> : vector<1x32xf32>
    %171 = tpu.matmul %170, %156, %cst_43 {dimension_numbers = #tpu.dot_dimension_numbers<[1], [0], [0], [1], [0, 0, 1, 1], [], []>} : vector<1x5xbf16>, vector<5x32xbf16>, vector<1x32xf32> -> vector<1x32xf32>
    %172 = tpu.concatenate %24, %45, %66, %87, %108, %129, %150, %171 in 1 : vector<1x32xf32>, vector<1x32xf32>, vector<1x32xf32>, vector<1x32xf32>, vector<1x32xf32>, vector<1x32xf32>, vector<1x32xf32>, vector<1x32xf32> -> vector<1x256xf32>
    %c0_44 = arith.constant 0 : index
    %c0_45 = arith.constant 0 : index
    %c0_46 = arith.constant 0 : index
    %173 = vector.load %arg3[%c0_44, %c0_45, %c0_46] : memref<1x1x256xf32, #tpu.memory_space<vmem>>, vector<1x1x256xf32>
    %174 = vector.shape_cast %173 : vector<1x1x256xf32> to vector<1x256xf32>
    %175 = vector.shape_cast %172 : vector<1x256xf32> to vector<1x1x256xf32>
    tpu.vector_store %arg3[%c0_44, %c0_45, %c0_46], %175 {strides = array<i32>} : memref<1x1x256xf32, #tpu.memory_space<vmem>>, vector<1x1x256xf32>,
    return
  }
  func.func @transform_0(%arg0: i32) -> (i32, i32, i32) {
    %c0_i32 = arith.constant 0 : i32
    %c0_i32_0 = arith.constant 0 : i32
    %c0_i32_1 = arith.constant 0 : i32
    return %arg0, %c0_i32, %c0_i32_0 : i32, i32, i32
  }
  func.func @transform_1(%arg0: i32) -> (i32, i32, i32) {
    %c0_i32 = arith.constant 0 : i32
    %c0_i32_0 = arith.constant 0 : i32
    %c0_i32_1 = arith.constant 0 : i32
    return %arg0, %c0_i32, %c0_i32_0 : i32, i32, i32
  }
  func.func @transform_2(%arg0: i32) -> (i32, i32, i32) {
    %c0_i32 = arith.constant 0 : i32
    %c0_i32_0 = arith.constant 0 : i32
    %c0_i32_1 = arith.constant 0 : i32
    return %arg0, %c0_i32, %c0_i32_0 : i32, i32, i32
  }
}

module attributes {stable_mosaic.version = 11 : i64} {
  func.func @_layernorm_kernel(%arg0: i32, %arg1: memref<2x128xf32, #tpu.memory_space<vmem>>, %arg2: memref<1x128xf32, #tpu.memory_space<vmem>>, %arg3: memref<1x128xf32, #tpu.memory_space<vmem>>, %arg4: memref<2x128xf32, #tpu.memory_space<vmem>>) attributes {dimension_semantics = [#tpu.dimension_semantics<parallel>], iteration_bounds = array<i64: 1>, scalar_prefetch = 0 : i64, scratch_operands = 0 : i64, tpu.core_type = #tpu.core_type<tc>, window_params = [{transform_indices = @transform_0, window_bounds = array<i64: 2, 128>}, {pipeline_mode = #tpu.pipeline_mode<synchronous>, transform_indices = @transform_1, window_bounds = array<i64: 1, 128>}, {pipeline_mode = #tpu.pipeline_mode<synchronous>, transform_indices = @transform_2, window_bounds = array<i64: 1, 128>}, {transform_indices = @transform_3, window_bounds = array<i64: 2, 128>}]} {
    %c0 = arith.constant 0 : index
    %c0_0 = arith.constant 0 : index
    %0 = vector.load %arg1[%c0, %c0_0] : memref<2x128xf32, #tpu.memory_space<vmem>>, vector<2x128xf32>
    %cst = arith.constant dense<0.000000e+00> : vector<2xf32>
    %1 = vector.multi_reduction <add>, %0, %cst [1] : vector<2x128xf32> to vector<2xf32>
    %2 = vector.shape_cast %1 : vector<2xf32> to vector<2x1xf32>
    %cst_1 = arith.constant 1.280000e+02 : f32
    %3 = vector.broadcast %cst_1 : f32 to vector<2x1xf32>
    %4 = arith.divf %2, %3 : vector<2x1xf32>
    %5 = vector.broadcast %4 : vector<2x1xf32> to vector<2x128xf32>
    %6 = arith.subf %0, %5 : vector<2x128xf32>
    %7 = arith.mulf %6, %6 : vector<2x128xf32>
    %cst_2 = arith.constant dense<0.000000e+00> : vector<2xf32>
    %8 = vector.multi_reduction <add>, %7, %cst_2 [1] : vector<2x128xf32> to vector<2xf32>
    %9 = vector.shape_cast %8 : vector<2xf32> to vector<2x1xf32>
    %cst_3 = arith.constant 1.280000e+02 : f32
    %10 = vector.broadcast %cst_3 : f32 to vector<2x1xf32>
    %11 = arith.divf %9, %10 : vector<2x1xf32>
    %cst_4 = arith.constant 9.99999997E-7 : f32
    %12 = vector.broadcast %cst_4 : f32 to vector<2x1xf32>
    %13 = arith.addf %11, %12 : vector<2x1xf32>
    %14 = math.rsqrt %13 : vector<2x1xf32>
    %15 = vector.broadcast %14 : vector<2x1xf32> to vector<2x128xf32>
    %16 = arith.mulf %6, %15 : vector<2x128xf32>
    %c0_5 = arith.constant 0 : index
    %c0_6 = arith.constant 0 : index
    %17 = vector.load %arg2[%c0_5, %c0_6] : memref<1x128xf32, #tpu.memory_space<vmem>>, vector<1x128xf32>
    %18 = vector.broadcast %17 : vector<1x128xf32> to vector<2x128xf32>
    %19 = arith.mulf %16, %18 : vector<2x128xf32>
    %c0_7 = arith.constant 0 : index
    %c0_8 = arith.constant 0 : index
    %20 = vector.load %arg3[%c0_7, %c0_8] : memref<1x128xf32, #tpu.memory_space<vmem>>, vector<1x128xf32>
    %21 = vector.broadcast %20 : vector<1x128xf32> to vector<2x128xf32>
    %22 = arith.addf %19, %21 : vector<2x128xf32>
    %c0_9 = arith.constant 0 : index
    %c0_10 = arith.constant 0 : index
    %23 = vector.load %arg4[%c0_9, %c0_10] : memref<2x128xf32, #tpu.memory_space<vmem>>, vector<2x128xf32>
    tpu.vector_store %arg4[%c0_9, %c0_10], %22 {strides = array<i32>} : memref<2x128xf32, #tpu.memory_space<vmem>>, vector<2x128xf32>,
    return
  }
  func.func @transform_0(%arg0: i32) -> (i32, i32) {
    %c0_i32 = arith.constant 0 : i32
    %c0_i32_0 = arith.constant 0 : i32
    return %arg0, %c0_i32 : i32, i32
  }
  func.func @transform_1(%arg0: i32) -> (i32, i32) {
    %c0_i32 = arith.constant 0 : i32
    %c0_i32_0 = arith.constant 0 : i32
    %c0_i32_1 = arith.constant 0 : i32
    return %c0_i32, %c0_i32_0 : i32, i32
  }
  func.func @transform_2(%arg0: i32) -> (i32, i32) {
    %c0_i32 = arith.constant 0 : i32
    %c0_i32_0 = arith.constant 0 : i32
    %c0_i32_1 = arith.constant 0 : i32
    return %c0_i32, %c0_i32_0 : i32, i32
  }
  func.func @transform_3(%arg0: i32) -> (i32, i32) {
    %c0_i32 = arith.constant 0 : i32
    %c0_i32_0 = arith.constant 0 : i32
    return %arg0, %c0_i32 : i32, i32
  }
}

</mosaic_0001>

<bundles_post_ra>
// kernel: image_encoder_forward.25
= control target key start
LH: loop header
LB: loop body
LE: loop exit
PB: predicated region body
PF: predicated region fallthrough
CT: control target
= control target key end

     0   :  { %vm175_vm0 = vcmask 523264   ;;  %v45_v28 = vlaneseq  ;;  %s394_s1 = inlined_call_operand.vmem [shape: bf16[192,256], index: 1, kind: input, shape index: {}]   ;;  %s395_s0 = inlined_call_operand.vmem [shape: f32[8,192], index: 0, kind: input, shape index: {}]   ;;  %s396_s2 = inlined_call_operand.vmem [shape: f32[1,256], index: 2, kind: input, shape index: {}]   ;;  %s397_s3 = inlined_call_operand.vmem [shape: f32[8,256], index: 3, kind: output, shape index: {}]  }
   0x1   :  { %v251_v0 = vld [vmem:[%s394_s1 + $0x4] ss:$8 sps:$4 sm:$0xff]   ;;  %v253_v1 = vld [vmem:[%s394_s1] ss:$8 sps:$4 sm:$0xff]   ;;  %v254_v2 = vld [vmem:[%s394_s1 + $0x14] ss:$8 sps:$4 sm:$0xff]  }
   0x2   :  { %179 = vmatprep.subr.bf16.mxu0 %v251_v0  ;;  %v256_v3 = vld [vmem:[%s394_s1 + $0x10] ss:$8 sps:$4 sm:$0xff]   ;;  %v257_v4 = vld [vmem:[%s394_s1 + $0x24] ss:$8 sps:$4 sm:$0xff]   ;;  %v259_v5 = vld [vmem:[%s394_s1 + $0x20] ss:$8 sps:$4 sm:$0xff]  }
   0x3   :  { %180 = vmatpush1.bf16.msra.mxu0 %v253_v1  ;;  %v260_v6 = vld [vmem:[%s394_s1 + $0x34] ss:$8 sps:$4 sm:$0xff]   ;;  %v262_v7 = vld [vmem:[%s394_s1 + $0x30] ss:$8 sps:$4 sm:$0xff]   ;;  %v263_v8 = vld [vmem:[%s394_s1 + $0x44] ss:$8 sps:$4 sm:$0xff]  }
   0x4   :  { %181 = vmatprep.subr.bf16.mxu0 %v254_v2  ;;  %v265_v9 = vld [vmem:[%s394_s1 + $0x40] ss:$8 sps:$4 sm:$0xff]   ;;  %v266_v10 = vld [vmem:[%s394_s1 + $0x54] ss:$8 sps:$4 sm:$0xff]   ;;  %v268_v13 = vld [vmem:[%s394_s1 + $0x50] ss:$8 sps:$4 sm:$0xff]  }
   0x5   :  { %v16_v11 = vld [vmem:[%s395_s0 + $0x8] sm:$0xff]  ;;  %v272_v16 = vld [vmem:[%s394_s1 + $0x74] ss:$8 sps:$4 sm:$0xff]   ;;  %v274_v17 = vld [vmem:[%s394_s1 + $0x70] ss:$8 sps:$4 sm:$0xff]   ;;  %v46_v29 = vshrl.u32 %v45_v28, 7 }
   0x6   :  { %v18_v12 = vpack.c.bf16 %v16_v11, %v16_v11  ;;  %v269_v14 = vld [vmem:[%s394_s1 + $0x64] ss:$8 sps:$4 sm:$0xff]   ;;  %v271_v15 = vld [vmem:[%s394_s1 + $0x60] ss:$8 sps:$4 sm:$0xff]   ;;  %v278_v20 = vld [vmem:[%s394_s1 + $0x94] ss:$8 sps:$4 sm:$0xff]  }
   0x7   :  { %182 = vmatpush1.bf16.msra.mxu0 %v256_v3  ;;  %v275_v18 = vld [vmem:[%s394_s1 + $0x84] ss:$8 sps:$4 sm:$0xff]   ;;  %v277_v19 = vld [vmem:[%s394_s1 + $0x80] ss:$8 sps:$4 sm:$0xff]   ;;  %v280_v21 = vld [vmem:[%s394_s1 + $0x90] ss:$8 sps:$4 sm:$0xff]  }
   0x8   :  { %183 = vmatprep.subr.bf16.mxu0 %v257_v4  ;;  %250 = vmatprep.mubr.msk.bf16.mxu0 %vm175_vm0, %v18_v12  ;;  %v281_v22 = vld [vmem:[%s394_s1 + $0xa4] ss:$8 sps:$4 sm:$0xff]   ;;  %v283_v23 = vld [vmem:[%s394_s1 + $0xa0] ss:$8 sps:$4 sm:$0xff]   ;;  %v284_v24 = vld [vmem:[%s394_s1 + $0xb4] ss:$8 sps:$4 sm:$0xff]  }
   0x9   :  { %v286_v25 = vld [vmem:[%s394_s1 + $0xb0] ss:$8 sps:$4 sm:$0xff]   ;;  %v15_v26 = vld [vmem:[%s395_s0] sm:$0xff]  ;;  %v47_v30 = vsub.s32 0, %v46_v29  ;;  %v51_v32 = vsub.s32 1, %v46_v29 }
   0xa   :  { %v17_v27 = vpack.c.bf16 %v15_v26, %v15_v26  ;;  %v43_v31 = vld [vmem:[%s396_s2] sm:$0x3] }
   0xb   :  { %184 = vmatpush1.bf16.msra.mxu0 %v259_v5  ;;  %v48_v33 = vrot.slane %v43_v31, %v47_v30  ;;  %v52_v34 = vrot.slane %v43_v31, %v51_v32 }
   0xc   :  { %185 = vmatprep.subr.bf16.mxu0 %v260_v6 }
   0xf   :  { %186 = vmatpush1.bf16.msra.mxu0 %v262_v7 }
  0x10   :  { %187 = vmatprep.subr.bf16.mxu0 %v263_v8 }
  0x13   :  { %188 = vmatpush1.bf16.msra.mxu0 %v265_v9 }
  0x14   :  { %189 = vmatprep.subr.bf16.mxu0 %v266_v10 }
  0x17   :  { %190 = vmatpush1.bf16.msra.mxu0 %v268_v13 }
  0x18   :  { %191 = vmatprep.subr.bf16.mxu0 %v269_v14 }
  0x1b   :  { %192 = vmatpush1.bf16.msra.mxu0 %v271_v15 }
  0x1c   :  { %193 = vmatprep.subr.bf16.mxu0 %v272_v16 }
  0x1f   :  { %194 = vmatpush1.bf16.msra.mxu0 %v274_v17 }
  0x20   :  { %195 = vmatprep.subr.bf16.mxu0 %v275_v18 }
  0x23   :  { %196 = vmatpush1.bf16.msra.mxu0 %v277_v19 }
  0x24   :  { %197 = vmatprep.subr.bf16.mxu0 %v278_v20 }
  0x27   :  { %198 = vmatpush1.bf16.msra.mxu0 %v280_v21 }
  0x28   :  { %199 = vmatprep.subr.bf16.mxu0 %v281_v22 }
  0x2b   :  { %200 = vmatpush1.bf16.msra.mxu0 %v283_v23 }
  0x2c   :  { %201 = vmatprep.subr.bf16.mxu0 %v284_v24 }
  0x2f   :  { %202 = vmatpush1.bf16.msra.mxu0 %v286_v25 }
  0x32   :  { %212 = vmatmul.mubr.bf16.vlgmr.msra.gmra.mrb[0].mxu0 %v17_v27 }
 0x105   :  { %v213_v35 = vpop.f32.mrb[0].mxu0 }
 0x106   :  { %v214_v36 = vadd.f32 %v213_v35, %v48_v33  ;;  %v215_v37 = vpop.f32.mrb[1].mxu0 }
 0x107   :  { %v216_v38 = vadd.f32 %v215_v37, %v52_v34  ;;  %v217_v39 = vpop.f32.mrb[2].mxu0 }
 0x108   :  { %220 = vst [vmem:[%s397_s3] sm:$0xff] %v214_v36  ;;  %v218_v40 = vpop.f32.mrb[3].mxu0 }
 0x109   :  { %221 = vst [vmem:[%s397_s3 + $0x8] sm:$0xff] %v216_v38 }

// kernel: image_encoder_forward.30
= control target key start
LH: loop header
LB: loop body
LE: loop exit
PB: predicated region body
PF: predicated region fallthrough
CT: control target
= control target key end

     0   :  { %vm27_vm0 = vcmask 1041408   ;;  %s1531_s0 = inlined_call_operand.vmem [shape: f32[10,256], index: 0, kind: input, shape index: {}]   ;;  %s1532_s3 = inlined_call_operand.vmem [shape: bf16[256,768], index: 3, kind: input, shape index: {}]   ;;  %s1533_s1 = inlined_call_operand.vmem [shape: f32[1,256], index: 1, kind: input, shape index: {}]   ;;  %s1534_s2 = inlined_call_operand.vmem [shape: f32[1,256], index: 2, kind: input, shape index: {}]   ;;  %s1535_s4 = inlined_call_operand.vmem [shape: f32[1,768], index: 4, kind: input, shape index: {}]   ;;  %s1536_s5 = inlined_call_operand.vmem [shape: f32[10,768], index: 5, kind: output, shape index: {}]  }
   0x1   :  { %v1126_v0 = vld [vmem:[%s1531_s0 + $0x10] sm:$0x3]  ;;  %v1131_v1 = vld [vmem:[%s1531_s0 + $0x18] sm:$0x3]  ;;  %v1140_v4 = vld [vmem:[%s1531_s0] sm:$0xff] }
   0x2   :  { %v28_v2 = vsel %vm27_vm0, %v1126_v0, 0.0  ;;  %v29_v3 = vsel %vm27_vm0, %v1131_v1, 0.0  ;;  %v1145_v5 = vld [vmem:[%s1531_s0 + $0x8] sm:$0xff]  ;;  %v945_v8 = vld [vmem:[%s1532_s3 + $0x4] ss:$24 sps:$4 sm:$0xff]  }
   0x3   :  { %v30_v6 = vadd.f32 %v29_v3, %v28_v2  ;;  %v24_v7 = vadd.f32 %v1145_v5, %v1140_v4  ;;  %v947_v9 = vld [vmem:[%s1532_s3] ss:$24 sps:$4 sm:$0xff]   ;;  %704 = vmatprep.subr.bf16.mxu0 %v945_v8  ;;  %v948_v10 = vld [vmem:[%s1532_s3 + $0xc] ss:$24 sps:$4 sm:$0xff]   ;;  %v953_v13 = vld [vmem:[%s1532_s3 + $0x30] ss:$24 sps:$4 sm:$0xff]  }
   0x4   :  { %v950_v11 = vld [vmem:[%s1532_s3 + $0x8] ss:$24 sps:$4 sm:$0xff]   ;;  %705 = vmatpush1.bf16.msra.mxu0 %v947_v9  ;;  %v951_v12 = vld [vmem:[%s1532_s3 + $0x34] ss:$24 sps:$4 sm:$0xff]   ;;  %747 = vmatprep.subr.bf16.mxu1 %v948_v10  ;;  %v956_v15 = vld [vmem:[%s1532_s3 + $0x38] ss:$24 sps:$4 sm:$0xff]  }
   0x5   :  { %31 = vadd.xlane.f32.xlu0 %v30_v6  ;;  %v954_v14 = vld [vmem:[%s1532_s3 + $0x3c] ss:$24 sps:$4 sm:$0xff]   ;;  %748 = vmatpush1.bf16.msra.mxu1 %v950_v11  ;;  %v959_v17 = vld [vmem:[%s1532_s3 + $0x60] ss:$24 sps:$4 sm:$0xff]   ;;  %v960_v18 = vld [vmem:[%s1532_s3 + $0x6c] ss:$24 sps:$4 sm:$0xff]  }
   0x6   :  { %706 = vmatprep.subr.bf16.mxu0 %v951_v12  ;;  %749 = vmatprep.subr.bf16.mxu1 %v954_v14  ;;  %v957_v16 = vld [vmem:[%s1532_s3 + $0x64] ss:$24 sps:$4 sm:$0xff]   ;;  %v963_v19 = vld [vmem:[%s1532_s3 + $0x94] ss:$24 sps:$4 sm:$0xff]   ;;  %v962_v20 = vld [vmem:[%s1532_s3 + $0x68] ss:$24 sps:$4 sm:$0xff]  }
   0x7   :  { %v966_v21 = vld [vmem:[%s1532_s3 + $0x9c] ss:$24 sps:$4 sm:$0xff]   ;;  %v965_v22 = vld [vmem:[%s1532_s3 + $0x90] ss:$24 sps:$4 sm:$0xff]   ;;  %v972_v25 = vld [vmem:[%s1532_s3 + $0xcc] ss:$24 sps:$4 sm:$0xff]  }
   0x8   :  { %707 = vmatpush1.bf16.msra.mxu0 %v953_v13  ;;  %v969_v23 = vld [vmem:[%s1532_s3 + $0xc4] ss:$24 sps:$4 sm:$0xff]   ;;  %v968_v24 = vld [vmem:[%s1532_s3 + $0x98] ss:$24 sps:$4 sm:$0xff]   ;;  %v975_v27 = vld [vmem:[%s1532_s3 + $0xf4] ss:$24 sps:$4 sm:$0xff]  }
   0x9   :  { %25 = vadd.xlane.f32.xlu0 %v24_v7  ;;  %708 = vmatprep.subr.bf16.mxu0 %v957_v16  ;;  %v971_v26 = vld [vmem:[%s1532_s3 + $0xc0] ss:$24 sps:$4 sm:$0xff]   ;;  %v978_v29 = vld [vmem:[%s1532_s3 + $0xfc] ss:$24 sps:$4 sm:$0xff]   ;;  %v977_v30 = vld [vmem:[%s1532_s3 + $0xf0] ss:$24 sps:$4 sm:$0xff]  }
   0xa   :  { %750 = vmatpush1.bf16.msra.mxu1 %v956_v15  ;;  %v974_v28 = vld [vmem:[%s1532_s3 + $0xc8] ss:$24 sps:$4 sm:$0xff]   ;;  %v981_v31 = vld [vmem:[%s1532_s3 + $0x124] ss:$24 sps:$4 sm:$0xff]   ;;  %v980_v32 = vld [vmem:[%s1532_s3 + $0xf8] ss:$24 sps:$4 sm:$0xff]  }
   0xb   :  { %751 = vmatprep.subr.bf16.mxu1 %v960_v18  ;;  %v983_v33 = vld [vmem:[%s1532_s3 + $0x120] ss:$24 sps:$4 sm:$0xff]   ;;  %v984_v34 = vld [vmem:[%s1532_s3 + $0x12c] ss:$24 sps:$4 sm:$0xff]   ;;  %v990_v37 = vld [vmem:[%s1532_s3 + $0x15c] ss:$24 sps:$4 sm:$0xff]  }
   0xc   :  { %709 = vmatpush1.bf16.msra.mxu0 %v959_v17  ;;  %v986_v35 = vld [vmem:[%s1532_s3 + $0x128] ss:$24 sps:$4 sm:$0xff]   ;;  %v987_v36 = vld [vmem:[%s1532_s3 + $0x154] ss:$24 sps:$4 sm:$0xff]   ;;  %v993_v39 = vld [vmem:[%s1532_s3 + $0x184] ss:$24 sps:$4 sm:$0xff]  }
   0xd   :  { %710 = vmatprep.subr.bf16.mxu0 %v963_v19  ;;  %v989_v38 = vld [vmem:[%s1532_s3 + $0x150] ss:$24 sps:$4 sm:$0xff]   ;;  %v996_v41 = vld [vmem:[%s1532_s3 + $0x18c] ss:$24 sps:$4 sm:$0xff]   ;;  %v995_v42 = vld [vmem:[%s1532_s3 + $0x180] ss:$24 sps:$4 sm:$0xff]  }
   0xe   :  { %752 = vmatpush1.bf16.msra.mxu1 %v962_v20  ;;  %v992_v40 = vld [vmem:[%s1532_s3 + $0x158] ss:$24 sps:$4 sm:$0xff]   ;;  %v999_v43 = vld [vmem:[%s1532_s3 + $0x1b4] ss:$24 sps:$4 sm:$0xff]   ;;  %v998_v44 = vld [vmem:[%s1532_s3 + $0x188] ss:$24 sps:$4 sm:$0xff]  }
   0xf   :  { %753 = vmatprep.subr.bf16.mxu1 %v966_v21  ;;  %v1001_v61 = vld [vmem:[%s1532_s3 + $0x1b0] ss:$24 sps:$4 sm:$0xff]   ;;  %v1002_v62 = vld [vmem:[%s1532_s3 + $0x1bc] ss:$24 sps:$4 sm:$0xff]   ;;  %v1008_v2 = vld [vmem:[%s1532_s3 + $0x1ec] ss:$24 sps:$4 sm:$0xff]  }
  0x10   :  { %711 = vmatpush1.bf16.msra.mxu0 %v965_v22  ;;  %v1004_v63 = vld [vmem:[%s1532_s3 + $0x1b8] ss:$24 sps:$4 sm:$0xff]   ;;  %v1010_v3 = vld [vmem:[%s1532_s3 + $0x1e8] ss:$24 sps:$4 sm:$0xff]   ;;  %v1014_v6 = vld [vmem:[%s1532_s3 + $0x21c] ss:$24 sps:$4 sm:$0xff]  }
  0x11   :  { %712 = vmatprep.subr.bf16.mxu0 %v969_v23  ;;  %v1016_v7 = vld [vmem:[%s1532_s3 + $0x218] ss:$24 sps:$4 sm:$0xff]   ;;  %v1017_v8 = vld [vmem:[%s1532_s3 + $0x244] ss:$24 sps:$4 sm:$0xff]   ;;  %v1022_v11 = vld [vmem:[%s1532_s3 + $0x248] ss:$24 sps:$4 sm:$0xff]  }
  0x12   :  { %754 = vmatpush1.bf16.msra.mxu1 %v968_v24  ;;  %v1019_v9 = vld [vmem:[%s1532_s3 + $0x240] ss:$24 sps:$4 sm:$0xff]   ;;  %v1020_v10 = vld [vmem:[%s1532_s3 + $0x24c] ss:$24 sps:$4 sm:$0xff]   ;;  %v1026_v13 = vld [vmem:[%s1532_s3 + $0x27c] ss:$24 sps:$4 sm:$0xff]  }
  0x13   :  { %755 = vmatprep.subr.bf16.mxu1 %v972_v25  ;;  %v1023_v12 = vld [vmem:[%s1532_s3 + $0x274] ss:$24 sps:$4 sm:$0xff]   ;;  %v1025_v14 = vld [vmem:[%s1532_s3 + $0x270] ss:$24 sps:$4 sm:$0xff]   ;;  %v1029_v16 = vld [vmem:[%s1532_s3 + $0x2a4] ss:$24 sps:$4 sm:$0xff]  }
  0x14   :  { %713 = vmatpush1.bf16.msra.mxu0 %v971_v26  ;;  %v1028_v15 = vld [vmem:[%s1532_s3 + $0x278] ss:$24 sps:$4 sm:$0xff]   ;;  %v1032_v17 = vld [vmem:[%s1532_s3 + $0x2ac] ss:$24 sps:$4 sm:$0xff]   ;;  %v1034_v19 = vld [vmem:[%s1532_s3 + $0x2a8] ss:$24 sps:$4 sm:$0xff]  }
  0x15   :  { %714 = vmatprep.subr.bf16.mxu0 %v975_v27  ;;  %v1031_v18 = vld [vmem:[%s1532_s3 + $0x2a0] ss:$24 sps:$4 sm:$0xff]   ;;  %v1035_v20 = vld [vmem:[%s1532_s3 + $0x2d4] ss:$24 sps:$4 sm:$0xff]   ;;  %v1037_v22 = vld [vmem:[%s1532_s3 + $0x2d0] ss:$24 sps:$4 sm:$0xff]  }
  0x16   :  { %756 = vmatpush1.bf16.msra.mxu1 %v974_v28  ;;  %v1038_v21 = vld [vmem:[%s1532_s3 + $0x2dc] ss:$24 sps:$4 sm:$0xff]   ;;  %v1040_v23 = vld [vmem:[%s1532_s3 + $0x2d8] ss:$24 sps:$4 sm:$0xff]  }
  0x17   :  { %757 = vmatprep.subr.bf16.mxu1 %v978_v29  ;;  %v1043_v24 = vld [vmem:[%s1532_s3 + $0x14] ss:$24 sps:$4 sm:$0xff]   ;;  %v64_v29 = vlaneseq }
  0x18   :  { %715 = vmatpush1.bf16.msra.mxu0 %v977_v30 }
  0x19   :  { %716 = vmatprep.subr.bf16.mxu0 %v981_v31 }
  0x1a   :  { %758 = vmatpush1.bf16.msra.mxu1 %v980_v32  ;;  %v1366_v32 = vshrl.u32 %v64_v29, 7 }
  0x1b   :  { %759 = vmatprep.subr.bf16.mxu1 %v984_v34 }
  0x1c   :  { %717 = vmatpush1.bf16.msra.mxu0 %v983_v33  ;;  %v1369_v33 = vsub.s32 1, %v1366_v32  ;;  %v1372_v34 = vsub.s32 0, %v1366_v32 }
  0x1d   :  { %718 = vmatprep.subr.bf16.mxu0 %v987_v36 }
  0x1e   :  { %760 = vmatpush1.bf16.msra.mxu1 %v986_v35  ;;  %v62_v35 = vld [vmem:[%s1533_s1] sm:$0x3] }
  0x1f   :  { %761 = vmatprep.subr.bf16.mxu1 %v990_v37 }
  0x20   :  { %719 = vmatpush1.bf16.msra.mxu0 %v989_v38  ;;  %v71_v38 = vrot.slane %v62_v35, %v1369_v33 }
  0x21   :  { %720 = vmatprep.subr.bf16.mxu0 %v993_v39  ;;  %v78_v39 = vld [vmem:[%s1534_s2] sm:$0x3] }
  0x22   :  { %762 = vmatpush1.bf16.msra.mxu1 %v992_v40 }
  0x23   :  { %763 = vmatprep.subr.bf16.mxu1 %v996_v41  ;;  %v67_v41 = vrot.slane %v62_v35, %v1372_v34 }
  0x24   :  { %721 = vmatpush1.bf16.msra.mxu0 %v995_v42 }
  0x25   :  { %722 = vmatprep.subr.bf16.mxu0 %v999_v43  ;;  %v87_v43 = vrot.slane %v78_v39, %v1369_v33 }
  0x26   :  { %764 = vmatpush1.bf16.msra.mxu1 %v998_v44  ;;  %v83_v44 = vrot.slane %v78_v39, %v1372_v34 }
  0x27   :  { %765 = vmatprep.subr.bf16.mxu1 %v1002_v62  ;;  %v1052_v62 = vld [vmem:[%s1532_s3 + $0xa4] ss:$24 sps:$4 sm:$0xff]  }
  0x28   :  { %723 = vmatpush1.bf16.msra.mxu0 %v1001_v61  ;;  %v1047_v61 = vld [vmem:[%s1532_s3 + $0x70] ss:$24 sps:$4 sm:$0xff]  }
  0x2a   :  { %766 = vmatpush1.bf16.msra.mxu1 %v1004_v63  ;;  %v1050_v63 = vld [vmem:[%s1532_s3 + $0xa0] ss:$24 sps:$4 sm:$0xff]  }
  0x2b   :  { %767 = vmatprep.subr.bf16.mxu1 %v1008_v2  ;;  %v1058_v2 = vld [vmem:[%s1532_s3 + $0x104] ss:$24 sps:$4 sm:$0xff]  }
  0x2e   :  { %768 = vmatpush1.bf16.msra.mxu1 %v1010_v3  ;;  %v1056_v3 = vld [vmem:[%s1532_s3 + $0x100] ss:$24 sps:$4 sm:$0xff]  }
  0x2f   :  { %769 = vmatprep.subr.bf16.mxu1 %v1014_v6  ;;  %v1064_v6 = vld [vmem:[%s1532_s3 + $0x164] ss:$24 sps:$4 sm:$0xff]  }
  0x32   :  { %770 = vmatpush1.bf16.msra.mxu1 %v1016_v7  ;;  %v1062_v7 = vld [vmem:[%s1532_s3 + $0x160] ss:$24 sps:$4 sm:$0xff]  }
  0x33   :  { %771 = vmatprep.subr.bf16.mxu1 %v1020_v10  ;;  %v1070_v10 = vld [vmem:[%s1532_s3 + $0x1c4] ss:$24 sps:$4 sm:$0xff]  }
  0x36   :  { %772 = vmatpush1.bf16.msra.mxu1 %v1022_v11  ;;  %v1068_v11 = vld [vmem:[%s1532_s3 + $0x1c0] ss:$24 sps:$4 sm:$0xff]  }
  0x37   :  { %773 = vmatprep.subr.bf16.mxu1 %v1026_v13  ;;  %v1071_v13 = vld [vmem:[%s1532_s3 + $0x1f0] ss:$24 sps:$4 sm:$0xff]  }
  0x3a   :  { %774 = vmatpush1.bf16.msra.mxu1 %v1028_v15  ;;  %v1074_v15 = vld [vmem:[%s1532_s3 + $0x220] ss:$24 sps:$4 sm:$0xff]  }
  0x3b   :  { %775 = vmatprep.subr.bf16.mxu1 %v1032_v17  ;;  %v1077_v17 = vld [vmem:[%s1532_s3 + $0x250] ss:$24 sps:$4 sm:$0xff]  }
  0x3e   :  { %776 = vmatpush1.bf16.msra.mxu1 %v1034_v19  ;;  %v1080_v19 = vld [vmem:[%s1532_s3 + $0x280] ss:$24 sps:$4 sm:$0xff]  }
  0x3f   :  { %777 = vmatprep.subr.bf16.mxu1 %v1038_v21  ;;  %v1083_v21 = vld [vmem:[%s1532_s3 + $0x2b0] ss:$24 sps:$4 sm:$0xff]  }
  0x42   :  { %778 = vmatpush1.bf16.msra.mxu1 %v1040_v23  ;;  %v1086_v23 = vld [vmem:[%s1532_s3 + $0x2e0] ss:$24 sps:$4 sm:$0xff]  }
  0x92   :  { %v32_v45 = vpop.xlane.xlu0 %31 }
  0x93   :  { %v35_v46 = vmul.f32 0.00390625, %v32_v45 }
  0x95   :  { %v1261_v47 = vsub.f32 %v1126_v0, %v35_v46  ;;  %v1264_v48 = vsub.f32 %v1131_v1, %v35_v46  ;;  %v1005_v0 = vld [vmem:[%s1532_s3 + $0x1e4] ss:$24 sps:$4 sm:$0xff]   ;;  %v1007_v1 = vld [vmem:[%s1532_s3 + $0x1e0] ss:$24 sps:$4 sm:$0xff]  }
  0x96   :  { %v26_v49 = vpop.xlane.xlu0 %25  ;;  %724 = vmatprep.subr.bf16.mxu0 %v1005_v0  ;;  %v1055_v0 = vld [vmem:[%s1532_s3 + $0xd4] ss:$24 sps:$4 sm:$0xff]  }
  0x97   :  { %v34_v50 = vmul.f32 0.00390625, %v26_v49  ;;  %v42_v53 = vmul.f32 %v1261_v47, %v1261_v47  ;;  %v43_v54 = vmul.f32 %v1264_v48, %v1264_v48  ;;  %725 = vmatpush1.bf16.msra.mxu0 %v1007_v1  ;;  %v1053_v1 = vld [vmem:[%s1532_s3 + $0xd0] ss:$24 sps:$4 sm:$0xff]  }
  0x99   :  { %v1267_v51 = vsub.f32 %v1140_v4, %v34_v50  ;;  %v1270_v52 = vsub.f32 %v1145_v5, %v34_v50  ;;  %v47_v58 = vsel %vm27_vm0, %v42_v53, 0.0  ;;  %v48_v59 = vsel %vm27_vm0, %v43_v54, 0.0  ;;  %v1011_v4 = vld [vmem:[%s1532_s3 + $0x214] ss:$24 sps:$4 sm:$0xff]   ;;  %v1013_v5 = vld [vmem:[%s1532_s3 + $0x210] ss:$24 sps:$4 sm:$0xff]  }
  0x9a   :  { %v49_v60 = vadd.f32 %v48_v59, %v47_v58  ;;  %726 = vmatprep.subr.bf16.mxu0 %v1011_v4  ;;  %v1041_v58 = vld [vmem:[%s1532_s3 + $0x10] ss:$24 sps:$4 sm:$0xff]   ;;  %v1061_v4 = vld [vmem:[%s1532_s3 + $0x134] ss:$24 sps:$4 sm:$0xff]  }
  0x9b   :  { %v40_v55 = vmul.f32 %v1267_v51, %v1267_v51  ;;  %v41_v56 = vmul.f32 %v1270_v52, %v1270_v52  ;;  %727 = vmatpush1.bf16.msra.mxu0 %v1013_v5  ;;  %v1059_v5 = vld [vmem:[%s1532_s3 + $0x130] ss:$24 sps:$4 sm:$0xff]  }
  0x9c   :  { %728 = vmatprep.subr.bf16.mxu0 %v1017_v8  ;;  %v1067_v8 = vld [vmem:[%s1532_s3 + $0x194] ss:$24 sps:$4 sm:$0xff]  }
  0x9d   :  { %v44_v57 = vadd.f32 %v41_v56, %v40_v55 }
  0x9f   :  { %45 = vadd.xlane.f32.xlu1 %v44_v57  ;;  %729 = vmatpush1.bf16.msra.mxu0 %v1019_v9  ;;  %v1065_v9 = vld [vmem:[%s1532_s3 + $0x190] ss:$24 sps:$4 sm:$0xff]  }
  0xa0   :  { %730 = vmatprep.subr.bf16.mxu0 %v1023_v12  ;;  %v1073_v12 = vld [vmem:[%s1532_s3 + $0x1f4] ss:$24 sps:$4 sm:$0xff]  }
  0xa3   :  { %50 = vadd.xlane.f32.xlu1 %v49_v60  ;;  %731 = vmatpush1.bf16.msra.mxu0 %v1025_v14  ;;  %v1049_v60 = vld [vmem:[%s1532_s3 + $0x74] ss:$24 sps:$4 sm:$0xff]   ;;  %v1076_v14 = vld [vmem:[%s1532_s3 + $0x224] ss:$24 sps:$4 sm:$0xff]  }
  0xa4   :  { %732 = vmatprep.subr.bf16.mxu0 %v1029_v16  ;;  %v1079_v16 = vld [vmem:[%s1532_s3 + $0x254] ss:$24 sps:$4 sm:$0xff]  }
  0xa7   :  { %733 = vmatpush1.bf16.msra.mxu0 %v1031_v18  ;;  %v1082_v18 = vld [vmem:[%s1532_s3 + $0x284] ss:$24 sps:$4 sm:$0xff]  }
  0xa8   :  { %734 = vmatprep.subr.bf16.mxu0 %v1035_v20  ;;  %v1085_v20 = vld [vmem:[%s1532_s3 + $0x2b4] ss:$24 sps:$4 sm:$0xff]  }
  0xab   :  { %735 = vmatpush1.bf16.msra.mxu0 %v1037_v22  ;;  %v1088_v22 = vld [vmem:[%s1532_s3 + $0x2e4] ss:$24 sps:$4 sm:$0xff]  }
  0xac   :  { %790 = vmatprep.subr.bf16.mxu0 %v1043_v24  ;;  %v204_v24 = vsub.s32 2, %v1366_v32 }
 0x12c   :  { %v46_v25 = vpop.xlane.xlu1 %45 }
 0x12d   :  { %v52_v26 = vmul.f32 0.00390625, %v46_v25  ;;  %v192_v25 = vld [vmem:[%s1535_s4] sm:$0x3f] }
 0x12e   :  { %v201_v29 = vrot.slane %v192_v25, %v1369_v33 }
 0x12f   :  { %v54_v27 = vadd.f32 1e-06, %v52_v26  ;;  %v208_v26 = vsub.s32 3, %v1366_v32 }
 0x130   :  { %v51_v28 = vpop.xlane.xlu1 %50 }
 0x131   :  { %1089 = vrsqrt.f32 %v54_v27  ;;  %v53_v30 = vmul.f32 0.00390625, %v51_v28  ;;  %v197_v27 = vrot.slane %v192_v25, %v1372_v34  ;;  %v205_v28 = vrot.slane %v192_v25, %v204_v24 }
 0x133   :  { %v55_v31 = vadd.f32 1e-06, %v53_v30  ;;  %v209_v30 = vrot.slane %v192_v25, %v208_v26 }
 0x135   :  { %1091 = vrsqrt.f32 %v55_v31 }
 0x13b   :  { %v1090_v36 = vpop.eup %1089 }
 0x13c   :  { %v59_v37 = vmul.f32 %v1090_v36, %v1270_v52  ;;  %v58_v40 = vmul.f32 %v1090_v36, %v1267_v51 }
 0x13e   :  { %v75_v46 = vmul.f32 %v71_v38, %v59_v37  ;;  %v74_v50 = vmul.f32 %v67_v41, %v58_v40 }
 0x13f   :  { %v1092_v42 = vpop.eup %1091 }
 0x140   :  { %v61_v45 = vmul.f32 %v1092_v42, %v1264_v48  ;;  %v60_v49 = vmul.f32 %v1092_v42, %v1261_v47  ;;  %v91_v54 = vadd.f32 %v87_v43, %v75_v46  ;;  %v90_v56 = vadd.f32 %v83_v44, %v74_v50  ;;  %v1046_v48 = vld [vmem:[%s1532_s3 + $0x44] ss:$24 sps:$4 sm:$0xff]   ;;  %v1044_v47 = vld [vmem:[%s1532_s3 + $0x40] ss:$24 sps:$4 sm:$0xff]  }
 0x141   :  { %v212_v50 = vsub.s32 4, %v1366_v32 }
 0x142   :  { %v77_v52 = vmul.f32 %v71_v38, %v61_v45  ;;  %v76_v53 = vmul.f32 %v67_v41, %v60_v49 }
 0x144   :  { %v93_v55 = vadd.f32 %v87_v43, %v77_v52  ;;  %v92_v57 = vadd.f32 %v83_v44, %v76_v53  ;;  %v216_v52 = vsub.s32 5, %v1366_v32  ;;  %v213_v53 = vrot.slane %v192_v25, %v212_v50 }
 0x146   :  { %v95_v51 = vpack.c.bf16 %v93_v55, %v91_v54  ;;  %v1391_v59 = vpack.c.bf16 %v92_v57, %v90_v56  ;;  %v217_v54 = vrot.slane %v192_v25, %v216_v52 }
 0x148   :  { %736 = vmatprep.mubr.bf16.mxu0 %v95_v51  ;;  %779 = vmatprep.mubr.bf16.mxu1 %v95_v51 }
 0x149   :  { %737 = vmatmul.mubr.bf16.vlgmr.msra.gmra.mrb[0].mxu0 %v1391_v59  ;;  %780 = vmatmul.mubr.bf16.vlgmr.msra.gmra.mrb[0].mxu1 %v1391_v59 }
 0x14a   :  { %791 = vmatpush1.bf16.msra.mxu0 %v1041_v58  ;;  %822 = vmatprep.mubr.bf16.mxu0 %v95_v51 }
 0x14b   :  { %792 = vmatprep.subr.bf16.mxu0 %v1046_v48 }
 0x14e   :  { %793 = vmatpush1.bf16.msra.mxu0 %v1044_v47 }
 0x14f   :  { %794 = vmatprep.subr.bf16.mxu0 %v1049_v60 }
 0x152   :  { %795 = vmatpush1.bf16.msra.mxu0 %v1047_v61 }
 0x153   :  { %796 = vmatprep.subr.bf16.mxu0 %v1052_v62 }
 0x156   :  { %797 = vmatpush1.bf16.msra.mxu0 %v1050_v63 }
 0x157   :  { %798 = vmatprep.subr.bf16.mxu0 %v1055_v0 }
 0x15a   :  { %799 = vmatpush1.bf16.msra.mxu0 %v1053_v1 }
 0x15b   :  { %800 = vmatprep.subr.bf16.mxu0 %v1058_v2 }
 0x15e   :  { %801 = vmatpush1.bf16.msra.mxu0 %v1056_v3 }
 0x15f   :  { %802 = vmatprep.subr.bf16.mxu0 %v1061_v4 }
 0x162   :  { %803 = vmatpush1.bf16.msra.mxu0 %v1059_v5 }
 0x163   :  { %804 = vmatprep.subr.bf16.mxu0 %v1064_v6 }
 0x166   :  { %805 = vmatpush1.bf16.msra.mxu0 %v1062_v7 }
 0x167   :  { %806 = vmatprep.subr.bf16.mxu0 %v1067_v8 }
 0x16a   :  { %807 = vmatpush1.bf16.msra.mxu0 %v1065_v9 }
 0x16b   :  { %808 = vmatprep.subr.bf16.mxu0 %v1070_v10 }
 0x16e   :  { %809 = vmatpush1.bf16.msra.mxu0 %v1068_v11 }
 0x16f   :  { %810 = vmatprep.subr.bf16.mxu0 %v1073_v12 }
 0x172   :  { %811 = vmatpush1.bf16.msra.mxu0 %v1071_v13 }
 0x173   :  { %812 = vmatprep.subr.bf16.mxu0 %v1076_v14 }
 0x176   :  { %813 = vmatpush1.bf16.msra.mxu0 %v1074_v15 }
 0x177   :  { %814 = vmatprep.subr.bf16.mxu0 %v1079_v16 }
 0x17a   :  { %815 = vmatpush1.bf16.msra.mxu0 %v1077_v17 }
 0x17b   :  { %816 = vmatprep.subr.bf16.mxu0 %v1082_v18 }
 0x17e   :  { %817 = vmatpush1.bf16.msra.mxu0 %v1080_v19 }
 0x17f   :  { %818 = vmatprep.subr.bf16.mxu0 %v1085_v20 }
 0x182   :  { %819 = vmatpush1.bf16.msra.mxu0 %v1083_v21 }
 0x183   :  { %820 = vmatprep.subr.bf16.mxu0 %v1088_v22 }
 0x186   :  { %821 = vmatpush1.bf16.msra.mxu0 %v1086_v23 }
 0x189   :  { %823 = vmatmul.mubr.bf16.vlgmr.msra.gmra.mrb[4].mxu0 %v1391_v59 }
 0x21c   :  { %v738_v31 = vpop.f32.mrb[0].mxu0  ;;  %v781_v35 = vpop.f32.mrb[0].mxu1 }
 0x21d   :  { %v739_v36 = vadd.f32 %v738_v31, %v197_v27  ;;  %v782_v37 = vadd.f32 %v781_v35, %v205_v28  ;;  %v740_v38 = vpop.f32.mrb[1].mxu0  ;;  %v783_v39 = vpop.f32.mrb[1].mxu1 }
 0x21e   :  { %v741_v40 = vadd.f32 %v740_v38, %v201_v29  ;;  %v784_v41 = vadd.f32 %v783_v39, %v209_v30  ;;  %v742_v42 = vpop.f32.mrb[2].mxu0  ;;  %v785_v43 = vpop.f32.mrb[2].mxu1 }
 0x21f   :  { %833 = vst [vmem:[%s1536_s5] sm:$0xff] %v739_v36  ;;  %835 = vst [vmem:[%s1536_s5 + $0x10] sm:$0xff] %v782_v37  ;;  %v743_v33 = vadd.f32 %v742_v42, %v197_v27  ;;  %v786_v34 = vadd.f32 %v785_v43, %v205_v28  ;;  %v744_v44 = vpop.f32.mrb[3].mxu0  ;;  %v787_v45 = vpop.f32.mrb[3].mxu1 }
 0x220   :  { %834 = vst [vmem:[%s1536_s5 + $0x8] sm:$0xff] %v741_v40  ;;  %836 = vst [vmem:[%s1536_s5 + $0x18] sm:$0xff] %v784_v41  ;;  %v745_v46 = vadd.f32 %v744_v44, %v201_v29  ;;  %v788_v49 = vadd.f32 %v787_v45, %v209_v30 }
 0x221   :  { %839 = vst [vmem:[%s1536_s5 + $0x30] sm:$0x3] %v743_v33  ;;  %841 = vst [vmem:[%s1536_s5 + $0x40] sm:$0x3] %v786_v34 }
 0x222   :  { %840 = vst [vmem:[%s1536_s5 + $0x38] sm:$0x3] %v745_v46  ;;  %842 = vst [vmem:[%s1536_s5 + $0x48] sm:$0x3] %v788_v49 }
 0x25c   :  { %v824_v55 = vpop.f32.mrb[4].mxu0 }
 0x25d   :  { %v825_v56 = vadd.f32 %v824_v55, %v213_v53  ;;  %v826_v57 = vpop.f32.mrb[5].mxu0 }
 0x25e   :  { %v827_v51 = vadd.f32 %v826_v57, %v217_v54  ;;  %v828_v58 = vpop.f32.mrb[6].mxu0 }
 0x25f   :  { %837 = vst [vmem:[%s1536_s5 + $0x20] sm:$0xff] %v825_v56  ;;  %v829_v59 = vadd.f32 %v828_v58, %v213_v53  ;;  %v830_v48 = vpop.f32.mrb[7].mxu0 }
 0x260   :  { %838 = vst [vmem:[%s1536_s5 + $0x28] sm:$0xff] %v827_v51  ;;  %v831_v47 = vadd.f32 %v830_v48, %v217_v54 }
 0x261   :  { %843 = vst [vmem:[%s1536_s5 + $0x50] sm:$0x3] %v829_v59 }
 0x262   :  { %844 = vst [vmem:[%s1536_s5 + $0x58] sm:$0x3] %v831_v47 }

// kernel: image_encoder_forward.31
= control target key start
LH: loop header
LB: loop body
LE: loop exit
PB: predicated region body
PF: predicated region fallthrough
CT: control target
= control target key end

     0   :  { %s1334_s6 = smov 0   ;;  %s1516_s0 = inlined_call_operand.vmem [shape: f32[2,5,768], index: 0, kind: input, shape index: {}]   ;;  %s1517_s1 = inlined_call_operand.vmem [shape: f32[2,5,256], index: 1, kind: output, shape index: {}]  }
   0x1 LB: > { %s1108_s7 = sadd.s32 4294967295, %s1316_s6   ;;  %p1112_p0 = scmp.ge.s32.totalorder %s1316_s6, 1  ;;  %s1316_s6 = sphi %s1334_s6, %s11_s6  }
   0x2   : > { %p87_p1 = scmp.lt.s32.totalorder %s1316_s6, 3 }
   0x4   : > { %p88_p2 = pnand %p1112_p0, %p87_p1 }
   0x5   : > { %p107_p3 = scmp.lt.s32.totalorder (!%p88_p2), %s1108_s7, 1  ;;  %v1318_v0 = vmov (!%p88_p2), 0.0   ;;  %vm1319_vm0 = vmmov (!%p88_p2), 0   ;;  %vm127_vm1 = vcmask (!%p88_p2), 261120   ;;  %vm175_vm2 = vcmask (!%p88_p2), 36864   ;;  %s1320_s12 = smov (!%p88_p2), 96  }
   0x6   : > { %91 = sbr.rel (%p88_p2) target bundleno = 1518 (0x5ee), region = 24  ;;  %1167 = vmatprep.subr.bf16.mxu0 (!%p88_p2), %v1318_v0  ;;  %1169 = vmatprep.mubr.msk.bf16.mxu0 (!%p88_p2), %vm1319_vm0, %v1318_v0  ;;  %s1321_s13 = smov (!%p88_p2), 64   ;;  %vm192_vm3 = vcmask (!%p88_p2), 1041408   ;;  %vm193_vm4 = vcmask (!%p88_p2), 1042432   ;;  %v1323_v23 = vmov (!%p88_p2), 65535   ;;  %vm188_vm5 = vcmask (!%p88_p2), 39936  }
   0x7   : > { %1173 = vmatprep.subr.bf16.mxu1 (!%p88_p2), %v1318_v0  ;;  %1175 = vmatprep.mubr.msk.bf16.mxu1 (!%p88_p2), %vm1319_vm0, %v1318_v0  ;;  %s1322_s14 = smov (!%p88_p2), 32   ;;  %v194_v24 = vsel (!%p88_p2), %vm192_vm3, 4294967295, %v1323_v23  ;;  %vm1044_vm6 = vcmask (!%p88_p2), 523264   ;;  %vm1046_vm7 = vcmask (!%p88_p2), 785408  }
   0x8   : > { %v1379_v25 = vsel (!%p88_p2), %vm193_vm4, %v194_v24, 0 }
   0xd   : > { %s1519_s7 = smov (!%p107_p3, %s1108_s7), 1 }
   0xe   : > { %s1263_s8 = smul.u32 48, %s1519_s7  ;;  %s1134_s15 = sshll.u32 %s1519_s7, 4 }
   0xf   : > { %s116_s18 = scalar_lea.vmem %s1517_s1, %s1134_s15 }
  0x10   : > { %s1354_s11 = scalar_lea.vmem %s1516_s0, %s1263_s8 }
  0x11   : > { %v120_v1 = vld [vmem:[%s1354_s11 + $0x10] sm:$0x1f]  ;;  %v118_v4 = vld [vmem:[%s1354_s11] sm:$0x1f]  ;;  %v121_v12 = vld [vmem:[%s1354_s11 + $0x18] sm:$0x1f] }
  0x12   : > { %v125_v2 = vpack.c.bf16 %v120_v1, %v120_v1  ;;  %v124_v5 = vpack.c.bf16 %v118_v4, %v118_v4  ;;  %v576_v13 = vpack.c.bf16 %v121_v12, %v121_v12  ;;  %v119_v14 = vld [vmem:[%s1354_s11 + $0x8] sm:$0x1f]  ;;  %v122_v21 = vld [vmem:[%s1354_s11 + $0x20] sm:$0x1f] }
  0x13   : > { %v575_v15 = vpack.c.bf16 %v119_v14, %v119_v14  ;;  %v1377_v22 = vpack.c.bf16 %v122_v21, %v122_v21 }
  0x14   : > { %v132_v3 = vsel %vm127_vm1, %v125_v2, 0  ;;  %243 = vrot.lane.b32.xlu1 %v125_v2, %s1320_s12  ;;  %v582_v40 = vsel %vm127_vm1, %v576_v13, 0 }
  0x15   : > { %1168 = vmatpush3.bf16.xpose.msra.mxu0 %v132_v3  ;;  %v197_v26 = vand.u32 %v1379_v25, %v1377_v22 }
  0x16   : > { %1185 = vmatprep.subr.bf16.mxu0 %v1318_v0 }
  0x17   : > { %1174 = vmatpush3.bf16.msra.mxu1 %v197_v26 }
  0x18   : > { %240 = vrot.lane.b32.xlu1 %v124_v5, %s1320_s12  ;;  %1179 = vmatprep.subr.bf16.mxu1 %v1318_v0 }
  0x1c   : > { %1170 = vmatmul.mubr.msk.bf16.vlgmr.msra.gmra.mrb[0].mxu0 %vm127_vm1, %v124_v5  ;;  %353 = vrot.lane.b32.xlu1 %v124_v5, %s1321_s13 }
  0x1d   : > { %1187 = vmatprep.mubr.msk.bf16.mxu0 %vm1319_vm0, %v1318_v0 }
  0x20   : > { %466 = vrot.lane.b32.xlu1 %v125_v2, %s1322_s14 }
  0x24   : > { %464 = vrot.lane.b32.xlu1 %v124_v5, %s1322_s14 }
  0x28   : > { %687 = vrot.lane.b32.xlu1 %v576_v13, %s1320_s12 }
  0x2c   : > { %684 = vrot.lane.b32.xlu1 %v575_v15, %s1320_s12 }
  0x30   : > { %799 = vrot.lane.b32.xlu1 %v576_v13, %s1321_s13 }
  0x34   : > { %910 = vrot.lane.b32.xlu1 %v576_v13, %s1322_s14 }
  0x86   : > { %v244_v29 = vpop.permute.xlu1 %243 }
  0x87   : > { %v249_v31 = vsel %vm127_vm1, %v244_v29, 0 }
  0x8a   : > { %v241_v33 = vpop.permute.xlu1 %240 }
  0x8e   : > { %v354_v35 = vpop.permute.xlu1 %353 }
  0x92   : > { %v467_v37 = vpop.permute.xlu1 %466 }
  0x93   : > { %v472_v38 = vsel %vm127_vm1, %v467_v37, 0 }
  0x96   : > { %v465_v39 = vpop.permute.xlu1 %464 }
  0x9a   : > { %v688_v41 = vpop.permute.xlu1 %687 }
  0x9b   : > { %v693_v43 = vsel %vm127_vm1, %v688_v41, 0 }
  0x9e   : > { %v685_v42 = vpop.permute.xlu1 %684 }
  0xa2   : > { %v800_v44 = vpop.permute.xlu1 %799 }
  0xa3   : > { %v805_v45 = vsel %vm127_vm1, %v800_v44, 0 }
  0xa6   : > { %v911_v46 = vpop.permute.xlu1 %910 }
  0xa7   : > { %v916_v48 = vsel %vm127_vm1, %v911_v46, 0 }
  0xef   : > { %v168_v6 = vpop.f32.mrb[0].mxu0 }
  0xf0   : > { %v174_v7 = vmul.f32 0.17677669, %v168_v6  ;;  %v1171_v8 = vpop.f32.mrb[1].mxu0 }
  0xf1   : > { %v171_v9 = vpop.f32.mrb[2].mxu0 }
  0xf2   : > { %v1172_v10 = vpop.f32.mrb[3].mxu0  ;;  %v176_v11 = vsel %vm175_vm2, %v174_v7, -inf }
  0xf3   : > { %177 = vmax.xlane.f32.xlu0 %v176_v11 }
 0x180   : > { %v178_v16 = vpop.xlane.xlu0 %177 }
 0x181   : > { %v179_v17 = vsub.f32 %v174_v7, %v178_v16 }
 0x183   : > { %v180_v18 = vmul.f32 1.442695, %v179_v17 }
 0x185   : > { %1278 = vpow2.f32 %v180_v18 }
 0x18f   : > { %v1279_v19 = vpop.eup %1278 }
 0x190   : > { %v182_v20 = vsel %vm175_vm2, %v1279_v19, 0.0 }
 0x191   : > { %183 = vadd.xlane.f32.xlu0 %v182_v20 }
 0x1a7   : > { %355 = vrot.lane.b32.xlu0 %v125_v2, %s1321_s13 }
 0x1ab   : > { %797 = vrot.lane.b32.xlu0 %v575_v15, %s1321_s13 }
 0x1af   : > { %908 = vrot.lane.b32.xlu0 %v575_v15, %s1322_s14 }
 0x21e   : > { %v184_v27 = vpop.xlane.xlu0 %183 }
 0x21f   : > { %1280 = vrcp.f32 %v184_v27 }
 0x222   : > { %v356_v34 = vpop.permute.xlu0 %355 }
 0x223   : > { %v361_v36 = vsel %vm127_vm1, %v356_v34, 0 }
 0x226   : > { %v798_v47 = vpop.permute.xlu0 %797 }
 0x229   : > { %v1281_v28 = vpop.eup %1280 }
 0x22a   : > { %v186_v30 = vmul.f32 %v1281_v28, %v1279_v19  ;;  %v909_v49 = vpop.permute.xlu0 %908 }
 0x22c   : > { %v187_v32 = vpack.c.bf16 %v186_v30, %v186_v30 }
 0x22e   : > { %1176 = vmatmul.mubr.msk.bf16.vlgmr.msra.gmra.mrb[0].mxu1 %vm188_vm5, %v187_v32 }
 0x22f   : > { %1180 = vmatpush3.bf16.xpose.msra.mxu1 %v249_v31  ;;  %1181 = vmatprep.mubr.msk.bf16.mxu1 %vm1319_vm0, %v1318_v0 }
 0x230   : > { %1191 = vmatprep.subr.bf16.mxu1 %v1318_v0 }
 0x236   : > { %1182 = vmatmul.mubr.msk.bf16.vlgmr.msra.gmra.mrb[4].mxu1 %vm127_vm1, %v241_v33 }
 0x237   : > { %1192 = vmatpush3.bf16.xpose.msra.mxu1 %v361_v36  ;;  %1193 = vmatprep.mubr.msk.bf16.mxu1 %vm1319_vm0, %v1318_v0 }
 0x238   : > { %1203 = vmatprep.subr.bf16.mxu1 %v1318_v0 }
 0x23e   : > { %1194 = vmatmul.mubr.msk.bf16.vlgmr.msra.gmra.mrb[8].mxu1 %vm127_vm1, %v354_v35 }
 0x23f   : > { %1204 = vmatpush3.bf16.xpose.msra.mxu1 %v472_v38  ;;  %1205 = vmatprep.mubr.msk.bf16.mxu1 %vm1319_vm0, %v1318_v0 }
 0x240   : > { %1215 = vmatprep.subr.bf16.mxu1 %v1318_v0 }
 0x246   : > { %1206 = vmatmul.mubr.msk.bf16.vlgmr.msra.gmra.mrb[12].mxu1 %vm127_vm1, %v465_v39 }
 0x247   : > { %1216 = vmatpush3.bf16.xpose.msra.mxu1 %v582_v40  ;;  %1217 = vmatprep.mubr.msk.bf16.mxu1 %vm1319_vm0, %v1318_v0 }
 0x248   : > { %1227 = vmatprep.subr.bf16.mxu1 %v1318_v0 }
 0x24e   : > { %1218 = vmatmul.mubr.msk.bf16.vlgmr.msra.gmra.mrb[16].mxu1 %vm127_vm1, %v575_v15 }
 0x24f   : > { %1228 = vmatpush3.bf16.xpose.msra.mxu1 %v693_v43  ;;  %1229 = vmatprep.mubr.msk.bf16.mxu1 %vm1319_vm0, %v1318_v0 }
 0x250   : > { %1239 = vmatprep.subr.bf16.mxu1 %v1318_v0 }
 0x256   : > { %1230 = vmatmul.mubr.msk.bf16.vlgmr.msra.gmra.mrb[20].mxu1 %vm127_vm1, %v685_v42 }
 0x257   : > { %1240 = vmatpush3.bf16.xpose.msra.mxu1 %v805_v45  ;;  %1241 = vmatprep.mubr.msk.bf16.mxu1 %vm1319_vm0, %v1318_v0 }
 0x258   : > { %1251 = vmatprep.subr.bf16.mxu1 %v1318_v0 }
 0x25e   : > { %1242 = vmatmul.mubr.msk.bf16.vlgmr.msra.gmra.mrb[24].mxu1 %vm127_vm1, %v798_v47 }
 0x25f   : > { %1252 = vmatpush3.bf16.xpose.msra.mxu1 %v916_v48  ;;  %1253 = vmatprep.mubr.msk.bf16.mxu1 %vm1319_vm0, %v1318_v0 }
 0x266   : > { %1254 = vmatmul.mubr.msk.bf16.vlgmr.msra.gmra.mrb[28].mxu1 %vm127_vm1, %v909_v49 }
 0x301   : > { %v1422_v50 = vpop.f32.mrb[0].mxu1 }
 0x302   : > { %v1177_v51 = vpop.f32.mrb[1].mxu1 }
 0x303   : > { %v236_v52 = vpop.f32.mrb[2].mxu1 }
 0x304   : > { %v1178_v53 = vpop.f32.mrb[3].mxu1 }
 0x309   : > { %v285_v54 = vpop.f32.mrb[4].mxu1 }
 0x30a   : > { %v291_v55 = vmul.f32 0.17677669, %v285_v54  ;;  %v1183_v56 = vpop.f32.mrb[5].mxu1 }
 0x30b   : > { %v288_v57 = vpop.f32.mrb[6].mxu1 }
 0x30c   : > { %v1184_v58 = vpop.f32.mrb[7].mxu1  ;;  %v292_v59 = vsel %vm175_vm2, %v291_v55, -inf }
 0x30d   : > { %293 = vmax.xlane.f32.xlu1 %v292_v59 }
 0x311   : > { %v397_v60 = vpop.f32.mrb[8].mxu1 }
 0x312   : > { %v403_v61 = vmul.f32 0.17677669, %v397_v60  ;;  %v1195_v62 = vpop.f32.mrb[9].mxu1 }
 0x313   : > { %v400_v63 = vpop.f32.mrb[10].mxu1 }
 0x314   : > { %v1196_v1 = vpop.f32.mrb[11].mxu1  ;;  %v404_v2 = vsel %vm175_vm2, %v403_v61, -inf }
 0x315   : > { %405 = vmax.xlane.f32.xlu0 %v404_v2 }
 0x319   : > { %v508_v3 = vpop.f32.mrb[12].mxu1 }
 0x31a   : > { %v514_v4 = vmul.f32 0.17677669, %v508_v3  ;;  %v1207_v5 = vpop.f32.mrb[13].mxu1 }
 0x31b   : > { %v511_v6 = vpop.f32.mrb[14].mxu1 }
 0x31c   : > { %v1208_v7 = vpop.f32.mrb[15].mxu1  ;;  %v515_v8 = vsel %vm175_vm2, %v514_v4, -inf }
 0x31d   : > { %516 = vmax.xlane.f32.xlu0 %v515_v8 }
 0x321   : > { %v618_v9 = vpop.f32.mrb[16].mxu1 }
 0x322   : > { %v1427_v10 = vmul.f32 0.17677669, %v618_v9  ;;  %v1219_v11 = vpop.f32.mrb[17].mxu1 }
 0x323   : > { %v621_v12 = vpop.f32.mrb[18].mxu1 }
 0x324   : > { %v625_v13 = vsel %vm175_vm2, %v1427_v10, -inf  ;;  %v1220_v14 = vpop.f32.mrb[19].mxu1 }
 0x325   : > { %626 = vmax.xlane.f32.xlu1 %v625_v13 }
 0x329   : > { %v729_v15 = vpop.f32.mrb[20].mxu1 }
 0x32a   : > { %v735_v16 = vmul.f32 0.17677669, %v729_v15  ;;  %v1231_v17 = vpop.f32.mrb[21].mxu1 }
 0x32b   : > { %v732_v18 = vpop.f32.mrb[22].mxu1 }
 0x32c   : > { %v736_v19 = vsel %vm175_vm2, %v735_v16, -inf  ;;  %v1232_v20 = vpop.f32.mrb[23].mxu1 }
 0x32d   : > { %737 = vmax.xlane.f32.xlu0 %v736_v19 }
 0x331   : > { %v841_v21 = vpop.f32.mrb[24].mxu1 }
 0x332   : > { %v847_v23 = vmul.f32 0.17677669, %v841_v21  ;;  %v1243_v24 = vpop.f32.mrb[25].mxu1 }
 0x333   : > { %v844_v26 = vpop.f32.mrb[26].mxu1 }
 0x334   : > { %v848_v27 = vsel %vm175_vm2, %v847_v23, -inf  ;;  %v1244_v28 = vpop.f32.mrb[27].mxu1 }
 0x335   : > { %849 = vmax.xlane.f32.xlu1 %v848_v27 }
 0x339   : > { %v952_v29 = vpop.f32.mrb[28].mxu1 }
 0x33a   : > { %v958_v30 = vmul.f32 0.17677669, %v952_v29  ;;  %v1255_v31 = vpop.f32.mrb[29].mxu1 }
 0x33b   : > { %v955_v32 = vpop.f32.mrb[30].mxu1 }
 0x33c   : > { %v959_v33 = vsel %vm175_vm2, %v958_v30, -inf  ;;  %v1256_v34 = vpop.f32.mrb[31].mxu1 }
 0x33d   : > { %960 = vmax.xlane.f32.xlu0 %v959_v33 }
 0x346   : > { %416 = vrot.lane.b32.xlu1 %v1377_v22, %s1321_s13 }
 0x353   : > { %305 = vrot.lane.b32.xlu0 %v1377_v22, %s1320_s12 }
 0x39a   : > { %v294_v35 = vpop.xlane.xlu1 %293 }
 0x39b   : > { %v295_v36 = vsub.f32 %v291_v55, %v294_v35 }
 0x39d   : > { %v296_v37 = vmul.f32 1.442695, %v295_v36 }
 0x39f   : > { %1282 = vpow2.f32 %v296_v37 }
 0x3a2   : > { %v406_v38 = vpop.xlane.xlu0 %405 }
 0x3a3   : > { %v407_v39 = vsub.f32 %v403_v61, %v406_v38  ;;  %v123_v61 = vld [vmem:[%s1354_s11 + $0x28] sm:$0x1f] }
 0x3a4   : > { %v577_v63 = vpack.c.bf16 %v123_v61, %v123_v61 }
 0x3a5   : > { %v408_v40 = vmul.f32 1.442695, %v407_v39 }
 0x3a6   : > { %v641_v28 = vand.u32 %v577_v63, %v1379_v25 }
 0x3a7   : > { %1284 = vpow2.f32 %v408_v40 }
 0x3a9   : > { %v1283_v41 = vpop.eup %1282 }
 0x3aa   : > { %v517_v42 = vpop.xlane.xlu0 %516  ;;  %v298_v43 = vsel %vm175_vm2, %v1283_v41, 0.0 }
 0x3ab   : > { %v518_v44 = vsub.f32 %v514_v4, %v517_v42  ;;  %299 = vadd.xlane.f32.xlu1 %v298_v43 }
 0x3ad   : > { %v519_v45 = vmul.f32 1.442695, %v518_v44 }
 0x3af   : > { %1286 = vpow2.f32 %v519_v45 }
 0x3b1   : > { %v1285_v46 = vpop.eup %1284 }
 0x3b2   : > { %v410_v47 = vsel %vm175_vm2, %v1285_v46, 0.0  ;;  %v627_v59 = vpop.xlane.xlu1 %626 }
 0x3b3   : > { %411 = vadd.xlane.f32.xlu0 %v410_v47  ;;  %v628_v60 = vsub.f32 %v1427_v10, %v627_v59 }
 0x3b5   : > { %v629_v1 = vmul.f32 1.442695, %v628_v60 }
 0x3b9   : > { %v1440_v48 = vpop.eup %1286 }
 0x3ba   : > { %v738_v49 = vpop.xlane.xlu0 %737  ;;  %v521_v51 = vsel %vm175_vm2, %v1440_v48, 0.0 }
 0x3bb   : > { %v739_v52 = vsub.f32 %v735_v16, %v738_v49  ;;  %522 = vadd.xlane.f32.xlu1 %v521_v51 }
 0x3bd   : > { %v740_v53 = vmul.f32 1.442695, %v739_v52 }
 0x3bf   : > { %1288 = vpow2.f32 %v740_v53 }
 0x3c0   : > { %1290 = vpow2.f32 %v629_v1 }
 0x3c2   : > { %v850_v62 = vpop.xlane.xlu1 %849 }
 0x3c3   : > { %v851_v2 = vsub.f32 %v847_v23, %v850_v62 }
 0x3c5   : > { %v852_v3 = vmul.f32 1.442695, %v851_v2 }
 0x3c6   : > { %v417_v11 = vpop.permute.xlu1 %416 }
 0x3c7   : > { %1292 = vpow2.f32 %v852_v3  ;;  %v422_v17 = vand.u32 %v417_v11, %v1379_v25 }
 0x3c9   : > { %v1444_v54 = vpop.eup %1288 }
 0x3ca   : > { %v961_v55 = vpop.xlane.xlu0 %960  ;;  %v742_v56 = vsel %vm175_vm2, %v1444_v54, 0.0  ;;  %v1291_v4 = vpop.eup %1290 }
 0x3cb   : > { %743 = vadd.xlane.f32.xlu0 %v742_v56  ;;  %v631_v6 = vsel %vm175_vm2, %v1291_v4, 0.0 }
 0x3cc   : > { %527 = vrot.lane.b32.xlu1 %v1377_v22, %s1322_s14  ;;  %v962_v22 = vsub.f32 %v958_v30, %v961_v55 }
 0x3ce   : > { %v306_v57 = vpop.permute.xlu0 %305  ;;  %v963_v5 = vmul.f32 1.442695, %v962_v22 }
 0x3cf   : > { %v311_v58 = vand.u32 %v306_v57, %v1379_v25 }
 0x3d0   : > { %1294 = vpow2.f32 %v963_v5 }
 0x3d1   : > { %1186 = vmatpush3.bf16.msra.mxu0 %v311_v58  ;;  %v1456_v7 = vpop.eup %1292 }
 0x3d2   : > { %1197 = vmatprep.subr.bf16.mxu0 %v1318_v0  ;;  %v854_v8 = vsel %vm175_vm2, %v1456_v7, 0.0 }
 0x3da   : > { %v1460_v9 = vpop.eup %1294 }
 0x3db   : > { %v965_v10 = vsel %vm175_vm2, %v1460_v9, 0.0 }
 0x3e1   : > { %749 = vrot.lane.b32.xlu0 %v577_v63, %s1320_s12 }
 0x3f0   : > { %632 = vadd.xlane.f32.xlu1 %v631_v6 }
 0x3f4   : > { %855 = vadd.xlane.f32.xlu1 %v854_v8 }
 0x400   : > { %966 = vadd.xlane.f32.xlu0 %v965_v10 }
 0x405   : > { %860 = vrot.lane.b32.xlu1 %v577_v63, %s1321_s13 }
 0x416   : > { %971 = vrot.lane.b32.xlu0 %v577_v63, %s1322_s14 }
 0x438   : > { %v300_v12 = vpop.xlane.xlu1 %299 }
 0x439   : > { %1296 = vrcp.f32 %v300_v12 }
 0x440   : > { %v412_v13 = vpop.xlane.xlu0 %411 }
 0x441   : > { %1298 = vrcp.f32 %v412_v13 }
 0x443   : > { %v1297_v14 = vpop.eup %1296 }
 0x444   : > { %v302_v15 = vmul.f32 %v1297_v14, %v1283_v41 }
 0x446   : > { %v303_v16 = vpack.c.bf16 %v302_v15, %v302_v15 }
 0x448   : > { %v523_v18 = vpop.xlane.xlu1 %522  ;;  %1188 = vmatmul.mubr.msk.bf16.vlgmr.msra.gmra.mrb[4].mxu0 %vm188_vm5, %v303_v16 }
 0x449   : > { %1300 = vrcp.f32 %v523_v18  ;;  %1198 = vmatpush3.bf16.msra.mxu0 %v422_v17  ;;  %1199 = vmatprep.mubr.msk.bf16.mxu0 %vm1319_vm0, %v1318_v0 }
 0x44a   : > { %1209 = vmatprep.subr.bf16.mxu0 %v1318_v0 }
 0x44b   : > { %v1299_v19 = vpop.eup %1298 }
 0x44c   : > { %v414_v20 = vmul.f32 %v1299_v19, %v1285_v46  ;;  %v528_v21 = vpop.permute.xlu1 %527 }
 0x44d   : > { %v533_v23 = vand.u32 %v528_v21, %v1379_v25 }
 0x44e   : > { %v415_v24 = vpack.c.bf16 %v414_v20, %v414_v20 }
 0x450   : > { %1200 = vmatmul.mubr.msk.bf16.vlgmr.msra.gmra.mrb[8].mxu0 %vm188_vm5, %v415_v24 }
 0x451   : > { %1210 = vmatpush3.bf16.msra.mxu0 %v533_v23  ;;  %1211 = vmatprep.mubr.msk.bf16.mxu0 %vm1319_vm0, %v1318_v0 }
 0x452   : > { %1221 = vmatprep.subr.bf16.mxu0 %v1318_v0 }
 0x453   : > { %v1301_v26 = vpop.eup %1300 }
 0x454   : > { %v525_v27 = vmul.f32 %v1301_v26, %v1440_v48 }
 0x456   : > { %v526_v29 = vpack.c.bf16 %v525_v27, %v525_v27 }
 0x458   : > { %1212 = vmatmul.mubr.msk.bf16.vlgmr.msra.gmra.mrb[12].mxu0 %vm188_vm5, %v526_v29  ;;  %v744_v31 = vpop.xlane.xlu0 %743 }
 0x459   : > { %1222 = vmatpush3.bf16.msra.mxu0 %v641_v28  ;;  %1223 = vmatprep.mubr.msk.bf16.mxu0 %vm1319_vm0, %v1318_v0 }
 0x45a   : > { %1233 = vmatprep.subr.bf16.mxu0 %v1318_v0 }
 0x45c   : > { %v750_v34 = vpop.permute.xlu0 %749 }
 0x45d   : > { %v755_v38 = vand.u32 %v750_v34, %v1379_v25 }
 0x47d   : > { %v633_v30 = vpop.xlane.xlu1 %632 }
 0x47e   : > { %1302 = vrcp.f32 %v633_v30 }
 0x47f   : > { %1304 = vrcp.f32 %v744_v31 }
 0x481   : > { %v856_v32 = vpop.xlane.xlu1 %855 }
 0x482   : > { %1306 = vrcp.f32 %v856_v32 }
 0x485   : > { %v861_v41 = vpop.permute.xlu1 %860 }
 0x486   : > { %v866_v42 = vand.u32 %v861_v41, %v1379_v25 }
 0x488   : > { %v1303_v33 = vpop.eup %1302 }
 0x489   : > { %v635_v35 = vmul.f32 %v1303_v33, %v1291_v4  ;;  %v1305_v37 = vpop.eup %1304 }
 0x48a   : > { %v746_v39 = vmul.f32 %v1305_v37, %v1444_v54 }
 0x48b   : > { %v636_v36 = vpack.c.bf16 %v635_v35, %v635_v35 }
 0x48c   : > { %v747_v43 = vpack.c.bf16 %v746_v39, %v746_v39  ;;  %v1307_v44 = vpop.eup %1306 }
 0x48d   : > { %1224 = vmatmul.mubr.msk.bf16.vlgmr.msra.gmra.mrb[16].mxu0 %vm188_vm5, %v636_v36  ;;  %v967_v40 = vpop.xlane.xlu0 %966  ;;  %v858_v45 = vmul.f32 %v1307_v44, %v1456_v7 }
 0x48e   : > { %1234 = vmatpush3.bf16.msra.mxu0 %v755_v38  ;;  %1235 = vmatprep.mubr.msk.bf16.mxu0 %vm1319_vm0, %v1318_v0  ;;  %1308 = vrcp.f32 %v967_v40 }
 0x48f   : > { %1245 = vmatprep.subr.bf16.mxu0 %v1318_v0  ;;  %v859_v48 = vpack.c.bf16 %v858_v45, %v858_v45 }
 0x491   : > { %v972_v46 = vpop.permute.xlu0 %971 }
 0x492   : > { %v977_v47 = vand.u32 %v972_v46, %v1379_v25 }
 0x495   : > { %1236 = vmatmul.mubr.msk.bf16.vlgmr.msra.gmra.mrb[20].mxu0 %vm188_vm5, %v747_v43 }
 0x496   : > { %1246 = vmatpush3.bf16.msra.mxu0 %v866_v42  ;;  %1247 = vmatprep.mubr.msk.bf16.mxu0 %vm1319_vm0, %v1318_v0 }
 0x497   : > { %1257 = vmatprep.subr.bf16.mxu0 %v1318_v0 }
 0x498   : > { %v1309_v49 = vpop.eup %1308 }
 0x499   : > { %v969_v51 = vmul.f32 %v1309_v49, %v1460_v9 }
 0x49b   : > { %v970_v52 = vpack.c.bf16 %v969_v51, %v969_v51 }
 0x49d   : > { %1248 = vmatmul.mubr.msk.bf16.vlgmr.msra.gmra.mrb[24].mxu0 %vm188_vm5, %v859_v48 }
 0x49e   : > { %1258 = vmatpush3.bf16.msra.mxu0 %v977_v47  ;;  %1259 = vmatprep.mubr.msk.bf16.mxu0 %vm1319_vm0, %v1318_v0 }
 0x4a5   : > { %1260 = vmatmul.mubr.msk.bf16.vlgmr.msra.gmra.mrb[28].mxu0 %vm188_vm5, %v970_v52 }
 0x51b   : > { %v347_v53 = vpop.f32.mrb[4].mxu0 }
 0x51c   : > { %1020 = vrot.lane.b32.xlu1 %v347_v53, %s1322_s14  ;;  %v1189_v54 = vpop.f32.mrb[5].mxu0 }
 0x51d   : > { %v350_v55 = vpop.f32.mrb[6].mxu0 }
 0x51e   : > { %v1190_v56 = vpop.f32.mrb[7].mxu0 }
 0x523   : > { %v458_v25 = vpop.f32.mrb[8].mxu0 }
 0x524   : > { %1024 = vrot.lane.b32.xlu0 %v458_v25, %s1321_s13  ;;  %v1201_v57 = vpop.f32.mrb[9].mxu0 }
 0x525   : > { %v461_v58 = vpop.f32.mrb[10].mxu0 }
 0x526   : > { %v1202_v59 = vpop.f32.mrb[11].mxu0 }
 0x52b   : > { %v569_v60 = vpop.f32.mrb[12].mxu0 }
 0x52c   : > { %1028 = vrot.lane.b32.xlu1 %v569_v60, %s1320_s12  ;;  %v1213_v0 = vpop.f32.mrb[13].mxu0 }
 0x52d   : > { %v572_v61 = vpop.f32.mrb[14].mxu0 }
 0x52e   : > { %v1214_v62 = vpop.f32.mrb[15].mxu0 }
 0x560   : > { %v677_v63 = vpop.f32.mrb[16].mxu0 }
 0x561   : > { %v1225_v1 = vpop.f32.mrb[17].mxu0 }
 0x562   : > { %v680_v2 = vpop.f32.mrb[18].mxu0 }
 0x563   : > { %v1226_v3 = vpop.f32.mrb[19].mxu0 }
 0x568   : > { %v791_v22 = vpop.f32.mrb[20].mxu0 }
 0x569   : > { %1032 = vrot.lane.b32.xlu0 %v791_v22, %s1322_s14  ;;  %v1237_v4 = vpop.f32.mrb[21].mxu0 }
 0x56a   : > { %v794_v5 = vpop.f32.mrb[22].mxu0 }
 0x56b   : > { %v1238_v6 = vpop.f32.mrb[23].mxu0 }
 0x570   : > { %v902_v7 = vpop.f32.mrb[24].mxu0 }
 0x571   : > { %1036 = vrot.lane.b32.xlu1 %v902_v7, %s1321_s13  ;;  %v1249_v8 = vpop.f32.mrb[25].mxu0 }
 0x572   : > { %v905_v9 = vpop.f32.mrb[26].mxu0 }
 0x573   : > { %v1250_v10 = vpop.f32.mrb[27].mxu0 }
 0x578   : > { %v1013_v11 = vpop.f32.mrb[28].mxu0 }
 0x579   : > { %1040 = vrot.lane.b32.xlu0 %v1013_v11, %s1320_s12  ;;  %v1261_v12 = vpop.f32.mrb[29].mxu0 }
 0x57a   : > { %v1016_v13 = vpop.f32.mrb[30].mxu0 }
 0x57b   : > { %v1262_v14 = vpop.f32.mrb[31].mxu0 }
 0x58e   : > { %v1021_v15 = vpop.permute.xlu1 %1020 }
 0x58f   : > { %v1043_v17 = vsel %vm127_vm1, %v1422_v50, %v1021_v15 }
 0x596   : > { %v1025_v16 = vpop.permute.xlu0 %1024 }
 0x597   : > { %v1045_v18 = vsel %vm1044_vm6, %v1043_v17, %v1025_v16 }
 0x59e   : > { %v1029_v19 = vpop.permute.xlu1 %1028 }
 0x59f   : > { %v1047_v20 = vsel %vm1046_vm7, %v1045_v18, %v1029_v19 }
 0x5a0   : > { %1051 = vst [vmem:[%s116_s18] sm:$0x1f] %v1047_v20 }
 0x5db   : > { %v1033_v21 = vpop.permute.xlu0 %1032 }
 0x5dc   : > { %v1048_v24 = vsel %vm127_vm1, %v677_v63, %v1033_v21 }
 0x5e3   : > { %v1037_v23 = vpop.permute.xlu1 %1036 }
 0x5e4   : > { %v1049_v26 = vsel %vm1044_vm6, %v1048_v24, %v1037_v23 }
 0x5eb   : > { %v1041_v27 = vpop.permute.xlu0 %1040 }
 0x5ec   : > { %v1050_v28 = vsel %vm1046_vm7, %v1049_v26, %v1041_v27 }
 0x5ed   : > { %1052 = vst [vmem:[%s116_s18 + $0x8] sm:$0x1f] %v1050_v28 }
 0x5ee PF: > { %s11_s6 = sadd.s32 1, %s1316_s6  }
 0x5ef   : > { %p8_p4 = scmp.ge.s32.totalorder %s11_s6, 4  }
 0x5f1   :  { %10 = sbr.rel (!%p8_p4) target bundleno = 1 (0x1), region = 54 }

// kernel: image_encoder_forward.32
= control target key start
LH: loop header
LB: loop body
LE: loop exit
PB: predicated region body
PF: predicated region fallthrough
CT: control target
= control target key end

     0   :  { %v57_v38 = vlaneseq  ;;  %s526_s1 = inlined_call_operand.vmem [shape: bf16[256,256], index: 1, kind: input, shape index: {}]   ;;  %s527_s0 = inlined_call_operand.vmem [shape: f32[10,256], index: 0, kind: input, shape index: {}]   ;;  %s528_s2 = inlined_call_operand.vmem [shape: f32[1,256], index: 2, kind: input, shape index: {}]   ;;  %s529_s3 = inlined_call_operand.vmem [shape: f32[10,256], index: 3, kind: input, shape index: {}]   ;;  %s530_s4 = inlined_call_operand.vmem [shape: f32[10,256], index: 4, kind: output, shape index: {}]  }
   0x1   :  { %v318_v0 = vld [vmem:[%s526_s1 + $0x4] ss:$8 sps:$4 sm:$0xff]   ;;  %v320_v1 = vld [vmem:[%s526_s1] ss:$8 sps:$4 sm:$0xff]   ;;  %v321_v2 = vld [vmem:[%s526_s1 + $0x14] ss:$8 sps:$4 sm:$0xff]  }
   0x2   :  { %227 = vmatprep.subr.bf16.mxu0 %v318_v0  ;;  %v323_v3 = vld [vmem:[%s526_s1 + $0x10] ss:$8 sps:$4 sm:$0xff]   ;;  %v324_v4 = vld [vmem:[%s526_s1 + $0x24] ss:$8 sps:$4 sm:$0xff]   ;;  %v326_v5 = vld [vmem:[%s526_s1 + $0x20] ss:$8 sps:$4 sm:$0xff]  }
   0x3   :  { %228 = vmatpush1.bf16.msra.mxu0 %v320_v1  ;;  %v327_v6 = vld [vmem:[%s526_s1 + $0x34] ss:$8 sps:$4 sm:$0xff]   ;;  %v329_v7 = vld [vmem:[%s526_s1 + $0x30] ss:$8 sps:$4 sm:$0xff]   ;;  %v330_v8 = vld [vmem:[%s526_s1 + $0x44] ss:$8 sps:$4 sm:$0xff]  }
   0x4   :  { %229 = vmatprep.subr.bf16.mxu0 %v321_v2  ;;  %v332_v9 = vld [vmem:[%s526_s1 + $0x40] ss:$8 sps:$4 sm:$0xff]   ;;  %v333_v10 = vld [vmem:[%s526_s1 + $0x54] ss:$8 sps:$4 sm:$0xff]   ;;  %v335_v11 = vld [vmem:[%s526_s1 + $0x50] ss:$8 sps:$4 sm:$0xff]  }
   0x5   :  { %v336_v12 = vld [vmem:[%s526_s1 + $0x64] ss:$8 sps:$4 sm:$0xff]   ;;  %v20_v14 = vld [vmem:[%s527_s0 + $0x18] sm:$0x3]  ;;  %v338_v16 = vld [vmem:[%s526_s1 + $0x60] ss:$8 sps:$4 sm:$0xff]  }
   0x6   :  { %v18_v13 = vld [vmem:[%s527_s0 + $0x8] sm:$0xff]  ;;  %v339_v17 = vld [vmem:[%s526_s1 + $0x74] ss:$8 sps:$4 sm:$0xff]   ;;  %v341_v18 = vld [vmem:[%s526_s1 + $0x70] ss:$8 sps:$4 sm:$0xff]   ;;  %v58_v39 = vshrl.u32 %v57_v38, 7 }
   0x7   :  { %230 = vmatpush1.bf16.msra.mxu0 %v323_v3  ;;  %v22_v15 = vpack.c.bf16 %v20_v14, %v18_v13  ;;  %v342_v19 = vld [vmem:[%s526_s1 + $0x84] ss:$8 sps:$4 sm:$0xff]   ;;  %v344_v20 = vld [vmem:[%s526_s1 + $0x80] ss:$8 sps:$4 sm:$0xff]   ;;  %v345_v21 = vld [vmem:[%s526_s1 + $0x94] ss:$8 sps:$4 sm:$0xff]  }
   0x8   :  { %231 = vmatprep.subr.bf16.mxu0 %v324_v4  ;;  %v347_v22 = vld [vmem:[%s526_s1 + $0x90] ss:$8 sps:$4 sm:$0xff]   ;;  %v348_v23 = vld [vmem:[%s526_s1 + $0xa4] ss:$8 sps:$4 sm:$0xff]   ;;  %v350_v24 = vld [vmem:[%s526_s1 + $0xa0] ss:$8 sps:$4 sm:$0xff]  }
   0x9   :  { %259 = vmatprep.mubr.bf16.mxu0 %v22_v15  ;;  %v351_v25 = vld [vmem:[%s526_s1 + $0xb4] ss:$8 sps:$4 sm:$0xff]   ;;  %v353_v26 = vld [vmem:[%s526_s1 + $0xb0] ss:$8 sps:$4 sm:$0xff]   ;;  %v354_v27 = vld [vmem:[%s526_s1 + $0xc4] ss:$8 sps:$4 sm:$0xff]  }
   0xa   :  { %v356_v28 = vld [vmem:[%s526_s1 + $0xc0] ss:$8 sps:$4 sm:$0xff]   ;;  %v357_v29 = vld [vmem:[%s526_s1 + $0xd4] ss:$8 sps:$4 sm:$0xff]   ;;  %v359_v30 = vld [vmem:[%s526_s1 + $0xd0] ss:$8 sps:$4 sm:$0xff]  }
   0xb   :  { %232 = vmatpush1.bf16.msra.mxu0 %v326_v5  ;;  %v360_v31 = vld [vmem:[%s526_s1 + $0xe4] ss:$8 sps:$4 sm:$0xff]   ;;  %v362_v32 = vld [vmem:[%s526_s1 + $0xe0] ss:$8 sps:$4 sm:$0xff]   ;;  %v363_v33 = vld [vmem:[%s526_s1 + $0xf4] ss:$8 sps:$4 sm:$0xff]  }
   0xc   :  { %233 = vmatprep.subr.bf16.mxu0 %v327_v6  ;;  %v365_v34 = vld [vmem:[%s526_s1 + $0xf0] ss:$8 sps:$4 sm:$0xff]   ;;  %v17_v35 = vld [vmem:[%s527_s0] sm:$0xff]  ;;  %v59_v40 = vsub.s32 0, %v58_v39  ;;  %v63_v42 = vsub.s32 1, %v58_v39  ;;  %v271_v49 = vld [vmem:[%s529_s3 + $0x8] sm:$0xff] }
   0xd   :  { %v19_v36 = vld [vmem:[%s527_s0 + $0x10] sm:$0x3]  ;;  %v55_v41 = vld [vmem:[%s528_s2] sm:$0x3]  ;;  %v273_v56 = vld [vmem:[%s529_s3 + $0x18] sm:$0x3] }
   0xe   :  { %v21_v37 = vpack.c.bf16 %v19_v36, %v17_v35  ;;  %v60_v43 = vrot.slane %v55_v41, %v59_v40  ;;  %v64_v44 = vrot.slane %v55_v41, %v63_v42  ;;  %v270_v46 = vld [vmem:[%s529_s3] sm:$0xff]  ;;  %v272_v52 = vld [vmem:[%s529_s3 + $0x10] sm:$0x3] }
   0xf   :  { %234 = vmatpush1.bf16.msra.mxu0 %v329_v7 }
  0x10   :  { %235 = vmatprep.subr.bf16.mxu0 %v330_v8 }
  0x13   :  { %236 = vmatpush1.bf16.msra.mxu0 %v332_v9 }
  0x14   :  { %237 = vmatprep.subr.bf16.mxu0 %v333_v10 }
  0x17   :  { %238 = vmatpush1.bf16.msra.mxu0 %v335_v11 }
  0x18   :  { %239 = vmatprep.subr.bf16.mxu0 %v336_v12 }
  0x1b   :  { %240 = vmatpush1.bf16.msra.mxu0 %v338_v16 }
  0x1c   :  { %241 = vmatprep.subr.bf16.mxu0 %v339_v17 }
  0x1f   :  { %242 = vmatpush1.bf16.msra.mxu0 %v341_v18 }
  0x20   :  { %243 = vmatprep.subr.bf16.mxu0 %v342_v19 }
  0x23   :  { %244 = vmatpush1.bf16.msra.mxu0 %v344_v20 }
  0x24   :  { %245 = vmatprep.subr.bf16.mxu0 %v345_v21 }
  0x27   :  { %246 = vmatpush1.bf16.msra.mxu0 %v347_v22 }
  0x28   :  { %247 = vmatprep.subr.bf16.mxu0 %v348_v23 }
  0x2b   :  { %248 = vmatpush1.bf16.msra.mxu0 %v350_v24 }
  0x2c   :  { %249 = vmatprep.subr.bf16.mxu0 %v351_v25 }
  0x2f   :  { %250 = vmatpush1.bf16.msra.mxu0 %v353_v26 }
  0x30   :  { %251 = vmatprep.subr.bf16.mxu0 %v354_v27 }
  0x33   :  { %252 = vmatpush1.bf16.msra.mxu0 %v356_v28 }
  0x34   :  { %253 = vmatprep.subr.bf16.mxu0 %v357_v29 }
  0x37   :  { %254 = vmatpush1.bf16.msra.mxu0 %v359_v30 }
  0x38   :  { %255 = vmatprep.subr.bf16.mxu0 %v360_v31 }
  0x3b   :  { %256 = vmatpush1.bf16.msra.mxu0 %v362_v32 }
  0x3c   :  { %257 = vmatprep.subr.bf16.mxu0 %v363_v33 }
  0x3f   :  { %258 = vmatpush1.bf16.msra.mxu0 %v365_v34 }
  0x42   :  { %260 = vmatmul.mubr.bf16.vlgmr.msra.gmra.mrb[0].mxu0 %v21_v37 }
 0x115   :  { %v261_v45 = vpop.f32.mrb[0].mxu0 }
 0x116   :  { %v262_v47 = vadd.f32 %v261_v45, %v60_v43  ;;  %v263_v48 = vpop.f32.mrb[1].mxu0 }
 0x117   :  { %v264_v50 = vadd.f32 %v263_v48, %v64_v44  ;;  %v265_v51 = vpop.f32.mrb[2].mxu0 }
 0x118   :  { %v274_v53 = vadd.f32 %v270_v46, %v262_v47  ;;  %v266_v54 = vadd.f32 %v265_v51, %v60_v43  ;;  %v267_v55 = vpop.f32.mrb[3].mxu0 }
 0x119   :  { %v275_v57 = vadd.f32 %v271_v49, %v264_v50  ;;  %v268_v58 = vadd.f32 %v267_v55, %v64_v44 }
 0x11a   :  { %278 = vst [vmem:[%s530_s4] sm:$0xff] %v274_v53  ;;  %v276_v59 = vadd.f32 %v272_v52, %v266_v54 }
 0x11b   :  { %279 = vst [vmem:[%s530_s4 + $0x8] sm:$0xff] %v275_v57  ;;  %v277_v60 = vadd.f32 %v273_v56, %v268_v58 }
 0x11c   :  { %280 = vst [vmem:[%s530_s4 + $0x10] sm:$0x3] %v276_v59 }
 0x11d   :  { %281 = vst [vmem:[%s530_s4 + $0x18] sm:$0x3] %v277_v60 }

// kernel: image_encoder_forward.35
= control target key start
LH: loop header
LB: loop body
LE: loop exit
PB: predicated region body
PF: predicated region fallthrough
CT: control target
= control target key end

     0   :  { %v26_v0 = vlaneseq  ;;  %v384_v1 = vmov 1983009808   ;;  %vm33_vm0 = vcmask 1041408   ;;  %v385_v12 = vmov 269488144   ;;  %s500_s0 = inlined_call_operand.vmem [shape: f32[2,256], index: 0, kind: input, shape index: {}]   ;;  %s501_s3 = inlined_call_operand.vmem [shape: bf16[256,128], index: 3, kind: input, shape index: {}]   ;;  %s502_s1 = inlined_call_operand.vmem [shape: f32[1,256], index: 1, kind: input, shape index: {}]   ;;  %s503_s2 = inlined_call_operand.vmem [shape: f32[1,256], index: 2, kind: input, shape index: {}]   ;;  %s504_s4 = inlined_call_operand.vmem [shape: f32[1,128], index: 4, kind: input, shape index: {}]   ;;  %s505_s5 = inlined_call_operand.vmem [shape: f32[2,128], index: 5, kind: output, shape index: {}]  }
   0x1   :  { %v24_v2 = vunpack.c.l.s4 %v384_v1  ;;  %v21_v5 = vld [vmem:[%s500_s0] sm:$0xf]  ;;  %v43_v13 = vunpack.c.l.s4 %v385_v12  ;;  %v366_v28 = vld [vmem:[%s501_s3 + $0x48] sm:$0xff]   ;;  %v368_v30 = vld [vmem:[%s501_s3 + $0x50] sm:$0xff]  }
   0x2   :  { %v416_v3 = vshrl.u32 %v26_v0, 7  ;;  %v364_v26 = vld [vmem:[%s501_s3 + $0x40] sm:$0xff]   ;;  %v367_v29 = vld [vmem:[%s501_s3 + $0x8] sm:$0xff]   ;;  %v369_v31 = vld [vmem:[%s501_s3 + $0x10] sm:$0xff]  }
   0x3   :  { %v25_v4 = vunpack.c.0.s8 %v24_v2  ;;  %v44_v14 = vunpack.c.0.s8 %v43_v13  ;;  %v365_v27 = vld [vmem:[%s501_s3] sm:$0xff]   ;;  %340 = vmatprep.subr.bf16.mxu0 %v364_v26  ;;  %v370_v32 = vld [vmem:[%s501_s3 + $0x58] sm:$0xff]   ;;  %v374_v36 = vld [vmem:[%s501_s3 + $0x68] sm:$0xff]  }
   0x4   :  { %341 = vmatpush3.bf16.msra.mxu0 %v365_v27  ;;  %v371_v33 = vld [vmem:[%s501_s3 + $0x18] sm:$0xff]   ;;  %v372_v34 = vld [vmem:[%s501_s3 + $0x60] sm:$0xff]   ;;  %v375_v37 = vld [vmem:[%s501_s3 + $0x28] sm:$0xff]   ;;  %v85_v45 = vsub.s32 0, %v416_v3  ;;  %v89_v46 = vsub.s32 1, %v416_v3 }
   0x5   :  { %v422_v6 = vsub.s32 %v25_v4, %v416_v3  ;;  %v428_v15 = vsub.s32 %v44_v14, %v416_v3  ;;  %342 = vmatprep.subr.bf16.mxu0 %v366_v28  ;;  %v373_v35 = vld [vmem:[%s501_s3 + $0x20] sm:$0xff]   ;;  %v376_v38 = vld [vmem:[%s501_s3 + $0x70] sm:$0xff]   ;;  %v378_v40 = vld [vmem:[%s501_s3 + $0x78] sm:$0xff]  }
   0x6   :  { %v377_v39 = vld [vmem:[%s501_s3 + $0x30] sm:$0xff]   ;;  %v379_v41 = vld [vmem:[%s501_s3 + $0x38] sm:$0xff]   ;;  %v81_v47 = vld [vmem:[%s502_s1] sm:$0x3] }
   0x7   :  { %v29_v7 = vrot.slane %v21_v5, %v422_v6  ;;  %v101_v48 = vld [vmem:[%s503_s2] sm:$0x3]  ;;  %v86_v49 = vrot.slane %v81_v47, %v85_v45  ;;  %v90_v50 = vrot.slane %v81_v47, %v89_v46 }
   0x8   :  { %343 = vmatpush3.bf16.msra.mxu0 %v367_v29  ;;  %v106_v51 = vrot.slane %v101_v48, %v85_v45  ;;  %v110_v52 = vrot.slane %v101_v48, %v89_v46  ;;  %v323_v13 = vld [vmem:[%s504_s4] ss:$0 sm:$0xff] }
   0x9   :  { %v30_v8 = vcombine.high %v29_v7, %v29_v7  ;;  %v34_v9 = vsel %vm33_vm0, %v29_v7, 0.0  ;;  %344 = vmatprep.subr.bf16.mxu0 %v368_v30  ;;  %v91_v53 = vcombine.low %v86_v49, %v90_v50 }
   0xa   :  { %v111_v54 = vcombine.low %v106_v51, %v110_v52 }
   0xb   :  { %v35_v10 = vsel %vm33_vm0, %v30_v8, 0.0  ;;  %v98_v57 = vrot.slane %v91_v53, %v422_v6 }
   0xc   :  { %v36_v11 = vadd.f32 %v35_v10, %v34_v9  ;;  %345 = vmatpush3.bf16.msra.mxu0 %v369_v31  ;;  %v118_v59 = vrot.slane %v111_v54, %v422_v6 }
   0xd   :  { %346 = vmatprep.subr.bf16.mxu0 %v370_v32 }
   0xe   :  { %37 = vadd.xlane.f32.xlu0 %v36_v11 }
  0x10   :  { %347 = vmatpush3.bf16.msra.mxu0 %v371_v33 }
  0x11   :  { %348 = vmatprep.subr.bf16.mxu0 %v372_v34 }
  0x14   :  { %349 = vmatpush3.bf16.msra.mxu0 %v373_v35 }
  0x15   :  { %350 = vmatprep.subr.bf16.mxu0 %v374_v36 }
  0x18   :  { %351 = vmatpush3.bf16.msra.mxu0 %v375_v37 }
  0x19   :  { %352 = vmatprep.subr.bf16.mxu0 %v376_v38 }
  0x1c   :  { %353 = vmatpush3.bf16.msra.mxu0 %v377_v39 }
  0x1d   :  { %354 = vmatprep.subr.bf16.mxu0 %v378_v40 }
  0x20   :  { %355 = vmatpush3.bf16.msra.mxu0 %v379_v41 }
  0x9b   :  { %v38_v16 = vpop.xlane.xlu0 %37 }
  0x9c   :  { %v40_v17 = vmul.f32 0.00390625, %v38_v16 }
  0x9e   :  { %v48_v18 = vrot.slane %v40_v17, %v428_v15 }
  0xa0   :  { %v50_v19 = vsub.f32 %v21_v5, %v48_v18 }
  0xa2   :  { %v51_v20 = vmul.f32 %v50_v19, %v50_v19 }
  0xa4   :  { %v59_v21 = vrot.slane %v51_v20, %v422_v6 }
  0xa6   :  { %v60_v22 = vcombine.high %v59_v21, %v59_v21  ;;  %v63_v23 = vsel %vm33_vm0, %v59_v21, 0.0 }
  0xa8   :  { %v64_v24 = vsel %vm33_vm0, %v60_v22, 0.0 }
  0xa9   :  { %v65_v25 = vadd.f32 %v64_v24, %v63_v23 }
  0xab   :  { %66 = vadd.xlane.f32.xlu0 %v65_v25 }
 0x138   :  { %v67_v42 = vpop.xlane.xlu0 %66 }
 0x139   :  { %v68_v43 = vmul.f32 0.00390625, %v67_v42 }
 0x13b   :  { %v69_v44 = vadd.f32 1e-06, %v68_v43 }
 0x13d   :  { %380 = vrsqrt.f32 %v69_v44 }
 0x147   :  { %v381_v55 = vpop.eup %380 }
 0x148   :  { %v78_v56 = vrot.slane %v381_v55, %v428_v15 }
 0x14a   :  { %v80_v58 = vmul.f32 %v78_v56, %v50_v19 }
 0x14c   :  { %v100_v60 = vmul.f32 %v98_v57, %v80_v58 }
 0x14e   :  { %v120_v61 = vadd.f32 %v118_v59, %v100_v60 }
 0x150   :  { %v121_v62 = vmul.f32 %v120_v61, %v120_v61 }
 0x152   :  { %v122_v63 = vmul.f32 %v121_v62, %v120_v61 }
 0x154   :  { %v123_v0 = vmul.f32 0.044715, %v122_v63 }
 0x156   :  { %v124_v1 = vadd.f32 %v123_v0, %v120_v61 }
 0x158   :  { %v125_v2 = vmul.f32 0.7978846, %v124_v1 }
 0x15a   :  { %382 = vtanh.f32 %v125_v2 }
 0x164   :  { %v383_v3 = vpop.eup %382 }
 0x165   :  { %v127_v4 = vadd.f32 1.0, %v383_v3 }
 0x167   :  { %v128_v5 = vmul.f32 0.5, %v127_v4 }
 0x169   :  { %v129_v7 = vmul.f32 %v128_v5, %v120_v61 }
 0x16b   :  { %v137_v8 = vrot.slane %v129_v7, %v422_v6 }
 0x16d   :  { %v138_v9 = vcombine.high %v137_v8, %v137_v8  ;;  %v141_v11 = vpack.c.bf16 %v137_v8, %v137_v8 }
 0x16f   :  { %v142_v10 = vpack.c.bf16 %v138_v9, %v138_v9 }
 0x171   :  { %310 = vmatprep.mubr.bf16.mxu0 %v142_v10 }
 0x172   :  { %311 = vmatmul.mubr.bf16.vlgmr.msra.gmra.mrb[0].mxu0 %v141_v11 }
 0x245   :  { %v356_v12 = vpop.f32.mrb[0].mxu0 }
 0x246   :  { %v357_v14 = vpop.f32.mrb[1].mxu0 }
 0x247   :  { %v358_v15 = vadd.f32 %v357_v14, %v356_v12  ;;  %v359_v16 = vpop.f32.mrb[2].mxu0 }
 0x248   :  { %v360_v17 = vpop.f32.mrb[3].mxu0 }
 0x249   :  { %v313_v18 = vadd.f32 %v358_v15, %v323_v13 }
 0x24b   :  { %318 = vst [vmem:[%s505_s5] sm:$0x3] %v313_v18 }

// kernel: image_encoder_forward.41
= control target key start
LH: loop header
LB: loop body
LE: loop exit
PB: predicated region body
PF: predicated region fallthrough
CT: control target
= control target key end

     0   :  { %vm22_vm0 = vcmask 1041408   ;;  %v222_v2 = vmov 0.0   ;;  %vm223_vm1 = vmmov 0   ;;  %s295_s0 = inlined_call_operand.vmem [shape: f32[2,128], index: 0, kind: input, shape index: {}]   ;;  %s296_s3 = inlined_call_operand.vmem [shape: bf16[128,128], index: 3, kind: input, shape index: {}]   ;;  %s297_s1 = inlined_call_operand.vmem [shape: f32[1,128], index: 1, kind: input, shape index: {}]   ;;  %s298_s2 = inlined_call_operand.vmem [shape: f32[1,128], index: 2, kind: input, shape index: {}]   ;;  %s299_s4 = inlined_call_operand.vmem [shape: f32[1,128], index: 4, kind: input, shape index: {}]   ;;  %s300_s5 = inlined_call_operand.vmem [shape: f32[2,128], index: 5, kind: output, shape index: {}]  }
   0x1   :  { %v21_v0 = vld [vmem:[%s295_s0] sm:$0x3]  ;;  %190 = vmatprep.subr.bf16.mxu0 %v222_v2  ;;  %v213_v4 = vld [vmem:[%s296_s3 + $0x8] sm:$0xff]   ;;  %v214_v10 = vld [vmem:[%s296_s3 + $0x10] sm:$0xff]   ;;  %206 = vmatprep.mubr.msk.bf16.mxu0 %vm223_vm1, %v222_v2 }
   0x2   :  { %v23_v1 = vsel %vm22_vm0, %v21_v0, 0.0  ;;  %v212_v3 = vld [vmem:[%s296_s3] sm:$0xff]   ;;  %v215_v11 = vld [vmem:[%s296_s3 + $0x18] sm:$0xff]   ;;  %v217_v13 = vld [vmem:[%s296_s3 + $0x28] sm:$0xff]  }
   0x3   :  { %24 = vadd.xlane.f32.xlu0 %v23_v1  ;;  %191 = vmatpush3.bf16.msra.mxu0 %v212_v3  ;;  %v216_v12 = vld [vmem:[%s296_s3 + $0x20] sm:$0xff]   ;;  %v218_v14 = vld [vmem:[%s296_s3 + $0x30] sm:$0xff]   ;;  %v219_v15 = vld [vmem:[%s296_s3 + $0x38] sm:$0xff]  }
   0x4   :  { %192 = vmatprep.subr.bf16.mxu0 %v222_v2  ;;  %v170_v20 = vld [vmem:[%s297_s1] ss:$0 sm:$0xff] }
   0x5   :  { %v171_v22 = vld [vmem:[%s298_s2] ss:$0 sm:$0xff] }
   0x6   :  { %v172_v26 = vld [vmem:[%s299_s4] ss:$0 sm:$0xff] }
   0x7   :  { %193 = vmatpush3.bf16.msra.mxu0 %v213_v4 }
   0x8   :  { %194 = vmatprep.subr.bf16.mxu0 %v222_v2 }
   0xb   :  { %195 = vmatpush3.bf16.msra.mxu0 %v214_v10 }
   0xc   :  { %196 = vmatprep.subr.bf16.mxu0 %v222_v2 }
   0xf   :  { %197 = vmatpush3.bf16.msra.mxu0 %v215_v11 }
  0x10   :  { %198 = vmatprep.subr.bf16.mxu0 %v222_v2 }
  0x13   :  { %199 = vmatpush3.bf16.msra.mxu0 %v216_v12 }
  0x14   :  { %200 = vmatprep.subr.bf16.mxu0 %v222_v2 }
  0x17   :  { %201 = vmatpush3.bf16.msra.mxu0 %v217_v13 }
  0x18   :  { %202 = vmatprep.subr.bf16.mxu0 %v222_v2 }
  0x1b   :  { %203 = vmatpush3.bf16.msra.mxu0 %v218_v14 }
  0x1c   :  { %204 = vmatprep.subr.bf16.mxu0 %v222_v2 }
  0x1f   :  { %205 = vmatpush3.bf16.msra.mxu0 %v219_v15 }
  0x90   :  { %v25_v5 = vpop.xlane.xlu0 %24 }
  0x91   :  { %v27_v6 = vmul.f32 0.0078125, %v25_v5 }
  0x93   :  { %v28_v7 = vsub.f32 %v21_v0, %v27_v6 }
  0x95   :  { %v29_v8 = vmul.f32 %v28_v7, %v28_v7 }
  0x97   :  { %v30_v9 = vsel %vm22_vm0, %v29_v8, 0.0 }
  0x98   :  { %31 = vadd.xlane.f32.xlu0 %v30_v9 }
 0x125   :  { %v32_v16 = vpop.xlane.xlu0 %31 }
 0x126   :  { %v33_v17 = vmul.f32 0.0078125, %v32_v16 }
 0x128   :  { %v34_v18 = vadd.f32 1e-06, %v33_v17 }
 0x12a   :  { %220 = vrsqrt.f32 %v34_v18 }
 0x134   :  { %v221_v19 = vpop.eup %220 }
 0x135   :  { %v36_v21 = vmul.f32 %v221_v19, %v28_v7 }
 0x137   :  { %v44_v23 = vmul.f32 %v170_v20, %v36_v21 }
 0x139   :  { %v52_v24 = vadd.f32 %v171_v22, %v44_v23 }
 0x13b   :  { %v53_v25 = vpack.c.bf16 %v52_v24, %v52_v24 }
 0x13d   :  { %207 = vmatmul.mubr.bf16.vlgmr.msra.gmra.mrb[0].mxu0 %v53_v25 }
 0x210   :  { %v159_v27 = vpop.f32.mrb[0].mxu0 }
 0x211   :  { %v160_v28 = vadd.f32 %v172_v26, %v159_v27  ;;  %v208_v29 = vpop.f32.mrb[1].mxu0 }
 0x212   :  { %v162_v30 = vpop.f32.mrb[2].mxu0 }
 0x213   :  { %165 = vst [vmem:[%s300_s5] sm:$0x3] %v160_v28  ;;  %v209_v31 = vpop.f32.mrb[3].mxu0 }

// kernel: image_encoder_forward.24
= control target key start
LH: loop header
LB: loop body
LE: loop exit
PB: predicated region body
PF: predicated region fallthrough
CT: control target
= control target key end

     0   :  { %vm52_vm0 = vcmask 392192   ;;  %s196_s1 = inlined_call_operand.vmem [shape: bf16[48,128], index: 1, kind: input, shape index: {}]   ;;  %s197_s0 = inlined_call_operand.vmem [shape: f32[32,48], index: 0, kind: input, shape index: {}]   ;;  %s198_s2 = inlined_call_operand.vmem [shape: f32[1,128], index: 2, kind: input, shape index: {}]   ;;  %s199_s3 = inlined_call_operand.vmem [shape: f32[32,128], index: 3, kind: output, shape index: {}]  }
   0x1   :  { %v137_v0 = vld [vmem:[%s196_s1] sm:$0xff]   ;;  %v138_v1 = vld [vmem:[%s196_s1 + $0x8] sm:$0xff]   ;;  %v139_v4 = vld [vmem:[%s196_s1 + $0x10] sm:$0xff]  }
   0x2   :  { %127 = vmatprep.subr.bf16.mxu0 %v137_v0  ;;  %v15_v2 = vld [vmem:[%s197_s0] sm:$0xff]  ;;  %v16_v3 = vld [vmem:[%s197_s0 + $0x8] sm:$0xff]  ;;  %v17_v6 = vld [vmem:[%s197_s0 + $0x10] sm:$0xff] }
   0x3   :  { %128 = vmatpush3.bf16.msra.mxu0 %v137_v0  ;;  %v19_v5 = vpack.c.bf16 %v16_v3, %v15_v2  ;;  %v18_v7 = vld [vmem:[%s197_s0 + $0x18] sm:$0xff]  ;;  %v116_v9 = vld [vmem:[%s198_s2] ss:$0 sm:$0xff] }
   0x4   :  { %129 = vmatprep.subr.bf16.mxu0 %v138_v1  ;;  %v20_v8 = vpack.c.bf16 %v18_v7, %v17_v6 }
   0x5   :  { %133 = vmatprep.mubr.msk.bf16.mxu0 %vm52_vm0, %v19_v5 }
   0x7   :  { %130 = vmatpush3.bf16.msra.mxu0 %v138_v1 }
   0x8   :  { %131 = vmatprep.subr.bf16.mxu0 %v139_v4 }
   0xb   :  { %132 = vmatpush3.bf16.msra.mxu0 %v139_v4 }
   0xe   :  { %134 = vmatmul.mubr.msk.bf16.vlgmr.msra.gmra.mrb[0].mxu0 %vm52_vm0, %v20_v8 }
  0xe1   :  { %v135_v10 = vpop.f32.mrb[0].mxu0 }
  0xe2   :  { %v102_v11 = vadd.f32 %v135_v10, %v116_v9  ;;  %v93_v12 = vpop.f32.mrb[1].mxu0 }
  0xe3   :  { %v94_v13 = vadd.f32 %v116_v9, %v93_v12  ;;  %v136_v14 = vpop.f32.mrb[2].mxu0 }
  0xe4   :  { %110 = vst [vmem:[%s199_s3 + $0x10] sm:$0xff] %v102_v11  ;;  %v105_v15 = vadd.f32 %v136_v14, %v116_v9  ;;  %v96_v16 = vpop.f32.mrb[3].mxu0 }
  0xe5   :  { %108 = vst [vmem:[%s199_s3] sm:$0xff] %v94_v13  ;;  %v97_v17 = vadd.f32 %v116_v9, %v96_v16 }
  0xe6   :  { %111 = vst [vmem:[%s199_s3 + $0x18] sm:$0xff] %v105_v15 }
  0xe7   :  { %109 = vst [vmem:[%s199_s3 + $0x8] sm:$0xff] %v97_v17 }

// kernel: image_encoder_forward.33
= control target key start
LH: loop header
LB: loop body
LE: loop exit
PB: predicated region body
PF: predicated region fallthrough
CT: control target
= control target key end

     0   :  { %vm33_vm0 = vcmask 1041408   ;;  %s3728_s0 = inlined_call_operand.vmem [shape: f32[10,256], index: 0, kind: input, shape index: {}]   ;;  %s3729_s3 = inlined_call_operand.vmem [shape: bf16[256,1024], index: 3, kind: input, shape index: {}]   ;;  %s3730_s1 = inlined_call_operand.vmem [shape: f32[1,256], index: 1, kind: input, shape index: {}]   ;;  %s3731_s2 = inlined_call_operand.vmem [shape: f32[1,256], index: 2, kind: input, shape index: {}]   ;;  %s3732_s5 = inlined_call_operand.vmem [shape: bf16[1024,256], index: 5, kind: input, shape index: {}]   ;;  %s3733_s4 = inlined_call_operand.vmem [shape: f32[1,1024], index: 4, kind: input, shape index: {}]   ;;  %s3734_s6 = inlined_call_operand.vmem [shape: f32[1,256], index: 6, kind: input, shape index: {}]   ;;  %s3735_s7 = inlined_call_operand.vmem [shape: f32[10,256], index: 7, kind: output, shape index: {}]  }
   0x1   :  { %v2747_v0 = vld [vmem:[%s3728_s0 + $0x10] sm:$0x3]  ;;  %v2752_v1 = vld [vmem:[%s3728_s0 + $0x18] sm:$0x3]  ;;  %v2761_v4 = vld [vmem:[%s3728_s0] sm:$0xff] }
   0x2   :  { %v34_v2 = vsel %vm33_vm0, %v2747_v0, 0.0  ;;  %v35_v3 = vsel %vm33_vm0, %v2752_v1, 0.0  ;;  %v2766_v5 = vld [vmem:[%s3728_s0 + $0x8] sm:$0xff]  ;;  %v102_v8 = vld [vmem:[%s3729_s3] sm:$0xff] }
   0x3   :  { %v36_v6 = vadd.f32 %v35_v3, %v34_v2  ;;  %v30_v7 = vadd.f32 %v2766_v5, %v2761_v4  ;;  %v106_v9 = vld [vmem:[%s3729_s3 + $0x20] sm:$0xff] }
   0x4   :  { %v110_v10 = vld [vmem:[%s3729_s3 + $0x40] sm:$0xff]  ;;  %v2201_v11 = vcombine.high %v102_v8, %v106_v9  ;;  %v2200_v12 = vcombine.low %v102_v8, %v106_v9 }
   0x5   :  { %37 = vadd.xlane.f32.xlu0 %v36_v6  ;;  %v114_v13 = vld [vmem:[%s3729_s3 + $0x60] sm:$0xff] }
   0x6   :  { %v2209_v14 = vcombine.high %v110_v10, %v114_v13  ;;  %v118_v15 = vld [vmem:[%s3729_s3 + $0x80] sm:$0xff]  ;;  %912 = vmatprep.subr.bf16.mxu1 %v2201_v11  ;;  %v2208_v17 = vcombine.low %v110_v10, %v114_v13 }
   0x7   :  { %v122_v16 = vld [vmem:[%s3729_s3 + $0xa0] sm:$0xff]  ;;  %913 = vmatpush1.bf16.msra.mxu1 %v2200_v12 }
   0x8   :  { %914 = vmatprep.subr.bf16.mxu1 %v2209_v14  ;;  %v2217_v18 = vcombine.high %v118_v15, %v122_v16  ;;  %v126_v19 = vld [vmem:[%s3729_s3 + $0xc0] sm:$0xff]  ;;  %v2216_v21 = vcombine.low %v118_v15, %v122_v16 }
   0x9   :  { %31 = vadd.xlane.f32.xlu0 %v30_v7  ;;  %v130_v20 = vld [vmem:[%s3729_s3 + $0xe0] sm:$0xff] }
   0xa   :  { %v2225_v22 = vcombine.high %v126_v19, %v130_v20  ;;  %v134_v23 = vld [vmem:[%s3729_s3 + $0x100] sm:$0xff]  ;;  %v2224_v25 = vcombine.low %v126_v19, %v130_v20 }
   0xb   :  { %915 = vmatpush1.bf16.msra.mxu1 %v2208_v17  ;;  %v138_v24 = vld [vmem:[%s3729_s3 + $0x120] sm:$0xff] }
   0xc   :  { %916 = vmatprep.subr.bf16.mxu1 %v2217_v18  ;;  %v2233_v26 = vcombine.high %v134_v23, %v138_v24  ;;  %v142_v27 = vld [vmem:[%s3729_s3 + $0x140] sm:$0xff]  ;;  %v2232_v29 = vcombine.low %v134_v23, %v138_v24  ;;  %v103_v24 = vld [vmem:[%s3729_s3 + $0x8] sm:$0xff] }
   0xd   :  { %v146_v28 = vld [vmem:[%s3729_s3 + $0x160] sm:$0xff] }
   0xe   :  { %v2241_v30 = vcombine.high %v142_v27, %v146_v28  ;;  %v150_v31 = vld [vmem:[%s3729_s3 + $0x180] sm:$0xff]  ;;  %v2240_v33 = vcombine.low %v142_v27, %v146_v28 }
   0xf   :  { %917 = vmatpush1.bf16.msra.mxu1 %v2216_v21  ;;  %v154_v32 = vld [vmem:[%s3729_s3 + $0x1a0] sm:$0xff] }
  0x10   :  { %918 = vmatprep.subr.bf16.mxu1 %v2225_v22  ;;  %v2249_v34 = vcombine.high %v150_v31, %v154_v32  ;;  %v158_v35 = vld [vmem:[%s3729_s3 + $0x1c0] sm:$0xff]  ;;  %v2248_v37 = vcombine.low %v150_v31, %v154_v32  ;;  %v70_v32 = vlaneseq }
  0x11   :  { %v162_v36 = vld [vmem:[%s3729_s3 + $0x1e0] sm:$0xff] }
  0x12   :  { %v2257_v38 = vcombine.high %v158_v35, %v162_v36  ;;  %v166_v39 = vld [vmem:[%s3729_s3 + $0x200] sm:$0xff]  ;;  %v2256_v41 = vcombine.low %v158_v35, %v162_v36  ;;  %v2894_v35 = vshrl.u32 %v70_v32, 7  ;;  %v187_v32 = vld [vmem:[%s3729_s3 + $0x2a8] sm:$0xff] }
  0x13   :  { %919 = vmatpush1.bf16.msra.mxu1 %v2224_v25  ;;  %v170_v40 = vld [vmem:[%s3729_s3 + $0x220] sm:$0xff]  ;;  %v107_v25 = vld [vmem:[%s3729_s3 + $0x28] sm:$0xff] }
  0x14   :  { %920 = vmatprep.subr.bf16.mxu1 %v2233_v26  ;;  %v2265_v42 = vcombine.high %v166_v39, %v170_v40  ;;  %v174_v43 = vld [vmem:[%s3729_s3 + $0x240] sm:$0xff]  ;;  %v2264_v45 = vcombine.low %v166_v39, %v170_v40  ;;  %v2203_v26 = vcombine.high %v103_v24, %v107_v25  ;;  %v2202_v27 = vcombine.low %v103_v24, %v107_v25  ;;  %v171_v24 = vld [vmem:[%s3729_s3 + $0x228] sm:$0xff] }
  0x15   :  { %v178_v44 = vld [vmem:[%s3729_s3 + $0x260] sm:$0xff]  ;;  %v2897_v36 = vsub.s32 1, %v2894_v35 }
  0x16   :  { %v2273_v46 = vcombine.high %v174_v43, %v178_v44  ;;  %v2272_v63 = vcombine.low %v174_v43, %v178_v44  ;;  %v198_v8 = vld [vmem:[%s3729_s3 + $0x300] sm:$0xff] }
  0x17   :  { %921 = vmatpush1.bf16.msra.mxu1 %v2232_v29  ;;  %v202_v9 = vld [vmem:[%s3729_s3 + $0x320] sm:$0xff] }
  0x18   :  { %922 = vmatprep.subr.bf16.mxu1 %v2241_v30  ;;  %v2297_v10 = vcombine.high %v198_v8, %v202_v9  ;;  %v2296_v11 = vcombine.low %v198_v8, %v202_v9  ;;  %v206_v12 = vld [vmem:[%s3729_s3 + $0x340] sm:$0xff]  ;;  %v139_v8 = vld [vmem:[%s3729_s3 + $0x128] sm:$0xff] }
  0x19   :  { %v210_v13 = vld [vmem:[%s3729_s3 + $0x360] sm:$0xff] }
  0x1a   :  { %v2305_v14 = vcombine.high %v206_v12, %v210_v13  ;;  %v2304_v15 = vcombine.low %v206_v12, %v210_v13  ;;  %v214_v16 = vld [vmem:[%s3729_s3 + $0x380] sm:$0xff]  ;;  %v147_v12 = vld [vmem:[%s3729_s3 + $0x168] sm:$0xff] }
  0x1b   :  { %923 = vmatpush1.bf16.msra.mxu1 %v2240_v33  ;;  %v218_v17 = vld [vmem:[%s3729_s3 + $0x3a0] sm:$0xff] }
  0x1c   :  { %924 = vmatprep.subr.bf16.mxu1 %v2249_v34  ;;  %v2313_v18 = vcombine.high %v214_v16, %v218_v17  ;;  %v2312_v19 = vcombine.low %v214_v16, %v218_v17  ;;  %v222_v20 = vld [vmem:[%s3729_s3 + $0x3c0] sm:$0xff]  ;;  %v155_v16 = vld [vmem:[%s3729_s3 + $0x1a8] sm:$0xff] }
  0x1d   :  { %v226_v21 = vld [vmem:[%s3729_s3 + $0x3e0] sm:$0xff] }
  0x1e   :  { %v2321_v22 = vcombine.high %v222_v20, %v226_v21  ;;  %v2320_v23 = vcombine.low %v222_v20, %v226_v21  ;;  %v84_v43 = vld [vmem:[%s3731_s2] sm:$0x3]  ;;  %v163_v20 = vld [vmem:[%s3729_s3 + $0x1e8] sm:$0xff] }
  0x1f   :  { %925 = vmatpush1.bf16.msra.mxu1 %v2248_v37  ;;  %v2900_v37 = vsub.s32 0, %v2894_v35 }
  0x20   :  { %926 = vmatprep.subr.bf16.mxu1 %v2257_v38  ;;  %v68_v38 = vld [vmem:[%s3730_s1] sm:$0x3] }
  0x21   :  { %v73_v44 = vrot.slane %v68_v38, %v2900_v37 }
  0x23   :  { %927 = vmatpush1.bf16.msra.mxu1 %v2256_v41 }
  0x24   :  { %928 = vmatprep.subr.bf16.mxu1 %v2265_v42  ;;  %v77_v42 = vrot.slane %v68_v38, %v2897_v36  ;;  %v191_v38 = vld [vmem:[%s3729_s3 + $0x2c8] sm:$0xff] }
  0x27   :  { %929 = vmatpush1.bf16.msra.mxu1 %v2264_v45 }
  0x28   :  { %930 = vmatprep.subr.bf16.mxu1 %v2273_v46  ;;  %v93_v46 = vrot.slane %v84_v43, %v2897_v36 }
  0x2b   :  { %931 = vmatpush1.bf16.msra.mxu1 %v2272_v63  ;;  %v119_v63 = vld [vmem:[%s3729_s3 + $0x88] sm:$0xff] }
  0x92   :  { %v38_v47 = vpop.xlane.xlu0 %37 }
  0x93   :  { %v41_v48 = vmul.f32 0.00390625, %v38_v47  ;;  %v89_v47 = vrot.slane %v84_v43, %v2900_v37  ;;  %v203_v43 = vld [vmem:[%s3729_s3 + $0x328] sm:$0xff] }
  0x95   :  { %v2831_v49 = vsub.f32 %v2747_v0, %v41_v48  ;;  %v2834_v50 = vsub.f32 %v2752_v1, %v41_v48  ;;  %v182_v0 = vld [vmem:[%s3729_s3 + $0x280] sm:$0xff] }
  0x96   :  { %v32_v51 = vpop.xlane.xlu0 %31  ;;  %v186_v1 = vld [vmem:[%s3729_s3 + $0x2a0] sm:$0xff] }
  0x97   :  { %v40_v52 = vmul.f32 0.00390625, %v32_v51  ;;  %v48_v55 = vmul.f32 %v2831_v49, %v2831_v49  ;;  %v49_v56 = vmul.f32 %v2834_v50, %v2834_v50  ;;  %v2281_v2 = vcombine.high %v182_v0, %v186_v1 }
  0x98   :  { %v2280_v3 = vcombine.low %v182_v0, %v186_v1  ;;  %v123_v0 = vld [vmem:[%s3729_s3 + $0xa8] sm:$0xff] }
  0x99   :  { %v2837_v53 = vsub.f32 %v2761_v4, %v40_v52  ;;  %v2840_v54 = vsub.f32 %v2766_v5, %v40_v52  ;;  %v53_v60 = vsel %vm33_vm0, %v48_v55, 0.0  ;;  %v54_v61 = vsel %vm33_vm0, %v49_v56, 0.0  ;;  %932 = vmatprep.subr.bf16.mxu1 %v2281_v2  ;;  %v190_v4 = vld [vmem:[%s3729_s3 + $0x2c0] sm:$0xff] }
  0x9a   :  { %v55_v62 = vadd.f32 %v54_v61, %v53_v60  ;;  %933 = vmatpush1.bf16.msra.mxu1 %v2280_v3  ;;  %v194_v5 = vld [vmem:[%s3729_s3 + $0x2e0] sm:$0xff]  ;;  %v111_v60 = vld [vmem:[%s3729_s3 + $0x48] sm:$0xff]  ;;  %v2219_v2 = vcombine.high %v119_v63, %v123_v0 }
  0x9b   :  { %v46_v57 = vmul.f32 %v2837_v53, %v2837_v53  ;;  %v47_v58 = vmul.f32 %v2840_v54, %v2840_v54  ;;  %v2289_v6 = vcombine.high %v190_v4, %v194_v5  ;;  %v2288_v7 = vcombine.low %v190_v4, %v194_v5  ;;  %v115_v61 = vld [vmem:[%s3729_s3 + $0x68] sm:$0xff] }
  0x9c   :  { %v2210_v1 = vcombine.low %v111_v60, %v115_v61  ;;  %v127_v3 = vld [vmem:[%s3729_s3 + $0xc8] sm:$0xff]  ;;  %v2218_v5 = vcombine.low %v119_v63, %v123_v0 }
  0x9d   :  { %v50_v59 = vadd.f32 %v47_v58, %v46_v57  ;;  %934 = vmatprep.subr.bf16.mxu1 %v2289_v6  ;;  %v131_v4 = vld [vmem:[%s3729_s3 + $0xe8] sm:$0xff] }
  0x9e   :  { %935 = vmatpush1.bf16.msra.mxu1 %v2288_v7  ;;  %v2227_v6 = vcombine.high %v127_v3, %v131_v4  ;;  %v135_v7 = vld [vmem:[%s3729_s3 + $0x108] sm:$0xff]  ;;  %v2226_v9 = vcombine.low %v127_v3, %v131_v4  ;;  %v2475_v3 = vld [vmem:[%s3732_s5 + $0x14] ss:$8 sps:$4 sm:$0xff]  }
  0x9f   :  { %51 = vadd.xlane.f32.xlu1 %v50_v59  ;;  %936 = vmatprep.subr.bf16.mxu1 %v2297_v10  ;;  %v2235_v10 = vcombine.high %v135_v7, %v139_v8  ;;  %v2234_v13 = vcombine.low %v135_v7, %v139_v8  ;;  %v2474_v63 = vld [vmem:[%s3732_s5] ss:$8 sps:$4 sm:$0xff]   ;;  %v120_v7 = vld [vmem:[%s3729_s3 + $0x90] sm:$0xff] }
  0xa0   :  { %v124_v8 = vld [vmem:[%s3729_s3 + $0xb0] sm:$0xff] }
  0xa2   :  { %937 = vmatpush1.bf16.msra.mxu1 %v2296_v11  ;;  %v143_v11 = vld [vmem:[%s3729_s3 + $0x148] sm:$0xff] }
  0xa3   :  { %56 = vadd.xlane.f32.xlu1 %v55_v62  ;;  %938 = vmatprep.subr.bf16.mxu1 %v2305_v14  ;;  %v2243_v14 = vcombine.high %v143_v11, %v147_v12  ;;  %v2242_v17 = vcombine.low %v143_v11, %v147_v12  ;;  %v2480_v11 = vld [vmem:[%s3732_s5 + $0x20] ss:$8 sps:$4 sm:$0xff]   ;;  %v2481_v12 = vld [vmem:[%s3732_s5 + $0x34] ss:$8 sps:$4 sm:$0xff]  }
  0xa6   :  { %939 = vmatpush1.bf16.msra.mxu1 %v2304_v15  ;;  %v151_v15 = vld [vmem:[%s3729_s3 + $0x188] sm:$0xff] }
  0xa7   :  { %940 = vmatprep.subr.bf16.mxu1 %v2313_v18  ;;  %v2251_v18 = vcombine.high %v151_v15, %v155_v16  ;;  %v2250_v21 = vcombine.low %v151_v15, %v155_v16  ;;  %v2484_v15 = vld [vmem:[%s3732_s5 + $0x44] ss:$8 sps:$4 sm:$0xff]   ;;  %v2221_v16 = vcombine.high %v120_v7, %v124_v8 }
  0xaa   :  { %941 = vmatpush1.bf16.msra.mxu1 %v2312_v19  ;;  %v159_v19 = vld [vmem:[%s3729_s3 + $0x1c8] sm:$0xff] }
  0xab   :  { %942 = vmatprep.subr.bf16.mxu1 %v2321_v22  ;;  %v2259_v22 = vcombine.high %v159_v19, %v163_v20  ;;  %v2258_v25 = vcombine.low %v159_v19, %v163_v20  ;;  %v2486_v19 = vld [vmem:[%s3732_s5 + $0x40] ss:$8 sps:$4 sm:$0xff]   ;;  %v2487_v20 = vld [vmem:[%s3732_s5 + $0x54] ss:$8 sps:$4 sm:$0xff]  }
  0xae   :  { %943 = vmatpush1.bf16.msra.mxu1 %v2320_v23  ;;  %v167_v23 = vld [vmem:[%s3729_s3 + $0x208] sm:$0xff] }
  0xaf   :  { %955 = vmatprep.subr.bf16.mxu1 %v2203_v26  ;;  %v2267_v26 = vcombine.high %v167_v23, %v171_v24 }
 0x12c   :  { %v52_v28 = vpop.xlane.xlu1 %51 }
 0x12d   :  { %v58_v29 = vmul.f32 0.00390625, %v52_v28  ;;  %v179_v28 = vld [vmem:[%s3729_s3 + $0x268] sm:$0xff] }
 0x12f   :  { %v60_v30 = vadd.f32 1e-06, %v58_v29  ;;  %v2266_v29 = vcombine.low %v167_v23, %v171_v24  ;;  %v140_v23 = vld [vmem:[%s3729_s3 + $0x130] sm:$0xff] }
 0x130   :  { %v57_v31 = vpop.xlane.xlu1 %56 }
 0x131   :  { %2664 = vrsqrt.f32 %v60_v30  ;;  %v59_v33 = vmul.f32 0.00390625, %v57_v31  ;;  %v183_v31 = vld [vmem:[%s3729_s3 + $0x288] sm:$0xff] }
 0x133   :  { %v61_v34 = vadd.f32 1e-06, %v59_v33 }
 0x135   :  { %2666 = vrsqrt.f32 %v61_v34  ;;  %v2283_v34 = vcombine.high %v183_v31, %v187_v32 }
 0x13b   :  { %v2665_v39 = vpop.eup %2664 }
 0x13c   :  { %v64_v40 = vmul.f32 %v2665_v39, %v2837_v53  ;;  %v65_v41 = vmul.f32 %v2665_v39, %v2840_v54  ;;  %v195_v39 = vld [vmem:[%s3729_s3 + $0x2e8] sm:$0xff] }
 0x13e   :  { %v81_v52 = vmul.f32 %v77_v42, %v65_v41  ;;  %v80_v53 = vmul.f32 %v73_v44, %v64_v40  ;;  %v2282_v40 = vcombine.low %v183_v31, %v187_v32  ;;  %v2291_v41 = vcombine.high %v191_v38, %v195_v39  ;;  %v2492_v31 = vld [vmem:[%s3732_s5 + $0x60] ss:$8 sps:$4 sm:$0xff]   ;;  %v2493_v32 = vld [vmem:[%s3732_s5 + $0x74] ss:$8 sps:$4 sm:$0xff]  }
 0x13f   :  { %v2667_v45 = vpop.eup %2666 }
 0x140   :  { %v66_v48 = vmul.f32 %v2667_v45, %v2831_v49  ;;  %v67_v51 = vmul.f32 %v2667_v45, %v2834_v50  ;;  %v97_v56 = vadd.f32 %v93_v46, %v81_v52  ;;  %v96_v58 = vadd.f32 %v89_v47, %v80_v53  ;;  %v215_v52 = vld [vmem:[%s3729_s3 + $0x388] sm:$0xff] }
 0x141   :  { %v2211_v50 = vcombine.high %v111_v60, %v115_v61  ;;  %v219_v53 = vld [vmem:[%s3729_s3 + $0x3a8] sm:$0xff]  ;;  %v104_v61 = vld [vmem:[%s3729_s3 + $0x10] sm:$0xff] }
 0x142   :  { %v83_v54 = vmul.f32 %v77_v42, %v67_v51  ;;  %v82_v55 = vmul.f32 %v73_v44, %v66_v48  ;;  %v199_v42 = vld [vmem:[%s3729_s3 + $0x308] sm:$0xff]  ;;  %v2290_v44 = vcombine.low %v191_v38, %v195_v39  ;;  %v156_v38 = vld [vmem:[%s3729_s3 + $0x1b0] sm:$0xff] }
 0x143   :  { %v2299_v45 = vcombine.high %v199_v42, %v203_v43  ;;  %v2298_v48 = vcombine.low %v199_v42, %v203_v43  ;;  %v164_v42 = vld [vmem:[%s3729_s3 + $0x1f0] sm:$0xff] }
 0x144   :  { %v99_v57 = vadd.f32 %v93_v46, %v83_v54  ;;  %v98_v59 = vadd.f32 %v89_v47, %v82_v55  ;;  %v207_v46 = vld [vmem:[%s3729_s3 + $0x348] sm:$0xff]  ;;  %v2315_v55 = vcombine.high %v215_v52, %v219_v53 }
 0x145   :  { %v211_v47 = vld [vmem:[%s3729_s3 + $0x368] sm:$0xff] }
 0x146   :  { %v2922_v62 = vpack.c.bf16 %v99_v57, %v97_v56  ;;  %v2924_v49 = vpack.c.bf16 %v98_v59, %v96_v58  ;;  %v2307_v51 = vcombine.high %v207_v46, %v211_v47  ;;  %v2306_v54 = vcombine.low %v207_v46, %v211_v47  ;;  %v223_v56 = vld [vmem:[%s3729_s3 + $0x3c8] sm:$0xff]  ;;  %v168_v46 = vld [vmem:[%s3729_s3 + $0x210] sm:$0xff] }
 0x147   :  { %v227_v57 = vld [vmem:[%s3729_s3 + $0x3e8] sm:$0xff]  ;;  %v2314_v58 = vcombine.low %v215_v52, %v219_v53  ;;  %v172_v47 = vld [vmem:[%s3729_s3 + $0x230] sm:$0xff] }
 0x148   :  { %944 = vmatprep.mubr.bf16.mxu1 %v2922_v62  ;;  %v2472_v59 = vld [vmem:[%s3732_s5 + $0x4] ss:$8 sps:$4 sm:$0xff]   ;;  %v2323_v60 = vcombine.high %v223_v56, %v227_v57  ;;  %v2322_v0 = vcombine.low %v223_v56, %v227_v57  ;;  %v2498_v52 = vld [vmem:[%s3732_s5 + $0x80] ss:$8 sps:$4 sm:$0xff]   ;;  %v2499_v56 = vld [vmem:[%s3732_s5 + $0x94] ss:$8 sps:$4 sm:$0xff]   ;;  %v2269_v57 = vcombine.high %v168_v46, %v172_v47 }
 0x149   :  { %945 = vmatmul.mubr.bf16.vlgmr.msra.gmra.mrb[0].mxu1 %v2924_v49  ;;  %2016 = vmatprep.subr.bf16.mxu0 %v2472_v59  ;;  %v2268_v59 = vcombine.low %v168_v46, %v172_v47  ;;  %v125_v46 = vld [vmem:[%s3729_s3 + $0xb8] sm:$0xff] }
 0x14a   :  { %956 = vmatpush1.bf16.msra.mxu1 %v2202_v27  ;;  %987 = vmatprep.mubr.bf16.mxu1 %v2922_v62  ;;  %v175_v27 = vld [vmem:[%s3729_s3 + $0x248] sm:$0xff] }
 0x14b   :  { %957 = vmatprep.subr.bf16.mxu1 %v2211_v50  ;;  %v2275_v30 = vcombine.high %v175_v27, %v179_v28  ;;  %v2274_v33 = vcombine.low %v175_v27, %v179_v28  ;;  %v108_v50 = vld [vmem:[%s3729_s3 + $0x30] sm:$0xff]  ;;  %2017 = vmatpush1.bf16.msra.mxu0 %v2474_v63 }
 0x14c   :  { %v2205_v4 = vcombine.high %v104_v61, %v108_v50  ;;  %2018 = vmatprep.subr.bf16.mxu0 %v2475_v3  ;;  %v144_v28 = vld [vmem:[%s3729_s3 + $0x150] sm:$0xff] }
 0x14e   :  { %958 = vmatpush1.bf16.msra.mxu1 %v2210_v1  ;;  %v112_v1 = vld [vmem:[%s3729_s3 + $0x50] sm:$0xff] }
 0x14f   :  { %959 = vmatprep.subr.bf16.mxu1 %v2219_v2  ;;  %v116_v2 = vld [vmem:[%s3729_s3 + $0x70] sm:$0xff] }
 0x152   :  { %960 = vmatpush1.bf16.msra.mxu1 %v2218_v5  ;;  %v2477_v5 = vld [vmem:[%s3732_s5 + $0x10] ss:$8 sps:$4 sm:$0xff]  }
 0x153   :  { %961 = vmatprep.subr.bf16.mxu1 %v2227_v6  ;;  %2019 = vmatpush1.bf16.msra.mxu0 %v2477_v5  ;;  %v2204_v6 = vcombine.low %v104_v61, %v108_v50  ;;  %v188_v61 = vld [vmem:[%s3729_s3 + $0x2b0] sm:$0xff]  ;;  %v2502_v50 = vld [vmem:[%s3732_s5 + $0xa4] ss:$8 sps:$4 sm:$0xff]  }
 0x154   :  { %v2508_v5 = vld [vmem:[%s3732_s5 + $0xc4] ss:$8 sps:$4 sm:$0xff]  }
 0x156   :  { %962 = vmatpush1.bf16.msra.mxu1 %v2226_v9  ;;  %v2478_v9 = vld [vmem:[%s3732_s5 + $0x24] ss:$8 sps:$4 sm:$0xff]  }
 0x157   :  { %963 = vmatprep.subr.bf16.mxu1 %v2235_v10  ;;  %v2213_v10 = vcombine.high %v112_v1, %v116_v2  ;;  %2020 = vmatprep.subr.bf16.mxu0 %v2478_v9  ;;  %v2511_v9 = vld [vmem:[%s3732_s5 + $0xd4] ss:$8 sps:$4 sm:$0xff]  }
 0x158   :  { %2021 = vmatpush1.bf16.msra.mxu0 %v2480_v11  ;;  %v200_v11 = vld [vmem:[%s3729_s3 + $0x310] sm:$0xff] }
 0x159   :  { %2022 = vmatprep.subr.bf16.mxu0 %v2481_v12  ;;  %v204_v12 = vld [vmem:[%s3729_s3 + $0x330] sm:$0xff] }
 0x15a   :  { %964 = vmatpush1.bf16.msra.mxu1 %v2234_v13  ;;  %v2483_v13 = vld [vmem:[%s3732_s5 + $0x30] ss:$8 sps:$4 sm:$0xff]  }
 0x15b   :  { %965 = vmatprep.subr.bf16.mxu1 %v2243_v14  ;;  %v2212_v14 = vcombine.low %v112_v1, %v116_v2  ;;  %v2505_v2 = vld [vmem:[%s3732_s5 + $0xb4] ss:$8 sps:$4 sm:$0xff]  }
 0x15c   :  { %2023 = vmatpush1.bf16.msra.mxu0 %v2483_v13 }
 0x15d   :  { %2024 = vmatprep.subr.bf16.mxu0 %v2484_v15  ;;  %v2514_v15 = vld [vmem:[%s3732_s5 + $0xe4] ss:$8 sps:$4 sm:$0xff]  }
 0x15e   :  { %966 = vmatpush1.bf16.msra.mxu1 %v2242_v17  ;;  %v128_v17 = vld [vmem:[%s3729_s3 + $0xd0] sm:$0xff] }
 0x15f   :  { %967 = vmatprep.subr.bf16.mxu1 %v2251_v18  ;;  %v132_v18 = vld [vmem:[%s3729_s3 + $0xf0] sm:$0xff] }
 0x160   :  { %v2229_v24 = vcombine.high %v128_v17, %v132_v18  ;;  %2025 = vmatpush1.bf16.msra.mxu0 %v2486_v19  ;;  %v2228_v27 = vcombine.low %v128_v17, %v132_v18  ;;  %v208_v17 = vld [vmem:[%s3729_s3 + $0x350] sm:$0xff]  ;;  %v2301_v19 = vcombine.high %v200_v11, %v204_v12 }
 0x161   :  { %2026 = vmatprep.subr.bf16.mxu0 %v2487_v20  ;;  %v212_v18 = vld [vmem:[%s3729_s3 + $0x370] sm:$0xff]  ;;  %v2516_v20 = vld [vmem:[%s3732_s5 + $0xe0] ss:$8 sps:$4 sm:$0xff]  }
 0x162   :  { %968 = vmatpush1.bf16.msra.mxu1 %v2250_v21  ;;  %v2220_v21 = vcombine.low %v120_v7, %v124_v8  ;;  %v196_v7 = vld [vmem:[%s3729_s3 + $0x2f0] sm:$0xff]  ;;  %v2510_v8 = vld [vmem:[%s3732_s5 + $0xc0] ss:$8 sps:$4 sm:$0xff]  }
 0x163   :  { %969 = vmatprep.subr.bf16.mxu1 %v2259_v22  ;;  %v136_v22 = vld [vmem:[%s3729_s3 + $0x110] sm:$0xff] }
 0x166   :  { %970 = vmatpush1.bf16.msra.mxu1 %v2258_v25  ;;  %v2489_v25 = vld [vmem:[%s3732_s5 + $0x50] ss:$8 sps:$4 sm:$0xff]  }
 0x167   :  { %971 = vmatprep.subr.bf16.mxu1 %v2267_v26  ;;  %v2490_v26 = vld [vmem:[%s3732_s5 + $0x64] ss:$8 sps:$4 sm:$0xff]   ;;  %2027 = vmatpush1.bf16.msra.mxu0 %v2489_v25  ;;  %v220_v25 = vld [vmem:[%s3729_s3 + $0x3b0] sm:$0xff] }
 0x168   :  { %2028 = vmatprep.subr.bf16.mxu0 %v2490_v26  ;;  %v2519_v26 = vld [vmem:[%s3732_s5 + $0xf0] ss:$8 sps:$4 sm:$0xff]  }
 0x16a   :  { %972 = vmatpush1.bf16.msra.mxu1 %v2266_v29  ;;  %v148_v29 = vld [vmem:[%s3729_s3 + $0x170] sm:$0xff] }
 0x16b   :  { %973 = vmatprep.subr.bf16.mxu1 %v2275_v30  ;;  %v2237_v30 = vcombine.high %v136_v22, %v140_v23  ;;  %v2245_v39 = vcombine.high %v144_v28, %v148_v29  ;;  %2029 = vmatpush1.bf16.msra.mxu0 %v2492_v31 }
 0x16c   :  { %2030 = vmatprep.subr.bf16.mxu0 %v2493_v32  ;;  %v2522_v32 = vld [vmem:[%s3732_s5 + $0x104] ss:$8 sps:$4 sm:$0xff]  }
 0x16e   :  { %974 = vmatpush1.bf16.msra.mxu1 %v2274_v33  ;;  %v2236_v33 = vcombine.low %v136_v22, %v140_v23  ;;  %v2517_v22 = vld [vmem:[%s3732_s5 + $0xf4] ss:$8 sps:$4 sm:$0xff]   ;;  %v2309_v23 = vcombine.high %v208_v17, %v212_v18 }
 0x16f   :  { %975 = vmatprep.subr.bf16.mxu1 %v2283_v34  ;;  %v152_v34 = vld [vmem:[%s3729_s3 + $0x190] sm:$0xff] }
 0x170   :  { %v2253_v43 = vcombine.high %v152_v34, %v156_v38 }
 0x172   :  { %976 = vmatpush1.bf16.msra.mxu1 %v2282_v40  ;;  %v2244_v40 = vcombine.low %v144_v28, %v148_v29  ;;  %v224_v29 = vld [vmem:[%s3729_s3 + $0x3d0] sm:$0xff] }
 0x173   :  { %977 = vmatprep.subr.bf16.mxu1 %v2291_v41  ;;  %v160_v41 = vld [vmem:[%s3729_s3 + $0x1d0] sm:$0xff] }
 0x174   :  { %v2260_v53 = vcombine.low %v160_v41, %v164_v42 }
 0x176   :  { %978 = vmatpush1.bf16.msra.mxu1 %v2290_v44  ;;  %v2495_v44 = vld [vmem:[%s3732_s5 + $0x70] ss:$8 sps:$4 sm:$0xff]  }
 0x177   :  { %979 = vmatprep.subr.bf16.mxu1 %v2299_v45  ;;  %2031 = vmatpush1.bf16.msra.mxu0 %v2495_v44  ;;  %v2252_v45 = vcombine.low %v152_v34, %v156_v38  ;;  %v105_v34 = vld [vmem:[%s3729_s3 + $0x18] sm:$0xff] }
 0x178   :  { %v109_v38 = vld [vmem:[%s3729_s3 + $0x38] sm:$0xff] }
 0x17a   :  { %980 = vmatpush1.bf16.msra.mxu1 %v2298_v48  ;;  %v2496_v48 = vld [vmem:[%s3732_s5 + $0x84] ss:$8 sps:$4 sm:$0xff]  }
 0x17b   :  { %981 = vmatprep.subr.bf16.mxu1 %v2307_v51  ;;  %v2261_v51 = vcombine.high %v160_v41, %v164_v42  ;;  %2032 = vmatprep.subr.bf16.mxu0 %v2496_v48  ;;  %v113_v41 = vld [vmem:[%s3729_s3 + $0x58] sm:$0xff] }
 0x17c   :  { %2033 = vmatpush1.bf16.msra.mxu0 %v2498_v52  ;;  %v117_v42 = vld [vmem:[%s3729_s3 + $0x78] sm:$0xff] }
 0x17d   :  { %2034 = vmatprep.subr.bf16.mxu0 %v2499_v56  ;;  %v2215_v44 = vcombine.high %v113_v41, %v117_v42  ;;  %v2214_v47 = vcombine.low %v113_v41, %v117_v42  ;;  %v133_v52 = vld [vmem:[%s3729_s3 + $0xf8] sm:$0xff]  ;;  %v3312_v42 = vld [vmem:[%s3733_s4] sm:$0xff] }
 0x17e   :  { %982 = vmatpush1.bf16.msra.mxu1 %v2306_v54  ;;  %v176_v54 = vld [vmem:[%s3729_s3 + $0x250] sm:$0xff] }
 0x17f   :  { %983 = vmatprep.subr.bf16.mxu1 %v2315_v55  ;;  %v180_v55 = vld [vmem:[%s3729_s3 + $0x270] sm:$0xff] }
 0x180   :  { %v2277_v63 = vcombine.high %v176_v54, %v180_v55  ;;  %v2276_v1 = vcombine.low %v176_v54, %v180_v55  ;;  %v137_v55 = vld [vmem:[%s3729_s3 + $0x118] sm:$0xff] }
 0x182   :  { %984 = vmatpush1.bf16.msra.mxu1 %v2314_v58  ;;  %v2501_v58 = vld [vmem:[%s3732_s5 + $0x90] ss:$8 sps:$4 sm:$0xff]  }
 0x183   :  { %985 = vmatprep.subr.bf16.mxu1 %v2323_v60  ;;  %2035 = vmatpush1.bf16.msra.mxu0 %v2501_v58  ;;  %v184_v60 = vld [vmem:[%s3729_s3 + $0x290] sm:$0xff]  ;;  %v145_v58 = vld [vmem:[%s3729_s3 + $0x158] sm:$0xff] }
 0x184   :  { %2036 = vmatprep.subr.bf16.mxu0 %v2502_v50  ;;  %v2285_v3 = vcombine.high %v184_v60, %v188_v61  ;;  %v153_v50 = vld [vmem:[%s3729_s3 + $0x198] sm:$0xff] }
 0x186   :  { %986 = vmatpush1.bf16.msra.mxu1 %v2322_v0  ;;  %v2504_v0 = vld [vmem:[%s3732_s5 + $0xa0] ss:$8 sps:$4 sm:$0xff]  }
 0x187   :  { %998 = vmatprep.subr.bf16.mxu1 %v2205_v4  ;;  %2037 = vmatpush1.bf16.msra.mxu0 %v2504_v0  ;;  %v2507_v4 = vld [vmem:[%s3732_s5 + $0xb0] ss:$8 sps:$4 sm:$0xff]  }
 0x188   :  { %2038 = vmatprep.subr.bf16.mxu0 %v2505_v2  ;;  %v161_v2 = vld [vmem:[%s3729_s3 + $0x1d8] sm:$0xff] }
 0x189   :  { %988 = vmatmul.mubr.bf16.vlgmr.msra.gmra.mrb[4].mxu1 %v2924_v49 }
 0x18a   :  { %999 = vmatpush1.bf16.msra.mxu1 %v2204_v6  ;;  %1030 = vmatprep.mubr.bf16.mxu1 %v2922_v62  ;;  %v192_v6 = vld [vmem:[%s3729_s3 + $0x2d0] sm:$0xff] }
 0x18b   :  { %1000 = vmatprep.subr.bf16.mxu1 %v2213_v10  ;;  %2039 = vmatpush1.bf16.msra.mxu0 %v2507_v4  ;;  %v2284_v10 = vcombine.low %v184_v60, %v188_v61  ;;  %v2293_v13 = vcombine.high %v192_v6, %v196_v7 }
 0x18c   :  { %2040 = vmatprep.subr.bf16.mxu0 %v2508_v5 }
 0x18e   :  { %1001 = vmatpush1.bf16.msra.mxu1 %v2212_v14  ;;  %v2513_v14 = vld [vmem:[%s3732_s5 + $0xd0] ss:$8 sps:$4 sm:$0xff]  }
 0x18f   :  { %1002 = vmatprep.subr.bf16.mxu1 %v2221_v16  ;;  %2041 = vmatpush1.bf16.msra.mxu0 %v2510_v8  ;;  %v2292_v16 = vcombine.low %v192_v6, %v196_v7  ;;  %v169_v6 = vld [vmem:[%s3729_s3 + $0x218] sm:$0xff] }
 0x190   :  { %2042 = vmatprep.subr.bf16.mxu0 %v2511_v9  ;;  %v173_v7 = vld [vmem:[%s3729_s3 + $0x238] sm:$0xff] }
 0x191   :  { %v2271_v9 = vcombine.high %v169_v6, %v173_v7 }
 0x192   :  { %1003 = vmatpush1.bf16.msra.mxu1 %v2220_v21  ;;  %v2300_v21 = vcombine.low %v200_v11, %v204_v12  ;;  %v181_v11 = vld [vmem:[%s3729_s3 + $0x278] sm:$0xff]  ;;  %v2270_v12 = vcombine.low %v169_v6, %v173_v7 }
 0x193   :  { %1004 = vmatprep.subr.bf16.mxu1 %v2229_v24  ;;  %2043 = vmatpush1.bf16.msra.mxu0 %v2513_v14  ;;  %v216_v24 = vld [vmem:[%s3729_s3 + $0x390] sm:$0xff]  ;;  %v185_v14 = vld [vmem:[%s3729_s3 + $0x298] sm:$0xff] }
 0x194   :  { %2044 = vmatprep.subr.bf16.mxu0 %v2514_v15  ;;  %v2317_v28 = vcombine.high %v216_v24, %v220_v25  ;;  %v2316_v31 = vcombine.low %v216_v24, %v220_v25  ;;  %v189_v15 = vld [vmem:[%s3729_s3 + $0x2b8] sm:$0xff] }
 0x196   :  { %1005 = vmatpush1.bf16.msra.mxu1 %v2228_v27  ;;  %v2308_v27 = vcombine.low %v208_v17, %v212_v18  ;;  %v2287_v17 = vcombine.high %v185_v14, %v189_v15  ;;  %v193_v18 = vld [vmem:[%s3729_s3 + $0x2d8] sm:$0xff] }
 0x197   :  { %1006 = vmatprep.subr.bf16.mxu1 %v2237_v30  ;;  %2045 = vmatpush1.bf16.msra.mxu0 %v2516_v20  ;;  %v228_v30 = vld [vmem:[%s3729_s3 + $0x3f0] sm:$0xff]  ;;  %v2286_v20 = vcombine.low %v185_v14, %v189_v15 }
 0x198   :  { %2046 = vmatprep.subr.bf16.mxu0 %v2517_v22  ;;  %v201_v22 = vld [vmem:[%s3729_s3 + $0x318] sm:$0xff] }
 0x19a   :  { %1007 = vmatpush1.bf16.msra.mxu1 %v2236_v33  ;;  %v2325_v33 = vcombine.high %v224_v29, %v228_v30 }
 0x19b   :  { %1008 = vmatprep.subr.bf16.mxu1 %v2245_v39  ;;  %2047 = vmatpush1.bf16.msra.mxu0 %v2519_v26  ;;  %v2324_v39 = vcombine.low %v224_v29, %v228_v30  ;;  %v209_v26 = vld [vmem:[%s3729_s3 + $0x358] sm:$0xff] }
 0x19c   :  { %2059 = vmatprep.subr.bf16.mxu0 %v2522_v32  ;;  %v217_v30 = vld [vmem:[%s3729_s3 + $0x398] sm:$0xff] }
 0x19e   :  { %1009 = vmatpush1.bf16.msra.mxu1 %v2244_v40  ;;  %v2207_v40 = vcombine.high %v105_v34, %v109_v38 }
 0x19f   :  { %1010 = vmatprep.subr.bf16.mxu1 %v2253_v43  ;;  %v2206_v43 = vcombine.low %v105_v34, %v109_v38  ;;  %v225_v34 = vld [vmem:[%s3729_s3 + $0x3d8] sm:$0xff] }
 0x1a0   :  { %v229_v38 = vld [vmem:[%s3729_s3 + $0x3f8] sm:$0xff] }
 0x1a1   :  { %v2326_v41 = vcombine.low %v225_v34, %v229_v38 }
 0x1a2   :  { %1011 = vmatpush1.bf16.msra.mxu1 %v2252_v45  ;;  %v121_v45 = vld [vmem:[%s3729_s3 + $0x98] sm:$0xff] }
 0x1a3   :  { %1012 = vmatprep.subr.bf16.mxu1 %v2261_v51  ;;  %v2223_v48 = vcombine.high %v121_v45, %v125_v46  ;;  %v129_v51 = vld [vmem:[%s3729_s3 + $0xd8] sm:$0xff] }
 0x1a4   :  { %v2231_v54 = vcombine.high %v129_v51, %v133_v52  ;;  %v2230_v56 = vcombine.low %v129_v51, %v133_v52 }
 0x1a6   :  { %1013 = vmatpush1.bf16.msra.mxu1 %v2260_v53  ;;  %v2222_v53 = vcombine.low %v121_v45, %v125_v46 }
 0x1a7   :  { %1014 = vmatprep.subr.bf16.mxu1 %v2269_v57 }
 0x1aa   :  { %1015 = vmatpush1.bf16.msra.mxu1 %v2268_v59  ;;  %v149_v59 = vld [vmem:[%s3729_s3 + $0x178] sm:$0xff] }
 0x1ab   :  { %1016 = vmatprep.subr.bf16.mxu1 %v2277_v63  ;;  %v2247_v61 = vcombine.high %v145_v58, %v149_v59  ;;  %v157_v63 = vld [vmem:[%s3729_s3 + $0x1b8] sm:$0xff]  ;;  %v2246_v0 = vcombine.low %v145_v58, %v149_v59 }
 0x1ac   :  { %v2254_v4 = vcombine.low %v153_v50, %v157_v63 }
 0x1ae   :  { %1017 = vmatpush1.bf16.msra.mxu1 %v2276_v1  ;;  %v2255_v1 = vcombine.high %v153_v50, %v157_v63 }
 0x1af   :  { %1018 = vmatprep.subr.bf16.mxu1 %v2285_v3  ;;  %v165_v3 = vld [vmem:[%s3729_s3 + $0x1f8] sm:$0xff] }
 0x1b0   :  { %v2263_v5 = vcombine.high %v161_v2, %v165_v3  ;;  %v2262_v8 = vcombine.low %v161_v2, %v165_v3 }
 0x1b2   :  { %1019 = vmatpush1.bf16.msra.mxu1 %v2284_v10  ;;  %v177_v10 = vld [vmem:[%s3729_s3 + $0x258] sm:$0xff] }
 0x1b3   :  { %1020 = vmatprep.subr.bf16.mxu1 %v2293_v13  ;;  %v2279_v13 = vcombine.high %v177_v10, %v181_v11 }
 0x1b6   :  { %1021 = vmatpush1.bf16.msra.mxu1 %v2292_v16  ;;  %v2278_v16 = vcombine.low %v177_v10, %v181_v11 }
 0x1b7   :  { %1022 = vmatprep.subr.bf16.mxu1 %v2301_v19  ;;  %v197_v19 = vld [vmem:[%s3729_s3 + $0x2f8] sm:$0xff] }
 0x1b8   :  { %v2294_v24 = vcombine.low %v193_v18, %v197_v19 }
 0x1ba   :  { %1023 = vmatpush1.bf16.msra.mxu1 %v2300_v21  ;;  %v2295_v21 = vcombine.high %v193_v18, %v197_v19 }
 0x1bb   :  { %1024 = vmatprep.subr.bf16.mxu1 %v2309_v23  ;;  %v205_v23 = vld [vmem:[%s3729_s3 + $0x338] sm:$0xff] }
 0x1bc   :  { %v2303_v25 = vcombine.high %v201_v22, %v205_v23 }
 0x1be   :  { %1025 = vmatpush1.bf16.msra.mxu1 %v2308_v27  ;;  %v213_v27 = vld [vmem:[%s3729_s3 + $0x378] sm:$0xff] }
 0x1bf   :  { %1026 = vmatprep.subr.bf16.mxu1 %v2317_v28  ;;  %v2302_v28 = vcombine.low %v201_v22, %v205_v23  ;;  %v2311_v29 = vcombine.high %v209_v26, %v213_v27  ;;  %v2310_v32 = vcombine.low %v209_v26, %v213_v27  ;;  %v2520_v27 = vld [vmem:[%s3732_s5 + $0x100] ss:$8 sps:$4 sm:$0xff]  }
 0x1c2   :  { %1027 = vmatpush1.bf16.msra.mxu1 %v2316_v31  ;;  %v221_v31 = vld [vmem:[%s3729_s3 + $0x3b8] sm:$0xff] }
 0x1c3   :  { %1028 = vmatprep.subr.bf16.mxu1 %v2325_v33  ;;  %v2319_v33 = vcombine.high %v217_v30, %v221_v31 }
 0x1c6   :  { %1029 = vmatpush1.bf16.msra.mxu1 %v2324_v39  ;;  %v2318_v39 = vcombine.low %v217_v30, %v221_v31  ;;  %v2528_v30 = vld [vmem:[%s3732_s5 + $0x124] ss:$8 sps:$4 sm:$0xff]   ;;  %v2526_v31 = vld [vmem:[%s3732_s5 + $0x120] ss:$8 sps:$4 sm:$0xff]  }
 0x1c7   :  { %1041 = vmatprep.subr.bf16.mxu1 %v2207_v40  ;;  %v2327_v40 = vcombine.high %v225_v34, %v229_v38  ;;  %v2534_v34 = vld [vmem:[%s3732_s5 + $0x144] ss:$8 sps:$4 sm:$0xff]   ;;  %v2532_v38 = vld [vmem:[%s3732_s5 + $0x140] ss:$8 sps:$4 sm:$0xff]  }
 0x1c9   :  { %1031 = vmatmul.mubr.bf16.vlgmr.msra.gmra.mrb[8].mxu1 %v2924_v49 }
 0x1ca   :  { %1042 = vmatpush1.bf16.msra.mxu1 %v2206_v43  ;;  %1073 = vmatprep.mubr.bf16.mxu1 %v2922_v62  ;;  %v141_v62 = vld [vmem:[%s3729_s3 + $0x138] sm:$0xff]  ;;  %v235_v43 = vrot.slane %v3312_v42, %v2900_v37 }
 0x1cb   :  { %1043 = vmatprep.subr.bf16.mxu1 %v2215_v44  ;;  %v2239_v57 = vcombine.high %v137_v55, %v141_v62  ;;  %v2238_v60 = vcombine.low %v137_v55, %v141_v62  ;;  %v239_v44 = vrot.slane %v3312_v42, %v2897_v36 }
 0x1ce   :  { %1044 = vmatpush1.bf16.msra.mxu1 %v2214_v47 }
 0x1cf   :  { %1045 = vmatprep.subr.bf16.mxu1 %v2223_v48 }
 0x1d2   :  { %1046 = vmatpush1.bf16.msra.mxu1 %v2222_v53 }
 0x1d3   :  { %1047 = vmatprep.subr.bf16.mxu1 %v2231_v54 }
 0x1d6   :  { %1048 = vmatpush1.bf16.msra.mxu1 %v2230_v56 }
 0x1d7   :  { %1049 = vmatprep.subr.bf16.mxu1 %v2239_v57 }
 0x1da   :  { %1050 = vmatpush1.bf16.msra.mxu1 %v2238_v60 }
 0x1db   :  { %1051 = vmatprep.subr.bf16.mxu1 %v2247_v61 }
 0x1de   :  { %1052 = vmatpush1.bf16.msra.mxu1 %v2246_v0 }
 0x1df   :  { %1053 = vmatprep.subr.bf16.mxu1 %v2255_v1 }
 0x1e2   :  { %1054 = vmatpush1.bf16.msra.mxu1 %v2254_v4 }
 0x1e3   :  { %1055 = vmatprep.subr.bf16.mxu1 %v2263_v5 }
 0x1e6   :  { %1056 = vmatpush1.bf16.msra.mxu1 %v2262_v8 }
 0x1e7   :  { %1057 = vmatprep.subr.bf16.mxu1 %v2271_v9 }
 0x1ea   :  { %1058 = vmatpush1.bf16.msra.mxu1 %v2270_v12 }
 0x1eb   :  { %1059 = vmatprep.subr.bf16.mxu1 %v2279_v13 }
 0x1ee   :  { %1060 = vmatpush1.bf16.msra.mxu1 %v2278_v16 }
 0x1ef   :  { %1061 = vmatprep.subr.bf16.mxu1 %v2287_v17 }
 0x1f2   :  { %1062 = vmatpush1.bf16.msra.mxu1 %v2286_v20 }
 0x1f3   :  { %1063 = vmatprep.subr.bf16.mxu1 %v2295_v21 }
 0x1f6   :  { %1064 = vmatpush1.bf16.msra.mxu1 %v2294_v24 }
 0x1f7   :  { %1065 = vmatprep.subr.bf16.mxu1 %v2303_v25 }
 0x1fa   :  { %1066 = vmatpush1.bf16.msra.mxu1 %v2302_v28  ;;  %v2525_v28 = vld [vmem:[%s3732_s5 + $0x114] ss:$8 sps:$4 sm:$0xff]  }
 0x1fb   :  { %1067 = vmatprep.subr.bf16.mxu1 %v2311_v29  ;;  %v2523_v29 = vld [vmem:[%s3732_s5 + $0x110] ss:$8 sps:$4 sm:$0xff]  }
 0x1fe   :  { %1068 = vmatpush1.bf16.msra.mxu1 %v2310_v32  ;;  %v2531_v32 = vld [vmem:[%s3732_s5 + $0x134] ss:$8 sps:$4 sm:$0xff]  }
 0x1ff   :  { %1069 = vmatprep.subr.bf16.mxu1 %v2319_v33  ;;  %v2529_v33 = vld [vmem:[%s3732_s5 + $0x130] ss:$8 sps:$4 sm:$0xff]  }
 0x202   :  { %1070 = vmatpush1.bf16.msra.mxu1 %v2318_v39  ;;  %v2537_v39 = vld [vmem:[%s3732_s5 + $0x154] ss:$8 sps:$4 sm:$0xff]  }
 0x203   :  { %1071 = vmatprep.subr.bf16.mxu1 %v2327_v40  ;;  %v2535_v40 = vld [vmem:[%s3732_s5 + $0x150] ss:$8 sps:$4 sm:$0xff]  }
 0x206   :  { %1072 = vmatpush1.bf16.msra.mxu1 %v2326_v41  ;;  %v2540_v41 = vld [vmem:[%s3732_s5 + $0x164] ss:$8 sps:$4 sm:$0xff]  }
 0x209   :  { %1074 = vmatmul.mubr.bf16.vlgmr.msra.gmra.mrb[12].mxu1 %v2924_v49 }
 0x21c   :  { %v946_v45 = vpop.f32.mrb[0].mxu1 }
 0x21d   :  { %v947_v46 = vadd.f32 %v946_v45, %v235_v43  ;;  %v948_v47 = vpop.f32.mrb[1].mxu1  ;;  %v2543_v45 = vld [vmem:[%s3732_s5 + $0x174] ss:$8 sps:$4 sm:$0xff]  }
 0x21e   :  { %v949_v48 = vadd.f32 %v948_v47, %v239_v44  ;;  %v950_v51 = vpop.f32.mrb[2].mxu1 }
 0x21f   :  { %v1084_v52 = vmul.f32 %v947_v46, %v947_v46  ;;  %v951_v53 = vadd.f32 %v950_v51, %v235_v43  ;;  %v952_v54 = vpop.f32.mrb[3].mxu1  ;;  %v2538_v43 = vld [vmem:[%s3732_s5 + $0x160] ss:$8 sps:$4 sm:$0xff]  }
 0x220   :  { %v1085_v49 = vmul.f32 %v949_v48, %v949_v48  ;;  %v953_v55 = vadd.f32 %v952_v54, %v239_v44  ;;  %v242_v44 = vsub.s32 2, %v2894_v35 }
 0x221   :  { %v1100_v62 = vmul.f32 %v1084_v52, %v947_v46  ;;  %v1092_v56 = vmul.f32 %v951_v53, %v951_v53  ;;  %v2546_v52 = vld [vmem:[%s3732_s5 + $0x184] ss:$8 sps:$4 sm:$0xff]  }
 0x222   :  { %v1101_v57 = vmul.f32 %v1085_v49, %v949_v48  ;;  %v1093_v58 = vmul.f32 %v953_v55, %v953_v55  ;;  %v243_v47 = vrot.slane %v3312_v42, %v242_v44  ;;  %v2565_v44 = vld [vmem:[%s3732_s5 + $0x1f0] ss:$8 sps:$4 sm:$0xff]  }
 0x223   :  { %v1116_v59 = vmul.f32 0.044715, %v1100_v62  ;;  %v1108_v60 = vmul.f32 %v1092_v56, %v951_v53 }
 0x224   :  { %v1117_v61 = vmul.f32 0.044715, %v1101_v57  ;;  %v1109_v50 = vmul.f32 %v1093_v58, %v953_v55  ;;  %v2549_v57 = vld [vmem:[%s3732_s5 + $0x194] ss:$8 sps:$4 sm:$0xff]  }
 0x225   :  { %v1132_v63 = vadd.f32 %v1116_v59, %v947_v46  ;;  %v1124_v0 = vmul.f32 0.044715, %v1108_v60 }
 0x226   :  { %v1125_v1 = vmul.f32 0.044715, %v1109_v50  ;;  %v1133_v2 = vadd.f32 %v1117_v61, %v949_v48 }
 0x227   :  { %v1148_v3 = vmul.f32 0.7978846, %v1132_v63  ;;  %v1140_v4 = vadd.f32 %v1124_v0, %v951_v53 }
 0x228   :  { %v1141_v5 = vadd.f32 %v1125_v1, %v953_v55  ;;  %v1149_v6 = vmul.f32 0.7978846, %v1133_v2  ;;  %v2547_v1 = vld [vmem:[%s3732_s5 + $0x190] ss:$8 sps:$4 sm:$0xff]  }
 0x229   :  { %2668 = vtanh.f32 %v1148_v3  ;;  %v1156_v7 = vmul.f32 0.7978846, %v1140_v4  ;;  %v2552_v4 = vld [vmem:[%s3732_s5 + $0x1a4] ss:$8 sps:$4 sm:$0xff]  }
 0x22a   :  { %v1157_v8 = vmul.f32 0.7978846, %v1141_v5  ;;  %2670 = vtanh.f32 %v1149_v6 }
 0x22b   :  { %2672 = vtanh.f32 %v1156_v7 }
 0x22c   :  { %2674 = vtanh.f32 %v1157_v8 }
 0x233   :  { %v2669_v9 = vpop.eup %2668 }
 0x234   :  { %v2671_v10 = vpop.eup %2670  ;;  %v1180_v11 = vadd.f32 1.0, %v2669_v9 }
 0x235   :  { %v2673_v12 = vpop.eup %2672  ;;  %v1181_v13 = vadd.f32 1.0, %v2671_v10 }
 0x236   :  { %v2675_v14 = vpop.eup %2674  ;;  %v1188_v15 = vadd.f32 1.0, %v2673_v12  ;;  %v1196_v16 = vmul.f32 0.5, %v1180_v11  ;;  %v2550_v11 = vld [vmem:[%s3732_s5 + $0x1a0] ss:$8 sps:$4 sm:$0xff]  }
 0x237   :  { %v1189_v17 = vadd.f32 1.0, %v2675_v14  ;;  %v1197_v18 = vmul.f32 0.5, %v1181_v13  ;;  %v2555_v14 = vld [vmem:[%s3732_s5 + $0x1b4] ss:$8 sps:$4 sm:$0xff]  }
 0x238   :  { %v1204_v19 = vmul.f32 0.5, %v1188_v15  ;;  %v1212_v21 = vmul.f32 %v1196_v16, %v947_v46  ;;  %v246_v46 = vsub.s32 3, %v2894_v35 }
 0x239   :  { %v1205_v20 = vmul.f32 0.5, %v1189_v17  ;;  %v1213_v23 = vmul.f32 %v1197_v18, %v949_v48  ;;  %v2541_v48 = vld [vmem:[%s3732_s5 + $0x170] ss:$8 sps:$4 sm:$0xff]  }
 0x23a   :  { %v1220_v22 = vmul.f32 %v1204_v19, %v951_v53  ;;  %v247_v51 = vrot.slane %v3312_v42, %v246_v46 }
 0x23b   :  { %v1221_v24 = vmul.f32 %v1205_v20, %v953_v55  ;;  %v2544_v55 = vld [vmem:[%s3732_s5 + $0x180] ss:$8 sps:$4 sm:$0xff]   ;;  %v2553_v20 = vld [vmem:[%s3732_s5 + $0x1b0] ss:$8 sps:$4 sm:$0xff]  }
 0x23c   :  { %v1228_v25 = vpack.c.bf16 %v1220_v22, %v1212_v21  ;;  %v2558_v22 = vld [vmem:[%s3732_s5 + $0x1c4] ss:$8 sps:$4 sm:$0xff]  }
 0x23d   :  { %v1229_v26 = vpack.c.bf16 %v1221_v24, %v1213_v23  ;;  %v2556_v23 = vld [vmem:[%s3732_s5 + $0x1c0] ss:$8 sps:$4 sm:$0xff]   ;;  %v2561_v24 = vld [vmem:[%s3732_s5 + $0x1d4] ss:$8 sps:$4 sm:$0xff]  }
 0x23f   :  { %2048 = vmatprep.mubr.bf16.mxu0 %v1229_v26  ;;  %v2564_v26 = vld [vmem:[%s3732_s5 + $0x1e4] ss:$8 sps:$4 sm:$0xff]  }
 0x240   :  { %2049 = vmatmul.mubr.bf16.vlgmr.msra.gmra.mrb[0].mxu0 %v1228_v25  ;;  %v2559_v25 = vld [vmem:[%s3732_s5 + $0x1d0] ss:$8 sps:$4 sm:$0xff]  }
 0x241   :  { %2060 = vmatpush1.bf16.msra.mxu0 %v2520_v27 }
 0x242   :  { %2061 = vmatprep.subr.bf16.mxu0 %v2525_v28 }
 0x245   :  { %2062 = vmatpush1.bf16.msra.mxu0 %v2523_v29 }
 0x246   :  { %2063 = vmatprep.subr.bf16.mxu0 %v2528_v30 }
 0x249   :  { %2064 = vmatpush1.bf16.msra.mxu0 %v2526_v31  ;;  %v2562_v31 = vld [vmem:[%s3732_s5 + $0x1e0] ss:$8 sps:$4 sm:$0xff]  }
 0x24a   :  { %2065 = vmatprep.subr.bf16.mxu0 %v2531_v32 }
 0x24d   :  { %2066 = vmatpush1.bf16.msra.mxu0 %v2529_v33 }
 0x24e   :  { %2067 = vmatprep.subr.bf16.mxu0 %v2534_v34 }
 0x251   :  { %2068 = vmatpush1.bf16.msra.mxu0 %v2532_v38 }
 0x252   :  { %2069 = vmatprep.subr.bf16.mxu0 %v2537_v39  ;;  %v2567_v39 = vld [vmem:[%s3732_s5 + $0x1f4] ss:$8 sps:$4 sm:$0xff]  }
 0x255   :  { %2070 = vmatpush1.bf16.msra.mxu0 %v2535_v40 }
 0x256   :  { %2071 = vmatprep.subr.bf16.mxu0 %v2540_v41 }
 0x259   :  { %2072 = vmatpush1.bf16.msra.mxu0 %v2538_v43 }
 0x25a   :  { %2073 = vmatprep.subr.bf16.mxu0 %v2543_v45 }
 0x25c   :  { %v989_v53 = vpop.f32.mrb[4].mxu1 }
 0x25d   :  { %v3370_v54 = vadd.f32 %v989_v53, %v243_v47  ;;  %v991_v49 = vpop.f32.mrb[5].mxu1  ;;  %2074 = vmatpush1.bf16.msra.mxu0 %v2541_v48  ;;  %v2570_v48 = vld [vmem:[%s3732_s5 + $0x204] ss:$8 sps:$4 sm:$0xff]  }
 0x25e   :  { %v3375_v62 = vadd.f32 %v991_v49, %v247_v51  ;;  %v993_v56 = vpop.f32.mrb[6].mxu1  ;;  %2075 = vmatprep.subr.bf16.mxu0 %v2546_v52 }
 0x25f   :  { %v1086_v58 = vmul.f32 %v3370_v54, %v3370_v54  ;;  %v3382_v59 = vadd.f32 %v993_v56, %v243_v47  ;;  %v995_v60 = vpop.f32.mrb[7].mxu1  ;;  %v2576_v56 = vld [vmem:[%s3732_s5 + $0x224] ss:$8 sps:$4 sm:$0xff]  }
 0x260   :  { %v1087_v61 = vmul.f32 %v3375_v62, %v3375_v62  ;;  %v3386_v50 = vadd.f32 %v995_v60, %v247_v51  ;;  %v2582_v60 = vld [vmem:[%s3732_s5 + $0x244] ss:$8 sps:$4 sm:$0xff]  }
 0x261   :  { %v1102_v63 = vmul.f32 %v1086_v58, %v3370_v54  ;;  %v1094_v0 = vmul.f32 %v3382_v59, %v3382_v59  ;;  %2076 = vmatpush1.bf16.msra.mxu0 %v2544_v55  ;;  %v2568_v55 = vld [vmem:[%s3732_s5 + $0x200] ss:$8 sps:$4 sm:$0xff]   ;;  %v2579_v58 = vld [vmem:[%s3732_s5 + $0x234] ss:$8 sps:$4 sm:$0xff]  }
 0x262   :  { %v1103_v2 = vmul.f32 %v1087_v61, %v3375_v62  ;;  %v1095_v3 = vmul.f32 %v3386_v50, %v3386_v50  ;;  %2077 = vmatprep.subr.bf16.mxu0 %v2549_v57  ;;  %v2574_v57 = vld [vmem:[%s3732_s5 + $0x220] ss:$8 sps:$4 sm:$0xff]  }
 0x263   :  { %v1118_v5 = vmul.f32 0.044715, %v1102_v63  ;;  %v1110_v6 = vmul.f32 %v1094_v0, %v3382_v59  ;;  %v2580_v61 = vld [vmem:[%s3732_s5 + $0x240] ss:$8 sps:$4 sm:$0xff]   ;;  %v2583_v63 = vld [vmem:[%s3732_s5 + $0x250] ss:$8 sps:$4 sm:$0xff]  }
 0x264   :  { %v1119_v7 = vmul.f32 0.044715, %v1103_v2  ;;  %v1111_v8 = vmul.f32 %v1095_v3, %v3386_v50  ;;  %v2588_v0 = vld [vmem:[%s3732_s5 + $0x264] ss:$8 sps:$4 sm:$0xff]   ;;  %v250_v2 = vsub.s32 4, %v2894_v35 }
 0x265   :  { %v1134_v9 = vadd.f32 %v1118_v5, %v3370_v54  ;;  %v1126_v10 = vmul.f32 0.044715, %v1110_v6  ;;  %2078 = vmatpush1.bf16.msra.mxu0 %v2547_v1  ;;  %v2586_v1 = vld [vmem:[%s3732_s5 + $0x260] ss:$8 sps:$4 sm:$0xff]   ;;  %v2591_v3 = vld [vmem:[%s3732_s5 + $0x274] ss:$8 sps:$4 sm:$0xff]  }
 0x266   :  { %v1135_v12 = vadd.f32 %v1119_v7, %v3375_v62  ;;  %v1127_v13 = vmul.f32 0.044715, %v1111_v8  ;;  %2079 = vmatprep.subr.bf16.mxu0 %v2552_v4  ;;  %v254_v4 = vsub.s32 5, %v2894_v35  ;;  %v251_v5 = vrot.slane %v3312_v42, %v250_v2  ;;  %v2589_v6 = vld [vmem:[%s3732_s5 + $0x270] ss:$8 sps:$4 sm:$0xff]  }
 0x267   :  { %v1150_v15 = vmul.f32 0.7978846, %v1134_v9  ;;  %v1142_v16 = vadd.f32 %v1126_v10, %v3382_v59  ;;  %v2594_v8 = vld [vmem:[%s3732_s5 + $0x284] ss:$8 sps:$4 sm:$0xff]   ;;  %v2613_v2 = vld [vmem:[%s3732_s5 + $0x2f0] ss:$8 sps:$4 sm:$0xff]  }
 0x268   :  { %v1151_v17 = vmul.f32 0.7978846, %v1135_v12  ;;  %v1143_v18 = vadd.f32 %v1127_v13, %v3386_v50  ;;  %v255_v7 = vrot.slane %v3312_v42, %v254_v4  ;;  %v2592_v12 = vld [vmem:[%s3732_s5 + $0x280] ss:$8 sps:$4 sm:$0xff]  }
 0x269   :  { %2676 = vtanh.f32 %v1150_v15  ;;  %v1158_v19 = vmul.f32 0.7978846, %v1142_v16  ;;  %2080 = vmatpush1.bf16.msra.mxu0 %v2550_v11  ;;  %v2597_v15 = vld [vmem:[%s3732_s5 + $0x294] ss:$8 sps:$4 sm:$0xff]  }
 0x26a   :  { %2678 = vtanh.f32 %v1151_v17  ;;  %v1159_v21 = vmul.f32 0.7978846, %v1143_v18  ;;  %2081 = vmatprep.subr.bf16.mxu0 %v2555_v14 }
 0x26b   :  { %2680 = vtanh.f32 %v1158_v19 }
 0x26c   :  { %2682 = vtanh.f32 %v1159_v21 }
 0x26d   :  { %2082 = vmatpush1.bf16.msra.mxu0 %v2553_v20 }
 0x26e   :  { %2083 = vmatprep.subr.bf16.mxu0 %v2558_v22 }
 0x271   :  { %2084 = vmatpush1.bf16.msra.mxu0 %v2556_v23  ;;  %v2595_v23 = vld [vmem:[%s3732_s5 + $0x290] ss:$8 sps:$4 sm:$0xff]  }
 0x272   :  { %2085 = vmatprep.subr.bf16.mxu0 %v2561_v24 }
 0x273   :  { %v2677_v27 = vpop.eup %2676 }
 0x274   :  { %v2679_v28 = vpop.eup %2678  ;;  %v1182_v29 = vadd.f32 1.0, %v2677_v27 }
 0x275   :  { %v2681_v30 = vpop.eup %2680  ;;  %2086 = vmatpush1.bf16.msra.mxu0 %v2559_v25  ;;  %v1183_v32 = vadd.f32 1.0, %v2679_v28 }
 0x276   :  { %v2683_v33 = vpop.eup %2682  ;;  %v1198_v34 = vmul.f32 0.5, %v1182_v29  ;;  %v1190_v38 = vadd.f32 1.0, %v2681_v30  ;;  %2087 = vmatprep.subr.bf16.mxu0 %v2564_v26  ;;  %v2600_v26 = vld [vmem:[%s3732_s5 + $0x2a4] ss:$8 sps:$4 sm:$0xff]  }
 0x277   :  { %v1191_v40 = vadd.f32 1.0, %v2683_v33  ;;  %v1199_v41 = vmul.f32 0.5, %v1183_v32  ;;  %v2598_v33 = vld [vmem:[%s3732_s5 + $0x2a0] ss:$8 sps:$4 sm:$0xff]  }
 0x278   :  { %v1206_v43 = vmul.f32 0.5, %v1190_v38  ;;  %v1214_v46 = vmul.f32 %v1198_v34, %v3370_v54  ;;  %v2573_v54 = vld [vmem:[%s3732_s5 + $0x214] ss:$8 sps:$4 sm:$0xff]  }
 0x279   :  { %2088 = vmatpush1.bf16.msra.mxu0 %v2562_v31  ;;  %v1207_v45 = vmul.f32 0.5, %v1191_v40  ;;  %v1215_v51 = vmul.f32 %v1199_v41, %v3375_v62  ;;  %v2571_v62 = vld [vmem:[%s3732_s5 + $0x210] ss:$8 sps:$4 sm:$0xff]  }
 0x27a   :  { %v1222_v47 = vmul.f32 %v1206_v43, %v3382_v59  ;;  %2089 = vmatprep.subr.bf16.mxu0 %v2567_v39  ;;  %v2577_v59 = vld [vmem:[%s3732_s5 + $0x230] ss:$8 sps:$4 sm:$0xff]   ;;  %v2603_v39 = vld [vmem:[%s3732_s5 + $0x2b4] ss:$8 sps:$4 sm:$0xff]  }
 0x27b   :  { %v1223_v52 = vmul.f32 %v1207_v45, %v3386_v50  ;;  %v2585_v50 = vld [vmem:[%s3732_s5 + $0x254] ss:$8 sps:$4 sm:$0xff]  }
 0x27c   :  { %v1230_v53 = vpack.c.bf16 %v1222_v47, %v1214_v46  ;;  %v2601_v46 = vld [vmem:[%s3732_s5 + $0x2b0] ss:$8 sps:$4 sm:$0xff]  }
 0x27d   :  { %2090 = vmatpush1.bf16.msra.mxu0 %v2565_v44  ;;  %v1231_v49 = vpack.c.bf16 %v1223_v52, %v1215_v51  ;;  %v2604_v51 = vld [vmem:[%s3732_s5 + $0x2c0] ss:$8 sps:$4 sm:$0xff]   ;;  %v2609_v52 = vld [vmem:[%s3732_s5 + $0x2d4] ss:$8 sps:$4 sm:$0xff]  }
 0x27e   :  { %2102 = vmatprep.subr.bf16.mxu0 %v2570_v48  ;;  %v2606_v48 = vld [vmem:[%s3732_s5 + $0x2c4] ss:$8 sps:$4 sm:$0xff]  }
 0x27f   :  { %2091 = vmatprep.mubr.bf16.mxu0 %v1231_v49  ;;  %v2612_v49 = vld [vmem:[%s3732_s5 + $0x2e4] ss:$8 sps:$4 sm:$0xff]  }
 0x280   :  { %2092 = vmatmul.mubr.bf16.vlgmr.msra.gmra.mrb[0].mxu0 %v1230_v53  ;;  %v2607_v53 = vld [vmem:[%s3732_s5 + $0x2d0] ss:$8 sps:$4 sm:$0xff]  }
 0x281   :  { %2103 = vmatpush1.bf16.msra.mxu0 %v2568_v55 }
 0x282   :  { %2104 = vmatprep.subr.bf16.mxu0 %v2573_v54 }
 0x285   :  { %2105 = vmatpush1.bf16.msra.mxu0 %v2571_v62 }
 0x286   :  { %2106 = vmatprep.subr.bf16.mxu0 %v2576_v56 }
 0x289   :  { %2107 = vmatpush1.bf16.msra.mxu0 %v2574_v57  ;;  %v2610_v57 = vld [vmem:[%s3732_s5 + $0x2e0] ss:$8 sps:$4 sm:$0xff]  }
 0x28a   :  { %2108 = vmatprep.subr.bf16.mxu0 %v2579_v58 }
 0x28d   :  { %2109 = vmatpush1.bf16.msra.mxu0 %v2577_v59 }
 0x28e   :  { %2110 = vmatprep.subr.bf16.mxu0 %v2582_v60 }
 0x291   :  { %2111 = vmatpush1.bf16.msra.mxu0 %v2580_v61 }
 0x292   :  { %2112 = vmatprep.subr.bf16.mxu0 %v2585_v50  ;;  %v2615_v50 = vld [vmem:[%s3732_s5 + $0x2f4] ss:$8 sps:$4 sm:$0xff]  }
 0x295   :  { %2113 = vmatpush1.bf16.msra.mxu0 %v2583_v63 }
 0x296   :  { %2114 = vmatprep.subr.bf16.mxu0 %v2588_v0 }
 0x299   :  { %2115 = vmatpush1.bf16.msra.mxu0 %v2586_v1 }
 0x29a   :  { %2116 = vmatprep.subr.bf16.mxu0 %v2591_v3 }
 0x29c   :  { %v1032_v9 = vpop.f32.mrb[8].mxu1 }
 0x29d   :  { %v3498_v10 = vadd.f32 %v1032_v9, %v251_v5  ;;  %v1034_v11 = vpop.f32.mrb[9].mxu1  ;;  %2117 = vmatpush1.bf16.msra.mxu0 %v2589_v6  ;;  %v2618_v6 = vld [vmem:[%s3732_s5 + $0x304] ss:$8 sps:$4 sm:$0xff]  }
 0x29e   :  { %v3503_v13 = vadd.f32 %v1034_v11, %v255_v7  ;;  %v1036_v14 = vpop.f32.mrb[10].mxu1  ;;  %2118 = vmatprep.subr.bf16.mxu0 %v2594_v8 }
 0x29f   :  { %v1088_v16 = vmul.f32 %v3498_v10, %v3498_v10  ;;  %v3510_v17 = vadd.f32 %v1036_v14, %v251_v5  ;;  %v1038_v18 = vpop.f32.mrb[11].mxu1  ;;  %v2624_v14 = vld [vmem:[%s3732_s5 + $0x324] ss:$8 sps:$4 sm:$0xff]  }
 0x2a0   :  { %v1089_v19 = vmul.f32 %v3503_v13, %v3503_v13  ;;  %v3514_v20 = vadd.f32 %v1038_v18, %v255_v7  ;;  %v2630_v18 = vld [vmem:[%s3732_s5 + $0x344] ss:$8 sps:$4 sm:$0xff]  }
 0x2a1   :  { %v1104_v21 = vmul.f32 %v1088_v16, %v3498_v10  ;;  %v1096_v22 = vmul.f32 %v3510_v17, %v3510_v17  ;;  %2119 = vmatpush1.bf16.msra.mxu0 %v2592_v12  ;;  %v2616_v12 = vld [vmem:[%s3732_s5 + $0x300] ss:$8 sps:$4 sm:$0xff]   ;;  %v2627_v16 = vld [vmem:[%s3732_s5 + $0x334] ss:$8 sps:$4 sm:$0xff]  }
 0x2a2   :  { %v1105_v24 = vmul.f32 %v1089_v19, %v3503_v13  ;;  %v1097_v25 = vmul.f32 %v3514_v20, %v3514_v20  ;;  %2120 = vmatprep.subr.bf16.mxu0 %v2597_v15  ;;  %v2622_v15 = vld [vmem:[%s3732_s5 + $0x320] ss:$8 sps:$4 sm:$0xff]  }
 0x2a3   :  { %v1120_v27 = vmul.f32 0.044715, %v1104_v21  ;;  %v1112_v28 = vmul.f32 %v1096_v22, %v3510_v17  ;;  %v2628_v19 = vld [vmem:[%s3732_s5 + $0x340] ss:$8 sps:$4 sm:$0xff]   ;;  %v2631_v21 = vld [vmem:[%s3732_s5 + $0x350] ss:$8 sps:$4 sm:$0xff]  }
 0x2a4   :  { %v1121_v29 = vmul.f32 0.044715, %v1105_v24  ;;  %v1113_v30 = vmul.f32 %v1097_v25, %v3514_v20  ;;  %v2636_v22 = vld [vmem:[%s3732_s5 + $0x364] ss:$8 sps:$4 sm:$0xff]   ;;  %v258_v24 = vsub.s32 6, %v2894_v35 }
 0x2a5   :  { %v1136_v31 = vadd.f32 %v1120_v27, %v3498_v10  ;;  %v1128_v32 = vmul.f32 0.044715, %v1112_v28  ;;  %2121 = vmatpush1.bf16.msra.mxu0 %v2595_v23  ;;  %v2634_v23 = vld [vmem:[%s3732_s5 + $0x360] ss:$8 sps:$4 sm:$0xff]   ;;  %v2639_v25 = vld [vmem:[%s3732_s5 + $0x374] ss:$8 sps:$4 sm:$0xff]  }
 0x2a6   :  { %v1137_v34 = vadd.f32 %v1121_v29, %v3503_v13  ;;  %v1129_v38 = vmul.f32 0.044715, %v1113_v30  ;;  %2122 = vmatprep.subr.bf16.mxu0 %v2600_v26  ;;  %v262_v26 = vsub.s32 7, %v2894_v35  ;;  %v259_v27 = vrot.slane %v3312_v42, %v258_v24  ;;  %v2637_v28 = vld [vmem:[%s3732_s5 + $0x370] ss:$8 sps:$4 sm:$0xff]  }
 0x2a7   :  { %v1152_v40 = vmul.f32 0.7978846, %v1136_v31  ;;  %v1144_v41 = vadd.f32 %v1128_v32, %v3510_v17  ;;  %v2642_v30 = vld [vmem:[%s3732_s5 + $0x384] ss:$8 sps:$4 sm:$0xff]   ;;  %v2640_v35 = vld [vmem:[%s3732_s5 + $0x380] ss:$8 sps:$4 sm:$0xff]  }
 0x2a8   :  { %v1153_v43 = vmul.f32 0.7978846, %v1137_v34  ;;  %v1145_v44 = vadd.f32 %v1129_v38, %v3514_v20  ;;  %v263_v29 = vrot.slane %v3312_v42, %v262_v26  ;;  %v2645_v42 = vld [vmem:[%s3732_s5 + $0x394] ss:$8 sps:$4 sm:$0xff]  }
 0x2a9   :  { %2684 = vtanh.f32 %v1152_v40  ;;  %v1160_v45 = vmul.f32 0.7978846, %v1144_v41  ;;  %2123 = vmatpush1.bf16.msra.mxu0 %v2598_v33 }
 0x2aa   :  { %2686 = vtanh.f32 %v1153_v43  ;;  %v1161_v47 = vmul.f32 0.7978846, %v1145_v44  ;;  %2124 = vmatprep.subr.bf16.mxu0 %v2603_v39 }
 0x2ab   :  { %2688 = vtanh.f32 %v1160_v45 }
 0x2ac   :  { %2690 = vtanh.f32 %v1161_v47  ;;  %v2643_v47 = vld [vmem:[%s3732_s5 + $0x390] ss:$8 sps:$4 sm:$0xff]  }
 0x2ad   :  { %2125 = vmatpush1.bf16.msra.mxu0 %v2601_v46 }
 0x2ae   :  { %2126 = vmatprep.subr.bf16.mxu0 %v2606_v48 }
 0x2b1   :  { %2127 = vmatpush1.bf16.msra.mxu0 %v2604_v51 }
 0x2b2   :  { %2128 = vmatprep.subr.bf16.mxu0 %v2609_v52  ;;  %v2648_v52 = vld [vmem:[%s3732_s5 + $0x3a4] ss:$8 sps:$4 sm:$0xff]  }
 0x2b3   :  { %v2685_v55 = vpop.eup %2684 }
 0x2b4   :  { %v2687_v54 = vpop.eup %2686  ;;  %v1184_v62 = vadd.f32 1.0, %v2685_v55 }
 0x2b5   :  { %v2689_v56 = vpop.eup %2688  ;;  %2129 = vmatpush1.bf16.msra.mxu0 %v2607_v53  ;;  %v1185_v58 = vadd.f32 1.0, %v2687_v54 }
 0x2b6   :  { %v2691_v59 = vpop.eup %2690  ;;  %v1200_v60 = vmul.f32 0.5, %v1184_v62  ;;  %v1192_v61 = vadd.f32 1.0, %v2689_v56  ;;  %2130 = vmatprep.subr.bf16.mxu0 %v2612_v49 }
 0x2b7   :  { %v1193_v63 = vadd.f32 1.0, %v2691_v59  ;;  %v1201_v0 = vmul.f32 0.5, %v1185_v58 }
 0x2b8   :  { %v1208_v1 = vmul.f32 0.5, %v1192_v61  ;;  %v1216_v4 = vmul.f32 %v1200_v60, %v3498_v10  ;;  %v2621_v10 = vld [vmem:[%s3732_s5 + $0x314] ss:$8 sps:$4 sm:$0xff]  }
 0x2b9   :  { %2131 = vmatpush1.bf16.msra.mxu0 %v2610_v57  ;;  %v1209_v3 = vmul.f32 0.5, %v1193_v63  ;;  %v1217_v7 = vmul.f32 %v1201_v0, %v3503_v13  ;;  %v2619_v13 = vld [vmem:[%s3732_s5 + $0x310] ss:$8 sps:$4 sm:$0xff]   ;;  %v2646_v57 = vld [vmem:[%s3732_s5 + $0x3a0] ss:$8 sps:$4 sm:$0xff]  }
 0x2ba   :  { %v1224_v5 = vmul.f32 %v1208_v1, %v3510_v17  ;;  %2132 = vmatprep.subr.bf16.mxu0 %v2615_v50  ;;  %v2625_v17 = vld [vmem:[%s3732_s5 + $0x330] ss:$8 sps:$4 sm:$0xff]   ;;  %v2651_v60 = vld [vmem:[%s3732_s5 + $0x3b4] ss:$8 sps:$4 sm:$0xff]  }
 0x2bb   :  { %v1225_v8 = vmul.f32 %v1209_v3, %v3514_v20  ;;  %v2633_v20 = vld [vmem:[%s3732_s5 + $0x354] ss:$8 sps:$4 sm:$0xff]  }
 0x2bc   :  { %v1232_v9 = vpack.c.bf16 %v1224_v5, %v1216_v4  ;;  %v2654_v4 = vld [vmem:[%s3732_s5 + $0x3c4] ss:$8 sps:$4 sm:$0xff]   ;;  %v2652_v5 = vld [vmem:[%s3732_s5 + $0x3c0] ss:$8 sps:$4 sm:$0xff]  }
 0x2bd   :  { %2133 = vmatpush1.bf16.msra.mxu0 %v2613_v2  ;;  %v1233_v11 = vpack.c.bf16 %v1225_v8, %v1217_v7  ;;  %v2649_v2 = vld [vmem:[%s3732_s5 + $0x3b0] ss:$8 sps:$4 sm:$0xff]   ;;  %v2660_v8 = vld [vmem:[%s3732_s5 + $0x3e4] ss:$8 sps:$4 sm:$0xff]  }
 0x2be   :  { %2145 = vmatprep.subr.bf16.mxu0 %v2618_v6  ;;  %v2657_v6 = vld [vmem:[%s3732_s5 + $0x3d4] ss:$8 sps:$4 sm:$0xff]   ;;  %v2655_v7 = vld [vmem:[%s3732_s5 + $0x3d0] ss:$8 sps:$4 sm:$0xff]  }
 0x2bf   :  { %2134 = vmatprep.mubr.bf16.mxu0 %v1233_v11 }
 0x2c0   :  { %2135 = vmatmul.mubr.bf16.vlgmr.msra.gmra.mrb[0].mxu0 %v1232_v9 }
 0x2c1   :  { %2146 = vmatpush1.bf16.msra.mxu0 %v2616_v12 }
 0x2c2   :  { %2147 = vmatprep.subr.bf16.mxu0 %v2621_v10 }
 0x2c5   :  { %2148 = vmatpush1.bf16.msra.mxu0 %v2619_v13  ;;  %v2658_v13 = vld [vmem:[%s3732_s5 + $0x3e0] ss:$8 sps:$4 sm:$0xff]  }
 0x2c6   :  { %2149 = vmatprep.subr.bf16.mxu0 %v2624_v14 }
 0x2c9   :  { %2150 = vmatpush1.bf16.msra.mxu0 %v2622_v15 }
 0x2ca   :  { %2151 = vmatprep.subr.bf16.mxu0 %v2627_v16 }
 0x2cd   :  { %2152 = vmatpush1.bf16.msra.mxu0 %v2625_v17 }
 0x2ce   :  { %2153 = vmatprep.subr.bf16.mxu0 %v2630_v18  ;;  %v2663_v18 = vld [vmem:[%s3732_s5 + $0x3f4] ss:$8 sps:$4 sm:$0xff]  }
 0x2d1   :  { %2154 = vmatpush1.bf16.msra.mxu0 %v2628_v19 }
 0x2d2   :  { %2155 = vmatprep.subr.bf16.mxu0 %v2633_v20 }
 0x2d5   :  { %2156 = vmatpush1.bf16.msra.mxu0 %v2631_v21 }
 0x2d6   :  { %2157 = vmatprep.subr.bf16.mxu0 %v2636_v22  ;;  %v2661_v22 = vld [vmem:[%s3732_s5 + $0x3f0] ss:$8 sps:$4 sm:$0xff]  }
 0x2d9   :  { %2158 = vmatpush1.bf16.msra.mxu0 %v2634_v23 }
 0x2da   :  { %2159 = vmatprep.subr.bf16.mxu0 %v2639_v25 }
 0x2dc   :  { %v1075_v31 = vpop.f32.mrb[12].mxu1 }
 0x2dd   :  { %v3626_v32 = vadd.f32 %v1075_v31, %v259_v27  ;;  %v1077_v33 = vpop.f32.mrb[13].mxu1  ;;  %2160 = vmatpush1.bf16.msra.mxu0 %v2637_v28 }
 0x2de   :  { %v3631_v34 = vadd.f32 %v1077_v33, %v263_v29  ;;  %v1079_v38 = vpop.f32.mrb[14].mxu1  ;;  %2161 = vmatprep.subr.bf16.mxu0 %v2642_v30  ;;  %v1364_v30 = vld [vmem:[%s3734_s6] sm:$0x3] }
 0x2df   :  { %v1090_v39 = vmul.f32 %v3626_v32, %v3626_v32  ;;  %v3638_v40 = vadd.f32 %v1079_v38, %v259_v27  ;;  %v1081_v41 = vpop.f32.mrb[15].mxu1  ;;  %v1369_v31 = vrot.slane %v1364_v30, %v2900_v37 }
 0x2e0   :  { %v1091_v43 = vmul.f32 %v3631_v34, %v3631_v34  ;;  %v3642_v44 = vadd.f32 %v1081_v41, %v263_v29 }
 0x2e1   :  { %v1106_v45 = vmul.f32 %v1090_v39, %v3626_v32  ;;  %v1098_v46 = vmul.f32 %v3638_v40, %v3638_v40  ;;  %2162 = vmatpush1.bf16.msra.mxu0 %v2640_v35  ;;  %v2700_v39 = vld [vmem:[%s3728_s0] sm:$0xff] }
 0x2e2   :  { %v1107_v48 = vmul.f32 %v1091_v43, %v3631_v34  ;;  %v1099_v51 = vmul.f32 %v3642_v44, %v3642_v44  ;;  %2163 = vmatprep.subr.bf16.mxu0 %v2645_v42 }
 0x2e3   :  { %v1122_v53 = vmul.f32 0.044715, %v1106_v45  ;;  %v1114_v49 = vmul.f32 %v1098_v46, %v3638_v40 }
 0x2e4   :  { %v1123_v55 = vmul.f32 0.044715, %v1107_v48  ;;  %v1115_v54 = vmul.f32 %v1099_v51, %v3642_v44 }
 0x2e5   :  { %v1138_v62 = vadd.f32 %v1122_v53, %v3626_v32  ;;  %v1130_v56 = vmul.f32 0.044715, %v1114_v49  ;;  %2164 = vmatpush1.bf16.msra.mxu0 %v2643_v47  ;;  %v2703_v47 = vld [vmem:[%s3728_s0 + $0x18] sm:$0x3] }
 0x2e6   :  { %v1139_v58 = vadd.f32 %v1123_v55, %v3631_v34  ;;  %v1131_v59 = vmul.f32 0.044715, %v1115_v54  ;;  %2165 = vmatprep.subr.bf16.mxu0 %v2648_v52 }
 0x2e7   :  { %v1154_v61 = vmul.f32 0.7978846, %v1138_v62  ;;  %v1146_v50 = vadd.f32 %v1130_v56, %v3638_v40 }
 0x2e8   :  { %v1155_v63 = vmul.f32 0.7978846, %v1139_v58  ;;  %v1147_v0 = vadd.f32 %v1131_v59, %v3642_v44 }
 0x2e9   :  { %2692 = vtanh.f32 %v1154_v61  ;;  %v1162_v1 = vmul.f32 0.7978846, %v1146_v50  ;;  %2166 = vmatpush1.bf16.msra.mxu0 %v2646_v57 }
 0x2ea   :  { %2694 = vtanh.f32 %v1155_v63  ;;  %v1163_v3 = vmul.f32 0.7978846, %v1147_v0  ;;  %2167 = vmatprep.subr.bf16.mxu0 %v2651_v60 }
 0x2eb   :  { %2696 = vtanh.f32 %v1162_v1 }
 0x2ec   :  { %2698 = vtanh.f32 %v1163_v3 }
 0x2ed   :  { %2168 = vmatpush1.bf16.msra.mxu0 %v2649_v2 }
 0x2ee   :  { %2169 = vmatprep.subr.bf16.mxu0 %v2654_v4 }
 0x2f1   :  { %2170 = vmatpush1.bf16.msra.mxu0 %v2652_v5 }
 0x2f2   :  { %2171 = vmatprep.subr.bf16.mxu0 %v2657_v6 }
 0x2f3   :  { %v2693_v9 = vpop.eup %2692 }
 0x2f4   :  { %v2695_v11 = vpop.eup %2694  ;;  %v1186_v12 = vadd.f32 1.0, %v2693_v9 }
 0x2f5   :  { %v2697_v10 = vpop.eup %2696  ;;  %2172 = vmatpush1.bf16.msra.mxu0 %v2655_v7  ;;  %v1187_v14 = vadd.f32 1.0, %v2695_v11 }
 0x2f6   :  { %v2699_v15 = vpop.eup %2698  ;;  %v1202_v16 = vmul.f32 0.5, %v1186_v12  ;;  %v1194_v17 = vadd.f32 1.0, %v2697_v10  ;;  %2173 = vmatprep.subr.bf16.mxu0 %v2660_v8 }
 0x2f7   :  { %v1195_v19 = vadd.f32 1.0, %v2699_v15  ;;  %v1203_v20 = vmul.f32 0.5, %v1187_v14 }
 0x2f8   :  { %v1210_v21 = vmul.f32 0.5, %v1194_v17  ;;  %v1218_v24 = vmul.f32 %v1202_v16, %v3626_v32  ;;  %v1373_v32 = vrot.slane %v1364_v30, %v2897_v36  ;;  %v2702_v36 = vld [vmem:[%s3728_s0 + $0x10] sm:$0x3] }
 0x2f9   :  { %2174 = vmatpush1.bf16.msra.mxu0 %v2658_v13  ;;  %v1211_v23 = vmul.f32 0.5, %v1195_v19  ;;  %v1219_v26 = vmul.f32 %v1203_v20, %v3631_v34 }
 0x2fa   :  { %v1226_v25 = vmul.f32 %v1210_v21, %v3638_v40  ;;  %2175 = vmatprep.subr.bf16.mxu0 %v2663_v18 }
 0x2fb   :  { %v1227_v27 = vmul.f32 %v1211_v23, %v3642_v44  ;;  %v2701_v44 = vld [vmem:[%s3728_s0 + $0x8] sm:$0xff] }
 0x2fc   :  { %v1234_v28 = vpack.c.bf16 %v1226_v25, %v1218_v24 }
 0x2fd   :  { %2176 = vmatpush1.bf16.msra.mxu0 %v2661_v22  ;;  %v1235_v29 = vpack.c.bf16 %v1227_v27, %v1219_v26 }
 0x2ff   :  { %2177 = vmatprep.mubr.bf16.mxu0 %v1235_v29 }
 0x300   :  { %2178 = vmatmul.mubr.bf16.vlgmr.msra.gmra.mrb[0].mxu0 %v1234_v28 }
 0x3d3   :  { %v2179_v33 = vpop.f32.mrb[0].mxu0 }
 0x3d4   :  { %v2456_v35 = vadd.f32 %v2179_v33, %v1369_v31  ;;  %v2181_v38 = vpop.f32.mrb[1].mxu0 }
 0x3d5   :  { %v2457_v42 = vadd.f32 %v2181_v38, %v1373_v32  ;;  %v2183_v34 = vpop.f32.mrb[2].mxu0 }
 0x3d6   :  { %v2188_v40 = vadd.f32 %v2700_v39, %v2456_v35  ;;  %v2458_v41 = vadd.f32 %v2183_v34, %v1369_v31  ;;  %v2185_v43 = vpop.f32.mrb[3].mxu0 }
 0x3d7   :  { %v2189_v45 = vadd.f32 %v2701_v44, %v2457_v42  ;;  %v2459_v37 = vadd.f32 %v2185_v43, %v1373_v32 }
 0x3d8   :  { %2192 = vst [vmem:[%s3735_s7] sm:$0xff] %v2188_v40  ;;  %v2190_v46 = vadd.f32 %v2702_v36, %v2458_v41 }
 0x3d9   :  { %2193 = vst [vmem:[%s3735_s7 + $0x8] sm:$0xff] %v2189_v45  ;;  %v2191_v48 = vadd.f32 %v2703_v47, %v2459_v37 }
 0x3da   :  { %2194 = vst [vmem:[%s3735_s7 + $0x10] sm:$0x3] %v2190_v46 }
 0x3db   :  { %2195 = vst [vmem:[%s3735_s7 + $0x18] sm:$0x3] %v2191_v48 }

// kernel: image_encoder_forward.28
= control target key start
LH: loop header
LB: loop body
LE: loop exit
PB: predicated region body
PF: predicated region fallthrough
CT: control target
= control target key end

     0   :  { %v246_v0 = vmov 0.0   ;;  %vm247_vm0 = vmmov 0   ;;  %s348_s1 = inlined_call_operand.vmem [shape: bf16[128,128], index: 1, kind: input, shape index: {}]   ;;  %s349_s0 = inlined_call_operand.vmem [shape: f32[34,128], index: 0, kind: input, shape index: {}]   ;;  %s350_s2 = inlined_call_operand.vmem [shape: f32[1,128], index: 2, kind: input, shape index: {}]   ;;  %s351_s3 = inlined_call_operand.vmem [shape: f32[34,128], index: 3, kind: input, shape index: {}]   ;;  %s352_s4 = inlined_call_operand.vmem [shape: f32[34,128], index: 4, kind: output, shape index: {}]  }
   0x1   :  { %220 = vmatprep.subr.bf16.mxu1 %v246_v0  ;;  %v238_v1 = vld [vmem:[%s348_s1] sm:$0xff]   ;;  %192 = vmatprep.subr.bf16.mxu0 %v246_v0  ;;  %v239_v2 = vld [vmem:[%s348_s1 + $0x8] sm:$0xff]   ;;  %v240_v3 = vld [vmem:[%s348_s1 + $0x10] sm:$0xff]  }
   0x2   :  { %212 = vmatprep.mubr.msk.bf16.mxu1 %vm247_vm0, %v246_v0  ;;  %208 = vmatprep.mubr.msk.bf16.mxu0 %vm247_vm0, %v246_v0  ;;  %v241_v4 = vld [vmem:[%s348_s1 + $0x18] sm:$0xff]   ;;  %v242_v5 = vld [vmem:[%s348_s1 + $0x20] sm:$0xff]   ;;  %v243_v6 = vld [vmem:[%s348_s1 + $0x28] sm:$0xff]  }
   0x3   :  { %228 = vmatpush3.bf16.msra.mxu1 %v238_v1  ;;  %193 = vmatpush3.bf16.msra.mxu0 %v238_v1  ;;  %v244_v7 = vld [vmem:[%s348_s1 + $0x30] sm:$0xff]   ;;  %v245_v8 = vld [vmem:[%s348_s1 + $0x38] sm:$0xff]   ;;  %v18_v11 = vld [vmem:[%s349_s0] sm:$0xff] }
   0x4   :  { %221 = vmatprep.subr.bf16.mxu1 %v246_v0  ;;  %194 = vmatprep.subr.bf16.mxu0 %v246_v0  ;;  %v20_v9 = vld [vmem:[%s349_s0 + $0x10] sm:$0xff]  ;;  %v21_v10 = vld [vmem:[%s349_s0 + $0x18] sm:$0xff]  ;;  %v19_v12 = vld [vmem:[%s349_s0 + $0x8] sm:$0xff] }
   0x5   :  { %v24_v13 = vpack.c.bf16 %v21_v10, %v20_v9  ;;  %v23_v14 = vpack.c.bf16 %v19_v12, %v18_v11  ;;  %v22_v15 = vld [vmem:[%s349_s0 + $0x20] sm:$0x3]  ;;  %v155_v19 = vld [vmem:[%s351_s3 + $0x10] sm:$0xff]  ;;  %v156_v27 = vld [vmem:[%s351_s3 + $0x18] sm:$0xff] }
   0x6   :  { %v25_v16 = vpack.c.bf16 %v22_v15, %v22_v15  ;;  %v172_v17 = vld [vmem:[%s350_s2] ss:$0 sm:$0xff]  ;;  %v154_v29 = vld [vmem:[%s351_s3 + $0x8] sm:$0xff] }
   0x7   :  { %229 = vmatpush3.bf16.msra.mxu1 %v239_v2  ;;  %195 = vmatpush3.bf16.msra.mxu0 %v239_v2  ;;  %v153_v21 = vld [vmem:[%s351_s3] sm:$0xff] }
   0x8   :  { %222 = vmatprep.subr.bf16.mxu1 %v246_v0  ;;  %196 = vmatprep.subr.bf16.mxu0 %v246_v0  ;;  %v157_v39 = vld [vmem:[%s351_s3 + $0x20] sm:$0x3] }
   0xb   :  { %230 = vmatpush3.bf16.msra.mxu1 %v240_v3  ;;  %197 = vmatpush3.bf16.msra.mxu0 %v240_v3 }
   0xc   :  { %223 = vmatprep.subr.bf16.mxu1 %v246_v0  ;;  %198 = vmatprep.subr.bf16.mxu0 %v246_v0 }
   0xf   :  { %231 = vmatpush3.bf16.msra.mxu1 %v241_v4  ;;  %199 = vmatpush3.bf16.msra.mxu0 %v241_v4 }
  0x10   :  { %224 = vmatprep.subr.bf16.mxu1 %v246_v0  ;;  %200 = vmatprep.subr.bf16.mxu0 %v246_v0 }
  0x13   :  { %232 = vmatpush3.bf16.msra.mxu1 %v242_v5  ;;  %201 = vmatpush3.bf16.msra.mxu0 %v242_v5 }
  0x14   :  { %225 = vmatprep.subr.bf16.mxu1 %v246_v0  ;;  %202 = vmatprep.subr.bf16.mxu0 %v246_v0 }
  0x17   :  { %233 = vmatpush3.bf16.msra.mxu1 %v243_v6  ;;  %203 = vmatpush3.bf16.msra.mxu0 %v243_v6 }
  0x18   :  { %226 = vmatprep.subr.bf16.mxu1 %v246_v0  ;;  %204 = vmatprep.subr.bf16.mxu0 %v246_v0 }
  0x1b   :  { %234 = vmatpush3.bf16.msra.mxu1 %v244_v7  ;;  %205 = vmatpush3.bf16.msra.mxu0 %v244_v7 }
  0x1c   :  { %227 = vmatprep.subr.bf16.mxu1 %v246_v0  ;;  %206 = vmatprep.subr.bf16.mxu0 %v246_v0 }
  0x1f   :  { %235 = vmatpush3.bf16.msra.mxu1 %v245_v8  ;;  %207 = vmatpush3.bf16.msra.mxu0 %v245_v8 }
  0x22   :  { %213 = vmatmul.mubr.bf16.vlgmr.msra.gmra.mrb[0].mxu1 %v24_v13  ;;  %209 = vmatmul.mubr.bf16.vlgmr.msra.gmra.mrb[0].mxu0 %v23_v14 }
  0x23   :  { %216 = vmatprep.mubr.msk.bf16.mxu1 %vm247_vm0, %v246_v0 }
  0x2a   :  { %217 = vmatmul.mubr.bf16.gmra.mrb[4].mxu1 %v25_v16 }
  0xf5   :  { %v139_v18 = vpop.f32.mrb[0].mxu1  ;;  %v131_v20 = vpop.f32.mrb[0].mxu0 }
  0xf6   :  { %v140_v22 = vadd.f32 %v172_v17, %v139_v18  ;;  %v214_v23 = vpop.f32.mrb[1].mxu1  ;;  %v132_v24 = vadd.f32 %v172_v17, %v131_v20  ;;  %v210_v25 = vpop.f32.mrb[1].mxu0 }
  0xf7   :  { %v142_v26 = vpop.f32.mrb[2].mxu1  ;;  %v134_v28 = vpop.f32.mrb[2].mxu0 }
  0xf8   :  { %v160_v30 = vadd.f32 %v155_v19, %v140_v22  ;;  %v143_v31 = vadd.f32 %v172_v17, %v142_v26  ;;  %v158_v32 = vadd.f32 %v153_v21, %v132_v24  ;;  %v215_v33 = vpop.f32.mrb[3].mxu1  ;;  %v135_v34 = vadd.f32 %v172_v17, %v134_v28  ;;  %v211_v35 = vpop.f32.mrb[3].mxu0 }
  0xfa   :  { %165 = vst [vmem:[%s352_s4 + $0x10] sm:$0xff] %v160_v30  ;;  %v161_v36 = vadd.f32 %v156_v27, %v143_v31  ;;  %163 = vst [vmem:[%s352_s4] sm:$0xff] %v158_v32  ;;  %v159_v37 = vadd.f32 %v154_v29, %v135_v34 }
  0xfc   :  { %166 = vst [vmem:[%s352_s4 + $0x18] sm:$0xff] %v161_v36  ;;  %164 = vst [vmem:[%s352_s4 + $0x8] sm:$0xff] %v159_v37 }
  0xfd   :  { %v147_v38 = vpop.f32.mrb[4].mxu1 }
  0xfe   :  { %v148_v40 = vadd.f32 %v172_v17, %v147_v38  ;;  %v218_v41 = vpop.f32.mrb[5].mxu1 }
  0xff   :  { %v150_v42 = vpop.f32.mrb[6].mxu1 }
 0x100   :  { %v162_v43 = vadd.f32 %v157_v39, %v148_v40  ;;  %v219_v44 = vpop.f32.mrb[7].mxu1 }
 0x102   :  { %167 = vst [vmem:[%s352_s4 + $0x20] sm:$0x3] %v162_v43 }

// kernel: image_encoder_forward.26
= control target key start
LH: loop header
LB: loop body
LE: loop exit
PB: predicated region body
PF: predicated region fallthrough
CT: control target
= control target key end

     0   :  { %vm34_vm0 = vcmask 1041408   ;;  %v535_v7 = vmov 0.0   ;;  %v536_v50 = vmov 0   ;;  %vm537_vm1 = vmmov 0   ;;  %s750_s0 = inlined_call_operand.vmem [shape: f32[34,128], index: 0, kind: input, shape index: {}]   ;;  %s751_s3 = inlined_call_operand.vmem [shape: bf16[128,384], index: 3, kind: input, shape index: {}]   ;;  %s752_s1 = inlined_call_operand.vmem [shape: f32[1,128], index: 1, kind: input, shape index: {}]   ;;  %s753_s2 = inlined_call_operand.vmem [shape: f32[1,128], index: 2, kind: input, shape index: {}]   ;;  %s754_s4 = inlined_call_operand.vmem [shape: f32[1,384], index: 4, kind: input, shape index: {}]   ;;  %s755_s5 = inlined_call_operand.vmem [shape: f32[34,384], index: 5, kind: output, shape index: {}]  }
   0x1   :  { %v21_v0 = vld [vmem:[%s750_s0] sm:$0xff]  ;;  %v23_v1 = vld [vmem:[%s750_s0 + $0x10] sm:$0xff]  ;;  %v22_v2 = vld [vmem:[%s750_s0 + $0x8] sm:$0xff]  ;;  %462 = vmatprep.subr.bf16.mxu1 %v535_v7  ;;  %321 = vmatprep.mubr.bf16.mxu0 %v536_v50 }
   0x2   :  { %26 = vadd.xlane.f32.xlu0 %v21_v0  ;;  %30 = vadd.xlane.f32.xlu1 %v23_v1  ;;  %v24_v3 = vld [vmem:[%s750_s0 + $0x18] sm:$0xff]  ;;  %v25_v4 = vld [vmem:[%s750_s0 + $0x20] sm:$0x3]  ;;  %v493_v6 = vld [vmem:[%s751_s3 + $0x4] ss:$12 sps:$4 sm:$0xff]  }
   0x3   :  { %v35_v5 = vsel %vm34_vm0, %v25_v4, 0.0  ;;  %v495_v8 = vld [vmem:[%s751_s3] ss:$12 sps:$4 sm:$0xff]   ;;  %289 = vmatprep.subr.bf16.mxu0 %v493_v6  ;;  %v496_v9 = vld [vmem:[%s751_s3 + $0x8] ss:$12 sps:$4 sm:$0xff]   ;;  %478 = vmatprep.mubr.msk.bf16.mxu1 %vm537_vm1, %v535_v7 }
   0x4   :  { %290 = vmatpush1.bf16.msra.mxu0 %v495_v8  ;;  %v497_v10 = vld [vmem:[%s751_s3 + $0x1c] ss:$12 sps:$4 sm:$0xff]   ;;  %463 = vmatpush3.bf16.msra.mxu1 %v496_v9  ;;  %v499_v32 = vld [vmem:[%s751_s3 + $0x18] ss:$12 sps:$4 sm:$0xff]   ;;  %v500_v33 = vld [vmem:[%s751_s3 + $0x20] ss:$12 sps:$4 sm:$0xff]  }
   0x5   :  { %291 = vmatprep.subr.bf16.mxu0 %v497_v10  ;;  %464 = vmatprep.subr.bf16.mxu1 %v535_v7  ;;  %v501_v34 = vld [vmem:[%s751_s3 + $0x34] ss:$12 sps:$4 sm:$0xff]   ;;  %v503_v35 = vld [vmem:[%s751_s3 + $0x30] ss:$12 sps:$4 sm:$0xff]   ;;  %v504_v36 = vld [vmem:[%s751_s3 + $0x38] ss:$12 sps:$4 sm:$0xff]  }
   0x6   :  { %28 = vadd.xlane.f32.xlu0 %v22_v2  ;;  %32 = vadd.xlane.f32.xlu1 %v24_v3  ;;  %v505_v37 = vld [vmem:[%s751_s3 + $0x4c] ss:$12 sps:$4 sm:$0xff]   ;;  %v507_v38 = vld [vmem:[%s751_s3 + $0x48] ss:$12 sps:$4 sm:$0xff]   ;;  %v508_v39 = vld [vmem:[%s751_s3 + $0x50] ss:$12 sps:$4 sm:$0xff]  }
   0x7   :  { %v509_v40 = vld [vmem:[%s751_s3 + $0x64] ss:$12 sps:$4 sm:$0xff]   ;;  %v511_v41 = vld [vmem:[%s751_s3 + $0x60] ss:$12 sps:$4 sm:$0xff]   ;;  %v512_v42 = vld [vmem:[%s751_s3 + $0x68] ss:$12 sps:$4 sm:$0xff]  }
   0x8   :  { %292 = vmatpush1.bf16.msra.mxu0 %v499_v32  ;;  %465 = vmatpush3.bf16.msra.mxu1 %v500_v33  ;;  %v513_v43 = vld [vmem:[%s751_s3 + $0x7c] ss:$12 sps:$4 sm:$0xff]   ;;  %v515_v44 = vld [vmem:[%s751_s3 + $0x78] ss:$12 sps:$4 sm:$0xff]   ;;  %v516_v45 = vld [vmem:[%s751_s3 + $0x80] ss:$12 sps:$4 sm:$0xff]  }
   0x9   :  { %466 = vmatprep.subr.bf16.mxu1 %v535_v7  ;;  %293 = vmatprep.subr.bf16.mxu0 %v501_v34  ;;  %v517_v46 = vld [vmem:[%s751_s3 + $0x94] ss:$12 sps:$4 sm:$0xff]   ;;  %v519_v47 = vld [vmem:[%s751_s3 + $0x90] ss:$12 sps:$4 sm:$0xff]   ;;  %v520_v48 = vld [vmem:[%s751_s3 + $0x98] ss:$12 sps:$4 sm:$0xff]  }
   0xa   :  { %36 = vadd.xlane.f32.xlu0 %v35_v5  ;;  %v521_v49 = vld [vmem:[%s751_s3 + $0xac] ss:$12 sps:$4 sm:$0xff]   ;;  %v523_v51 = vld [vmem:[%s751_s3 + $0xa8] ss:$12 sps:$4 sm:$0xff]   ;;  %v524_v52 = vld [vmem:[%s751_s3 + $0xb0] ss:$12 sps:$4 sm:$0xff]  }
   0xb   :  { %v425_v6 = vld [vmem:[%s752_s1] ss:$0 sm:$0xff] }
   0xc   :  { %294 = vmatpush1.bf16.msra.mxu0 %v503_v35  ;;  %467 = vmatpush3.bf16.msra.mxu1 %v504_v36 }
   0xd   :  { %468 = vmatprep.subr.bf16.mxu1 %v535_v7  ;;  %295 = vmatprep.subr.bf16.mxu0 %v505_v37 }
  0x10   :  { %296 = vmatpush1.bf16.msra.mxu0 %v507_v38  ;;  %469 = vmatpush3.bf16.msra.mxu1 %v508_v39 }
  0x11   :  { %470 = vmatprep.subr.bf16.mxu1 %v535_v7  ;;  %297 = vmatprep.subr.bf16.mxu0 %v509_v40 }
  0x14   :  { %298 = vmatpush1.bf16.msra.mxu0 %v511_v41  ;;  %471 = vmatpush3.bf16.msra.mxu1 %v512_v42 }
  0x15   :  { %472 = vmatprep.subr.bf16.mxu1 %v535_v7  ;;  %299 = vmatprep.subr.bf16.mxu0 %v513_v43 }
  0x18   :  { %300 = vmatpush1.bf16.msra.mxu0 %v515_v44  ;;  %473 = vmatpush3.bf16.msra.mxu1 %v516_v45 }
  0x19   :  { %301 = vmatprep.subr.bf16.mxu0 %v517_v46  ;;  %474 = vmatprep.subr.bf16.mxu1 %v535_v7 }
  0x1c   :  { %302 = vmatpush1.bf16.msra.mxu0 %v519_v47  ;;  %475 = vmatpush3.bf16.msra.mxu1 %v520_v48 }
  0x1d   :  { %303 = vmatprep.subr.bf16.mxu0 %v521_v49  ;;  %476 = vmatprep.subr.bf16.mxu1 %v535_v7 }
  0x20   :  { %304 = vmatpush1.bf16.msra.mxu0 %v523_v51  ;;  %477 = vmatpush3.bf16.msra.mxu1 %v524_v52 }
  0x8f   :  { %v27_v11 = vpop.xlane.xlu0 %26  ;;  %v31_v12 = vpop.xlane.xlu1 %30 }
  0x90   :  { %v39_v13 = vmul.f32 0.0078125, %v27_v11  ;;  %v41_v14 = vmul.f32 0.0078125, %v31_v12  ;;  %v426_v12 = vld [vmem:[%s753_s2] ss:$0 sm:$0xff] }
  0x92   :  { %v598_v15 = vsub.f32 %v21_v0, %v39_v13  ;;  %v600_v16 = vsub.f32 %v23_v1, %v41_v14 }
  0x93   :  { %v29_v17 = vpop.xlane.xlu0 %28  ;;  %v33_v18 = vpop.xlane.xlu1 %32 }
  0x94   :  { %v40_v19 = vmul.f32 0.0078125, %v29_v17  ;;  %v49_v20 = vmul.f32 %v598_v15, %v598_v15  ;;  %v42_v21 = vmul.f32 0.0078125, %v33_v18  ;;  %v51_v24 = vmul.f32 %v600_v16, %v600_v16 }
  0x96   :  { %v604_v22 = vsub.f32 %v22_v2, %v40_v19  ;;  %54 = vadd.xlane.f32.xlu1 %v49_v20  ;;  %v606_v23 = vsub.f32 %v24_v3, %v42_v21 }
  0x97   :  { %v37_v25 = vpop.xlane.xlu0 %36 }
  0x98   :  { %v43_v26 = vmul.f32 0.0078125, %v37_v25  ;;  %v50_v27 = vmul.f32 %v604_v22, %v604_v22  ;;  %v52_v29 = vmul.f32 %v606_v23, %v606_v23 }
  0x9a   :  { %v612_v28 = vsub.f32 %v25_v4, %v43_v26  ;;  %58 = vadd.xlane.f32.xlu1 %v51_v24  ;;  %56 = vadd.xlane.f32.xlu0 %v50_v27 }
  0x9c   :  { %v53_v30 = vmul.f32 %v612_v28, %v612_v28 }
  0x9e   :  { %60 = vadd.xlane.f32.xlu0 %v52_v29  ;;  %v62_v31 = vsel %vm34_vm0, %v53_v30, 0.0 }
  0x9f   :  { %63 = vadd.xlane.f32.xlu1 %v62_v31  ;;  %v146_v31 = vlaneseq }
  0xa1   :  { %v147_v32 = vshrl.u32 %v146_v31, 7 }
  0xa3   :  { %v148_v33 = vsub.s32 0, %v147_v32  ;;  %v156_v34 = vsub.s32 2, %v147_v32  ;;  %v152_v35 = vsub.s32 1, %v147_v32 }
 0x123   :  { %v55_v53 = vpop.xlane.xlu1 %54 }
 0x124   :  { %v65_v54 = vmul.f32 0.0078125, %v55_v53 }
 0x126   :  { %v70_v55 = vadd.f32 1e-06, %v65_v54 }
 0x127   :  { %v59_v56 = vpop.xlane.xlu1 %58  ;;  %v57_v57 = vpop.xlane.xlu0 %56 }
 0x128   :  { %525 = vrsqrt.f32 %v70_v55  ;;  %v67_v58 = vmul.f32 0.0078125, %v59_v56  ;;  %v66_v59 = vmul.f32 0.0078125, %v57_v57 }
 0x12a   :  { %v71_v60 = vadd.f32 1e-06, %v66_v59  ;;  %v72_v61 = vadd.f32 1e-06, %v67_v58 }
 0x12b   :  { %v61_v62 = vpop.xlane.xlu0 %60 }
 0x12c   :  { %v68_v63 = vmul.f32 0.0078125, %v61_v62  ;;  %v64_v0 = vpop.xlane.xlu1 %63  ;;  %527 = vrsqrt.f32 %v71_v60 }
 0x12d   :  { %v69_v1 = vmul.f32 0.0078125, %v64_v0  ;;  %529 = vrsqrt.f32 %v72_v61 }
 0x12e   :  { %v73_v2 = vadd.f32 1e-06, %v68_v63 }
 0x12f   :  { %v74_v3 = vadd.f32 1e-06, %v69_v1 }
 0x130   :  { %531 = vrsqrt.f32 %v73_v2 }
 0x131   :  { %533 = vrsqrt.f32 %v74_v3 }
 0x132   :  { %v526_v4 = vpop.eup %525 }
 0x133   :  { %v80_v5 = vmul.f32 %v526_v4, %v598_v15 }
 0x135   :  { %v92_v10 = vmul.f32 %v425_v6, %v80_v5 }
 0x136   :  { %v528_v8 = vpop.eup %527 }
 0x137   :  { %v81_v9 = vmul.f32 %v528_v8, %v604_v22  ;;  %v530_v11 = vpop.eup %529  ;;  %v104_v18 = vadd.f32 %v426_v12, %v92_v10 }
 0x138   :  { %v82_v19 = vmul.f32 %v530_v11, %v600_v16 }
 0x139   :  { %v93_v14 = vmul.f32 %v425_v6, %v81_v9 }
 0x13a   :  { %v532_v13 = vpop.eup %531  ;;  %v94_v22 = vmul.f32 %v425_v6, %v82_v19 }
 0x13b   :  { %v83_v17 = vmul.f32 %v532_v13, %v606_v23  ;;  %v105_v15 = vadd.f32 %v426_v12, %v93_v14  ;;  %v534_v24 = vpop.eup %533 }
 0x13c   :  { %v84_v26 = vmul.f32 %v534_v24, %v612_v28  ;;  %v106_v27 = vadd.f32 %v426_v12, %v94_v22  ;;  %v144_v28 = vld [vmem:[%s754_s4] sm:$0x7] }
 0x13d   :  { %v109_v20 = vpack.c.bf16 %v105_v15, %v104_v18  ;;  %v95_v21 = vmul.f32 %v425_v6, %v83_v17  ;;  %v149_v36 = vrot.slane %v144_v28, %v148_v33  ;;  %v157_v37 = vrot.slane %v144_v28, %v156_v34 }
 0x13e   :  { %v96_v23 = vmul.f32 %v425_v6, %v84_v26  ;;  %v153_v38 = vrot.slane %v144_v28, %v152_v35 }
 0x13f   :  { %322 = vmatmul.mubr.bf16.vlgmr.msra.gmra.mrb[0].mxu0 %v109_v20  ;;  %479 = vmatmul.mubr.bf16.vlgmr.msra.gmra.mrb[0].mxu1 %v109_v20  ;;  %v107_v25 = vadd.f32 %v426_v12, %v95_v21 }
 0x140   :  { %331 = vmatprep.mubr.bf16.mxu0 %v536_v50  ;;  %482 = vmatprep.mubr.msk.bf16.mxu1 %vm537_vm1, %v535_v7  ;;  %v108_v16 = vadd.f32 %v426_v12, %v96_v23 }
 0x141   :  { %v110_v29 = vpack.c.bf16 %v107_v25, %v106_v27 }
 0x142   :  { %v111_v30 = vpack.c.bf16 %v108_v16, %v108_v16 }
 0x147   :  { %332 = vmatmul.mubr.bf16.gmra.mrb[4].mxu0 %v110_v29  ;;  %483 = vmatmul.mubr.bf16.gmra.mrb[4].mxu1 %v110_v29 }
 0x148   :  { %341 = vmatprep.mubr.bf16.mxu0 %v536_v50  ;;  %486 = vmatprep.mubr.msk.bf16.mxu1 %vm537_vm1, %v535_v7 }
 0x14f   :  { %342 = vmatmul.mubr.bf16.gmra.mrb[8].mxu0 %v111_v30  ;;  %487 = vmatmul.mubr.bf16.gmra.mrb[8].mxu1 %v111_v30 }
 0x212   :  { %v323_v39 = vpop.f32.mrb[0].mxu0  ;;  %v384_v40 = vpop.f32.mrb[0].mxu1 }
 0x213   :  { %v324_v41 = vadd.f32 %v323_v39, %v149_v36  ;;  %v385_v7 = vadd.f32 %v384_v40, %v157_v37  ;;  %v325_v42 = vpop.f32.mrb[1].mxu0  ;;  %v480_v43 = vpop.f32.mrb[1].mxu1 }
 0x214   :  { %v326_v44 = vadd.f32 %v325_v42, %v153_v38  ;;  %v327_v45 = vpop.f32.mrb[2].mxu0  ;;  %v387_v46 = vpop.f32.mrb[2].mxu1 }
 0x215   :  { %406 = vst [vmem:[%s755_s5] sm:$0xff] %v324_v41  ;;  %408 = vst [vmem:[%s755_s5 + $0x10] sm:$0xff] %v385_v7  ;;  %v328_v47 = vadd.f32 %v327_v45, %v149_v36  ;;  %v388_v48 = vadd.f32 %v387_v46, %v157_v37  ;;  %v329_v49 = vpop.f32.mrb[3].mxu0  ;;  %v481_v50 = vpop.f32.mrb[3].mxu1 }
 0x216   :  { %407 = vst [vmem:[%s755_s5 + $0x8] sm:$0xff] %v326_v44  ;;  %v330_v51 = vadd.f32 %v329_v49, %v153_v38 }
 0x217   :  { %409 = vst [vmem:[%s755_s5 + $0x18] sm:$0xff] %v328_v47  ;;  %411 = vst [vmem:[%s755_s5 + $0x28] sm:$0xff] %v388_v48 }
 0x218   :  { %410 = vst [vmem:[%s755_s5 + $0x20] sm:$0xff] %v330_v51 }
 0x21a   :  { %v333_v52 = vpop.f32.mrb[4].mxu0  ;;  %v392_v53 = vpop.f32.mrb[4].mxu1 }
 0x21b   :  { %v334_v54 = vadd.f32 %v333_v52, %v149_v36  ;;  %v393_v55 = vadd.f32 %v392_v53, %v157_v37  ;;  %v335_v56 = vpop.f32.mrb[5].mxu0  ;;  %v484_v57 = vpop.f32.mrb[5].mxu1 }
 0x21c   :  { %v336_v58 = vadd.f32 %v335_v56, %v153_v38  ;;  %v337_v59 = vpop.f32.mrb[6].mxu0  ;;  %v395_v60 = vpop.f32.mrb[6].mxu1 }
 0x21d   :  { %412 = vst [vmem:[%s755_s5 + $0x30] sm:$0xff] %v334_v54  ;;  %414 = vst [vmem:[%s755_s5 + $0x40] sm:$0xff] %v393_v55  ;;  %v338_v61 = vadd.f32 %v337_v59, %v149_v36  ;;  %v396_v62 = vadd.f32 %v395_v60, %v157_v37  ;;  %v339_v63 = vpop.f32.mrb[7].mxu0  ;;  %v485_v0 = vpop.f32.mrb[7].mxu1 }
 0x21e   :  { %413 = vst [vmem:[%s755_s5 + $0x38] sm:$0xff] %v336_v58  ;;  %v340_v1 = vadd.f32 %v339_v63, %v153_v38 }
 0x21f   :  { %415 = vst [vmem:[%s755_s5 + $0x48] sm:$0xff] %v338_v61  ;;  %417 = vst [vmem:[%s755_s5 + $0x58] sm:$0xff] %v396_v62 }
 0x220   :  { %416 = vst [vmem:[%s755_s5 + $0x50] sm:$0xff] %v340_v1 }
 0x222   :  { %v343_v2 = vpop.f32.mrb[8].mxu0  ;;  %v400_v3 = vpop.f32.mrb[8].mxu1 }
 0x223   :  { %v344_v4 = vadd.f32 %v343_v2, %v149_v36  ;;  %v401_v5 = vadd.f32 %v400_v3, %v157_v37  ;;  %v345_v6 = vpop.f32.mrb[9].mxu0  ;;  %v488_v8 = vpop.f32.mrb[9].mxu1 }
 0x224   :  { %v346_v9 = vadd.f32 %v345_v6, %v153_v38  ;;  %v347_v10 = vpop.f32.mrb[10].mxu0  ;;  %v403_v11 = vpop.f32.mrb[10].mxu1 }
 0x225   :  { %418 = vst [vmem:[%s755_s5 + $0x60] sm:$0x3] %v344_v4  ;;  %420 = vst [vmem:[%s755_s5 + $0x70] sm:$0x3] %v401_v5  ;;  %v348_v12 = vpop.f32.mrb[11].mxu0  ;;  %v489_v13 = vpop.f32.mrb[11].mxu1 }
 0x226   :  { %419 = vst [vmem:[%s755_s5 + $0x68] sm:$0x3] %v346_v9 }

// kernel: image_encoder_forward.27
= control target key start
LH: loop header
LB: loop body
LE: loop exit
PB: predicated region body
PF: predicated region fallthrough
CT: control target
= control target key end

     0   :  { %s1122_s6 = smov 0   ;;  %s1306_s0 = inlined_call_operand.vmem [shape: f32[2,17,384], index: 0, kind: input, shape index: {}]   ;;  %s1307_s1 = inlined_call_operand.vmem [shape: f32[2,17,128], index: 1, kind: output, shape index: {}]  }
   0x1 LB: > { %s909_s7 = sadd.s32 4294967295, %s1106_s6   ;;  %p913_p0 = scmp.ge.s32.totalorder %s1106_s6, 1  ;;  %s1106_s6 = sphi %s1122_s6, %s11_s6  }
   0x2   : > { %p87_p1 = scmp.lt.s32.totalorder %s1106_s6, 3 }
   0x4   : > { %p88_p2 = pnand %p913_p0, %p87_p1 }
   0x5   : > { %p107_p3 = scmp.lt.s32.totalorder (!%p88_p2), %s909_s7, 1  ;;  %vm133_vm0 = vcmask (!%p88_p2), 261120   ;;  %vm204_vm1 = vcmask (!%p88_p2), 131072   ;;  %vm197_vm2 = vcmask (!%p88_p2), 138240   ;;  %vm240_vm3 = vcmask (!%p88_p2), 1040384   ;;  %s1109_s12 = smov (!%p88_p2), 96  }
   0x6   : > { %91 = sbr.rel (%p88_p2) target bundleno = 2565 (0xa05), region = 24  ;;  %v1108_v42 = vmov (!%p88_p2), 0   ;;  %s1110_s13 = smov (!%p88_p2), 64   ;;  %vm847_vm4 = vcmask (!%p88_p2), 785408   ;;  %vm843_vm5 = vcmask (!%p88_p2), 523264  }
   0x7   : > { %v1177_v43 = vsel (!%p88_p2), %vm240_vm3, 65535, %v1108_v42  ;;  %s1111_s14 = smov (!%p88_p2), 32  }
   0xd   : > { %s1309_s7 = smov (!%p107_p3, %s909_s7), 1 }
   0xe   : > { %s1038_s8 = smul.u32 72, %s1309_s7 }
   0xf   : > { %s1039_s15 = smul.u32 24, %s1309_s7 }
  0x10   : > { %s1136_s11 = scalar_lea.vmem %s1306_s0, %s1038_s8 }
  0x11   : > { %v119_v0 = vld [vmem:[%s1136_s11 + $0x8] sm:$0xff]  ;;  %v122_v1 = vld [vmem:[%s1136_s11 + $0x20] sm:$0xff]  ;;  %v125_v2 = vld [vmem:[%s1136_s11 + $0x38] sm:$0x1]  ;;  %s116_s18 = scalar_lea.vmem %s1307_s1, %s1039_s15 }
  0x12   : > { %v1141_v3 = vpack.c.bf16 %v122_v1, %v119_v0  ;;  %v1143_v4 = vpack.c.bf16 %v125_v2, %v125_v2  ;;  %v118_v5 = vld [vmem:[%s1136_s11] sm:$0xff]  ;;  %v121_v6 = vld [vmem:[%s1136_s11 + $0x18] sm:$0xff]  ;;  %v124_v10 = vld [vmem:[%s1136_s11 + $0x30] sm:$0x1] }
  0x13   : > { %v1147_v7 = vpack.c.bf16 %v121_v6, %v118_v5  ;;  %v1160_v11 = vpack.c.bf16 %v124_v10, %v124_v10  ;;  %v120_v37 = vld [vmem:[%s1136_s11 + $0x10] sm:$0xff]  ;;  %v123_v38 = vld [vmem:[%s1136_s11 + $0x28] sm:$0xff]  ;;  %v126_v40 = vld [vmem:[%s1136_s11 + $0x40] sm:$0x1] }
  0x14   : > { %1030 = vmatprep.subr.msk.bf16.mxu0 %vm133_vm0, %v1141_v3  ;;  %v141_v8 = vsel %vm133_vm0, %v1141_v3, 0  ;;  %v144_v9 = vsel %vm133_vm0, %v1143_v4, 0  ;;  %v1172_v39 = vpack.c.bf16 %v123_v38, %v120_v37  ;;  %v1175_v41 = vpack.c.bf16 %v126_v40, %v126_v40 }
  0x15   : > { %967 = vmatpush3.bf16.xpose.msra.mxu0 %v141_v8  ;;  %970 = vmatprep.mubr.msk.bf16.mxu0 %vm133_vm0, %v1147_v7 }
  0x16   : > { %1031 = vmatprep.subr.msk.bf16.mxu0 %vm133_vm0, %v1143_v4  ;;  %974 = vmatprep.subr.bf16.mxu1 %v1172_v39  ;;  %v244_v44 = vand.u32 %v1177_v43, %v1175_v41 }
  0x17   : > { %975 = vmatpush3.bf16.msra.mxu1 %v1172_v39 }
  0x18   : > { %976 = vmatprep.subr.bf16.mxu1 %v244_v44 }
  0x1b   : > { %977 = vmatpush3.bf16.msra.mxu1 %v244_v44 }
  0x1d   : > { %969 = vmatpush3.bf16.xpose.msra.mxu0 %v144_v9 }
  0x24   : > { %971 = vmatmul.mubr.msk.bf16.vlgmr.msra.gmra.mrb[0].mxu0 %vm133_vm0, %v1160_v11 }
  0xf7   : > { %v972_v12 = vpop.f32.mrb[0].mxu0 }
  0xf8   : > { %v196_v13 = vmul.f32 0.17677669, %v972_v12  ;;  %v180_v14 = vpop.f32.mrb[1].mxu0 }
  0xf9   : > { %v194_v15 = vmul.f32 0.17677669, %v180_v14  ;;  %v973_v16 = vpop.f32.mrb[2].mxu0 }
  0xfa   : > { %v183_v17 = vpop.f32.mrb[3].mxu0  ;;  %v205_v18 = vsel %vm204_vm1, %v196_v13, -inf }
  0xfb   : > { %v195_v19 = vmul.f32 0.17677669, %v183_v17  ;;  %206 = vmax.xlane.f32.xlu1 %v205_v18  ;;  %v198_v20 = vsel %vm197_vm2, %v194_v15, -inf }
  0xfc   : > { %199 = vmax.xlane.f32.xlu0 %v198_v20 }
  0xfd   : > { %v201_v21 = vsel %vm197_vm2, %v195_v19, -inf }
 0x100   : > { %202 = vmax.xlane.f32.xlu0 %v201_v21 }
 0x188   : > { %v207_v22 = vpop.xlane.xlu1 %206 }
 0x189   : > { %v210_v23 = vsub.f32 %v196_v13, %v207_v22  ;;  %v200_v24 = vpop.xlane.xlu0 %199 }
 0x18a   : > { %v208_v25 = vsub.f32 %v194_v15, %v200_v24 }
 0x18b   : > { %v215_v26 = vmul.f32 1.442695, %v210_v23 }
 0x18c   : > { %v211_v27 = vmul.f32 1.442695, %v208_v25 }
 0x18d   : > { %v203_v28 = vpop.xlane.xlu0 %202 }
 0x18e   : > { %1052 = vpow2.f32 %v211_v27  ;;  %v209_v29 = vsub.f32 %v195_v19, %v203_v28 }
 0x18f   : > { %1054 = vpow2.f32 %v215_v26 }
 0x190   : > { %v213_v30 = vmul.f32 1.442695, %v209_v29 }
 0x192   : > { %1056 = vpow2.f32 %v213_v30 }
 0x198   : > { %v1053_v31 = vpop.eup %1052 }
 0x199   : > { %v217_v32 = vsel %vm197_vm2, %v1053_v31, 0.0  ;;  %v1055_v33 = vpop.eup %1054 }
 0x19a   : > { %218 = vadd.xlane.f32.xlu1 %v217_v32  ;;  %v223_v35 = vsel %vm204_vm1, %v1055_v33, 0.0 }
 0x19c   : > { %v1057_v34 = vpop.eup %1056 }
 0x19d   : > { %v220_v36 = vsel %vm197_vm2, %v1057_v34, 0.0 }
 0x19e   : > { %224 = vadd.xlane.f32.xlu1 %v223_v35  ;;  %221 = vadd.xlane.f32.xlu0 %v220_v36 }
 0x1af   : > { %304 = vrot.lane.b32.xlu1 %v1143_v4, %s1109_s12 }
 0x1b3   : > { %296 = vrot.lane.b32.xlu1 %v1147_v7, %s1109_s12 }
 0x1b4   : > { %302 = vrot.lane.b32.xlu0 %v1141_v3, %s1109_s12 }
 0x1b7   : > { %298 = vrot.lane.b32.xlu1 %v1160_v11, %s1109_s12 }
 0x227   : > { %v219_v45 = vpop.xlane.xlu1 %218 }
 0x228   : > { %1058 = vrcp.f32 %v219_v45 }
 0x22b   : > { %v225_v46 = vpop.xlane.xlu1 %224  ;;  %v222_v47 = vpop.xlane.xlu0 %221 }
 0x22c   : > { %1060 = vrcp.f32 %v225_v46 }
 0x22d   : > { %1062 = vrcp.f32 %v222_v47 }
 0x22f   : > { %v303_v48 = vpop.permute.xlu0 %302  ;;  %v305_v50 = vpop.permute.xlu1 %304 }
 0x230   : > { %1032 = vmatprep.subr.msk.bf16.mxu1 %vm133_vm0, %v303_v48  ;;  %v313_v58 = vsel %vm133_vm0, %v303_v48, 0  ;;  %v316_v60 = vsel %vm133_vm0, %v305_v50, 0 }
 0x232   : > { %v1059_v49 = vpop.eup %1058 }
 0x233   : > { %v229_v54 = vmul.f32 %v1059_v49, %v1053_v31  ;;  %v297_v59 = vpop.permute.xlu1 %296 }
 0x236   : > { %v1061_v51 = vpop.eup %1060 }
 0x237   : > { %v1063_v52 = vpop.eup %1062  ;;  %v231_v53 = vmul.f32 %v1061_v51, %v1055_v33  ;;  %v299_v61 = vpop.permute.xlu1 %298 }
 0x238   : > { %v230_v55 = vmul.f32 %v1063_v52, %v1057_v34 }
 0x239   : > { %v233_v56 = vpack.c.bf16 %v231_v53, %v231_v53 }
 0x23a   : > { %v232_v57 = vpack.c.bf16 %v230_v55, %v229_v54 }
 0x23c   : > { %978 = vmatprep.mubr.msk.bf16.mxu1 %vm197_vm2, %v232_v57 }
 0x23d   : > { %979 = vmatmul.mubr.msk.bf16.vlgmr.msra.gmra.mrb[0].mxu1 %vm197_vm2, %v233_v56 }
 0x23e   : > { %983 = vmatpush3.bf16.xpose.msra.mxu1 %v313_v58  ;;  %986 = vmatprep.mubr.msk.bf16.mxu1 %vm133_vm0, %v297_v59 }
 0x23f   : > { %1033 = vmatprep.subr.msk.bf16.mxu1 %vm133_vm0, %v305_v50 }
 0x246   : > { %985 = vmatpush3.bf16.xpose.msra.mxu1 %v316_v60 }
 0x24d   : > { %987 = vmatmul.mubr.msk.bf16.vlgmr.msra.gmra.mrb[4].mxu1 %vm133_vm0, %v299_v61 }
 0x310   : > { %v1199_v62 = vpop.f32.mrb[0].mxu1 }
 0x311   : > { %v1201_v63 = vpop.f32.mrb[1].mxu1 }
 0x312   : > { %v981_v0 = vpop.f32.mrb[2].mxu1 }
 0x313   : > { %v1203_v1 = vpop.f32.mrb[3].mxu1 }
 0x320   : > { %v988_v2 = vpop.f32.mrb[4].mxu1 }
 0x321   : > { %v352_v5 = vpop.f32.mrb[5].mxu1  ;;  %v368_v10 = vmul.f32 0.17677669, %v988_v2 }
 0x322   : > { %v366_v6 = vmul.f32 0.17677669, %v352_v5  ;;  %v989_v8 = vpop.f32.mrb[6].mxu1 }
 0x323   : > { %v355_v9 = vpop.f32.mrb[7].mxu1  ;;  %v375_v15 = vsel %vm204_vm1, %v368_v10, -inf }
 0x324   : > { %v367_v12 = vmul.f32 0.17677669, %v355_v9  ;;  %v369_v13 = vsel %vm197_vm2, %v366_v6, -inf }
 0x325   : > { %370 = vmax.xlane.f32.xlu0 %v369_v13 }
 0x326   : > { %v372_v14 = vsel %vm197_vm2, %v367_v12, -inf }
 0x327   : > { %373 = vmax.xlane.f32.xlu1 %v372_v14 }
 0x329   : > { %376 = vmax.xlane.f32.xlu0 %v375_v15 }
 0x3b2   : > { %v371_v16 = vpop.xlane.xlu0 %370 }
 0x3b3   : > { %v378_v17 = vsub.f32 %v366_v6, %v371_v16 }
 0x3b4   : > { %v374_v18 = vpop.xlane.xlu1 %373 }
 0x3b5   : > { %v381_v19 = vmul.f32 1.442695, %v378_v17  ;;  %v379_v20 = vsub.f32 %v367_v12, %v374_v18 }
 0x3b6   : > { %v377_v21 = vpop.xlane.xlu0 %376 }
 0x3b7   : > { %1064 = vpow2.f32 %v381_v19  ;;  %v383_v22 = vmul.f32 1.442695, %v379_v20  ;;  %v380_v23 = vsub.f32 %v368_v10, %v377_v21 }
 0x3b9   : > { %1066 = vpow2.f32 %v383_v22  ;;  %v385_v24 = vmul.f32 1.442695, %v380_v23 }
 0x3bb   : > { %1068 = vpow2.f32 %v385_v24 }
 0x3c1   : > { %v1065_v25 = vpop.eup %1064 }
 0x3c2   : > { %v387_v26 = vsel %vm197_vm2, %v1065_v25, 0.0 }
 0x3c3   : > { %v1067_v27 = vpop.eup %1066  ;;  %388 = vadd.xlane.f32.xlu0 %v387_v26 }
 0x3c4   : > { %v390_v30 = vsel %vm197_vm2, %v1067_v27, 0.0 }
 0x3c5   : > { %v1069_v28 = vpop.eup %1068 }
 0x3c6   : > { %v393_v29 = vsel %vm204_vm1, %v1069_v28, 0.0 }
 0x3c7   : > { %394 = vadd.xlane.f32.xlu1 %v393_v29  ;;  %391 = vadd.xlane.f32.xlu0 %v390_v30 }
 0x3d8   : > { %408 = vrot.lane.b32.xlu1 %v1175_v41, %s1109_s12 }
 0x3dc   : > { %472 = vrot.lane.b32.xlu1 %v1141_v3, %s1110_s13 }
 0x3dd   : > { %406 = vrot.lane.b32.xlu0 %v1172_v39, %s1109_s12 }
 0x3e0   : > { %474 = vrot.lane.b32.xlu1 %v1143_v4, %s1110_s13 }
 0x3e1   : > { %468 = vrot.lane.b32.xlu0 %v1147_v7, %s1110_s13 }
 0x3e4   : > { %470 = vrot.lane.b32.xlu1 %v1160_v11, %s1110_s13 }
 0x450   : > { %v389_v31 = vpop.xlane.xlu0 %388 }
 0x451   : > { %1070 = vrcp.f32 %v389_v31 }
 0x454   : > { %v392_v32 = vpop.xlane.xlu0 %391  ;;  %v395_v33 = vpop.xlane.xlu1 %394 }
 0x455   : > { %1072 = vrcp.f32 %v392_v32 }
 0x456   : > { %1074 = vrcp.f32 %v395_v33 }
 0x458   : > { %v407_v34 = vpop.permute.xlu0 %406  ;;  %v409_v35 = vpop.permute.xlu1 %408 }
 0x459   : > { %990 = vmatprep.subr.bf16.mxu0 %v407_v34  ;;  %v418_v36 = vand.u32 %v409_v35, %v1177_v43 }
 0x45a   : > { %991 = vmatpush3.bf16.msra.mxu0 %v407_v34 }
 0x45b   : > { %992 = vmatprep.subr.bf16.mxu0 %v418_v36  ;;  %v1071_v38 = vpop.eup %1070 }
 0x45c   : > { %v473_v37 = vpop.permute.xlu1 %472  ;;  %v399_v44 = vmul.f32 %v1071_v38, %v1065_v25  ;;  %v469_v49 = vpop.permute.xlu0 %468 }
 0x45d   : > { %v483_v50 = vsel %vm133_vm0, %v473_v37, 0 }
 0x45e   : > { %993 = vmatpush3.bf16.msra.mxu0 %v418_v36 }
 0x45f   : > { %v1073_v40 = vpop.eup %1072  ;;  %1034 = vmatprep.subr.msk.bf16.mxu0 %vm133_vm0, %v473_v37 }
 0x460   : > { %v1075_v42 = vpop.eup %1074  ;;  %v400_v45 = vmul.f32 %v1073_v40, %v1067_v27  ;;  %v475_v51 = vpop.permute.xlu1 %474 }
 0x461   : > { %v401_v46 = vmul.f32 %v1075_v42, %v1069_v28  ;;  %v486_v52 = vsel %vm133_vm0, %v475_v51, 0 }
 0x462   : > { %v402_v47 = vpack.c.bf16 %v400_v45, %v399_v44 }
 0x463   : > { %v403_v48 = vpack.c.bf16 %v401_v46, %v401_v46 }
 0x464   : > { %994 = vmatprep.mubr.msk.bf16.mxu0 %vm197_vm2, %v402_v47  ;;  %v471_v53 = vpop.permute.xlu1 %470 }
 0x465   : > { %995 = vmatmul.mubr.msk.bf16.vlgmr.msra.gmra.mrb[4].mxu0 %vm197_vm2, %v403_v48 }
 0x466   : > { %1002 = vmatprep.mubr.msk.bf16.mxu0 %vm133_vm0, %v469_v49 }
 0x467   : > { %999 = vmatpush3.bf16.xpose.msra.mxu0 %v483_v50 }
 0x468   : > { %1035 = vmatprep.subr.msk.bf16.mxu0 %vm133_vm0, %v475_v51 }
 0x46f   : > { %1001 = vmatpush3.bf16.xpose.msra.mxu0 %v486_v52 }
 0x476   : > { %1003 = vmatmul.mubr.msk.bf16.vlgmr.msra.gmra.mrb[8].mxu0 %vm133_vm0, %v471_v53 }
 0x538   : > { %v1232_v54 = vpop.f32.mrb[4].mxu0 }
 0x539   : > { %v1234_v55 = vpop.f32.mrb[5].mxu0 }
 0x53a   : > { %v997_v56 = vpop.f32.mrb[6].mxu0 }
 0x53b   : > { %v1236_v57 = vpop.f32.mrb[7].mxu0 }
 0x549   : > { %v1004_v58 = vpop.f32.mrb[8].mxu0 }
 0x54a   : > { %v522_v59 = vpop.f32.mrb[9].mxu0  ;;  %v538_v2 = vmul.f32 0.17677669, %v1004_v58 }
 0x54b   : > { %v536_v60 = vmul.f32 0.17677669, %v522_v59  ;;  %v1005_v61 = vpop.f32.mrb[10].mxu0 }
 0x54c   : > { %v525_v0 = vpop.f32.mrb[11].mxu0  ;;  %v545_v9 = vsel %vm204_vm1, %v538_v2, -inf }
 0x54d   : > { %v537_v5 = vmul.f32 0.17677669, %v525_v0  ;;  %v539_v6 = vsel %vm197_vm2, %v536_v60, -inf }
 0x54e   : > { %540 = vmax.xlane.f32.xlu0 %v539_v6 }
 0x54f   : > { %v542_v8 = vsel %vm197_vm2, %v537_v5, -inf }
 0x550   : > { %543 = vmax.xlane.f32.xlu1 %v542_v8 }
 0x552   : > { %546 = vmax.xlane.f32.xlu0 %v545_v9 }
 0x5db   : > { %v541_v10 = vpop.xlane.xlu0 %540 }
 0x5dc   : > { %v548_v12 = vsub.f32 %v536_v60, %v541_v10 }
 0x5dd   : > { %v544_v13 = vpop.xlane.xlu1 %543 }
 0x5de   : > { %v551_v14 = vmul.f32 1.442695, %v548_v12  ;;  %v549_v15 = vsub.f32 %v537_v5, %v544_v13 }
 0x5df   : > { %v547_v16 = vpop.xlane.xlu0 %546 }
 0x5e0   : > { %1076 = vpow2.f32 %v551_v14  ;;  %v553_v17 = vmul.f32 1.442695, %v549_v15  ;;  %v550_v18 = vsub.f32 %v538_v2, %v547_v16 }
 0x5e2   : > { %1078 = vpow2.f32 %v553_v17  ;;  %v555_v19 = vmul.f32 1.442695, %v550_v18 }
 0x5e4   : > { %1080 = vpow2.f32 %v555_v19 }
 0x5ea   : > { %v1077_v20 = vpop.eup %1076 }
 0x5eb   : > { %v557_v21 = vsel %vm197_vm2, %v1077_v20, 0.0 }
 0x5ec   : > { %v1079_v22 = vpop.eup %1078  ;;  %558 = vadd.xlane.f32.xlu0 %v557_v21 }
 0x5ed   : > { %v560_v25 = vsel %vm197_vm2, %v1079_v22, 0.0 }
 0x5ee   : > { %v1081_v23 = vpop.eup %1080 }
 0x5ef   : > { %v563_v24 = vsel %vm204_vm1, %v1081_v23, 0.0 }
 0x5f0   : > { %564 = vadd.xlane.f32.xlu1 %v563_v24  ;;  %561 = vadd.xlane.f32.xlu0 %v560_v25 }
 0x601   : > { %576 = vrot.lane.b32.xlu1 %v1175_v41, %s1110_s13 }
 0x605   : > { %640 = vrot.lane.b32.xlu1 %v1141_v3, %s1111_s14 }
 0x606   : > { %574 = vrot.lane.b32.xlu0 %v1172_v39, %s1110_s13 }
 0x609   : > { %642 = vrot.lane.b32.xlu1 %v1143_v4, %s1111_s14 }
 0x60a   : > { %636 = vrot.lane.b32.xlu0 %v1147_v7, %s1111_s14 }
 0x60d   : > { %638 = vrot.lane.b32.xlu1 %v1160_v11, %s1111_s14 }
 0x679   : > { %v559_v26 = vpop.xlane.xlu0 %558 }
 0x67a   : > { %1082 = vrcp.f32 %v559_v26 }
 0x67d   : > { %v562_v27 = vpop.xlane.xlu0 %561  ;;  %v565_v28 = vpop.xlane.xlu1 %564 }
 0x67e   : > { %1084 = vrcp.f32 %v562_v27 }
 0x67f   : > { %1086 = vrcp.f32 %v565_v28 }
 0x681   : > { %v575_v29 = vpop.permute.xlu0 %574  ;;  %v577_v3 = vpop.permute.xlu1 %576 }
 0x682   : > { %1006 = vmatprep.subr.bf16.mxu1 %v575_v29  ;;  %v586_v30 = vand.u32 %v577_v3, %v1177_v43 }
 0x683   : > { %1007 = vmatpush3.bf16.msra.mxu1 %v575_v29 }
 0x684   : > { %1008 = vmatprep.subr.bf16.mxu1 %v586_v30  ;;  %v1083_v31 = vpop.eup %1082 }
 0x685   : > { %v641_v4 = vpop.permute.xlu1 %640  ;;  %v569_v32 = vmul.f32 %v1083_v31, %v1077_v20  ;;  %v637_v37 = vpop.permute.xlu0 %636 }
 0x686   : > { %v651_v38 = vsel %vm133_vm0, %v641_v4, 0 }
 0x687   : > { %1009 = vmatpush3.bf16.msra.mxu1 %v586_v30 }
 0x688   : > { %v1085_v7 = vpop.eup %1084  ;;  %1036 = vmatprep.subr.msk.bf16.mxu1 %vm133_vm0, %v641_v4 }
 0x689   : > { %v1087_v11 = vpop.eup %1086  ;;  %v570_v33 = vmul.f32 %v1085_v7, %v1079_v22  ;;  %v643_v40 = vpop.permute.xlu1 %642 }
 0x68a   : > { %v571_v34 = vmul.f32 %v1087_v11, %v1081_v23  ;;  %v654_v42 = vsel %vm133_vm0, %v643_v40, 0 }
 0x68b   : > { %v572_v35 = vpack.c.bf16 %v570_v33, %v569_v32 }
 0x68c   : > { %v573_v36 = vpack.c.bf16 %v571_v34, %v571_v34 }
 0x68d   : > { %1010 = vmatprep.mubr.msk.bf16.mxu1 %vm197_vm2, %v572_v35  ;;  %v639_v44 = vpop.permute.xlu1 %638 }
 0x68e   : > { %1011 = vmatmul.mubr.msk.bf16.vlgmr.msra.gmra.mrb[8].mxu1 %vm197_vm2, %v573_v36 }
 0x68f   : > { %1018 = vmatprep.mubr.msk.bf16.mxu1 %vm133_vm0, %v637_v37 }
 0x690   : > { %1015 = vmatpush3.bf16.xpose.msra.mxu1 %v651_v38 }
 0x691   : > { %1037 = vmatprep.subr.msk.bf16.mxu1 %vm133_vm0, %v643_v40 }
 0x698   : > { %1017 = vmatpush3.bf16.xpose.msra.mxu1 %v654_v42 }
 0x69f   : > { %1019 = vmatmul.mubr.msk.bf16.vlgmr.msra.gmra.mrb[12].mxu1 %vm133_vm0, %v639_v44 }
 0x761   : > { %v1012_v45 = vpop.f32.mrb[8].mxu1 }
 0x762   : > { %v622_v46 = vpop.f32.mrb[9].mxu1 }
 0x763   : > { %v1013_v47 = vpop.f32.mrb[10].mxu1 }
 0x764   : > { %v625_v48 = vpop.f32.mrb[11].mxu1 }
 0x772   : > { %v1020_v49 = vpop.f32.mrb[12].mxu1 }
 0x773   : > { %v690_v50 = vpop.f32.mrb[13].mxu1  ;;  %v706_v56 = vmul.f32 0.17677669, %v1020_v49 }
 0x774   : > { %v704_v51 = vmul.f32 0.17677669, %v690_v50  ;;  %v1021_v52 = vpop.f32.mrb[14].mxu1 }
 0x775   : > { %v693_v53 = vpop.f32.mrb[15].mxu1  ;;  %v713_v61 = vsel %vm204_vm1, %v706_v56, -inf }
 0x776   : > { %v705_v58 = vmul.f32 0.17677669, %v693_v53  ;;  %v707_v59 = vsel %vm197_vm2, %v704_v51, -inf }
 0x777   : > { %708 = vmax.xlane.f32.xlu0 %v707_v59 }
 0x778   : > { %v710_v60 = vsel %vm197_vm2, %v705_v58, -inf }
 0x779   : > { %711 = vmax.xlane.f32.xlu1 %v710_v60 }
 0x77b   : > { %714 = vmax.xlane.f32.xlu0 %v713_v61 }
 0x804   : > { %v709_v0 = vpop.xlane.xlu0 %708 }
 0x805   : > { %v716_v2 = vsub.f32 %v704_v51, %v709_v0 }
 0x806   : > { %v712_v5 = vpop.xlane.xlu1 %711 }
 0x807   : > { %v719_v6 = vmul.f32 1.442695, %v716_v2  ;;  %v717_v8 = vsub.f32 %v705_v58, %v712_v5 }
 0x808   : > { %v715_v9 = vpop.xlane.xlu0 %714 }
 0x809   : > { %1088 = vpow2.f32 %v719_v6  ;;  %v721_v10 = vmul.f32 1.442695, %v717_v8  ;;  %v718_v12 = vsub.f32 %v706_v56, %v715_v9 }
 0x80b   : > { %1090 = vpow2.f32 %v721_v10  ;;  %v723_v13 = vmul.f32 1.442695, %v718_v12 }
 0x80d   : > { %1092 = vpow2.f32 %v723_v13 }
 0x813   : > { %v1089_v14 = vpop.eup %1088 }
 0x814   : > { %v725_v15 = vsel %vm197_vm2, %v1089_v14, 0.0 }
 0x815   : > { %v1091_v16 = vpop.eup %1090  ;;  %726 = vadd.xlane.f32.xlu0 %v725_v15 }
 0x816   : > { %v728_v19 = vsel %vm197_vm2, %v1091_v16, 0.0 }
 0x817   : > { %v1093_v17 = vpop.eup %1092 }
 0x818   : > { %v731_v18 = vsel %vm204_vm1, %v1093_v17, 0.0 }
 0x819   : > { %732 = vadd.xlane.f32.xlu1 %v731_v18  ;;  %729 = vadd.xlane.f32.xlu0 %v728_v19 }
 0x82a   : > { %744 = vrot.lane.b32.xlu1 %v1175_v41, %s1111_s14 }
 0x82e   : > { %807 = vrot.lane.b32.xlu1 %v1234_v55, %s1111_s14 }
 0x82f   : > { %742 = vrot.lane.b32.xlu0 %v1172_v39, %s1111_s14 }
 0x832   : > { %809 = vrot.lane.b32.xlu1 %v1236_v57, %s1111_s14 }
 0x833   : > { %811 = vrot.lane.b32.xlu0 %v1232_v54, %s1111_s14 }
 0x836   : > { %819 = vrot.lane.b32.xlu1 %v622_v46, %s1110_s13 }
 0x837   : > { %821 = vrot.lane.b32.xlu0 %v625_v48, %s1110_s13 }
 0x83a   : > { %823 = vrot.lane.b32.xlu1 %v1012_v45, %s1110_s13 }
 0x8a2   : > { %v727_v20 = vpop.xlane.xlu0 %726 }
 0x8a3   : > { %1094 = vrcp.f32 %v727_v20 }
 0x8a6   : > { %v730_v41 = vpop.xlane.xlu0 %729  ;;  %v733_v21 = vpop.xlane.xlu1 %732 }
 0x8a7   : > { %1096 = vrcp.f32 %v730_v41 }
 0x8a8   : > { %1098 = vrcp.f32 %v733_v21 }
 0x8aa   : > { %v743_v55 = vpop.permute.xlu0 %742  ;;  %v745_v39 = vpop.permute.xlu1 %744 }
 0x8ab   : > { %v754_v22 = vand.u32 %v745_v39, %v1177_v43  ;;  %1022 = vmatprep.subr.bf16.mxu0 %v743_v55 }
 0x8ac   : > { %1023 = vmatpush3.bf16.msra.mxu0 %v743_v55 }
 0x8ad   : > { %1024 = vmatprep.subr.bf16.mxu0 %v754_v22  ;;  %v1095_v54 = vpop.eup %1094 }
 0x8ae   : > { %v737_v24 = vmul.f32 %v1095_v54, %v1089_v14  ;;  %v808_v4 = vpop.permute.xlu1 %807  ;;  %v812_v7 = vpop.permute.xlu0 %811 }
 0x8af   : > { %v840_v34 = vsel %vm133_vm0, %v1201_v63, %v808_v4  ;;  %v842_v44 = vsel %vm133_vm0, %v1199_v62, %v812_v7 }
 0x8b0   : > { %1025 = vmatpush3.bf16.msra.mxu0 %v754_v22 }
 0x8b1   : > { %v1097_v57 = vpop.eup %1096 }
 0x8b2   : > { %v1099_v23 = vpop.eup %1098  ;;  %v738_v25 = vmul.f32 %v1097_v57, %v1091_v16  ;;  %v810_v31 = vpop.permute.xlu1 %809 }
 0x8b3   : > { %v739_v26 = vmul.f32 %v1099_v23, %v1093_v17  ;;  %v822_v32 = vpop.permute.xlu0 %821  ;;  %v841_v35 = vsel %vm133_vm0, %v1203_v1, %v810_v31 }
 0x8b4   : > { %v740_v27 = vpack.c.bf16 %v738_v25, %v737_v24  ;;  %v845_v40 = vsel %vm843_vm5, %v841_v35, %v822_v32 }
 0x8b5   : > { %v741_v28 = vpack.c.bf16 %v739_v26, %v739_v26 }
 0x8b6   : > { %1026 = vmatprep.mubr.msk.bf16.mxu0 %vm197_vm2, %v740_v27  ;;  %v820_v11 = vpop.permute.xlu1 %819 }
 0x8b7   : > { %1027 = vmatmul.mubr.msk.bf16.vlgmr.msra.gmra.mrb[12].mxu0 %vm197_vm2, %v741_v28  ;;  %v844_v36 = vsel %vm843_vm5, %v840_v34, %v820_v11 }
 0x8ba   : > { %v824_v33 = vpop.permute.xlu1 %823 }
 0x8bb   : > { %v846_v45 = vsel %vm843_vm5, %v842_v44, %v824_v33 }
 0x98a   : > { %v1028_v29 = vpop.f32.mrb[12].mxu0 }
 0x98b   : > { %v790_v3 = vpop.f32.mrb[13].mxu0 }
 0x98c   : > { %831 = vrot.lane.b32.xlu0 %v790_v3, %s1109_s12  ;;  %v1029_v43 = vpop.f32.mrb[14].mxu0 }
 0x98d   : > { %v793_v30 = vpop.f32.mrb[15].mxu0 }
 0x98e   : > { %833 = vrot.lane.b32.xlu1 %v793_v30, %s1109_s12 }
 0x990   : > { %835 = vrot.lane.b32.xlu0 %v1028_v29, %s1109_s12 }
 0x9fe   : > { %v832_v37 = vpop.permute.xlu0 %831 }
 0x9ff   : > { %v848_v38 = vsel %vm847_vm4, %v844_v36, %v832_v37 }
 0xa00   : > { %851 = vst [vmem:[%s116_s18] sm:$0xff] %v848_v38  ;;  %v834_v42 = vpop.permute.xlu1 %833 }
 0xa01   : > { %v849_v63 = vsel %vm847_vm4, %v845_v40, %v834_v42 }
 0xa02   : > { %852 = vst [vmem:[%s116_s18 + $0x8] sm:$0xff] %v849_v63  ;;  %v836_v1 = vpop.permute.xlu0 %835 }
 0xa03   : > { %v850_v46 = vsel %vm847_vm4, %v846_v45, %v836_v1 }
 0xa04   : > { %853 = vst [vmem:[%s116_s18 + $0x10] sm:$0x1] %v850_v46 }
 0xa05 PF: > { %s11_s6 = sadd.s32 1, %s1106_s6  }
 0xa06   : > { %p8_p4 = scmp.ge.s32.totalorder %s11_s6, 4  }
 0xa08   :  { %10 = sbr.rel (!%p8_p4) target bundleno = 1 (0x1), region = 54 }

// kernel: image_encoder_forward.44
= control target key start
LH: loop header
LB: loop body
LE: loop exit
PB: predicated region body
PF: predicated region fallthrough
CT: control target
= control target key end

     0   :  { %v186_v0 = vmov 0.0   ;;  %vm187_vm0 = vmmov 0   ;;  %s249_s1 = inlined_call_operand.vmem [shape: bf16[128,128], index: 1, kind: input, shape index: {}]   ;;  %s250_s0 = inlined_call_operand.vmem [shape: f32[2,128], index: 0, kind: input, shape index: {}]   ;;  %s251_s2 = inlined_call_operand.vmem [shape: f32[1,128], index: 2, kind: input, shape index: {}]   ;;  %s252_s3 = inlined_call_operand.vmem [shape: f32[2,128], index: 3, kind: input, shape index: {}]   ;;  %s253_s4 = inlined_call_operand.vmem [shape: f32[2,128], index: 4, kind: output, shape index: {}]  }
   0x1   :  { %156 = vmatprep.subr.bf16.mxu0 %v186_v0  ;;  %v178_v1 = vld [vmem:[%s249_s1] sm:$0xff]   ;;  %172 = vmatprep.mubr.msk.bf16.mxu0 %vm187_vm0, %v186_v0  ;;  %v179_v2 = vld [vmem:[%s249_s1 + $0x8] sm:$0xff]   ;;  %v180_v3 = vld [vmem:[%s249_s1 + $0x10] sm:$0xff]  }
   0x2   :  { %157 = vmatpush3.bf16.msra.mxu0 %v178_v1  ;;  %v181_v4 = vld [vmem:[%s249_s1 + $0x18] sm:$0xff]   ;;  %v182_v5 = vld [vmem:[%s249_s1 + $0x20] sm:$0xff]   ;;  %v183_v6 = vld [vmem:[%s249_s1 + $0x28] sm:$0xff]  }
   0x3   :  { %158 = vmatprep.subr.bf16.mxu0 %v186_v0  ;;  %v184_v7 = vld [vmem:[%s249_s1 + $0x30] sm:$0xff]   ;;  %v185_v8 = vld [vmem:[%s249_s1 + $0x38] sm:$0xff]   ;;  %v18_v9 = vld [vmem:[%s250_s0] sm:$0x3] }
   0x4   :  { %v19_v10 = vpack.c.bf16 %v18_v9, %v18_v9  ;;  %v138_v11 = vld [vmem:[%s251_s2] ss:$0 sm:$0xff] }
   0x5   :  { %v131_v13 = vld [vmem:[%s252_s3] sm:$0x3] }
   0x6   :  { %159 = vmatpush3.bf16.msra.mxu0 %v179_v2 }
   0x7   :  { %160 = vmatprep.subr.bf16.mxu0 %v186_v0 }
   0xa   :  { %161 = vmatpush3.bf16.msra.mxu0 %v180_v3 }
   0xb   :  { %162 = vmatprep.subr.bf16.mxu0 %v186_v0 }
   0xe   :  { %163 = vmatpush3.bf16.msra.mxu0 %v181_v4 }
   0xf   :  { %164 = vmatprep.subr.bf16.mxu0 %v186_v0 }
  0x12   :  { %165 = vmatpush3.bf16.msra.mxu0 %v182_v5 }
  0x13   :  { %166 = vmatprep.subr.bf16.mxu0 %v186_v0 }
  0x16   :  { %167 = vmatpush3.bf16.msra.mxu0 %v183_v6 }
  0x17   :  { %168 = vmatprep.subr.bf16.mxu0 %v186_v0 }
  0x1a   :  { %169 = vmatpush3.bf16.msra.mxu0 %v184_v7 }
  0x1b   :  { %170 = vmatprep.subr.bf16.mxu0 %v186_v0 }
  0x1e   :  { %171 = vmatpush3.bf16.msra.mxu0 %v185_v8 }
  0x21   :  { %173 = vmatmul.mubr.bf16.vlgmr.msra.gmra.mrb[0].mxu0 %v19_v10 }
  0xf4   :  { %v125_v12 = vpop.f32.mrb[0].mxu0 }
  0xf5   :  { %v126_v14 = vadd.f32 %v138_v11, %v125_v12  ;;  %v174_v15 = vpop.f32.mrb[1].mxu0 }
  0xf6   :  { %v128_v16 = vpop.f32.mrb[2].mxu0 }
  0xf7   :  { %v132_v17 = vadd.f32 %v131_v13, %v126_v14  ;;  %v175_v18 = vpop.f32.mrb[3].mxu0 }
  0xf9   :  { %133 = vst [vmem:[%s253_s4] sm:$0x3] %v132_v17 }

// kernel: image_encoder_forward.42
= control target key start
LH: loop header
LB: loop body
LE: loop exit
PB: predicated region body
PF: predicated region fallthrough
CT: control target
= control target key end

     0   :  { %vm34_vm0 = vcmask 1041408   ;;  %v364_v40 = vmov 0   ;;  %s524_s0 = inlined_call_operand.vmem [shape: f32[34,128], index: 0, kind: input, shape index: {}]   ;;  %s525_s3 = inlined_call_operand.vmem [shape: bf16[128,256], index: 3, kind: input, shape index: {}]   ;;  %s526_s1 = inlined_call_operand.vmem [shape: f32[1,128], index: 1, kind: input, shape index: {}]   ;;  %s527_s2 = inlined_call_operand.vmem [shape: f32[1,128], index: 2, kind: input, shape index: {}]   ;;  %s528_s4 = inlined_call_operand.vmem [shape: f32[1,256], index: 4, kind: input, shape index: {}]   ;;  %s529_s5 = inlined_call_operand.vmem [shape: f32[34,256], index: 5, kind: output, shape index: {}]  }
   0x1   :  { %v23_v0 = vld [vmem:[%s524_s0 + $0x10] sm:$0xff]  ;;  %v21_v1 = vld [vmem:[%s524_s0] sm:$0xff]  ;;  %v24_v2 = vld [vmem:[%s524_s0 + $0x18] sm:$0xff]  ;;  %262 = vmatprep.mubr.bf16.mxu1 %v364_v40  ;;  %252 = vmatprep.mubr.bf16.mxu0 %v364_v40 }
   0x2   :  { %30 = vadd.xlane.f32.xlu0 %v23_v0  ;;  %26 = vadd.xlane.f32.xlu1 %v21_v1  ;;  %v22_v3 = vld [vmem:[%s524_s0 + $0x8] sm:$0xff]  ;;  %v25_v4 = vld [vmem:[%s524_s0 + $0x20] sm:$0x3]  ;;  %v333_v8 = vld [vmem:[%s525_s3 + $0x14] ss:$8 sps:$4 sm:$0xff]  }
   0x3   :  { %v35_v5 = vsel %vm34_vm0, %v25_v4, 0.0  ;;  %v330_v6 = vld [vmem:[%s525_s3 + $0x4] ss:$8 sps:$4 sm:$0xff]   ;;  %v332_v7 = vld [vmem:[%s525_s3] ss:$8 sps:$4 sm:$0xff]  }
   0x4   :  { %313 = vmatprep.subr.bf16.mxu1 %v330_v6  ;;  %220 = vmatprep.subr.bf16.mxu0 %v330_v6  ;;  %v335_v30 = vld [vmem:[%s525_s3 + $0x10] ss:$8 sps:$4 sm:$0xff]   ;;  %v336_v31 = vld [vmem:[%s525_s3 + $0x24] ss:$8 sps:$4 sm:$0xff]   ;;  %v338_v32 = vld [vmem:[%s525_s3 + $0x20] ss:$8 sps:$4 sm:$0xff]  }
   0x5   :  { %321 = vmatpush1.bf16.msra.mxu1 %v332_v7  ;;  %221 = vmatpush1.bf16.msra.mxu0 %v332_v7  ;;  %v339_v33 = vld [vmem:[%s525_s3 + $0x34] ss:$8 sps:$4 sm:$0xff]   ;;  %v341_v34 = vld [vmem:[%s525_s3 + $0x30] ss:$8 sps:$4 sm:$0xff]   ;;  %v342_v35 = vld [vmem:[%s525_s3 + $0x44] ss:$8 sps:$4 sm:$0xff]  }
   0x6   :  { %32 = vadd.xlane.f32.xlu0 %v24_v2  ;;  %28 = vadd.xlane.f32.xlu1 %v22_v3  ;;  %v344_v36 = vld [vmem:[%s525_s3 + $0x40] ss:$8 sps:$4 sm:$0xff]   ;;  %v345_v37 = vld [vmem:[%s525_s3 + $0x54] ss:$8 sps:$4 sm:$0xff]   ;;  %v347_v38 = vld [vmem:[%s525_s3 + $0x50] ss:$8 sps:$4 sm:$0xff]  }
   0x7   :  { %314 = vmatprep.subr.bf16.mxu1 %v333_v8  ;;  %222 = vmatprep.subr.bf16.mxu0 %v333_v8  ;;  %v348_v39 = vld [vmem:[%s525_s3 + $0x64] ss:$8 sps:$4 sm:$0xff]   ;;  %v350_v41 = vld [vmem:[%s525_s3 + $0x60] ss:$8 sps:$4 sm:$0xff]   ;;  %v351_v42 = vld [vmem:[%s525_s3 + $0x74] ss:$8 sps:$4 sm:$0xff]  }
   0x8   :  { %v353_v43 = vld [vmem:[%s525_s3 + $0x70] ss:$8 sps:$4 sm:$0xff]   ;;  %v295_v61 = vld [vmem:[%s526_s1] ss:$0 sm:$0xff] }
   0x9   :  { %322 = vmatpush1.bf16.msra.mxu1 %v335_v30  ;;  %223 = vmatpush1.bf16.msra.mxu0 %v335_v30 }
   0xa   :  { %36 = vadd.xlane.f32.xlu0 %v35_v5  ;;  %315 = vmatprep.subr.bf16.mxu1 %v336_v31 }
   0xb   :  { %224 = vmatprep.subr.bf16.mxu0 %v336_v31 }
   0xd   :  { %323 = vmatpush1.bf16.msra.mxu1 %v338_v32  ;;  %225 = vmatpush1.bf16.msra.mxu0 %v338_v32 }
   0xe   :  { %316 = vmatprep.subr.bf16.mxu1 %v339_v33  ;;  %226 = vmatprep.subr.bf16.mxu0 %v339_v33 }
  0x11   :  { %324 = vmatpush1.bf16.msra.mxu1 %v341_v34  ;;  %227 = vmatpush1.bf16.msra.mxu0 %v341_v34 }
  0x12   :  { %317 = vmatprep.subr.bf16.mxu1 %v342_v35  ;;  %228 = vmatprep.subr.bf16.mxu0 %v342_v35 }
  0x15   :  { %325 = vmatpush1.bf16.msra.mxu1 %v344_v36  ;;  %229 = vmatpush1.bf16.msra.mxu0 %v344_v36 }
  0x16   :  { %318 = vmatprep.subr.bf16.mxu1 %v345_v37  ;;  %230 = vmatprep.subr.bf16.mxu0 %v345_v37 }
  0x19   :  { %326 = vmatpush1.bf16.msra.mxu1 %v347_v38  ;;  %231 = vmatpush1.bf16.msra.mxu0 %v347_v38 }
  0x1a   :  { %319 = vmatprep.subr.bf16.mxu1 %v348_v39  ;;  %232 = vmatprep.subr.bf16.mxu0 %v348_v39 }
  0x1d   :  { %327 = vmatpush1.bf16.msra.mxu1 %v350_v41  ;;  %233 = vmatpush1.bf16.msra.mxu0 %v350_v41 }
  0x1e   :  { %320 = vmatprep.subr.bf16.mxu1 %v351_v42  ;;  %234 = vmatprep.subr.bf16.mxu0 %v351_v42 }
  0x21   :  { %328 = vmatpush1.bf16.msra.mxu1 %v353_v43  ;;  %235 = vmatpush1.bf16.msra.mxu0 %v353_v43 }
  0x8f   :  { %v31_v9 = vpop.xlane.xlu0 %30  ;;  %v27_v10 = vpop.xlane.xlu1 %26 }
  0x90   :  { %v41_v11 = vmul.f32 0.0078125, %v31_v9  ;;  %v39_v12 = vmul.f32 0.0078125, %v27_v10 }
  0x92   :  { %v420_v13 = vsub.f32 %v23_v0, %v41_v11  ;;  %v422_v14 = vsub.f32 %v21_v1, %v39_v12 }
  0x93   :  { %v33_v15 = vpop.xlane.xlu0 %32  ;;  %v29_v16 = vpop.xlane.xlu1 %28 }
  0x94   :  { %v42_v17 = vmul.f32 0.0078125, %v33_v15  ;;  %v51_v18 = vmul.f32 %v420_v13, %v420_v13  ;;  %v40_v19 = vmul.f32 0.0078125, %v29_v16  ;;  %v49_v22 = vmul.f32 %v422_v14, %v422_v14 }
  0x96   :  { %v426_v20 = vsub.f32 %v24_v2, %v42_v17  ;;  %58 = vadd.xlane.f32.xlu1 %v51_v18  ;;  %v428_v21 = vsub.f32 %v22_v3, %v40_v19  ;;  %v296_v2 = vld [vmem:[%s527_s2] ss:$0 sm:$0xff] }
  0x97   :  { %v37_v23 = vpop.xlane.xlu0 %36 }
  0x98   :  { %v43_v24 = vmul.f32 0.0078125, %v37_v23  ;;  %v52_v25 = vmul.f32 %v426_v20, %v426_v20  ;;  %v50_v27 = vmul.f32 %v428_v21, %v428_v21 }
  0x9a   :  { %v434_v26 = vsub.f32 %v25_v4, %v43_v24  ;;  %60 = vadd.xlane.f32.xlu0 %v52_v25  ;;  %54 = vadd.xlane.f32.xlu1 %v49_v22 }
  0x9c   :  { %v53_v28 = vmul.f32 %v434_v26, %v434_v26 }
  0x9e   :  { %56 = vadd.xlane.f32.xlu0 %v50_v27  ;;  %v62_v29 = vsel %vm34_vm0, %v53_v28, 0.0 }
  0x9f   :  { %63 = vadd.xlane.f32.xlu1 %v62_v29 }
 0x123   :  { %v59_v44 = vpop.xlane.xlu1 %58 }
 0x124   :  { %v67_v45 = vmul.f32 0.0078125, %v59_v44 }
 0x126   :  { %v72_v46 = vadd.f32 1e-06, %v67_v45 }
 0x127   :  { %v61_v47 = vpop.xlane.xlu0 %60  ;;  %v55_v48 = vpop.xlane.xlu1 %54 }
 0x128   :  { %354 = vrsqrt.f32 %v72_v46  ;;  %v68_v49 = vmul.f32 0.0078125, %v61_v47  ;;  %v65_v50 = vmul.f32 0.0078125, %v55_v48 }
 0x12a   :  { %v73_v51 = vadd.f32 1e-06, %v68_v49  ;;  %v70_v52 = vadd.f32 1e-06, %v65_v50 }
 0x12b   :  { %v57_v53 = vpop.xlane.xlu0 %56 }
 0x12c   :  { %356 = vrsqrt.f32 %v73_v51  ;;  %v66_v54 = vmul.f32 0.0078125, %v57_v53  ;;  %v64_v55 = vpop.xlane.xlu1 %63 }
 0x12d   :  { %358 = vrsqrt.f32 %v70_v52  ;;  %v69_v56 = vmul.f32 0.0078125, %v64_v55 }
 0x12e   :  { %v71_v57 = vadd.f32 1e-06, %v66_v54 }
 0x12f   :  { %v74_v58 = vadd.f32 1e-06, %v69_v56 }
 0x130   :  { %360 = vrsqrt.f32 %v71_v57 }
 0x131   :  { %362 = vrsqrt.f32 %v74_v58 }
 0x132   :  { %v355_v59 = vpop.eup %354 }
 0x133   :  { %v82_v60 = vmul.f32 %v355_v59, %v420_v13 }
 0x135   :  { %v94_v1 = vmul.f32 %v295_v61, %v82_v60 }
 0x136   :  { %v357_v62 = vpop.eup %356 }
 0x137   :  { %v359_v63 = vpop.eup %358  ;;  %v83_v0 = vmul.f32 %v357_v62, %v426_v20  ;;  %v106_v7 = vadd.f32 %v296_v2, %v94_v1  ;;  %v130_v20 = vlaneseq }
 0x138   :  { %v80_v3 = vmul.f32 %v359_v63, %v422_v14 }
 0x139   :  { %v95_v4 = vmul.f32 %v295_v61, %v83_v0  ;;  %v131_v22 = vshrl.u32 %v130_v20, 7 }
 0x13a   :  { %v361_v5 = vpop.eup %360  ;;  %v92_v10 = vmul.f32 %v295_v61, %v80_v3 }
 0x13b   :  { %v363_v6 = vpop.eup %362  ;;  %v107_v8 = vadd.f32 %v296_v2, %v95_v4  ;;  %v81_v9 = vmul.f32 %v361_v5, %v428_v21  ;;  %v132_v23 = vsub.s32 0, %v131_v22  ;;  %v128_v21 = vld [vmem:[%s528_s4] sm:$0x3]  ;;  %v136_v24 = vsub.s32 1, %v131_v22 }
 0x13c   :  { %v84_v11 = vmul.f32 %v363_v6, %v434_v26  ;;  %v104_v16 = vadd.f32 %v296_v2, %v92_v10 }
 0x13d   :  { %v110_v12 = vpack.c.bf16 %v107_v8, %v106_v7  ;;  %v93_v13 = vmul.f32 %v295_v61, %v81_v9  ;;  %v133_v25 = vrot.slane %v128_v21, %v132_v23  ;;  %v137_v26 = vrot.slane %v128_v21, %v136_v24 }
 0x13e   :  { %v96_v15 = vmul.f32 %v295_v61, %v84_v11 }
 0x13f   :  { %263 = vmatmul.mubr.bf16.vlgmr.msra.gmra.mrb[0].mxu1 %v110_v12  ;;  %v105_v17 = vadd.f32 %v296_v2, %v93_v13 }
 0x140   :  { %272 = vmatprep.mubr.bf16.mxu1 %v364_v40  ;;  %v108_v19 = vadd.f32 %v296_v2, %v96_v15 }
 0x141   :  { %v109_v18 = vpack.c.bf16 %v105_v17, %v104_v16 }
 0x142   :  { %v111_v14 = vpack.c.bf16 %v108_v19, %v108_v19 }
 0x143   :  { %253 = vmatmul.mubr.bf16.vlgmr.msra.gmra.mrb[0].mxu0 %v109_v18 }
 0x147   :  { %273 = vmatmul.mubr.bf16.gmra.mrb[4].mxu1 %v111_v14 }
 0x212   :  { %v264_v27 = vpop.f32.mrb[0].mxu1 }
 0x213   :  { %v265_v28 = vadd.f32 %v264_v27, %v133_v25  ;;  %v266_v29 = vpop.f32.mrb[1].mxu1 }
 0x214   :  { %v267_v30 = vadd.f32 %v266_v29, %v137_v26  ;;  %v268_v31 = vpop.f32.mrb[2].mxu1 }
 0x215   :  { %285 = vst [vmem:[%s529_s5 + $0x20] sm:$0xff] %v265_v28  ;;  %v269_v32 = vadd.f32 %v268_v31, %v133_v25  ;;  %v270_v33 = vpop.f32.mrb[3].mxu1 }
 0x216   :  { %286 = vst [vmem:[%s529_s5 + $0x28] sm:$0xff] %v267_v30  ;;  %v271_v34 = vadd.f32 %v270_v33, %v137_v26  ;;  %v254_v35 = vpop.f32.mrb[0].mxu0 }
 0x217   :  { %287 = vst [vmem:[%s529_s5 + $0x30] sm:$0xff] %v269_v32  ;;  %v255_v36 = vadd.f32 %v254_v35, %v133_v25  ;;  %v256_v37 = vpop.f32.mrb[1].mxu0 }
 0x218   :  { %288 = vst [vmem:[%s529_s5 + $0x38] sm:$0xff] %v271_v34  ;;  %v257_v38 = vadd.f32 %v256_v37, %v137_v26  ;;  %v258_v39 = vpop.f32.mrb[2].mxu0 }
 0x219   :  { %281 = vst [vmem:[%s529_s5] sm:$0xff] %v255_v36  ;;  %v259_v40 = vadd.f32 %v258_v39, %v133_v25  ;;  %v260_v41 = vpop.f32.mrb[3].mxu0 }
 0x21a   :  { %282 = vst [vmem:[%s529_s5 + $0x8] sm:$0xff] %v257_v38  ;;  %v261_v42 = vadd.f32 %v260_v41, %v137_v26  ;;  %v274_v43 = vpop.f32.mrb[4].mxu1 }
 0x21b   :  { %283 = vst [vmem:[%s529_s5 + $0x10] sm:$0xff] %v259_v40  ;;  %v275_v44 = vadd.f32 %v274_v43, %v133_v25  ;;  %v276_v45 = vpop.f32.mrb[5].mxu1 }
 0x21c   :  { %284 = vst [vmem:[%s529_s5 + $0x18] sm:$0xff] %v261_v42  ;;  %v277_v46 = vadd.f32 %v276_v45, %v137_v26  ;;  %v278_v47 = vpop.f32.mrb[6].mxu1 }
 0x21d   :  { %289 = vst [vmem:[%s529_s5 + $0x40] sm:$0x3] %v275_v44  ;;  %v279_v48 = vpop.f32.mrb[7].mxu1 }
 0x21e   :  { %290 = vst [vmem:[%s529_s5 + $0x48] sm:$0x3] %v277_v46 }

// kernel: image_encoder_forward.29
= control target key start
LH: loop header
LB: loop body
LE: loop exit
PB: predicated region body
PF: predicated region fallthrough
CT: control target
= control target key end

     0   :  { %vm40_vm0 = vcmask 1041408   ;;  %v1306_v57 = vmov 0   ;;  %s1809_s0 = inlined_call_operand.vmem [shape: f32[34,128], index: 0, kind: input, shape index: {}]   ;;  %s1810_s3 = inlined_call_operand.vmem [shape: bf16[128,512], index: 3, kind: input, shape index: {}]   ;;  %s1811_s1 = inlined_call_operand.vmem [shape: f32[1,128], index: 1, kind: input, shape index: {}]   ;;  %s1812_s2 = inlined_call_operand.vmem [shape: f32[1,128], index: 2, kind: input, shape index: {}]   ;;  %s1813_s5 = inlined_call_operand.vmem [shape: bf16[512,128], index: 5, kind: input, shape index: {}]   ;;  %s1814_s4 = inlined_call_operand.vmem [shape: f32[1,512], index: 4, kind: input, shape index: {}]   ;;  %s1815_s6 = inlined_call_operand.vmem [shape: f32[1,128], index: 6, kind: input, shape index: {}]   ;;  %s1816_s7 = inlined_call_operand.vmem [shape: f32[34,128], index: 7, kind: output, shape index: {}]  }
   0x1   :  { %v27_v0 = vld [vmem:[%s1809_s0] sm:$0xff]  ;;  %v29_v1 = vld [vmem:[%s1809_s0 + $0x10] sm:$0xff]  ;;  %v28_v2 = vld [vmem:[%s1809_s0 + $0x8] sm:$0xff]  ;;  %364 = vmatprep.mubr.bf16.mxu0 %v1306_v57  ;;  %425 = vmatprep.mubr.bf16.mxu1 %v1306_v57 }
   0x2   :  { %32 = vadd.xlane.f32.xlu0 %v27_v0  ;;  %36 = vadd.xlane.f32.xlu1 %v29_v1  ;;  %v30_v3 = vld [vmem:[%s1809_s0 + $0x18] sm:$0xff]  ;;  %v31_v4 = vld [vmem:[%s1809_s0 + $0x20] sm:$0x3]  ;;  %v1171_v6 = vld [vmem:[%s1810_s3 + $0x4] ss:$16 sps:$4 sm:$0xff]  }
   0x3   :  { %v41_v5 = vsel %vm40_vm0, %v31_v4, 0.0  ;;  %v1173_v7 = vld [vmem:[%s1810_s3 + $0xc] ss:$16 sps:$4 sm:$0xff]   ;;  %332 = vmatprep.subr.bf16.mxu0 %v1171_v6  ;;  %v1175_v8 = vld [vmem:[%s1810_s3] ss:$16 sps:$4 sm:$0xff]  }
   0x4   :  { %v1176_v9 = vld [vmem:[%s1810_s3 + $0x8] ss:$16 sps:$4 sm:$0xff]   ;;  %393 = vmatprep.subr.bf16.mxu1 %v1173_v7  ;;  %v1177_v10 = vld [vmem:[%s1810_s3 + $0x24] ss:$16 sps:$4 sm:$0xff]   ;;  %333 = vmatpush1.bf16.msra.mxu0 %v1175_v8  ;;  %v1179_v11 = vld [vmem:[%s1810_s3 + $0x2c] ss:$16 sps:$4 sm:$0xff]  }
   0x5   :  { %394 = vmatpush1.bf16.msra.mxu1 %v1176_v9  ;;  %334 = vmatprep.subr.bf16.mxu0 %v1177_v10  ;;  %v1181_v33 = vld [vmem:[%s1810_s3 + $0x20] ss:$16 sps:$4 sm:$0xff]   ;;  %v1182_v34 = vld [vmem:[%s1810_s3 + $0x28] ss:$16 sps:$4 sm:$0xff]   ;;  %v1183_v35 = vld [vmem:[%s1810_s3 + $0x44] ss:$16 sps:$4 sm:$0xff]  }
   0x6   :  { %34 = vadd.xlane.f32.xlu0 %v28_v2  ;;  %38 = vadd.xlane.f32.xlu1 %v30_v3  ;;  %v1185_v36 = vld [vmem:[%s1810_s3 + $0x4c] ss:$16 sps:$4 sm:$0xff]   ;;  %v1187_v37 = vld [vmem:[%s1810_s3 + $0x40] ss:$16 sps:$4 sm:$0xff]   ;;  %v1188_v38 = vld [vmem:[%s1810_s3 + $0x48] ss:$16 sps:$4 sm:$0xff]  }
   0x7   :  { %395 = vmatprep.subr.bf16.mxu1 %v1179_v11  ;;  %v1189_v39 = vld [vmem:[%s1810_s3 + $0x64] ss:$16 sps:$4 sm:$0xff]   ;;  %v1191_v40 = vld [vmem:[%s1810_s3 + $0x6c] ss:$16 sps:$4 sm:$0xff]   ;;  %v1193_v41 = vld [vmem:[%s1810_s3 + $0x60] ss:$16 sps:$4 sm:$0xff]  }
   0x8   :  { %335 = vmatpush1.bf16.msra.mxu0 %v1181_v33  ;;  %v1194_v42 = vld [vmem:[%s1810_s3 + $0x68] ss:$16 sps:$4 sm:$0xff]   ;;  %v1195_v43 = vld [vmem:[%s1810_s3 + $0x84] ss:$16 sps:$4 sm:$0xff]   ;;  %v1197_v44 = vld [vmem:[%s1810_s3 + $0x8c] ss:$16 sps:$4 sm:$0xff]  }
   0x9   :  { %396 = vmatpush1.bf16.msra.mxu1 %v1182_v34  ;;  %336 = vmatprep.subr.bf16.mxu0 %v1183_v35  ;;  %v1199_v45 = vld [vmem:[%s1810_s3 + $0x80] ss:$16 sps:$4 sm:$0xff]   ;;  %v1200_v46 = vld [vmem:[%s1810_s3 + $0x88] ss:$16 sps:$4 sm:$0xff]   ;;  %v1201_v47 = vld [vmem:[%s1810_s3 + $0xa4] ss:$16 sps:$4 sm:$0xff]  }
   0xa   :  { %42 = vadd.xlane.f32.xlu0 %v41_v5  ;;  %397 = vmatprep.subr.bf16.mxu1 %v1185_v36  ;;  %v1203_v48 = vld [vmem:[%s1810_s3 + $0xac] ss:$16 sps:$4 sm:$0xff]   ;;  %v1205_v49 = vld [vmem:[%s1810_s3 + $0xa0] ss:$16 sps:$4 sm:$0xff]   ;;  %v1206_v50 = vld [vmem:[%s1810_s3 + $0xa8] ss:$16 sps:$4 sm:$0xff]  }
   0xb   :  { %v1207_v51 = vld [vmem:[%s1810_s3 + $0xc4] ss:$16 sps:$4 sm:$0xff]   ;;  %v1209_v52 = vld [vmem:[%s1810_s3 + $0xcc] ss:$16 sps:$4 sm:$0xff]   ;;  %v1211_v53 = vld [vmem:[%s1810_s3 + $0xc0] ss:$16 sps:$4 sm:$0xff]  }
   0xc   :  { %337 = vmatpush1.bf16.msra.mxu0 %v1187_v37  ;;  %v1212_v54 = vld [vmem:[%s1810_s3 + $0xc8] ss:$16 sps:$4 sm:$0xff]   ;;  %v1213_v55 = vld [vmem:[%s1810_s3 + $0xe4] ss:$16 sps:$4 sm:$0xff]   ;;  %v1215_v56 = vld [vmem:[%s1810_s3 + $0xec] ss:$16 sps:$4 sm:$0xff]  }
   0xd   :  { %398 = vmatpush1.bf16.msra.mxu1 %v1188_v38  ;;  %338 = vmatprep.subr.bf16.mxu0 %v1189_v39  ;;  %v1217_v58 = vld [vmem:[%s1810_s3 + $0xe0] ss:$16 sps:$4 sm:$0xff]   ;;  %v1218_v59 = vld [vmem:[%s1810_s3 + $0xe8] ss:$16 sps:$4 sm:$0xff]  }
   0xe   :  { %399 = vmatprep.subr.bf16.mxu1 %v1191_v40  ;;  %v1219_v37 = vld [vmem:[%s1813_s5 + $0x40] sm:$0xff]   ;;  %v1223_v40 = vld [vmem:[%s1813_s5 + $0x48] sm:$0xff]  }
   0xf   :  { %v1220_v38 = vld [vmem:[%s1813_s5 + $0xc0] sm:$0xff]  }
  0x10   :  { %339 = vmatpush1.bf16.msra.mxu0 %v1193_v41  ;;  %v1222_v39 = vld [vmem:[%s1813_s5 + $0x80] sm:$0xff]   ;;  %v1224_v41 = vld [vmem:[%s1813_s5 + $0xc8] sm:$0xff]  }
  0x11   :  { %400 = vmatpush1.bf16.msra.mxu1 %v1194_v42  ;;  %340 = vmatprep.subr.bf16.mxu0 %v1195_v43  ;;  %v1225_v42 = vld [vmem:[%s1813_s5 + $0x8] sm:$0xff]  }
  0x12   :  { %401 = vmatprep.subr.bf16.mxu1 %v1197_v44  ;;  %v1226_v43 = vld [vmem:[%s1813_s5 + $0x88] sm:$0xff]   ;;  %v1227_v44 = vld [vmem:[%s1813_s5 + $0x50] sm:$0xff]  }
  0x14   :  { %341 = vmatpush1.bf16.msra.mxu0 %v1199_v45  ;;  %v1228_v45 = vld [vmem:[%s1813_s5 + $0xd0] sm:$0xff]  }
  0x15   :  { %402 = vmatpush1.bf16.msra.mxu1 %v1200_v46  ;;  %342 = vmatprep.subr.bf16.mxu0 %v1201_v47  ;;  %v1229_v46 = vld [vmem:[%s1813_s5 + $0x10] sm:$0xff]  }
  0x16   :  { %403 = vmatprep.subr.bf16.mxu1 %v1203_v48  ;;  %v1230_v47 = vld [vmem:[%s1813_s5 + $0x90] sm:$0xff]   ;;  %v1231_v48 = vld [vmem:[%s1813_s5 + $0x58] sm:$0xff]  }
  0x18   :  { %343 = vmatpush1.bf16.msra.mxu0 %v1205_v49  ;;  %v1232_v49 = vld [vmem:[%s1813_s5 + $0xd8] sm:$0xff]  }
  0x19   :  { %404 = vmatpush1.bf16.msra.mxu1 %v1206_v50  ;;  %344 = vmatprep.subr.bf16.mxu0 %v1207_v51  ;;  %v1233_v50 = vld [vmem:[%s1813_s5 + $0x18] sm:$0xff]  }
  0x1a   :  { %405 = vmatprep.subr.bf16.mxu1 %v1209_v52  ;;  %v1234_v51 = vld [vmem:[%s1813_s5 + $0x98] sm:$0xff]   ;;  %v1235_v52 = vld [vmem:[%s1813_s5 + $0x60] sm:$0xff]  }
  0x1c   :  { %345 = vmatpush1.bf16.msra.mxu0 %v1211_v53  ;;  %v1236_v53 = vld [vmem:[%s1813_s5 + $0xe0] sm:$0xff]  }
  0x1d   :  { %406 = vmatpush1.bf16.msra.mxu1 %v1212_v54  ;;  %346 = vmatprep.subr.bf16.mxu0 %v1213_v55  ;;  %v1237_v54 = vld [vmem:[%s1813_s5 + $0x20] sm:$0xff]  }
  0x1e   :  { %407 = vmatprep.subr.bf16.mxu1 %v1215_v56  ;;  %v1238_v55 = vld [vmem:[%s1813_s5 + $0xa0] sm:$0xff]   ;;  %v1239_v56 = vld [vmem:[%s1813_s5 + $0x68] sm:$0xff]  }
  0x20   :  { %347 = vmatpush1.bf16.msra.mxu0 %v1217_v58  ;;  %v1241_v58 = vld [vmem:[%s1813_s5 + $0x28] sm:$0xff]  }
  0x21   :  { %408 = vmatpush1.bf16.msra.mxu1 %v1218_v59  ;;  %1102 = vmatprep.subr.bf16.mxu0 %v1219_v37  ;;  %v1242_v59 = vld [vmem:[%s1813_s5 + $0xa8] sm:$0xff]  }
  0x22   :  { %1136 = vmatprep.subr.bf16.mxu1 %v1220_v38 }
  0x8f   :  { %v33_v12 = vpop.xlane.xlu0 %32  ;;  %v37_v13 = vpop.xlane.xlu1 %36 }
  0x90   :  { %v45_v14 = vmul.f32 0.0078125, %v33_v12  ;;  %v47_v15 = vmul.f32 0.0078125, %v37_v13  ;;  %v1035_v13 = vld [vmem:[%s1811_s1] ss:$0 sm:$0xff] }
  0x92   :  { %v1381_v16 = vsub.f32 %v27_v0, %v45_v14  ;;  %v1383_v17 = vsub.f32 %v29_v1, %v47_v15 }
  0x93   :  { %v35_v18 = vpop.xlane.xlu0 %34  ;;  %v39_v19 = vpop.xlane.xlu1 %38 }
  0x94   :  { %v46_v20 = vmul.f32 0.0078125, %v35_v18  ;;  %v55_v21 = vmul.f32 %v1381_v16, %v1381_v16  ;;  %v48_v22 = vmul.f32 0.0078125, %v39_v19  ;;  %v57_v25 = vmul.f32 %v1383_v17, %v1383_v17 }
  0x96   :  { %v1387_v23 = vsub.f32 %v28_v2, %v46_v20  ;;  %60 = vadd.xlane.f32.xlu1 %v55_v21  ;;  %v1389_v24 = vsub.f32 %v30_v3, %v48_v22  ;;  %v1036_v20 = vld [vmem:[%s1812_s2] ss:$0 sm:$0xff] }
  0x97   :  { %v43_v26 = vpop.xlane.xlu0 %42 }
  0x98   :  { %v49_v27 = vmul.f32 0.0078125, %v43_v26  ;;  %v56_v28 = vmul.f32 %v1387_v23, %v1387_v23  ;;  %v58_v30 = vmul.f32 %v1389_v24, %v1389_v24 }
  0x9a   :  { %v1395_v29 = vsub.f32 %v31_v4, %v49_v27  ;;  %64 = vadd.xlane.f32.xlu1 %v57_v25  ;;  %62 = vadd.xlane.f32.xlu0 %v56_v28 }
  0x9c   :  { %v59_v31 = vmul.f32 %v1395_v29, %v1395_v29 }
  0x9e   :  { %66 = vadd.xlane.f32.xlu0 %v58_v30  ;;  %v68_v32 = vsel %vm40_vm0, %v59_v31, 0.0 }
  0x9f   :  { %69 = vadd.xlane.f32.xlu1 %v68_v32 }
 0x123   :  { %v61_v60 = vpop.xlane.xlu1 %60 }
 0x124   :  { %v71_v61 = vmul.f32 0.0078125, %v61_v60  ;;  %v1243_v60 = vld [vmem:[%s1813_s5 + $0x70] sm:$0xff]  }
 0x126   :  { %v76_v62 = vadd.f32 1e-06, %v71_v61  ;;  %v1244_v61 = vld [vmem:[%s1813_s5 + $0xf0] sm:$0xff]  }
 0x127   :  { %v65_v63 = vpop.xlane.xlu1 %64  ;;  %v63_v0 = vpop.xlane.xlu0 %62 }
 0x128   :  { %1251 = vrsqrt.f32 %v76_v62  ;;  %v73_v1 = vmul.f32 0.0078125, %v65_v63  ;;  %v72_v2 = vmul.f32 0.0078125, %v63_v0  ;;  %v1245_v62 = vld [vmem:[%s1813_s5 + $0x30] sm:$0xff]   ;;  %v1247_v0 = vld [vmem:[%s1813_s5 + $0x78] sm:$0xff]  }
 0x129   :  { %v1246_v63 = vld [vmem:[%s1813_s5 + $0xb0] sm:$0xff]  }
 0x12a   :  { %v77_v3 = vadd.f32 1e-06, %v72_v2  ;;  %v78_v4 = vadd.f32 1e-06, %v73_v1  ;;  %v1248_v1 = vld [vmem:[%s1813_s5 + $0xf8] sm:$0xff]  }
 0x12b   :  { %v67_v5 = vpop.xlane.xlu0 %66  ;;  %v1249_v2 = vld [vmem:[%s1813_s5 + $0x38] sm:$0xff]  }
 0x12c   :  { %v74_v6 = vmul.f32 0.0078125, %v67_v5  ;;  %v70_v7 = vpop.xlane.xlu1 %69  ;;  %1253 = vrsqrt.f32 %v77_v3  ;;  %v1250_v3 = vld [vmem:[%s1813_s5 + $0xb8] sm:$0xff]  }
 0x12d   :  { %v75_v8 = vmul.f32 0.0078125, %v70_v7  ;;  %1255 = vrsqrt.f32 %v78_v4  ;;  %v152_v4 = vlaneseq }
 0x12e   :  { %v79_v9 = vadd.f32 1e-06, %v74_v6 }
 0x12f   :  { %v80_v10 = vadd.f32 1e-06, %v75_v8  ;;  %v153_v5 = vshrl.u32 %v152_v4, 7  ;;  %v150_v8 = vld [vmem:[%s1814_s4] sm:$0xf] }
 0x130   :  { %1257 = vrsqrt.f32 %v79_v9 }
 0x131   :  { %1259 = vrsqrt.f32 %v80_v10  ;;  %v154_v6 = vsub.s32 0, %v153_v5  ;;  %v162_v7 = vsub.s32 2, %v153_v5  ;;  %v158_v9 = vsub.s32 1, %v153_v5 }
 0x132   :  { %v1252_v11 = vpop.eup %1251  ;;  %v166_v10 = vsub.s32 3, %v153_v5 }
 0x133   :  { %v86_v12 = vmul.f32 %v1252_v11, %v1381_v16  ;;  %v1590_v11 = vrot.slane %v150_v8, %v154_v6 }
 0x135   :  { %v98_v18 = vmul.f32 %v1035_v13, %v86_v12  ;;  %v1592_v12 = vrot.slane %v150_v8, %v162_v7 }
 0x136   :  { %v1254_v14 = vpop.eup %1253 }
 0x137   :  { %v87_v15 = vmul.f32 %v1254_v14, %v1387_v23  ;;  %v1256_v19 = vpop.eup %1255  ;;  %v110_v26 = vadd.f32 %v1036_v20, %v98_v18  ;;  %v1596_v14 = vrot.slane %v150_v8, %v166_v10 }
 0x138   :  { %v88_v27 = vmul.f32 %v1256_v19, %v1383_v17 }
 0x139   :  { %v99_v22 = vmul.f32 %v1035_v13, %v87_v15 }
 0x13a   :  { %v1258_v21 = vpop.eup %1257  ;;  %v100_v23 = vmul.f32 %v1035_v13, %v88_v27 }
 0x13b   :  { %v89_v25 = vmul.f32 %v1258_v21, %v1389_v24  ;;  %v111_v16 = vadd.f32 %v1036_v20, %v99_v22  ;;  %v1260_v31 = vpop.eup %1259 }
 0x13c   :  { %v90_v33 = vmul.f32 %v1260_v31, %v1395_v29  ;;  %v112_v34 = vadd.f32 %v1036_v20, %v100_v23  ;;  %v1221_v29 = vld [vmem:[%s1813_s5] sm:$0xff]  }
 0x13d   :  { %v115_v28 = vpack.c.bf16 %v111_v16, %v110_v26  ;;  %v101_v30 = vmul.f32 %v1035_v13, %v89_v25 }
 0x13e   :  { %v102_v36 = vmul.f32 %v1035_v13, %v90_v33  ;;  %v1594_v13 = vrot.slane %v150_v8, %v158_v9 }
 0x13f   :  { %365 = vmatmul.mubr.bf16.vlgmr.msra.gmra.mrb[0].mxu0 %v115_v28  ;;  %426 = vmatmul.mubr.bf16.vlgmr.msra.gmra.mrb[0].mxu1 %v115_v28  ;;  %v113_v32 = vadd.f32 %v1036_v20, %v101_v30 }
 0x140   :  { %374 = vmatprep.mubr.bf16.mxu0 %v1306_v57  ;;  %435 = vmatprep.mubr.bf16.mxu1 %v1306_v57  ;;  %v114_v24 = vadd.f32 %v1036_v20, %v102_v36 }
 0x141   :  { %v116_v35 = vpack.c.bf16 %v113_v32, %v112_v34  ;;  %1103 = vmatpush3.bf16.msra.mxu0 %v1221_v29  ;;  %1137 = vmatpush3.bf16.msra.mxu1 %v1222_v39 }
 0x142   :  { %v117_v17 = vpack.c.bf16 %v114_v24, %v114_v24  ;;  %1104 = vmatprep.subr.bf16.mxu0 %v1223_v40  ;;  %1138 = vmatprep.subr.bf16.mxu1 %v1224_v41 }
 0x145   :  { %1105 = vmatpush3.bf16.msra.mxu0 %v1225_v42  ;;  %1139 = vmatpush3.bf16.msra.mxu1 %v1226_v43 }
 0x146   :  { %1106 = vmatprep.subr.bf16.mxu0 %v1227_v44  ;;  %1140 = vmatprep.subr.bf16.mxu1 %v1228_v45 }
 0x147   :  { %375 = vmatmul.mubr.bf16.gmra.mrb[4].mxu0 %v116_v35  ;;  %436 = vmatmul.mubr.bf16.gmra.mrb[4].mxu1 %v116_v35 }
 0x148   :  { %384 = vmatprep.mubr.bf16.mxu0 %v1306_v57  ;;  %445 = vmatprep.mubr.bf16.mxu1 %v1306_v57  ;;  %v1240_v57 = vld [vmem:[%s1813_s5 + $0xe8] sm:$0xff]  }
 0x149   :  { %1107 = vmatpush3.bf16.msra.mxu0 %v1229_v46  ;;  %1141 = vmatpush3.bf16.msra.mxu1 %v1230_v47 }
 0x14a   :  { %1108 = vmatprep.subr.bf16.mxu0 %v1231_v48  ;;  %1142 = vmatprep.subr.bf16.mxu1 %v1232_v49 }
 0x14d   :  { %1109 = vmatpush3.bf16.msra.mxu0 %v1233_v50  ;;  %1143 = vmatpush3.bf16.msra.mxu1 %v1234_v51 }
 0x14e   :  { %1110 = vmatprep.subr.bf16.mxu0 %v1235_v52  ;;  %1144 = vmatprep.subr.bf16.mxu1 %v1236_v53 }
 0x14f   :  { %385 = vmatmul.mubr.bf16.gmra.mrb[8].mxu0 %v117_v17  ;;  %446 = vmatmul.mubr.bf16.gmra.mrb[8].mxu1 %v117_v17 }
 0x151   :  { %1111 = vmatpush3.bf16.msra.mxu0 %v1237_v54  ;;  %1145 = vmatpush3.bf16.msra.mxu1 %v1238_v55 }
 0x152   :  { %1112 = vmatprep.subr.bf16.mxu0 %v1239_v56  ;;  %1146 = vmatprep.subr.bf16.mxu1 %v1240_v57 }
 0x155   :  { %1113 = vmatpush3.bf16.msra.mxu0 %v1241_v58  ;;  %1147 = vmatpush3.bf16.msra.mxu1 %v1242_v59 }
 0x156   :  { %1114 = vmatprep.subr.bf16.mxu0 %v1243_v60  ;;  %1148 = vmatprep.subr.bf16.mxu1 %v1244_v61 }
 0x159   :  { %1115 = vmatpush3.bf16.msra.mxu0 %v1245_v62  ;;  %1149 = vmatpush3.bf16.msra.mxu1 %v1246_v63 }
 0x15a   :  { %1116 = vmatprep.subr.bf16.mxu0 %v1247_v0  ;;  %1150 = vmatprep.subr.bf16.mxu1 %v1248_v1 }
 0x15d   :  { %1117 = vmatpush3.bf16.msra.mxu0 %v1249_v2  ;;  %1151 = vmatpush3.bf16.msra.mxu1 %v1250_v3 }
 0x212   :  { %v366_v15 = vpop.f32.mrb[0].mxu0  ;;  %v427_v18 = vpop.f32.mrb[0].mxu1 }
 0x213   :  { %v1599_v19 = vadd.f32 %v366_v15, %v1590_v11  ;;  %v1602_v20 = vadd.f32 %v427_v18, %v1592_v12  ;;  %v368_v21 = vpop.f32.mrb[1].mxu0  ;;  %v429_v22 = vpop.f32.mrb[1].mxu1 }
 0x214   :  { %v1605_v25 = vadd.f32 %v368_v21, %v1594_v13  ;;  %v1608_v26 = vadd.f32 %v429_v22, %v1596_v14  ;;  %v370_v16 = vpop.f32.mrb[2].mxu0  ;;  %v431_v27 = vpop.f32.mrb[2].mxu1 }
 0x215   :  { %v454_v28 = vmul.f32 %v1599_v19, %v1599_v19  ;;  %v456_v30 = vmul.f32 %v1602_v20, %v1602_v20  ;;  %v1615_v31 = vadd.f32 %v370_v16, %v1590_v11  ;;  %v1618_v23 = vadd.f32 %v431_v27, %v1592_v12  ;;  %v372_v32 = vpop.f32.mrb[3].mxu0  ;;  %v433_v33 = vpop.f32.mrb[3].mxu1 }
 0x216   :  { %v455_v34 = vmul.f32 %v1605_v25, %v1605_v25  ;;  %v457_v35 = vmul.f32 %v1608_v26, %v1608_v26  ;;  %v1625_v36 = vadd.f32 %v372_v32, %v1594_v13  ;;  %v1628_v24 = vadd.f32 %v433_v33, %v1596_v14 }
 0x217   :  { %v474_v17 = vmul.f32 %v454_v28, %v1599_v19  ;;  %v476_v37 = vmul.f32 %v456_v30, %v1602_v20  ;;  %v458_v38 = vmul.f32 %v1615_v31, %v1615_v31  ;;  %v460_v29 = vmul.f32 %v1618_v23, %v1618_v23 }
 0x218   :  { %v475_v39 = vmul.f32 %v455_v34, %v1605_v25  ;;  %v477_v40 = vmul.f32 %v457_v35, %v1608_v26  ;;  %v459_v41 = vmul.f32 %v1625_v36, %v1625_v36  ;;  %v461_v42 = vmul.f32 %v1628_v24, %v1628_v24 }
 0x219   :  { %v494_v43 = vmul.f32 0.044715, %v474_v17  ;;  %v496_v44 = vmul.f32 0.044715, %v476_v37  ;;  %v478_v45 = vmul.f32 %v458_v38, %v1615_v31  ;;  %v480_v46 = vmul.f32 %v460_v29, %v1618_v23 }
 0x21a   :  { %v495_v47 = vmul.f32 0.044715, %v475_v39  ;;  %v497_v48 = vmul.f32 0.044715, %v477_v40  ;;  %v479_v49 = vmul.f32 %v459_v41, %v1625_v36  ;;  %v481_v50 = vmul.f32 %v461_v42, %v1628_v24  ;;  %v376_v51 = vpop.f32.mrb[4].mxu0  ;;  %v437_v52 = vpop.f32.mrb[4].mxu1 }
 0x21b   :  { %v514_v53 = vadd.f32 %v494_v43, %v1599_v19  ;;  %v516_v54 = vadd.f32 %v496_v44, %v1602_v20  ;;  %v498_v55 = vmul.f32 0.044715, %v478_v45  ;;  %v500_v56 = vmul.f32 0.044715, %v480_v46  ;;  %v378_v57 = vpop.f32.mrb[5].mxu0  ;;  %v439_v58 = vpop.f32.mrb[5].mxu1 }
 0x21c   :  { %v515_v59 = vadd.f32 %v495_v47, %v1605_v25  ;;  %v517_v60 = vadd.f32 %v497_v48, %v1608_v26  ;;  %v499_v61 = vmul.f32 0.044715, %v479_v49  ;;  %v501_v62 = vmul.f32 0.044715, %v481_v50  ;;  %v380_v63 = vpop.f32.mrb[6].mxu0  ;;  %v441_v0 = vpop.f32.mrb[6].mxu1 }
 0x21d   :  { %v534_v1 = vmul.f32 0.7978846, %v514_v53  ;;  %v536_v2 = vmul.f32 0.7978846, %v516_v54  ;;  %v518_v3 = vadd.f32 %v498_v55, %v1615_v31  ;;  %v520_v4 = vadd.f32 %v500_v56, %v1618_v23  ;;  %v382_v5 = vpop.f32.mrb[7].mxu0  ;;  %v443_v6 = vpop.f32.mrb[7].mxu1 }
 0x21e   :  { %v535_v7 = vmul.f32 0.7978846, %v515_v59  ;;  %v537_v8 = vmul.f32 0.7978846, %v517_v60  ;;  %v519_v9 = vadd.f32 %v499_v61, %v1625_v36  ;;  %v521_v10 = vadd.f32 %v501_v62, %v1628_v24 }
 0x21f   :  { %1261 = vtanh.f32 %v534_v1  ;;  %v538_v15 = vmul.f32 0.7978846, %v518_v3  ;;  %v540_v18 = vmul.f32 0.7978846, %v520_v4  ;;  %v1655_v21 = vadd.f32 %v376_v51, %v1590_v11 }
 0x220   :  { %1263 = vtanh.f32 %v536_v2  ;;  %v539_v22 = vmul.f32 0.7978846, %v519_v9  ;;  %v541_v16 = vmul.f32 0.7978846, %v521_v10  ;;  %v1658_v27 = vadd.f32 %v437_v52, %v1592_v12 }
 0x221   :  { %1265 = vtanh.f32 %v535_v7  ;;  %v462_v28 = vmul.f32 %v1655_v21, %v1655_v21  ;;  %v1663_v30 = vadd.f32 %v378_v57, %v1594_v13  ;;  %v1666_v32 = vadd.f32 %v439_v58, %v1596_v14 }
 0x222   :  { %1267 = vtanh.f32 %v537_v8  ;;  %v464_v33 = vmul.f32 %v1658_v27, %v1658_v27  ;;  %v1671_v34 = vadd.f32 %v380_v63, %v1590_v11  ;;  %v1674_v35 = vadd.f32 %v441_v0, %v1592_v12  ;;  %v386_v17 = vpop.f32.mrb[8].mxu0  ;;  %v1676_v37 = vpop.f32.mrb[8].mxu1 }
 0x223   :  { %1269 = vtanh.f32 %v538_v15  ;;  %v482_v38 = vmul.f32 %v462_v28, %v1655_v21  ;;  %v463_v29 = vmul.f32 %v1663_v30, %v1663_v30  ;;  %v465_v39 = vmul.f32 %v1666_v32, %v1666_v32  ;;  %v1683_v40 = vpop.f32.mrb[9].mxu0  ;;  %v1685_v41 = vpop.f32.mrb[9].mxu1 }
 0x224   :  { %1271 = vtanh.f32 %v540_v18  ;;  %v484_v42 = vmul.f32 %v464_v33, %v1658_v27  ;;  %v466_v43 = vmul.f32 %v1671_v34, %v1671_v34  ;;  %v468_v44 = vmul.f32 %v1674_v35, %v1674_v35  ;;  %v390_v45 = vpop.f32.mrb[10].mxu0  ;;  %v451_v46 = vpop.f32.mrb[10].mxu1 }
 0x225   :  { %1273 = vtanh.f32 %v539_v22  ;;  %v502_v47 = vmul.f32 0.044715, %v482_v38  ;;  %v483_v48 = vmul.f32 %v463_v29, %v1663_v30  ;;  %v485_v49 = vmul.f32 %v465_v39, %v1666_v32  ;;  %v391_v50 = vpop.f32.mrb[11].mxu0  ;;  %v452_v51 = vpop.f32.mrb[11].mxu1 }
 0x226   :  { %1275 = vtanh.f32 %v541_v16  ;;  %v504_v52 = vmul.f32 0.044715, %v484_v42  ;;  %v486_v53 = vmul.f32 %v466_v43, %v1671_v34  ;;  %v488_v54 = vmul.f32 %v468_v44, %v1674_v35 }
 0x227   :  { %v522_v55 = vadd.f32 %v502_v47, %v1655_v21  ;;  %v503_v56 = vmul.f32 0.044715, %v483_v48  ;;  %v505_v57 = vmul.f32 0.044715, %v485_v49  ;;  %v1698_v58 = vadd.f32 %v382_v5, %v1594_v13 }
 0x228   :  { %v524_v59 = vadd.f32 %v504_v52, %v1658_v27  ;;  %v506_v60 = vmul.f32 0.044715, %v486_v53  ;;  %v508_v61 = vmul.f32 0.044715, %v488_v54  ;;  %v1702_v62 = vadd.f32 %v443_v6, %v1596_v14 }
 0x229   :  { %v1262_v63 = vpop.eup %1261  ;;  %v542_v0 = vmul.f32 0.7978846, %v522_v55  ;;  %v523_v1 = vadd.f32 %v503_v56, %v1663_v30  ;;  %v525_v2 = vadd.f32 %v505_v57, %v1666_v32  ;;  %v467_v3 = vmul.f32 %v1698_v58, %v1698_v58 }
 0x22a   :  { %v1264_v4 = vpop.eup %1263  ;;  %v574_v7 = vadd.f32 1.0, %v1262_v63  ;;  %v544_v5 = vmul.f32 0.7978846, %v524_v59  ;;  %v526_v8 = vadd.f32 %v506_v60, %v1671_v34  ;;  %v528_v9 = vadd.f32 %v508_v61, %v1674_v35 }
 0x22b   :  { %v1266_v10 = vpop.eup %1265  ;;  %v576_v15 = vadd.f32 1.0, %v1264_v4  ;;  %1277 = vtanh.f32 %v542_v0  ;;  %v543_v6 = vmul.f32 0.7978846, %v523_v1  ;;  %v545_v18 = vmul.f32 0.7978846, %v525_v2 }
 0x22c   :  { %v1268_v22 = vpop.eup %1267  ;;  %v594_v16 = vmul.f32 0.5, %v574_v7  ;;  %1279 = vtanh.f32 %v544_v5  ;;  %v546_v28 = vmul.f32 0.7978846, %v526_v8  ;;  %v548_v33 = vmul.f32 0.7978846, %v528_v9 }
 0x22d   :  { %v1270_v38 = vpop.eup %1269  ;;  %v596_v29 = vmul.f32 0.5, %v576_v15  ;;  %1281 = vtanh.f32 %v543_v6  ;;  %v487_v39 = vmul.f32 %v467_v3, %v1698_v58  ;;  %v469_v42 = vmul.f32 %v1702_v62, %v1702_v62 }
 0x22e   :  { %v1272_v43 = vpop.eup %1271  ;;  %v1714_v44 = vmul.f32 %v594_v16, %v1599_v19  ;;  %v578_v45 = vadd.f32 1.0, %v1270_v38  ;;  %1283 = vtanh.f32 %v545_v18  ;;  %v1717_v46 = vadd.f32 %v386_v17, %v1590_v11 }
 0x22f   :  { %v1274_v47 = vpop.eup %1273  ;;  %v1720_v48 = vmul.f32 %v596_v29, %v1602_v20  ;;  %v580_v49 = vadd.f32 1.0, %v1272_v43  ;;  %1285 = vtanh.f32 %v546_v28  ;;  %v507_v50 = vmul.f32 0.044715, %v487_v39 }
 0x230   :  { %v1276_v51 = vpop.eup %1275  ;;  %v598_v52 = vmul.f32 0.5, %v578_v45  ;;  %1287 = vtanh.f32 %v548_v33  ;;  %v489_v53 = vmul.f32 %v469_v42, %v1702_v62  ;;  %v470_v19 = vmul.f32 %v1717_v46, %v1717_v46 }
 0x231   :  { %v600_v54 = vmul.f32 0.5, %v580_v49  ;;  %v527_v55 = vadd.f32 %v507_v50, %v1698_v58  ;;  %v1728_v11 = vadd.f32 %v1676_v37, %v1592_v12  ;;  %v1732_v20 = vadd.f32 %v1683_v40, %v1594_v13 }
 0x232   :  { %v618_v17 = vmul.f32 %v598_v52, %v1615_v31  ;;  %v509_v56 = vmul.f32 0.044715, %v489_v53  ;;  %v490_v57 = vmul.f32 %v470_v19, %v1717_v46  ;;  %v1738_v59 = vadd.f32 %v1685_v41, %v1596_v14 }
 0x233   :  { %v1741_v60 = vmul.f32 %v600_v54, %v1618_v23  ;;  %v547_v61 = vmul.f32 0.7978846, %v527_v55  ;;  %v472_v12 = vmul.f32 %v1728_v11, %v1728_v11  ;;  %v471_v13 = vmul.f32 %v1732_v20, %v1732_v20 }
 0x234   :  { %v634_v37 = vpack.c.bf16 %v618_v17, %v1714_v44  ;;  %v529_v31 = vadd.f32 %v509_v56, %v1702_v62  ;;  %v510_v40 = vmul.f32 0.044715, %v490_v57  ;;  %v473_v63 = vmul.f32 %v1738_v59, %v1738_v59 }
 0x235   :  { %v1278_v14 = vpop.eup %1277  ;;  %v636_v23 = vpack.c.bf16 %v1741_v60, %v1720_v48  ;;  %1289 = vtanh.f32 %v547_v61  ;;  %v492_v41 = vmul.f32 %v472_v12, %v1728_v11  ;;  %v491_v0 = vmul.f32 %v471_v13, %v1732_v20 }
 0x236   :  { %v1280_v1 = vpop.eup %1279  ;;  %v549_v2 = vmul.f32 0.7978846, %v529_v31  ;;  %v530_v3 = vadd.f32 %v510_v40, %v1717_v46  ;;  %v493_v4 = vmul.f32 %v473_v63, %v1738_v59  ;;  %v575_v7 = vadd.f32 1.0, %v1266_v10 }
 0x237   :  { %v1282_v5 = vpop.eup %1281  ;;  %v512_v8 = vmul.f32 0.044715, %v492_v41  ;;  %v511_v9 = vmul.f32 0.044715, %v491_v0  ;;  %v579_v15 = vadd.f32 1.0, %v1274_v47  ;;  %v577_v6 = vadd.f32 1.0, %v1268_v22 }
 0x238   :  { %v1284_v18 = vpop.eup %1283  ;;  %1291 = vtanh.f32 %v549_v2  ;;  %v550_v16 = vmul.f32 0.7978846, %v530_v3  ;;  %v513_v28 = vmul.f32 0.044715, %v493_v4  ;;  %v595_v33 = vmul.f32 0.5, %v575_v7 }
 0x239   :  { %v1286_v38 = vpop.eup %1285  ;;  %v532_v29 = vadd.f32 %v512_v8, %v1728_v11  ;;  %v531_v39 = vadd.f32 %v511_v9, %v1732_v20  ;;  %v599_v42 = vmul.f32 0.5, %v579_v15  ;;  %v581_v43 = vadd.f32 1.0, %v1276_v51 }
 0x23a   :  { %v1288_v44 = vpop.eup %1287  ;;  %1293 = vtanh.f32 %v550_v16  ;;  %v533_v10 = vadd.f32 %v513_v28, %v1738_v59  ;;  %v615_v45 = vmul.f32 %v595_v33, %v1605_v25  ;;  %v597_v47 = vmul.f32 0.5, %v577_v6 }
 0x23b   :  { %v552_v22 = vmul.f32 0.7978846, %v532_v29  ;;  %v551_v48 = vmul.f32 0.7978846, %v531_v39  ;;  %v619_v49 = vmul.f32 %v599_v42, %v1625_v36  ;;  %v601_v50 = vmul.f32 0.5, %v581_v43 }
 0x23c   :  { %v553_v52 = vmul.f32 0.7978846, %v533_v10  ;;  %v617_v53 = vmul.f32 %v597_v47, %v1608_v26  ;;  %v583_v19 = vadd.f32 1.0, %v1282_v5  ;;  %v582_v55 = vadd.f32 1.0, %v1278_v14 }
 0x23d   :  { %1295 = vtanh.f32 %v552_v22  ;;  %v635_v54 = vpack.c.bf16 %v619_v49, %v615_v45  ;;  %v621_v51 = vmul.f32 %v601_v50, %v1628_v24  ;;  %v585_v17 = vadd.f32 1.0, %v1284_v18  ;;  %v1069_v22 = vld [vmem:[%s1815_s6] ss:$0 sm:$0xff] }
 0x23e   :  { %1297 = vtanh.f32 %v551_v48  ;;  %v586_v56 = vadd.f32 1.0, %v1286_v38  ;;  %v602_v60 = vmul.f32 0.5, %v582_v55  ;;  %v584_v61 = vadd.f32 1.0, %v1280_v1 }
 0x23f   :  { %v1290_v57 = vpop.eup %1289  ;;  %1299 = vtanh.f32 %v553_v52  ;;  %941 = vmatprep.mubr.bf16.mxu0 %v635_v54  ;;  %v637_v25 = vpack.c.bf16 %v621_v51, %v617_v53  ;;  %v603_v12 = vmul.f32 0.5, %v583_v19  ;;  %v588_v26 = vadd.f32 1.0, %v1288_v44 }
 0x240   :  { %942 = vmatmul.mubr.bf16.vlgmr.msra.gmra.mrb[12].mxu0 %v634_v37  ;;  %v587_v36 = vadd.f32 1.0, %v1290_v57  ;;  %v606_v13 = vmul.f32 0.5, %v586_v56  ;;  %v604_v31 = vmul.f32 0.5, %v584_v61  ;;  %v622_v63 = vmul.f32 %v602_v60, %v1655_v21  ;;  %v1301_v56 = vld [vmem:[%s1809_s0] sm:$0xff]  ;;  %v1302_v61 = vld [vmem:[%s1809_s0 + $0x8] sm:$0xff] }
 0x241   :  { %997 = vmatprep.mubr.bf16.mxu1 %v637_v25  ;;  %v605_v0 = vmul.f32 0.5, %v585_v17  ;;  %v608_v2 = vmul.f32 0.5, %v588_v26  ;;  %v623_v1 = vmul.f32 %v603_v12, %v1663_v30 }
 0x242   :  { %v1292_v40 = vpop.eup %1291  ;;  %998 = vmatmul.mubr.bf16.vlgmr.msra.gmra.mrb[12].mxu1 %v636_v23  ;;  %v607_v24 = vmul.f32 0.5, %v587_v36  ;;  %v626_v14 = vmul.f32 %v606_v13, %v1671_v34  ;;  %v624_v5 = vmul.f32 %v604_v31, %v1658_v27 }
 0x243   :  { %v589_v41 = vadd.f32 1.0, %v1292_v40  ;;  %v628_v8 = vmul.f32 %v608_v2, %v1674_v35  ;;  %v625_v21 = vmul.f32 %v605_v0, %v1666_v32 }
 0x244   :  { %v1294_v3 = vpop.eup %1293  ;;  %v627_v37 = vmul.f32 %v607_v24, %v1698_v58  ;;  %v638_v4 = vpack.c.bf16 %v626_v14, %v622_v63 }
 0x245   :  { %v609_v7 = vmul.f32 0.5, %v589_v41  ;;  %v590_v23 = vadd.f32 1.0, %v1294_v3  ;;  %v640_v6 = vpack.c.bf16 %v628_v8, %v624_v5 }
 0x246   :  { %v639_v9 = vpack.c.bf16 %v627_v37, %v623_v1 }
 0x247   :  { %v1296_v15 = vpop.eup %1295  ;;  %v629_v34 = vmul.f32 %v609_v7, %v1702_v62  ;;  %v610_v16 = vmul.f32 0.5, %v590_v23 }
 0x248   :  { %v1298_v18 = vpop.eup %1297  ;;  %949 = vmatprep.mubr.bf16.mxu0 %v639_v9  ;;  %v592_v30 = vadd.f32 1.0, %v1296_v15  ;;  %v1304_v9 = vld [vmem:[%s1809_s0 + $0x18] sm:$0xff] }
 0x249   :  { %v1300_v28 = vpop.eup %1299  ;;  %v641_v58 = vpack.c.bf16 %v629_v34, %v625_v21  ;;  %950 = vmatmul.mubr.bf16.gmra.mrb[16].mxu0 %v638_v4  ;;  %v591_v33 = vadd.f32 1.0, %v1298_v18  ;;  %v630_v39 = vmul.f32 %v610_v16, %v1717_v46  ;;  %v1303_v4 = vld [vmem:[%s1809_s0 + $0x10] sm:$0xff] }
 0x24a   :  { %v593_v38 = vadd.f32 1.0, %v1300_v28  ;;  %v612_v27 = vmul.f32 0.5, %v592_v30 }
 0x24b   :  { %1005 = vmatprep.mubr.bf16.mxu1 %v641_v58  ;;  %v611_v35 = vmul.f32 0.5, %v591_v33  ;;  %v642_v10 = vpack.c.bf16 %v630_v39, %v630_v39 }
 0x24c   :  { %1006 = vmatmul.mubr.bf16.gmra.mrb[16].mxu1 %v640_v6  ;;  %v613_v29 = vmul.f32 0.5, %v593_v38  ;;  %v632_v42 = vmul.f32 %v612_v27, %v1728_v11  ;;  %v1305_v27 = vld [vmem:[%s1809_s0 + $0x20] sm:$0x3] }
 0x24d   :  { %v631_v32 = vmul.f32 %v611_v35, %v1732_v20 }
 0x24e   :  { %v633_v62 = vmul.f32 %v613_v29, %v1738_v59  ;;  %v644_v45 = vpack.c.bf16 %v632_v42, %v632_v42 }
 0x24f   :  { %v643_v43 = vpack.c.bf16 %v631_v32, %v631_v32 }
 0x250   :  { %v645_v44 = vpack.c.bf16 %v633_v62, %v633_v62 }
 0x251   :  { %957 = vmatprep.mubr.bf16.mxu0 %v643_v43 }
 0x252   :  { %1013 = vmatprep.mubr.bf16.mxu1 %v645_v44  ;;  %958 = vmatmul.mubr.bf16.gmra.mrb[20].mxu0 %v642_v10 }
 0x254   :  { %1014 = vmatmul.mubr.bf16.gmra.mrb[20].mxu1 %v644_v45 }
 0x313   :  { %v1118_v47 = vpop.f32.mrb[12].mxu0 }
 0x314   :  { %v1119_v46 = vpop.f32.mrb[13].mxu0 }
 0x315   :  { %v1152_v48 = vpop.f32.mrb[12].mxu1  ;;  %v1120_v20 = vadd.f32 %v1119_v46, %v1118_v47  ;;  %v1121_v49 = vpop.f32.mrb[14].mxu0 }
 0x316   :  { %v1153_v59 = vpop.f32.mrb[13].mxu1  ;;  %v1122_v50 = vpop.f32.mrb[15].mxu0 }
 0x317   :  { %v944_v11 = vadd.f32 %v1120_v20, %v1069_v22  ;;  %v1154_v52 = vadd.f32 %v1153_v59, %v1152_v48  ;;  %v1155_v53 = vpop.f32.mrb[14].mxu1  ;;  %v1123_v19 = vadd.f32 %v1122_v50, %v1121_v49 }
 0x318   :  { %v1156_v54 = vpop.f32.mrb[15].mxu1 }
 0x319   :  { %v1000_v51 = vadd.f32 %v1154_v52, %v944_v11  ;;  %v947_v55 = vadd.f32 %v1123_v19, %v1069_v22  ;;  %v1157_v17 = vadd.f32 %v1156_v54, %v1155_v53 }
 0x31b   :  { %v1021_v57 = vadd.f32 %v1301_v56, %v1000_v51  ;;  %v1003_v25 = vadd.f32 %v1157_v17, %v947_v55 }
 0x31c   :  { %v1124_v60 = vpop.f32.mrb[16].mxu0 }
 0x31d   :  { %1026 = vst [vmem:[%s1816_s7] sm:$0xff] %v1021_v57  ;;  %v1022_v36 = vadd.f32 %v1302_v61, %v1003_v25  ;;  %v1125_v12 = vpop.f32.mrb[17].mxu0 }
 0x31e   :  { %v1126_v13 = vadd.f32 %v1125_v12, %v1124_v60  ;;  %v1127_v26 = vpop.f32.mrb[18].mxu0 }
 0x31f   :  { %1027 = vst [vmem:[%s1816_s7 + $0x8] sm:$0xff] %v1022_v36  ;;  %v1158_v31 = vpop.f32.mrb[16].mxu1  ;;  %v1128_v40 = vpop.f32.mrb[19].mxu0 }
 0x320   :  { %v952_v24 = vadd.f32 %v1126_v13, %v1069_v22  ;;  %v1159_v63 = vpop.f32.mrb[17].mxu1  ;;  %v1129_v14 = vadd.f32 %v1128_v40, %v1127_v26 }
 0x321   :  { %v1160_v41 = vadd.f32 %v1159_v63, %v1158_v31  ;;  %v1161_v0 = vpop.f32.mrb[18].mxu1 }
 0x322   :  { %v955_v2 = vadd.f32 %v1129_v14, %v1069_v22  ;;  %v1162_v3 = vpop.f32.mrb[19].mxu1 }
 0x323   :  { %v1008_v1 = vadd.f32 %v1160_v41, %v952_v24  ;;  %v1163_v37 = vadd.f32 %v1162_v3, %v1161_v0 }
 0x325   :  { %v1023_v7 = vadd.f32 %v1303_v4, %v1008_v1  ;;  %v1011_v5 = vadd.f32 %v1163_v37, %v955_v2  ;;  %v1130_v8 = vpop.f32.mrb[20].mxu0 }
 0x326   :  { %v1131_v23 = vpop.f32.mrb[21].mxu0 }
 0x327   :  { %1028 = vst [vmem:[%s1816_s7 + $0x10] sm:$0xff] %v1023_v7  ;;  %v1024_v15 = vadd.f32 %v1304_v9, %v1011_v5  ;;  %v1164_v21 = vpop.f32.mrb[20].mxu1  ;;  %v1132_v34 = vadd.f32 %v1131_v23, %v1130_v8  ;;  %v1133_v6 = vpop.f32.mrb[22].mxu0 }
 0x328   :  { %v1165_v18 = vpop.f32.mrb[21].mxu1  ;;  %v1134_v16 = vpop.f32.mrb[23].mxu0 }
 0x329   :  { %1029 = vst [vmem:[%s1816_s7 + $0x18] sm:$0xff] %v1024_v15  ;;  %v960_v30 = vadd.f32 %v1132_v34, %v1069_v22  ;;  %v1166_v28 = vadd.f32 %v1165_v18, %v1164_v21  ;;  %v1167_v58 = vpop.f32.mrb[22].mxu1 }
 0x32a   :  { %v1168_v33 = vpop.f32.mrb[23].mxu1 }
 0x32b   :  { %v1016_v38 = vadd.f32 %v1166_v28, %v960_v30 }
 0x32d   :  { %v1025_v35 = vadd.f32 %v1305_v27, %v1016_v38 }
 0x32f   :  { %1030 = vst [vmem:[%s1816_s7 + $0x20] sm:$0x3] %v1025_v35 }

// kernel: image_encoder_forward.43
= control target key start
LH: loop header
LB: loop body
LE: loop exit
PB: predicated region body
PF: predicated region fallthrough
CT: control target
= control target key end

     0   :  { %s881_s9 = smov 0   ;;  %s1028_s0 = inlined_call_operand.vmem [shape: f32[2,1,128], index: 0, kind: input, shape index: {}]   ;;  %s1029_s1 = inlined_call_operand.vmem [shape: f32[2,17,256], index: 1, kind: input, shape index: {}]   ;;  %s1030_s2 = inlined_call_operand.vmem [shape: f32[2,1,128], index: 2, kind: output, shape index: {}]  }
   0x1 LB: > { %s717_s10 = sadd.s32 4294967295, %s858_s9   ;;  %p721_p0 = scmp.ge.s32.totalorder %s858_s9, 1  ;;  %s858_s9 = sphi %s881_s9, %s12_s9  }
   0x2   : > { %p120_p1 = scmp.lt.s32.totalorder %s858_s9, 3 }
   0x4   : > { %p121_p2 = pnand %p721_p0, %p120_p1 }
   0x5   : > { %p143_p3 = scmp.lt.s32.totalorder (!%p121_p2), %s717_s10, 1  ;;  %v860_v0 = vmov (!%p121_p2), 0.0   ;;  %vm861_vm0 = vmmov (!%p121_p2), 0   ;;  %vm167_vm1 = vcmask (!%p121_p2), 261120   ;;  %vm218_vm2 = vcmask (!%p121_p2), 131072   ;;  %s862_s18 = smov (!%p121_p2), 96  }
   0x6   : > { %124 = sbr.rel (%p121_p2) target bundleno = 2533 (0x9e5), region = 28  ;;  %757 = vmatprep.subr.bf16.mxu0 (!%p121_p2), %v860_v0  ;;  %761 = vmatprep.mubr.msk.bf16.mxu0 (!%p121_p2), %vm861_vm0, %v860_v0  ;;  %vm235_vm3 = vcmask (!%p121_p2), 1040384   ;;  %v863_v26 = vmov (!%p121_p2), 0   ;;  %vm231_vm4 = vcmask (!%p121_p2), 138240   ;;  %s864_s19 = smov (!%p121_p2), 64   ;;  %vm656_vm5 = vcmask (!%p121_p2), 523264  }
   0x7   : > { %765 = vmatprep.subr.bf16.mxu1 (!%p121_p2), %v860_v0  ;;  %769 = vmatprep.mubr.msk.bf16.mxu1 (!%p121_p2), %vm861_vm0, %v860_v0  ;;  %v939_v27 = vsel (!%p121_p2), %vm235_vm3, 65535, %v863_v26  ;;  %s865_s20 = smov (!%p121_p2), 32   ;;  %vm658_vm6 = vcmask (!%p121_p2), 785408  }
   0xd   : > { %s1032_s10 = smov (!%p143_p3, %s717_s10), 1 }
   0xe   : > { %s821_s11 = smul.u32 48, %s1032_s10  ;;  %s145_s17 = scalar_lea.vmem %s1028_s0, %s1032_s10 }
   0xf   : > { %v155_v8 = vld [vmem:[%s145_s17] sm:$0x1]  ;;  %s153_s23 = scalar_lea.vmem %s1030_s2, %s1032_s10 }
  0x10   : > { %s901_s14 = scalar_lea.vmem %s1029_s1, %s821_s11  ;;  %v920_v9 = vpack.c.bf16 %v155_v8, %v155_v8 }
  0x11   : > { %v156_v1 = vld [vmem:[%s901_s14] sm:$0xff]  ;;  %v158_v2 = vld [vmem:[%s901_s14 + $0x10] sm:$0xff]  ;;  %v157_v21 = vld [vmem:[%s901_s14 + $0x8] sm:$0xff] }
  0x12   : > { %v905_v3 = vpack.c.bf16 %v158_v2, %v156_v1  ;;  %v160_v4 = vld [vmem:[%s901_s14 + $0x20] sm:$0x1]  ;;  %v159_v22 = vld [vmem:[%s901_s14 + $0x18] sm:$0xff]  ;;  %v161_v24 = vld [vmem:[%s901_s14 + $0x28] sm:$0x1] }
  0x13   : > { %v911_v6 = vpack.c.bf16 %v160_v4, %v160_v4  ;;  %v934_v23 = vpack.c.bf16 %v159_v22, %v157_v21  ;;  %v937_v25 = vpack.c.bf16 %v161_v24, %v161_v24 }
  0x14   : > { %v172_v5 = vsel %vm167_vm1, %v905_v3, 0  ;;  %286 = vrot.lane.b32.xlu1 %v905_v3, %s862_s18 }
  0x15   : > { %758 = vmatpush3.bf16.xpose.msra.mxu0 %v172_v5  ;;  %v175_v7 = vsel %vm167_vm1, %v911_v6, 0  ;;  %766 = vmatpush3.bf16.msra.mxu1 %v934_v23  ;;  %v239_v28 = vand.u32 %v939_v27, %v937_v25 }
  0x16   : > { %759 = vmatprep.subr.bf16.mxu0 %v860_v0  ;;  %767 = vmatprep.subr.bf16.mxu1 %v860_v0 }
  0x18   : > { %288 = vrot.lane.b32.xlu1 %v911_v6, %s862_s18 }
  0x19   : > { %768 = vmatpush3.bf16.msra.mxu1 %v239_v28 }
  0x1a   : > { %773 = vmatprep.subr.bf16.mxu1 %v860_v0 }
  0x1d   : > { %760 = vmatpush3.bf16.xpose.msra.mxu0 %v175_v7 }
  0x1e   : > { %781 = vmatprep.subr.bf16.mxu0 %v860_v0 }
  0x24   : > { %762 = vmatmul.mubr.msk.bf16.vlgmr.msra.gmra.mrb[0].mxu0 %vm167_vm1, %v920_v9 }
  0x25   : > { %785 = vmatprep.mubr.msk.bf16.mxu0 %vm861_vm0, %v860_v0 }
  0x86   : > { %v287_v31 = vpop.permute.xlu1 %286 }
  0x87   : > { %v294_v33 = vsel %vm167_vm1, %v287_v31, 0 }
  0x8a   : > { %v289_v35 = vpop.permute.xlu1 %288 }
  0x8b   : > { %v297_v36 = vsel %vm167_vm1, %v289_v35, 0 }
  0xf7   : > { %v211_v10 = vpop.f32.mrb[0].mxu0 }
  0xf8   : > { %v217_v11 = vmul.f32 0.17677669, %v211_v10  ;;  %v763_v12 = vpop.f32.mrb[1].mxu0 }
  0xf9   : > { %v214_v13 = vpop.f32.mrb[2].mxu0 }
  0xfa   : > { %v764_v14 = vpop.f32.mrb[3].mxu0  ;;  %v219_v15 = vsel %vm218_vm2, %v217_v11, -inf }
  0xfb   : > { %220 = vmax.xlane.f32.xlu0 %v219_v15 }
 0x188   : > { %v221_v16 = vpop.xlane.xlu0 %220 }
 0x189   : > { %v222_v17 = vsub.f32 %v217_v11, %v221_v16 }
 0x18b   : > { %v223_v18 = vmul.f32 1.442695, %v222_v17 }
 0x18d   : > { %836 = vpow2.f32 %v223_v18 }
 0x197   : > { %v837_v19 = vpop.eup %836 }
 0x198   : > { %v225_v20 = vsel %vm218_vm2, %v837_v19, 0.0 }
 0x199   : > { %226 = vadd.xlane.f32.xlu0 %v225_v20 }
 0x1af   : > { %282 = vrot.lane.b32.xlu0 %v920_v9, %s862_s18 }
 0x226   : > { %v227_v29 = vpop.xlane.xlu0 %226 }
 0x227   : > { %838 = vrcp.f32 %v227_v29 }
 0x22a   : > { %v283_v37 = vpop.permute.xlu0 %282 }
 0x231   : > { %v839_v30 = vpop.eup %838 }
 0x232   : > { %v229_v32 = vmul.f32 %v839_v30, %v837_v19 }
 0x234   : > { %v230_v34 = vpack.c.bf16 %v229_v32, %v229_v32 }
 0x236   : > { %770 = vmatmul.mubr.msk.bf16.vlgmr.msra.gmra.mrb[0].mxu1 %vm231_vm4, %v230_v34 }
 0x237   : > { %774 = vmatpush3.bf16.xpose.msra.mxu1 %v294_v33  ;;  %777 = vmatprep.mubr.msk.bf16.mxu1 %vm861_vm0, %v860_v0 }
 0x238   : > { %775 = vmatprep.subr.bf16.mxu1 %v860_v0 }
 0x23f   : > { %776 = vmatpush3.bf16.xpose.msra.mxu1 %v297_v36 }
 0x240   : > { %797 = vmatprep.subr.bf16.mxu1 %v860_v0 }
 0x246   : > { %778 = vmatmul.mubr.msk.bf16.vlgmr.msra.gmra.mrb[4].mxu1 %vm167_vm1, %v283_v37 }
 0x247   : > { %801 = vmatprep.mubr.msk.bf16.mxu1 %vm861_vm0, %v860_v0 }
 0x309   : > { %v958_v38 = vpop.f32.mrb[0].mxu1 }
 0x30a   : > { %v771_v39 = vpop.f32.mrb[1].mxu1 }
 0x30b   : > { %v278_v40 = vpop.f32.mrb[2].mxu1 }
 0x30c   : > { %v772_v41 = vpop.f32.mrb[3].mxu1 }
 0x319   : > { %v333_v42 = vpop.f32.mrb[4].mxu1 }
 0x31a   : > { %v339_v43 = vmul.f32 0.17677669, %v333_v42  ;;  %v779_v44 = vpop.f32.mrb[5].mxu1 }
 0x31b   : > { %v336_v45 = vpop.f32.mrb[6].mxu1 }
 0x31c   : > { %v780_v46 = vpop.f32.mrb[7].mxu1  ;;  %v340_v47 = vsel %vm218_vm2, %v339_v43, -inf }
 0x31d   : > { %341 = vmax.xlane.f32.xlu1 %v340_v47 }
 0x32e   : > { %354 = vrot.lane.b32.xlu1 %v934_v23, %s862_s18 }
 0x332   : > { %407 = vrot.lane.b32.xlu1 %v905_v3, %s864_s19 }
 0x336   : > { %409 = vrot.lane.b32.xlu1 %v911_v6, %s864_s19 }
 0x33a   : > { %405 = vrot.lane.b32.xlu1 %v920_v9, %s864_s19 }
 0x3aa   : > { %v342_v48 = vpop.xlane.xlu1 %341 }
 0x3ab   : > { %v343_v49 = vsub.f32 %v339_v43, %v342_v48 }
 0x3ad   : > { %v344_v50 = vmul.f32 1.442695, %v343_v49 }
 0x3ae   : > { %v355_v53 = vpop.permute.xlu1 %354 }
 0x3af   : > { %840 = vpow2.f32 %v344_v50  ;;  %782 = vmatpush3.bf16.msra.mxu0 %v355_v53 }
 0x3b0   : > { %783 = vmatprep.subr.bf16.mxu0 %v860_v0 }
 0x3b2   : > { %v408_v58 = vpop.permute.xlu1 %407 }
 0x3b3   : > { %v415_v60 = vsel %vm167_vm1, %v408_v58, 0 }
 0x3b6   : > { %v410_v62 = vpop.permute.xlu1 %409 }
 0x3b7   : > { %v418_v63 = vsel %vm167_vm1, %v410_v62, 0 }
 0x3b9   : > { %v841_v51 = vpop.eup %840 }
 0x3ba   : > { %v346_v52 = vsel %vm218_vm2, %v841_v51, 0.0  ;;  %v406_v1 = vpop.permute.xlu1 %405 }
 0x3bb   : > { %347 = vadd.xlane.f32.xlu0 %v346_v52 }
 0x3d1   : > { %356 = vrot.lane.b32.xlu0 %v937_v25, %s862_s18 }
 0x448   : > { %v348_v54 = vpop.xlane.xlu0 %347 }
 0x449   : > { %842 = vrcp.f32 %v348_v54 }
 0x44c   : > { %v357_v55 = vpop.permute.xlu0 %356 }
 0x44d   : > { %v363_v56 = vand.u32 %v357_v55, %v939_v27 }
 0x44f   : > { %784 = vmatpush3.bf16.msra.mxu0 %v363_v56 }
 0x450   : > { %789 = vmatprep.subr.bf16.mxu0 %v860_v0 }
 0x453   : > { %v843_v57 = vpop.eup %842 }
 0x454   : > { %v350_v59 = vmul.f32 %v843_v57, %v841_v51 }
 0x456   : > { %v351_v61 = vpack.c.bf16 %v350_v59, %v350_v59 }
 0x458   : > { %786 = vmatmul.mubr.msk.bf16.vlgmr.msra.gmra.mrb[4].mxu0 %vm231_vm4, %v351_v61 }
 0x459   : > { %790 = vmatpush3.bf16.xpose.msra.mxu0 %v415_v60  ;;  %793 = vmatprep.mubr.msk.bf16.mxu0 %vm861_vm0, %v860_v0 }
 0x45a   : > { %791 = vmatprep.subr.bf16.mxu0 %v860_v0 }
 0x461   : > { %792 = vmatpush3.bf16.xpose.msra.mxu0 %v418_v63 }
 0x462   : > { %813 = vmatprep.subr.bf16.mxu0 %v860_v0 }
 0x468   : > { %794 = vmatmul.mubr.msk.bf16.vlgmr.msra.gmra.mrb[8].mxu0 %vm167_vm1, %v406_v1 }
 0x469   : > { %817 = vmatprep.mubr.msk.bf16.mxu0 %vm861_vm0, %v860_v0 }
 0x52b   : > { %v399_v2 = vpop.f32.mrb[4].mxu0 }
 0x52c   : > { %v787_v4 = vpop.f32.mrb[5].mxu0 }
 0x52d   : > { %v402_v5 = vpop.f32.mrb[6].mxu0 }
 0x52e   : > { %v788_v7 = vpop.f32.mrb[7].mxu0 }
 0x53b   : > { %v454_v8 = vpop.f32.mrb[8].mxu0 }
 0x53c   : > { %v460_v10 = vmul.f32 0.17677669, %v454_v8  ;;  %v795_v11 = vpop.f32.mrb[9].mxu0 }
 0x53d   : > { %v457_v12 = vpop.f32.mrb[10].mxu0 }
 0x53e   : > { %v796_v13 = vpop.f32.mrb[11].mxu0  ;;  %v461_v14 = vsel %vm218_vm2, %v460_v10, -inf }
 0x53f   : > { %462 = vmax.xlane.f32.xlu1 %v461_v14 }
 0x550   : > { %473 = vrot.lane.b32.xlu1 %v934_v23, %s864_s19 }
 0x554   : > { %526 = vrot.lane.b32.xlu1 %v905_v3, %s865_s20 }
 0x558   : > { %528 = vrot.lane.b32.xlu1 %v911_v6, %s865_s20 }
 0x55c   : > { %524 = vrot.lane.b32.xlu1 %v920_v9, %s865_s20 }
 0x5cc   : > { %v463_v15 = vpop.xlane.xlu1 %462 }
 0x5cd   : > { %v464_v16 = vsub.f32 %v460_v10, %v463_v15 }
 0x5cf   : > { %v465_v17 = vmul.f32 1.442695, %v464_v16 }
 0x5d0   : > { %v474_v20 = vpop.permute.xlu1 %473 }
 0x5d1   : > { %844 = vpow2.f32 %v465_v17  ;;  %798 = vmatpush3.bf16.msra.mxu1 %v474_v20 }
 0x5d2   : > { %799 = vmatprep.subr.bf16.mxu1 %v860_v0 }
 0x5d4   : > { %v527_v22 = vpop.permute.xlu1 %526 }
 0x5d5   : > { %v534_v26 = vsel %vm167_vm1, %v527_v22, 0 }
 0x5d8   : > { %v529_v29 = vpop.permute.xlu1 %528 }
 0x5d9   : > { %v537_v30 = vsel %vm167_vm1, %v529_v29, 0 }
 0x5db   : > { %v845_v18 = vpop.eup %844 }
 0x5dc   : > { %v467_v19 = vsel %vm218_vm2, %v845_v18, 0.0  ;;  %v525_v31 = vpop.permute.xlu1 %524 }
 0x5dd   : > { %468 = vadd.xlane.f32.xlu0 %v467_v19 }
 0x5f3   : > { %475 = vrot.lane.b32.xlu0 %v937_v25, %s864_s19 }
 0x66a   : > { %v469_v3 = vpop.xlane.xlu0 %468 }
 0x66b   : > { %846 = vrcp.f32 %v469_v3 }
 0x66e   : > { %v476_v6 = vpop.permute.xlu0 %475 }
 0x66f   : > { %v482_v9 = vand.u32 %v476_v6, %v939_v27 }
 0x671   : > { %800 = vmatpush3.bf16.msra.mxu1 %v482_v9 }
 0x672   : > { %805 = vmatprep.subr.bf16.mxu1 %v860_v0 }
 0x675   : > { %v847_v21 = vpop.eup %846 }
 0x676   : > { %v471_v24 = vmul.f32 %v847_v21, %v845_v18 }
 0x678   : > { %v472_v28 = vpack.c.bf16 %v471_v24, %v471_v24 }
 0x67a   : > { %802 = vmatmul.mubr.msk.bf16.vlgmr.msra.gmra.mrb[8].mxu1 %vm231_vm4, %v472_v28 }
 0x67b   : > { %806 = vmatpush3.bf16.xpose.msra.mxu1 %v534_v26  ;;  %809 = vmatprep.mubr.msk.bf16.mxu1 %vm861_vm0, %v860_v0 }
 0x67c   : > { %807 = vmatprep.subr.bf16.mxu1 %v860_v0 }
 0x683   : > { %808 = vmatpush3.bf16.xpose.msra.mxu1 %v537_v30 }
 0x68a   : > { %810 = vmatmul.mubr.msk.bf16.vlgmr.msra.gmra.mrb[12].mxu1 %vm167_vm1, %v525_v31 }
 0x74d   : > { %v518_v32 = vpop.f32.mrb[8].mxu1 }
 0x74e   : > { %v803_v33 = vpop.f32.mrb[9].mxu1 }
 0x74f   : > { %v521_v34 = vpop.f32.mrb[10].mxu1 }
 0x750   : > { %v804_v35 = vpop.f32.mrb[11].mxu1 }
 0x75d   : > { %v573_v36 = vpop.f32.mrb[12].mxu1 }
 0x75e   : > { %v579_v37 = vmul.f32 0.17677669, %v573_v36  ;;  %v811_v39 = vpop.f32.mrb[13].mxu1 }
 0x75f   : > { %v576_v40 = vpop.f32.mrb[14].mxu1 }
 0x760   : > { %v812_v41 = vpop.f32.mrb[15].mxu1  ;;  %v580_v42 = vsel %vm218_vm2, %v579_v37, -inf }
 0x761   : > { %581 = vmax.xlane.f32.xlu0 %v580_v42 }
 0x777   : > { %592 = vrot.lane.b32.xlu0 %v934_v23, %s865_s20 }
 0x77b   : > { %644 = vrot.lane.b32.xlu0 %v399_v2, %s865_s20 }
 0x7ee   : > { %v582_v43 = vpop.xlane.xlu0 %581 }
 0x7ef   : > { %v583_v44 = vsub.f32 %v579_v37, %v582_v43 }
 0x7f1   : > { %v584_v45 = vmul.f32 1.442695, %v583_v44 }
 0x7f2   : > { %v593_v46 = vpop.permute.xlu0 %592 }
 0x7f3   : > { %848 = vpow2.f32 %v584_v45  ;;  %814 = vmatpush3.bf16.msra.mxu0 %v593_v46 }
 0x7f4   : > { %815 = vmatprep.subr.bf16.mxu0 %v860_v0 }
 0x7f6   : > { %v645_v56 = vpop.permute.xlu0 %644 }
 0x7fd   : > { %v849_v47 = vpop.eup %848 }
 0x7fe   : > { %v586_v48 = vsel %vm218_vm2, %v849_v47, 0.0 }
 0x7ff   : > { %587 = vadd.xlane.f32.xlu1 %v586_v48 }
 0x810   : > { %594 = vrot.lane.b32.xlu1 %v937_v25, %s865_s20 }
 0x814   : > { %648 = vrot.lane.b32.xlu1 %v518_v32, %s864_s19 }
 0x88c   : > { %v588_v23 = vpop.xlane.xlu1 %587 }
 0x88d   : > { %850 = vrcp.f32 %v588_v23 }
 0x890   : > { %v595_v49 = vpop.permute.xlu1 %594 }
 0x891   : > { %v601_v50 = vand.u32 %v595_v49, %v939_v27  ;;  %v655_v27 = vsel %vm167_vm1, %v958_v38, %v645_v56 }
 0x893   : > { %816 = vmatpush3.bf16.msra.mxu0 %v601_v50 }
 0x894   : > { %v649_v57 = vpop.permute.xlu1 %648 }
 0x895   : > { %v657_v58 = vsel %vm656_vm5, %v655_v27, %v649_v57 }
 0x897   : > { %v851_v51 = vpop.eup %850 }
 0x898   : > { %v590_v52 = vmul.f32 %v851_v51, %v849_v47 }
 0x89a   : > { %v591_v53 = vpack.c.bf16 %v590_v52, %v590_v52 }
 0x89c   : > { %818 = vmatmul.mubr.msk.bf16.vlgmr.msra.gmra.mrb[12].mxu0 %vm231_vm4, %v591_v53 }
 0x96f   : > { %v637_v0 = vpop.f32.mrb[12].mxu0 }
 0x970   : > { %652 = vrot.lane.b32.xlu0 %v637_v0, %s862_s18  ;;  %v819_v54 = vpop.f32.mrb[13].mxu0 }
 0x971   : > { %v640_v55 = vpop.f32.mrb[14].mxu0 }
 0x972   : > { %v820_v25 = vpop.f32.mrb[15].mxu0 }
 0x9e2   : > { %v653_v59 = vpop.permute.xlu0 %652 }
 0x9e3   : > { %v659_v60 = vsel %vm658_vm6, %v657_v58, %v653_v59 }
 0x9e4   : > { %660 = vst [vmem:[%s153_s23] sm:$0x1] %v659_v60 }
 0x9e5 PF: > { %s12_s9 = sadd.s32 1, %s858_s9  }
 0x9e6   : > { %p9_p4 = scmp.ge.s32.totalorder %s12_s9, 4  }
 0x9e8   :  { %11 = sbr.rel (!%p9_p4) target bundleno = 1 (0x1), region = 61 }

// kernel: image_encoder_forward.47
= control target key start
LH: loop header
LB: loop body
LE: loop exit
PB: predicated region body
PF: predicated region fallthrough
CT: control target
= control target key end

     0   :  { %v19_v0 = vlaneseq  ;;  %v123_v1 = vmov 1983009808   ;;  %vm26_vm0 = vcmask 1041408   ;;  %v124_v12 = vmov 269488144   ;;  %s161_s0 = inlined_call_operand.vmem [shape: f32[2,256], index: 0, kind: input, shape index: {}]   ;;  %s162_s1 = inlined_call_operand.vmem [shape: f32[1,256], index: 1, kind: input, shape index: {}]   ;;  %s163_s2 = inlined_call_operand.vmem [shape: f32[1,256], index: 2, kind: input, shape index: {}]   ;;  %s164_s3 = inlined_call_operand.vmem [shape: f32[2,256], index: 3, kind: output, shape index: {}]  }
   0x1   :  { %v17_v2 = vunpack.c.l.s4 %v123_v1  ;;  %v14_v5 = vld [vmem:[%s161_s0] sm:$0xf]  ;;  %v36_v13 = vunpack.c.l.s4 %v124_v12 }
   0x2   :  { %v20_v3 = vshrl.u32 %v19_v0, 7  ;;  %v74_v31 = vld [vmem:[%s162_s1] sm:$0x3] }
   0x3   :  { %v18_v4 = vunpack.c.0.s8 %v17_v2  ;;  %v37_v14 = vunpack.c.0.s8 %v36_v13  ;;  %v94_v32 = vld [vmem:[%s163_s2] sm:$0x3] }
   0x4   :  { %v78_v29 = vsub.s32 0, %v20_v3  ;;  %v82_v30 = vsub.s32 1, %v20_v3 }
   0x5   :  { %v21_v6 = vsub.s32 %v18_v4, %v20_v3  ;;  %v40_v15 = vsub.s32 %v37_v14, %v20_v3 }
   0x6   :  { %v79_v33 = vrot.slane %v74_v31, %v78_v29  ;;  %v83_v34 = vrot.slane %v74_v31, %v82_v30  ;;  %v99_v35 = vrot.slane %v94_v32, %v78_v29  ;;  %v103_v36 = vrot.slane %v94_v32, %v82_v30 }
   0x7   :  { %v22_v7 = vrot.slane %v14_v5, %v21_v6 }
   0x8   :  { %v84_v37 = vcombine.low %v79_v33, %v83_v34  ;;  %v104_v38 = vcombine.low %v99_v35, %v103_v36 }
   0x9   :  { %v23_v8 = vcombine.high %v22_v7, %v22_v7  ;;  %v27_v9 = vsel %vm26_vm0, %v22_v7, 0.0 }
   0xa   :  { %v91_v40 = vrot.slane %v84_v37, %v21_v6  ;;  %v111_v42 = vrot.slane %v104_v38, %v21_v6 }
   0xb   :  { %v28_v10 = vsel %vm26_vm0, %v23_v8, 0.0 }
   0xc   :  { %v29_v11 = vadd.f32 %v28_v10, %v27_v9 }
   0xe   :  { %30 = vadd.xlane.f32.xlu0 %v29_v11 }
  0x9b   :  { %v31_v16 = vpop.xlane.xlu0 %30 }
  0x9c   :  { %v33_v17 = vmul.f32 0.00390625, %v31_v16 }
  0x9e   :  { %v41_v18 = vrot.slane %v33_v17, %v40_v15 }
  0xa0   :  { %v43_v19 = vsub.f32 %v14_v5, %v41_v18 }
  0xa2   :  { %v44_v20 = vmul.f32 %v43_v19, %v43_v19 }
  0xa4   :  { %v52_v21 = vrot.slane %v44_v20, %v21_v6 }
  0xa6   :  { %v53_v22 = vcombine.high %v52_v21, %v52_v21  ;;  %v56_v23 = vsel %vm26_vm0, %v52_v21, 0.0 }
  0xa8   :  { %v57_v24 = vsel %vm26_vm0, %v53_v22, 0.0 }
  0xa9   :  { %v58_v25 = vadd.f32 %v57_v24, %v56_v23 }
  0xab   :  { %59 = vadd.xlane.f32.xlu0 %v58_v25 }
 0x138   :  { %v60_v26 = vpop.xlane.xlu0 %59 }
 0x139   :  { %v61_v27 = vmul.f32 0.00390625, %v60_v26 }
 0x13b   :  { %v62_v28 = vadd.f32 1e-06, %v61_v27 }
 0x13d   :  { %121 = vrsqrt.f32 %v62_v28 }
 0x147   :  { %v122_v39 = vpop.eup %121 }
 0x148   :  { %v71_v41 = vrot.slane %v122_v39, %v40_v15 }
 0x14a   :  { %v73_v43 = vmul.f32 %v71_v41, %v43_v19 }
 0x14c   :  { %v93_v44 = vmul.f32 %v91_v40, %v73_v43 }
 0x14e   :  { %v113_v45 = vadd.f32 %v111_v42, %v93_v44 }
 0x150   :  { %114 = vst [vmem:[%s164_s3] sm:$0xf] %v113_v45 }

// kernel: image_encoder_forward.45
= control target key start
LH: loop header
LB: loop body
LE: loop exit
PB: predicated region body
PF: predicated region fallthrough
CT: control target
= control target key end

     0   :  { %vm22_vm0 = vcmask 1041408   ;;  %v276_v10 = vmov 0   ;;  %v81_v43 = vlaneseq  ;;  %s370_s0 = inlined_call_operand.vmem [shape: f32[2,128], index: 0, kind: input, shape index: {}]   ;;  %s371_s3 = inlined_call_operand.vmem [shape: bf16[128,256], index: 3, kind: input, shape index: {}]   ;;  %s372_s1 = inlined_call_operand.vmem [shape: f32[1,128], index: 1, kind: input, shape index: {}]   ;;  %s373_s2 = inlined_call_operand.vmem [shape: f32[1,128], index: 2, kind: input, shape index: {}]   ;;  %s374_s4 = inlined_call_operand.vmem [shape: f32[1,256], index: 4, kind: input, shape index: {}]   ;;  %s375_s5 = inlined_call_operand.vmem [shape: f32[2,256], index: 5, kind: output, shape index: {}]  }
   0x1   :  { %v21_v0 = vld [vmem:[%s370_s0] sm:$0x3]  ;;  %v248_v7 = vld [vmem:[%s371_s3 + $0x4] ss:$8 sps:$4 sm:$0xff]   ;;  %v251_v9 = vld [vmem:[%s371_s3 + $0x14] ss:$8 sps:$4 sm:$0xff]   ;;  %203 = vmatprep.mubr.bf16.mxu0 %v276_v10 }
   0x2   :  { %v23_v1 = vsel %vm22_vm0, %v21_v0, 0.0  ;;  %v250_v8 = vld [vmem:[%s371_s3] ss:$8 sps:$4 sm:$0xff]   ;;  %171 = vmatprep.subr.bf16.mxu0 %v248_v7  ;;  %v253_v11 = vld [vmem:[%s371_s3 + $0x10] ss:$8 sps:$4 sm:$0xff]   ;;  %v82_v44 = vshrl.u32 %v81_v43, 7 }
   0x3   :  { %24 = vadd.xlane.f32.xlu0 %v23_v1  ;;  %172 = vmatpush1.bf16.msra.mxu0 %v250_v8  ;;  %v254_v12 = vld [vmem:[%s371_s3 + $0x24] ss:$8 sps:$4 sm:$0xff]   ;;  %v256_v13 = vld [vmem:[%s371_s3 + $0x20] ss:$8 sps:$4 sm:$0xff]   ;;  %v257_v14 = vld [vmem:[%s371_s3 + $0x34] ss:$8 sps:$4 sm:$0xff]  }
   0x4   :  { %173 = vmatprep.subr.bf16.mxu0 %v251_v9  ;;  %v259_v15 = vld [vmem:[%s371_s3 + $0x30] ss:$8 sps:$4 sm:$0xff]   ;;  %v260_v16 = vld [vmem:[%s371_s3 + $0x44] ss:$8 sps:$4 sm:$0xff]   ;;  %v262_v17 = vld [vmem:[%s371_s3 + $0x40] ss:$8 sps:$4 sm:$0xff]  }
   0x5   :  { %v263_v18 = vld [vmem:[%s371_s3 + $0x54] ss:$8 sps:$4 sm:$0xff]   ;;  %v265_v19 = vld [vmem:[%s371_s3 + $0x50] ss:$8 sps:$4 sm:$0xff]   ;;  %v266_v20 = vld [vmem:[%s371_s3 + $0x64] ss:$8 sps:$4 sm:$0xff]  }
   0x6   :  { %v268_v21 = vld [vmem:[%s371_s3 + $0x60] ss:$8 sps:$4 sm:$0xff]   ;;  %v269_v22 = vld [vmem:[%s371_s3 + $0x74] ss:$8 sps:$4 sm:$0xff]   ;;  %v271_v23 = vld [vmem:[%s371_s3 + $0x70] ss:$8 sps:$4 sm:$0xff]  }
   0x7   :  { %174 = vmatpush1.bf16.msra.mxu0 %v253_v11  ;;  %v228_v28 = vld [vmem:[%s372_s1] ss:$0 sm:$0xff]  ;;  %v83_v45 = vsub.s32 0, %v82_v44  ;;  %v87_v47 = vsub.s32 1, %v82_v44 }
   0x8   :  { %175 = vmatprep.subr.bf16.mxu0 %v254_v12  ;;  %v229_v30 = vld [vmem:[%s373_s2] ss:$0 sm:$0xff] }
   0x9   :  { %v79_v46 = vld [vmem:[%s374_s4] sm:$0x3] }
   0xa   :  { %v84_v48 = vrot.slane %v79_v46, %v83_v45  ;;  %v88_v49 = vrot.slane %v79_v46, %v87_v47 }
   0xb   :  { %176 = vmatpush1.bf16.msra.mxu0 %v256_v13 }
   0xc   :  { %177 = vmatprep.subr.bf16.mxu0 %v257_v14 }
   0xf   :  { %178 = vmatpush1.bf16.msra.mxu0 %v259_v15 }
  0x10   :  { %179 = vmatprep.subr.bf16.mxu0 %v260_v16 }
  0x13   :  { %180 = vmatpush1.bf16.msra.mxu0 %v262_v17 }
  0x14   :  { %181 = vmatprep.subr.bf16.mxu0 %v263_v18 }
  0x17   :  { %182 = vmatpush1.bf16.msra.mxu0 %v265_v19 }
  0x18   :  { %183 = vmatprep.subr.bf16.mxu0 %v266_v20 }
  0x1b   :  { %184 = vmatpush1.bf16.msra.mxu0 %v268_v21 }
  0x1c   :  { %185 = vmatprep.subr.bf16.mxu0 %v269_v22 }
  0x1f   :  { %186 = vmatpush1.bf16.msra.mxu0 %v271_v23 }
  0x90   :  { %v25_v2 = vpop.xlane.xlu0 %24 }
  0x91   :  { %v27_v3 = vmul.f32 0.0078125, %v25_v2 }
  0x93   :  { %v28_v4 = vsub.f32 %v21_v0, %v27_v3 }
  0x95   :  { %v29_v5 = vmul.f32 %v28_v4, %v28_v4 }
  0x97   :  { %v30_v6 = vsel %vm22_vm0, %v29_v5, 0.0 }
  0x98   :  { %31 = vadd.xlane.f32.xlu0 %v30_v6 }
 0x125   :  { %v32_v24 = vpop.xlane.xlu0 %31 }
 0x126   :  { %v33_v25 = vmul.f32 0.0078125, %v32_v24 }
 0x128   :  { %v34_v26 = vadd.f32 1e-06, %v33_v25 }
 0x12a   :  { %272 = vrsqrt.f32 %v34_v26 }
 0x134   :  { %v273_v27 = vpop.eup %272 }
 0x135   :  { %v36_v29 = vmul.f32 %v273_v27, %v28_v4 }
 0x137   :  { %v44_v31 = vmul.f32 %v228_v28, %v36_v29 }
 0x139   :  { %v52_v32 = vadd.f32 %v229_v30, %v44_v31 }
 0x13b   :  { %v53_v33 = vmul.f32 %v52_v32, %v52_v32 }
 0x13d   :  { %v54_v34 = vmul.f32 %v53_v33, %v52_v32 }
 0x13f   :  { %v55_v35 = vmul.f32 0.044715, %v54_v34 }
 0x141   :  { %v56_v36 = vadd.f32 %v55_v35, %v52_v32 }
 0x143   :  { %v57_v37 = vmul.f32 0.7978846, %v56_v36 }
 0x145   :  { %274 = vtanh.f32 %v57_v37 }
 0x14f   :  { %v275_v38 = vpop.eup %274 }
 0x150   :  { %v59_v39 = vadd.f32 1.0, %v275_v38 }
 0x152   :  { %v60_v40 = vmul.f32 0.5, %v59_v39 }
 0x154   :  { %v61_v41 = vmul.f32 %v60_v40, %v52_v32 }
 0x156   :  { %v62_v42 = vpack.c.bf16 %v61_v41, %v61_v41 }
 0x158   :  { %204 = vmatmul.mubr.bf16.vlgmr.msra.gmra.mrb[0].mxu0 %v62_v42 }
 0x22b   :  { %v205_v50 = vpop.f32.mrb[0].mxu0 }
 0x22c   :  { %v206_v51 = vadd.f32 %v205_v50, %v84_v48  ;;  %v207_v52 = vpop.f32.mrb[1].mxu0 }
 0x22d   :  { %v208_v53 = vadd.f32 %v207_v52, %v88_v49  ;;  %v209_v54 = vpop.f32.mrb[2].mxu0 }
 0x22e   :  { %v210_v55 = vpop.f32.mrb[3].mxu0 }
 0x22f   :  { %v214_v56 = vcombine.low %v206_v51, %v208_v53 }
 0x231   :  { %246 = vst.sshfl [vmem:[%s375_s5] sm:$0x33 pattern:$0x76325410] %v214_v56 }

// kernel: image_encoder_forward.36
= control target key start
LH: loop header
LB: loop body
LE: loop exit
PB: predicated region body
PF: predicated region fallthrough
CT: control target
= control target key end

     0   :  { %v25_v0 = vlaneseq  ;;  %v479_v1 = vmov 1983009808   ;;  %vm32_vm0 = vcmask 1041408   ;;  %v480_v30 = vmov 269488144   ;;  %s639_s0 = inlined_call_operand.vmem [shape: f32[2,256], index: 0, kind: input, shape index: {}]   ;;  %s640_s3 = inlined_call_operand.vmem [shape: bf16[256,256], index: 3, kind: input, shape index: {}]   ;;  %s641_s1 = inlined_call_operand.vmem [shape: f32[1,256], index: 1, kind: input, shape index: {}]   ;;  %s642_s2 = inlined_call_operand.vmem [shape: f32[1,256], index: 2, kind: input, shape index: {}]   ;;  %s643_s4 = inlined_call_operand.vmem [shape: f32[1,256], index: 4, kind: input, shape index: {}]   ;;  %s644_s5 = inlined_call_operand.vmem [shape: f32[2,256], index: 5, kind: output, shape index: {}]  }
   0x1   :  { %v23_v2 = vunpack.c.l.s4 %v479_v1  ;;  %v20_v5 = vld [vmem:[%s639_s0] sm:$0xf]  ;;  %v429_v12 = vld [vmem:[%s640_s3 + $0x4] ss:$8 sps:$4 sm:$0xff]   ;;  %v432_v14 = vld [vmem:[%s640_s3 + $0x14] ss:$8 sps:$4 sm:$0xff]   ;;  %v42_v31 = vunpack.c.l.s4 %v480_v30 }
   0x2   :  { %v511_v3 = vshrl.u32 %v25_v0, 7  ;;  %v431_v13 = vld [vmem:[%s640_s3] ss:$8 sps:$4 sm:$0xff]   ;;  %337 = vmatprep.subr.bf16.mxu0 %v429_v12  ;;  %v434_v15 = vld [vmem:[%s640_s3 + $0x10] ss:$8 sps:$4 sm:$0xff]  }
   0x3   :  { %v24_v4 = vunpack.c.0.s8 %v23_v2  ;;  %338 = vmatpush1.bf16.msra.mxu0 %v431_v13  ;;  %v435_v16 = vld [vmem:[%s640_s3 + $0x24] ss:$8 sps:$4 sm:$0xff]   ;;  %v437_v17 = vld [vmem:[%s640_s3 + $0x20] ss:$8 sps:$4 sm:$0xff]   ;;  %v438_v18 = vld [vmem:[%s640_s3 + $0x34] ss:$8 sps:$4 sm:$0xff]   ;;  %v43_v32 = vunpack.c.0.s8 %v42_v31 }
   0x4   :  { %339 = vmatprep.subr.bf16.mxu0 %v432_v14  ;;  %v440_v19 = vld [vmem:[%s640_s3 + $0x30] ss:$8 sps:$4 sm:$0xff]   ;;  %v441_v20 = vld [vmem:[%s640_s3 + $0x44] ss:$8 sps:$4 sm:$0xff]   ;;  %v443_v21 = vld [vmem:[%s640_s3 + $0x40] ss:$8 sps:$4 sm:$0xff]  }
   0x5   :  { %v517_v6 = vsub.s32 %v24_v4, %v511_v3  ;;  %v444_v22 = vld [vmem:[%s640_s3 + $0x54] ss:$8 sps:$4 sm:$0xff]   ;;  %v446_v23 = vld [vmem:[%s640_s3 + $0x50] ss:$8 sps:$4 sm:$0xff]   ;;  %v447_v24 = vld [vmem:[%s640_s3 + $0x64] ss:$8 sps:$4 sm:$0xff]   ;;  %v46_v33 = vsub.s32 %v43_v32, %v511_v3 }
   0x6   :  { %v449_v25 = vld [vmem:[%s640_s3 + $0x60] ss:$8 sps:$4 sm:$0xff]   ;;  %v450_v26 = vld [vmem:[%s640_s3 + $0x74] ss:$8 sps:$4 sm:$0xff]   ;;  %v452_v27 = vld [vmem:[%s640_s3 + $0x70] ss:$8 sps:$4 sm:$0xff]  }
   0x7   :  { %v28_v7 = vrot.slane %v20_v5, %v517_v6  ;;  %340 = vmatpush1.bf16.msra.mxu0 %v434_v15  ;;  %v453_v28 = vld [vmem:[%s640_s3 + $0x84] ss:$8 sps:$4 sm:$0xff]   ;;  %v455_v29 = vld [vmem:[%s640_s3 + $0x80] ss:$8 sps:$4 sm:$0xff]   ;;  %v456_v44 = vld [vmem:[%s640_s3 + $0x94] ss:$8 sps:$4 sm:$0xff]  }
   0x8   :  { %341 = vmatprep.subr.bf16.mxu0 %v435_v16  ;;  %v458_v45 = vld [vmem:[%s640_s3 + $0x90] ss:$8 sps:$4 sm:$0xff]   ;;  %v459_v46 = vld [vmem:[%s640_s3 + $0xa4] ss:$8 sps:$4 sm:$0xff]   ;;  %v461_v47 = vld [vmem:[%s640_s3 + $0xa0] ss:$8 sps:$4 sm:$0xff]  }
   0x9   :  { %v29_v8 = vcombine.high %v28_v7, %v28_v7  ;;  %v33_v9 = vsel %vm32_vm0, %v28_v7, 0.0  ;;  %v462_v48 = vld [vmem:[%s640_s3 + $0xb4] ss:$8 sps:$4 sm:$0xff]   ;;  %v464_v49 = vld [vmem:[%s640_s3 + $0xb0] ss:$8 sps:$4 sm:$0xff]   ;;  %v84_v61 = vsub.s32 0, %v511_v3 }
   0xa   :  { %v465_v50 = vld [vmem:[%s640_s3 + $0xc4] ss:$8 sps:$4 sm:$0xff]   ;;  %v467_v51 = vld [vmem:[%s640_s3 + $0xc0] ss:$8 sps:$4 sm:$0xff]   ;;  %v468_v52 = vld [vmem:[%s640_s3 + $0xd4] ss:$8 sps:$4 sm:$0xff]  }
   0xb   :  { %v34_v10 = vsel %vm32_vm0, %v29_v8, 0.0  ;;  %342 = vmatpush1.bf16.msra.mxu0 %v437_v17  ;;  %v470_v53 = vld [vmem:[%s640_s3 + $0xd0] ss:$8 sps:$4 sm:$0xff]   ;;  %v471_v54 = vld [vmem:[%s640_s3 + $0xe4] ss:$8 sps:$4 sm:$0xff]   ;;  %v88_v62 = vsub.s32 1, %v511_v3 }
   0xc   :  { %v35_v11 = vadd.f32 %v34_v10, %v33_v9  ;;  %343 = vmatprep.subr.bf16.mxu0 %v438_v18  ;;  %v473_v55 = vld [vmem:[%s640_s3 + $0xe0] ss:$8 sps:$4 sm:$0xff]   ;;  %v474_v56 = vld [vmem:[%s640_s3 + $0xf4] ss:$8 sps:$4 sm:$0xff]   ;;  %v476_v57 = vld [vmem:[%s640_s3 + $0xf0] ss:$8 sps:$4 sm:$0xff]  }
   0xd   :  { %v80_v63 = vld [vmem:[%s641_s1] sm:$0x3] }
   0xe   :  { %36 = vadd.xlane.f32.xlu0 %v35_v11  ;;  %v100_v0 = vld [vmem:[%s642_s2] sm:$0x3]  ;;  %v85_v1 = vrot.slane %v80_v63, %v84_v61  ;;  %v89_v2 = vrot.slane %v80_v63, %v88_v62 }
   0xf   :  { %344 = vmatpush1.bf16.msra.mxu0 %v440_v19  ;;  %v105_v4 = vrot.slane %v100_v0, %v84_v61  ;;  %v165_v19 = vld [vmem:[%s643_s4] sm:$0x3] }
  0x10   :  { %345 = vmatprep.subr.bf16.mxu0 %v441_v20  ;;  %v90_v7 = vcombine.low %v85_v1, %v89_v2  ;;  %v170_v20 = vrot.slane %v165_v19, %v84_v61 }
  0x12   :  { %v97_v11 = vrot.slane %v90_v7, %v517_v6 }
  0x13   :  { %346 = vmatpush1.bf16.msra.mxu0 %v443_v21  ;;  %v174_v21 = vrot.slane %v165_v19, %v88_v62 }
  0x14   :  { %347 = vmatprep.subr.bf16.mxu0 %v444_v22 }
  0x17   :  { %348 = vmatpush1.bf16.msra.mxu0 %v446_v23 }
  0x18   :  { %349 = vmatprep.subr.bf16.mxu0 %v447_v24 }
  0x1b   :  { %350 = vmatpush1.bf16.msra.mxu0 %v449_v25 }
  0x1c   :  { %351 = vmatprep.subr.bf16.mxu0 %v450_v26 }
  0x1f   :  { %352 = vmatpush1.bf16.msra.mxu0 %v452_v27 }
  0x20   :  { %353 = vmatprep.subr.bf16.mxu0 %v453_v28 }
  0x23   :  { %354 = vmatpush1.bf16.msra.mxu0 %v455_v29 }
  0x24   :  { %355 = vmatprep.subr.bf16.mxu0 %v456_v44 }
  0x27   :  { %356 = vmatpush1.bf16.msra.mxu0 %v458_v45 }
  0x28   :  { %357 = vmatprep.subr.bf16.mxu0 %v459_v46 }
  0x2b   :  { %358 = vmatpush1.bf16.msra.mxu0 %v461_v47 }
  0x2c   :  { %359 = vmatprep.subr.bf16.mxu0 %v462_v48 }
  0x2f   :  { %360 = vmatpush1.bf16.msra.mxu0 %v464_v49 }
  0x30   :  { %361 = vmatprep.subr.bf16.mxu0 %v465_v50 }
  0x33   :  { %362 = vmatpush1.bf16.msra.mxu0 %v467_v51 }
  0x34   :  { %363 = vmatprep.subr.bf16.mxu0 %v468_v52 }
  0x37   :  { %364 = vmatpush1.bf16.msra.mxu0 %v470_v53 }
  0x38   :  { %365 = vmatprep.subr.bf16.mxu0 %v471_v54 }
  0x3b   :  { %366 = vmatpush1.bf16.msra.mxu0 %v473_v55 }
  0x3c   :  { %367 = vmatprep.subr.bf16.mxu0 %v474_v56 }
  0x3f   :  { %368 = vmatpush1.bf16.msra.mxu0 %v476_v57 }
  0x9b   :  { %v37_v34 = vpop.xlane.xlu0 %36 }
  0x9c   :  { %v39_v35 = vmul.f32 0.00390625, %v37_v34 }
  0x9e   :  { %v47_v36 = vrot.slane %v39_v35, %v46_v33 }
  0xa0   :  { %v49_v37 = vsub.f32 %v20_v5, %v47_v36  ;;  %v109_v5 = vrot.slane %v100_v0, %v88_v62 }
  0xa2   :  { %v50_v38 = vmul.f32 %v49_v37, %v49_v37  ;;  %v110_v8 = vcombine.low %v105_v4, %v109_v5 }
  0xa4   :  { %v58_v39 = vrot.slane %v50_v38, %v517_v6  ;;  %v117_v12 = vrot.slane %v110_v8, %v517_v6 }
  0xa6   :  { %v59_v40 = vcombine.high %v58_v39, %v58_v39  ;;  %v62_v41 = vsel %vm32_vm0, %v58_v39, 0.0 }
  0xa8   :  { %v63_v42 = vsel %vm32_vm0, %v59_v40, 0.0 }
  0xa9   :  { %v64_v43 = vadd.f32 %v63_v42, %v62_v41 }
  0xab   :  { %65 = vadd.xlane.f32.xlu0 %v64_v43 }
 0x138   :  { %v66_v58 = vpop.xlane.xlu0 %65 }
 0x139   :  { %v67_v59 = vmul.f32 0.00390625, %v66_v58 }
 0x13b   :  { %v68_v60 = vadd.f32 1e-06, %v67_v59 }
 0x13d   :  { %477 = vrsqrt.f32 %v68_v60 }
 0x147   :  { %v478_v9 = vpop.eup %477 }
 0x148   :  { %v77_v10 = vrot.slane %v478_v9, %v46_v33 }
 0x14a   :  { %v79_v3 = vmul.f32 %v77_v10, %v49_v37 }
 0x14c   :  { %v99_v13 = vmul.f32 %v97_v11, %v79_v3 }
 0x14e   :  { %v119_v14 = vadd.f32 %v117_v12, %v99_v13 }
 0x150   :  { %v127_v15 = vrot.slane %v119_v14, %v517_v6 }
 0x152   :  { %v128_v16 = vcombine.high %v127_v15, %v127_v15  ;;  %v131_v18 = vpack.c.bf16 %v127_v15, %v127_v15 }
 0x154   :  { %v132_v17 = vpack.c.bf16 %v128_v16, %v128_v16 }
 0x156   :  { %369 = vmatprep.mubr.bf16.mxu0 %v132_v17 }
 0x157   :  { %370 = vmatmul.mubr.bf16.vlgmr.msra.gmra.mrb[0].mxu0 %v131_v18 }
 0x22a   :  { %v371_v22 = vpop.f32.mrb[0].mxu0 }
 0x22b   :  { %v372_v23 = vadd.f32 %v371_v22, %v170_v20  ;;  %v373_v24 = vpop.f32.mrb[1].mxu0 }
 0x22c   :  { %v374_v25 = vadd.f32 %v373_v24, %v174_v21  ;;  %v375_v26 = vpop.f32.mrb[2].mxu0 }
 0x22d   :  { %v376_v27 = vpop.f32.mrb[3].mxu0 }
 0x22e   :  { %v380_v28 = vcombine.low %v372_v23, %v374_v25 }
 0x230   :  { %426 = vst.sshfl [vmem:[%s644_s5] sm:$0x33 pattern:$0x76325410] %v380_v28 }

// kernel: image_encoder_forward.39
= control target key start
LH: loop header
LB: loop body
LE: loop exit
PB: predicated region body
PF: predicated region fallthrough
CT: control target
= control target key end

     0   :  { %v65_v36 = vlaneseq  ;;  %s522_s1 = inlined_call_operand.vmem [shape: bf16[256,256], index: 1, kind: input, shape index: {}]   ;;  %s523_s0 = inlined_call_operand.vmem [shape: f32[2,256], index: 0, kind: input, shape index: {}]   ;;  %s524_s2 = inlined_call_operand.vmem [shape: f32[1,256], index: 2, kind: input, shape index: {}]   ;;  %s525_s3 = inlined_call_operand.vmem [shape: f32[2,256], index: 3, kind: input, shape index: {}]   ;;  %s526_s4 = inlined_call_operand.vmem [shape: f32[2,256], index: 4, kind: output, shape index: {}]  }
   0x1   :  { %v341_v0 = vld [vmem:[%s522_s1 + $0x4] ss:$8 sps:$4 sm:$0xff]   ;;  %v343_v1 = vld [vmem:[%s522_s1] ss:$8 sps:$4 sm:$0xff]   ;;  %v344_v2 = vld [vmem:[%s522_s1 + $0x14] ss:$8 sps:$4 sm:$0xff]  }
   0x2   :  { %235 = vmatprep.subr.bf16.mxu0 %v341_v0  ;;  %v346_v3 = vld [vmem:[%s522_s1 + $0x10] ss:$8 sps:$4 sm:$0xff]   ;;  %v347_v4 = vld [vmem:[%s522_s1 + $0x24] ss:$8 sps:$4 sm:$0xff]   ;;  %v349_v5 = vld [vmem:[%s522_s1 + $0x20] ss:$8 sps:$4 sm:$0xff]  }
   0x3   :  { %236 = vmatpush1.bf16.msra.mxu0 %v343_v1  ;;  %v350_v6 = vld [vmem:[%s522_s1 + $0x34] ss:$8 sps:$4 sm:$0xff]   ;;  %v352_v7 = vld [vmem:[%s522_s1 + $0x30] ss:$8 sps:$4 sm:$0xff]   ;;  %v353_v8 = vld [vmem:[%s522_s1 + $0x44] ss:$8 sps:$4 sm:$0xff]  }
   0x4   :  { %237 = vmatprep.subr.bf16.mxu0 %v344_v2  ;;  %v355_v9 = vld [vmem:[%s522_s1 + $0x40] ss:$8 sps:$4 sm:$0xff]   ;;  %v356_v10 = vld [vmem:[%s522_s1 + $0x54] ss:$8 sps:$4 sm:$0xff]   ;;  %v358_v11 = vld [vmem:[%s522_s1 + $0x50] ss:$8 sps:$4 sm:$0xff]  }
   0x5   :  { %v359_v12 = vld [vmem:[%s522_s1 + $0x64] ss:$8 sps:$4 sm:$0xff]   ;;  %v306_v13 = vld.sshfl [vmem:[%s523_s0] sm:$0x33 pattern:$0x76325410] }
   0x6   :  { %v26_v14 = vcombine.high %v306_v13, %v306_v13  ;;  %v361_v15 = vld [vmem:[%s522_s1 + $0x60] ss:$8 sps:$4 sm:$0xff]   ;;  %v362_v16 = vld [vmem:[%s522_s1 + $0x74] ss:$8 sps:$4 sm:$0xff]   ;;  %v364_v18 = vld [vmem:[%s522_s1 + $0x70] ss:$8 sps:$4 sm:$0xff]   ;;  %v29_v35 = vpack.c.bf16 %v306_v13, %v306_v13 }
   0x7   :  { %238 = vmatpush1.bf16.msra.mxu0 %v346_v3  ;;  %v365_v19 = vld [vmem:[%s522_s1 + $0x84] ss:$8 sps:$4 sm:$0xff]   ;;  %v367_v20 = vld [vmem:[%s522_s1 + $0x80] ss:$8 sps:$4 sm:$0xff]   ;;  %v368_v21 = vld [vmem:[%s522_s1 + $0x94] ss:$8 sps:$4 sm:$0xff]  }
   0x8   :  { %239 = vmatprep.subr.bf16.mxu0 %v347_v4  ;;  %v30_v17 = vpack.c.bf16 %v26_v14, %v26_v14  ;;  %v370_v22 = vld [vmem:[%s522_s1 + $0x90] ss:$8 sps:$4 sm:$0xff]   ;;  %v371_v23 = vld [vmem:[%s522_s1 + $0xa4] ss:$8 sps:$4 sm:$0xff]   ;;  %v373_v24 = vld [vmem:[%s522_s1 + $0xa0] ss:$8 sps:$4 sm:$0xff]  }
   0x9   :  { %v374_v25 = vld [vmem:[%s522_s1 + $0xb4] ss:$8 sps:$4 sm:$0xff]   ;;  %v376_v26 = vld [vmem:[%s522_s1 + $0xb0] ss:$8 sps:$4 sm:$0xff]   ;;  %v377_v27 = vld [vmem:[%s522_s1 + $0xc4] ss:$8 sps:$4 sm:$0xff]  }
   0xa   :  { %267 = vmatprep.mubr.bf16.mxu0 %v30_v17  ;;  %v379_v28 = vld [vmem:[%s522_s1 + $0xc0] ss:$8 sps:$4 sm:$0xff]   ;;  %v380_v29 = vld [vmem:[%s522_s1 + $0xd4] ss:$8 sps:$4 sm:$0xff]   ;;  %v382_v30 = vld [vmem:[%s522_s1 + $0xd0] ss:$8 sps:$4 sm:$0xff]  }
   0xb   :  { %240 = vmatpush1.bf16.msra.mxu0 %v349_v5  ;;  %v383_v31 = vld [vmem:[%s522_s1 + $0xe4] ss:$8 sps:$4 sm:$0xff]   ;;  %v385_v32 = vld [vmem:[%s522_s1 + $0xe0] ss:$8 sps:$4 sm:$0xff]   ;;  %v386_v33 = vld [vmem:[%s522_s1 + $0xf4] ss:$8 sps:$4 sm:$0xff]  }
   0xc   :  { %241 = vmatprep.subr.bf16.mxu0 %v350_v6  ;;  %v388_v34 = vld [vmem:[%s522_s1 + $0xf0] ss:$8 sps:$4 sm:$0xff]   ;;  %v66_v37 = vshrl.u32 %v65_v36, 7  ;;  %v63_v39 = vld [vmem:[%s524_s2] sm:$0x3] }
   0xd   :  { %v339_v42 = vld.sshfl [vmem:[%s525_s3] sm:$0x33 pattern:$0x76325410] }
   0xe   :  { %v67_v38 = vsub.s32 0, %v66_v37  ;;  %v71_v40 = vsub.s32 1, %v66_v37  ;;  %v285_v45 = vcombine.high %v339_v42, %v339_v42 }
   0xf   :  { %242 = vmatpush1.bf16.msra.mxu0 %v352_v7 }
  0x10   :  { %243 = vmatprep.subr.bf16.mxu0 %v353_v8  ;;  %v68_v41 = vrot.slane %v63_v39, %v67_v38  ;;  %v72_v43 = vrot.slane %v63_v39, %v71_v40 }
  0x13   :  { %244 = vmatpush1.bf16.msra.mxu0 %v355_v9 }
  0x14   :  { %245 = vmatprep.subr.bf16.mxu0 %v356_v10 }
  0x17   :  { %246 = vmatpush1.bf16.msra.mxu0 %v358_v11 }
  0x18   :  { %247 = vmatprep.subr.bf16.mxu0 %v359_v12 }
  0x1b   :  { %248 = vmatpush1.bf16.msra.mxu0 %v361_v15 }
  0x1c   :  { %249 = vmatprep.subr.bf16.mxu0 %v362_v16 }
  0x1f   :  { %250 = vmatpush1.bf16.msra.mxu0 %v364_v18 }
  0x20   :  { %251 = vmatprep.subr.bf16.mxu0 %v365_v19 }
  0x23   :  { %252 = vmatpush1.bf16.msra.mxu0 %v367_v20 }
  0x24   :  { %253 = vmatprep.subr.bf16.mxu0 %v368_v21 }
  0x27   :  { %254 = vmatpush1.bf16.msra.mxu0 %v370_v22 }
  0x28   :  { %255 = vmatprep.subr.bf16.mxu0 %v371_v23 }
  0x2b   :  { %256 = vmatpush1.bf16.msra.mxu0 %v373_v24 }
  0x2c   :  { %257 = vmatprep.subr.bf16.mxu0 %v374_v25 }
  0x2f   :  { %258 = vmatpush1.bf16.msra.mxu0 %v376_v26 }
  0x30   :  { %259 = vmatprep.subr.bf16.mxu0 %v377_v27 }
  0x33   :  { %260 = vmatpush1.bf16.msra.mxu0 %v379_v28 }
  0x34   :  { %261 = vmatprep.subr.bf16.mxu0 %v380_v29 }
  0x37   :  { %262 = vmatpush1.bf16.msra.mxu0 %v382_v30 }
  0x38   :  { %263 = vmatprep.subr.bf16.mxu0 %v383_v31 }
  0x3b   :  { %264 = vmatpush1.bf16.msra.mxu0 %v385_v32 }
  0x3c   :  { %265 = vmatprep.subr.bf16.mxu0 %v386_v33 }
  0x3f   :  { %266 = vmatpush1.bf16.msra.mxu0 %v388_v34 }
  0x42   :  { %268 = vmatmul.mubr.bf16.vlgmr.msra.gmra.mrb[0].mxu0 %v29_v35 }
 0x115   :  { %v269_v44 = vpop.f32.mrb[0].mxu0 }
 0x116   :  { %v270_v46 = vadd.f32 %v269_v44, %v68_v41  ;;  %v271_v47 = vpop.f32.mrb[1].mxu0 }
 0x117   :  { %v272_v48 = vadd.f32 %v271_v47, %v72_v43  ;;  %v273_v49 = vpop.f32.mrb[2].mxu0 }
 0x118   :  { %v288_v50 = vadd.f32 %v339_v42, %v270_v46  ;;  %v274_v51 = vpop.f32.mrb[3].mxu0 }
 0x119   :  { %v289_v52 = vadd.f32 %v285_v45, %v272_v48 }
 0x11b   :  { %v292_v53 = vcombine.low %v288_v50, %v289_v52 }
 0x11d   :  { %340 = vst.sshfl [vmem:[%s526_s4] sm:$0x33 pattern:$0x76325410] %v292_v53 }

// kernel: image_encoder_forward.37
= control target key start
LH: loop header
LB: loop body
LE: loop exit
PB: predicated region body
PF: predicated region fallthrough
CT: control target
= control target key end

     0   :  { %vm27_vm0 = vcmask 1041408   ;;  %s1071_s0 = inlined_call_operand.vmem [shape: f32[10,256], index: 0, kind: input, shape index: {}]   ;;  %s1072_s3 = inlined_call_operand.vmem [shape: bf16[256,512], index: 3, kind: input, shape index: {}]   ;;  %s1073_s1 = inlined_call_operand.vmem [shape: f32[1,256], index: 1, kind: input, shape index: {}]   ;;  %s1074_s2 = inlined_call_operand.vmem [shape: f32[1,256], index: 2, kind: input, shape index: {}]   ;;  %s1075_s4 = inlined_call_operand.vmem [shape: f32[1,512], index: 4, kind: input, shape index: {}]   ;;  %s1076_s5 = inlined_call_operand.vmem [shape: f32[10,512], index: 5, kind: output, shape index: {}]  }
   0x1   :  { %v797_v0 = vld [vmem:[%s1071_s0 + $0x10] sm:$0x3]  ;;  %v802_v1 = vld [vmem:[%s1071_s0 + $0x18] sm:$0x3]  ;;  %v811_v4 = vld [vmem:[%s1071_s0] sm:$0xff] }
   0x2   :  { %v28_v2 = vsel %vm27_vm0, %v797_v0, 0.0  ;;  %v29_v3 = vsel %vm27_vm0, %v802_v1, 0.0  ;;  %v816_v5 = vld [vmem:[%s1071_s0 + $0x8] sm:$0xff]  ;;  %v664_v8 = vld [vmem:[%s1072_s3 + $0x4] ss:$16 sps:$4 sm:$0xff]  }
   0x3   :  { %v30_v6 = vadd.f32 %v29_v3, %v28_v2  ;;  %v24_v7 = vadd.f32 %v816_v5, %v811_v4  ;;  %v666_v9 = vld [vmem:[%s1072_s3 + $0xc] ss:$16 sps:$4 sm:$0xff]   ;;  %502 = vmatprep.subr.bf16.mxu0 %v664_v8  ;;  %v668_v10 = vld [vmem:[%s1072_s3] ss:$16 sps:$4 sm:$0xff]   ;;  %v669_v11 = vld [vmem:[%s1072_s3 + $0x8] ss:$16 sps:$4 sm:$0xff]  }
   0x4   :  { %545 = vmatprep.subr.bf16.mxu1 %v666_v9  ;;  %v670_v12 = vld [vmem:[%s1072_s3 + $0x24] ss:$16 sps:$4 sm:$0xff]   ;;  %503 = vmatpush1.bf16.msra.mxu0 %v668_v10  ;;  %v672_v13 = vld [vmem:[%s1072_s3 + $0x2c] ss:$16 sps:$4 sm:$0xff]   ;;  %v674_v14 = vld [vmem:[%s1072_s3 + $0x20] ss:$16 sps:$4 sm:$0xff]  }
   0x5   :  { %31 = vadd.xlane.f32.xlu0 %v30_v6  ;;  %546 = vmatpush1.bf16.msra.mxu1 %v669_v11  ;;  %v675_v15 = vld [vmem:[%s1072_s3 + $0x28] ss:$16 sps:$4 sm:$0xff]   ;;  %v676_v16 = vld [vmem:[%s1072_s3 + $0x44] ss:$16 sps:$4 sm:$0xff]   ;;  %v678_v17 = vld [vmem:[%s1072_s3 + $0x4c] ss:$16 sps:$4 sm:$0xff]  }
   0x6   :  { %504 = vmatprep.subr.bf16.mxu0 %v670_v12  ;;  %547 = vmatprep.subr.bf16.mxu1 %v672_v13  ;;  %v680_v18 = vld [vmem:[%s1072_s3 + $0x40] ss:$16 sps:$4 sm:$0xff]   ;;  %v681_v19 = vld [vmem:[%s1072_s3 + $0x48] ss:$16 sps:$4 sm:$0xff]   ;;  %v682_v20 = vld [vmem:[%s1072_s3 + $0x64] ss:$16 sps:$4 sm:$0xff]  }
   0x7   :  { %v684_v21 = vld [vmem:[%s1072_s3 + $0x6c] ss:$16 sps:$4 sm:$0xff]   ;;  %v686_v22 = vld [vmem:[%s1072_s3 + $0x60] ss:$16 sps:$4 sm:$0xff]   ;;  %v687_v23 = vld [vmem:[%s1072_s3 + $0x68] ss:$16 sps:$4 sm:$0xff]  }
   0x8   :  { %505 = vmatpush1.bf16.msra.mxu0 %v674_v14  ;;  %v688_v24 = vld [vmem:[%s1072_s3 + $0x84] ss:$16 sps:$4 sm:$0xff]   ;;  %v690_v25 = vld [vmem:[%s1072_s3 + $0x8c] ss:$16 sps:$4 sm:$0xff]   ;;  %v692_v26 = vld [vmem:[%s1072_s3 + $0x80] ss:$16 sps:$4 sm:$0xff]  }
   0x9   :  { %25 = vadd.xlane.f32.xlu0 %v24_v7  ;;  %548 = vmatpush1.bf16.msra.mxu1 %v675_v15  ;;  %v693_v27 = vld [vmem:[%s1072_s3 + $0x88] ss:$16 sps:$4 sm:$0xff]   ;;  %v694_v28 = vld [vmem:[%s1072_s3 + $0xa4] ss:$16 sps:$4 sm:$0xff]   ;;  %v696_v29 = vld [vmem:[%s1072_s3 + $0xac] ss:$16 sps:$4 sm:$0xff]  }
   0xa   :  { %506 = vmatprep.subr.bf16.mxu0 %v676_v16  ;;  %549 = vmatprep.subr.bf16.mxu1 %v678_v17  ;;  %v698_v30 = vld [vmem:[%s1072_s3 + $0xa0] ss:$16 sps:$4 sm:$0xff]   ;;  %v699_v31 = vld [vmem:[%s1072_s3 + $0xa8] ss:$16 sps:$4 sm:$0xff]   ;;  %v700_v32 = vld [vmem:[%s1072_s3 + $0xc4] ss:$16 sps:$4 sm:$0xff]  }
   0xb   :  { %v702_v33 = vld [vmem:[%s1072_s3 + $0xcc] ss:$16 sps:$4 sm:$0xff]   ;;  %v704_v34 = vld [vmem:[%s1072_s3 + $0xc0] ss:$16 sps:$4 sm:$0xff]   ;;  %v705_v35 = vld [vmem:[%s1072_s3 + $0xc8] ss:$16 sps:$4 sm:$0xff]  }
   0xc   :  { %507 = vmatpush1.bf16.msra.mxu0 %v680_v18  ;;  %v706_v36 = vld [vmem:[%s1072_s3 + $0xe4] ss:$16 sps:$4 sm:$0xff]   ;;  %v708_v37 = vld [vmem:[%s1072_s3 + $0xec] ss:$16 sps:$4 sm:$0xff]   ;;  %v710_v38 = vld [vmem:[%s1072_s3 + $0xe0] ss:$16 sps:$4 sm:$0xff]  }
   0xd   :  { %550 = vmatpush1.bf16.msra.mxu1 %v681_v19  ;;  %508 = vmatprep.subr.bf16.mxu0 %v682_v20  ;;  %v711_v39 = vld [vmem:[%s1072_s3 + $0xe8] ss:$16 sps:$4 sm:$0xff]   ;;  %v712_v40 = vld [vmem:[%s1072_s3 + $0x104] ss:$16 sps:$4 sm:$0xff]   ;;  %v714_v41 = vld [vmem:[%s1072_s3 + $0x10c] ss:$16 sps:$4 sm:$0xff]  }
   0xe   :  { %551 = vmatprep.subr.bf16.mxu1 %v684_v21  ;;  %v716_v42 = vld [vmem:[%s1072_s3 + $0x100] ss:$16 sps:$4 sm:$0xff]   ;;  %v717_v43 = vld [vmem:[%s1072_s3 + $0x108] ss:$16 sps:$4 sm:$0xff]   ;;  %v718_v60 = vld [vmem:[%s1072_s3 + $0x124] ss:$16 sps:$4 sm:$0xff]  }
   0xf   :  { %v720_v61 = vld [vmem:[%s1072_s3 + $0x12c] ss:$16 sps:$4 sm:$0xff]   ;;  %v722_v62 = vld [vmem:[%s1072_s3 + $0x120] ss:$16 sps:$4 sm:$0xff]   ;;  %v723_v63 = vld [vmem:[%s1072_s3 + $0x128] ss:$16 sps:$4 sm:$0xff]  }
  0x10   :  { %509 = vmatpush1.bf16.msra.mxu0 %v686_v22  ;;  %v728_v2 = vld [vmem:[%s1072_s3 + $0x140] ss:$16 sps:$4 sm:$0xff]   ;;  %v729_v3 = vld [vmem:[%s1072_s3 + $0x148] ss:$16 sps:$4 sm:$0xff]   ;;  %v736_v8 = vld [vmem:[%s1072_s3 + $0x184] ss:$16 sps:$4 sm:$0xff]  }
  0x11   :  { %552 = vmatpush1.bf16.msra.mxu1 %v687_v23  ;;  %510 = vmatprep.subr.bf16.mxu0 %v688_v24  ;;  %v734_v6 = vld [vmem:[%s1072_s3 + $0x160] ss:$16 sps:$4 sm:$0xff]   ;;  %v735_v7 = vld [vmem:[%s1072_s3 + $0x168] ss:$16 sps:$4 sm:$0xff]   ;;  %v738_v9 = vld [vmem:[%s1072_s3 + $0x18c] ss:$16 sps:$4 sm:$0xff]  }
  0x12   :  { %553 = vmatprep.subr.bf16.mxu1 %v690_v25  ;;  %v740_v10 = vld [vmem:[%s1072_s3 + $0x180] ss:$16 sps:$4 sm:$0xff]   ;;  %v741_v11 = vld [vmem:[%s1072_s3 + $0x188] ss:$16 sps:$4 sm:$0xff]   ;;  %v742_v12 = vld [vmem:[%s1072_s3 + $0x1a4] ss:$16 sps:$4 sm:$0xff]  }
  0x13   :  { %v744_v13 = vld [vmem:[%s1072_s3 + $0x1ac] ss:$16 sps:$4 sm:$0xff]   ;;  %v746_v14 = vld [vmem:[%s1072_s3 + $0x1a0] ss:$16 sps:$4 sm:$0xff]   ;;  %v747_v15 = vld [vmem:[%s1072_s3 + $0x1a8] ss:$16 sps:$4 sm:$0xff]  }
  0x14   :  { %511 = vmatpush1.bf16.msra.mxu0 %v692_v26  ;;  %v748_v16 = vld [vmem:[%s1072_s3 + $0x1c4] ss:$16 sps:$4 sm:$0xff]   ;;  %v750_v17 = vld [vmem:[%s1072_s3 + $0x1cc] ss:$16 sps:$4 sm:$0xff]   ;;  %v752_v18 = vld [vmem:[%s1072_s3 + $0x1c0] ss:$16 sps:$4 sm:$0xff]  }
  0x15   :  { %554 = vmatpush1.bf16.msra.mxu1 %v693_v27  ;;  %512 = vmatprep.subr.bf16.mxu0 %v694_v28  ;;  %v753_v19 = vld [vmem:[%s1072_s3 + $0x1c8] ss:$16 sps:$4 sm:$0xff]   ;;  %v754_v20 = vld [vmem:[%s1072_s3 + $0x1e4] ss:$16 sps:$4 sm:$0xff]   ;;  %v756_v21 = vld [vmem:[%s1072_s3 + $0x1ec] ss:$16 sps:$4 sm:$0xff]   ;;  %v64_v28 = vlaneseq }
  0x16   :  { %555 = vmatprep.subr.bf16.mxu1 %v696_v29  ;;  %v758_v22 = vld [vmem:[%s1072_s3 + $0x1e0] ss:$16 sps:$4 sm:$0xff]   ;;  %v759_v23 = vld [vmem:[%s1072_s3 + $0x1e8] ss:$16 sps:$4 sm:$0xff]  }
  0x18   :  { %513 = vmatpush1.bf16.msra.mxu0 %v698_v30 }
  0x19   :  { %556 = vmatpush1.bf16.msra.mxu1 %v699_v31  ;;  %514 = vmatprep.subr.bf16.mxu0 %v700_v32  ;;  %v65_v31 = vshrl.u32 %v64_v28, 7 }
  0x1a   :  { %557 = vmatprep.subr.bf16.mxu1 %v702_v33 }
  0x1b   :  { %v66_v32 = vsub.s32 0, %v65_v31  ;;  %v70_v33 = vsub.s32 1, %v65_v31 }
  0x1c   :  { %515 = vmatpush1.bf16.msra.mxu0 %v704_v34  ;;  %v62_v34 = vld [vmem:[%s1073_s1] sm:$0x3] }
  0x1d   :  { %558 = vmatpush1.bf16.msra.mxu1 %v705_v35  ;;  %516 = vmatprep.subr.bf16.mxu0 %v706_v36 }
  0x1e   :  { %559 = vmatprep.subr.bf16.mxu1 %v708_v37  ;;  %v67_v37 = vrot.slane %v62_v34, %v66_v32 }
  0x20   :  { %517 = vmatpush1.bf16.msra.mxu0 %v710_v38  ;;  %v71_v38 = vrot.slane %v62_v34, %v70_v33 }
  0x21   :  { %560 = vmatpush1.bf16.msra.mxu1 %v711_v39  ;;  %518 = vmatprep.subr.bf16.mxu0 %v712_v40  ;;  %v78_v39 = vld [vmem:[%s1074_s2] sm:$0x3] }
  0x22   :  { %561 = vmatprep.subr.bf16.mxu1 %v714_v41 }
  0x24   :  { %519 = vmatpush1.bf16.msra.mxu0 %v716_v42  ;;  %v83_v42 = vrot.slane %v78_v39, %v66_v32 }
  0x25   :  { %562 = vmatpush1.bf16.msra.mxu1 %v717_v43  ;;  %520 = vmatprep.subr.bf16.mxu0 %v718_v60  ;;  %v87_v43 = vrot.slane %v78_v39, %v70_v33 }
  0x26   :  { %563 = vmatprep.subr.bf16.mxu1 %v720_v61 }
  0x28   :  { %521 = vmatpush1.bf16.msra.mxu0 %v722_v62 }
  0x29   :  { %564 = vmatpush1.bf16.msra.mxu1 %v723_v63 }
  0x92   :  { %v32_v44 = vpop.xlane.xlu0 %31 }
  0x93   :  { %v35_v45 = vmul.f32 0.00390625, %v32_v44 }
  0x95   :  { %v929_v46 = vsub.f32 %v797_v0, %v35_v45  ;;  %v932_v47 = vsub.f32 %v802_v1, %v35_v45  ;;  %v724_v0 = vld [vmem:[%s1072_s3 + $0x144] ss:$16 sps:$4 sm:$0xff]   ;;  %v726_v1 = vld [vmem:[%s1072_s3 + $0x14c] ss:$16 sps:$4 sm:$0xff]  }
  0x96   :  { %v26_v48 = vpop.xlane.xlu0 %25  ;;  %522 = vmatprep.subr.bf16.mxu0 %v724_v0  ;;  %565 = vmatprep.subr.bf16.mxu1 %v726_v1 }
  0x97   :  { %v34_v49 = vmul.f32 0.00390625, %v26_v48  ;;  %v42_v52 = vmul.f32 %v929_v46, %v929_v46  ;;  %v43_v53 = vmul.f32 %v932_v47, %v932_v47  ;;  %523 = vmatpush1.bf16.msra.mxu0 %v728_v2  ;;  %566 = vmatpush1.bf16.msra.mxu1 %v729_v3 }
  0x99   :  { %v935_v50 = vsub.f32 %v811_v4, %v34_v49  ;;  %v938_v51 = vsub.f32 %v816_v5, %v34_v49  ;;  %v47_v57 = vsel %vm27_vm0, %v42_v52, 0.0  ;;  %v48_v58 = vsel %vm27_vm0, %v43_v53, 0.0  ;;  %v730_v4 = vld [vmem:[%s1072_s3 + $0x164] ss:$16 sps:$4 sm:$0xff]   ;;  %v732_v5 = vld [vmem:[%s1072_s3 + $0x16c] ss:$16 sps:$4 sm:$0xff]  }
  0x9a   :  { %v49_v59 = vadd.f32 %v48_v58, %v47_v57  ;;  %524 = vmatprep.subr.bf16.mxu0 %v730_v4  ;;  %567 = vmatprep.subr.bf16.mxu1 %v732_v5 }
  0x9b   :  { %v40_v54 = vmul.f32 %v935_v50, %v935_v50  ;;  %v41_v55 = vmul.f32 %v938_v51, %v938_v51  ;;  %525 = vmatpush1.bf16.msra.mxu0 %v734_v6  ;;  %568 = vmatpush1.bf16.msra.mxu1 %v735_v7 }
  0x9c   :  { %526 = vmatprep.subr.bf16.mxu0 %v736_v8  ;;  %569 = vmatprep.subr.bf16.mxu1 %v738_v9 }
  0x9d   :  { %v44_v56 = vadd.f32 %v41_v55, %v40_v54 }
  0x9f   :  { %45 = vadd.xlane.f32.xlu1 %v44_v56  ;;  %527 = vmatpush1.bf16.msra.mxu0 %v740_v10 }
  0xa0   :  { %570 = vmatpush1.bf16.msra.mxu1 %v741_v11  ;;  %528 = vmatprep.subr.bf16.mxu0 %v742_v12 }
  0xa1   :  { %571 = vmatprep.subr.bf16.mxu1 %v744_v13 }
  0xa3   :  { %50 = vadd.xlane.f32.xlu1 %v49_v59  ;;  %529 = vmatpush1.bf16.msra.mxu0 %v746_v14  ;;  %v176_v59 = vsub.s32 3, %v65_v31 }
  0xa4   :  { %572 = vmatpush1.bf16.msra.mxu1 %v747_v15  ;;  %530 = vmatprep.subr.bf16.mxu0 %v748_v16 }
  0xa5   :  { %573 = vmatprep.subr.bf16.mxu1 %v750_v17 }
  0xa7   :  { %531 = vmatpush1.bf16.msra.mxu0 %v752_v18 }
  0xa8   :  { %574 = vmatpush1.bf16.msra.mxu1 %v753_v19  ;;  %532 = vmatprep.subr.bf16.mxu0 %v754_v20 }
  0xa9   :  { %575 = vmatprep.subr.bf16.mxu1 %v756_v21 }
  0xab   :  { %533 = vmatpush1.bf16.msra.mxu0 %v758_v22 }
  0xac   :  { %576 = vmatpush1.bf16.msra.mxu1 %v759_v23 }
 0x12c   :  { %v46_v24 = vpop.xlane.xlu1 %45 }
 0x12d   :  { %v52_v25 = vmul.f32 0.00390625, %v46_v24 }
 0x12f   :  { %v54_v26 = vadd.f32 1e-06, %v52_v25 }
 0x130   :  { %v51_v27 = vpop.xlane.xlu1 %50 }
 0x131   :  { %760 = vrsqrt.f32 %v54_v26  ;;  %v53_v29 = vmul.f32 0.00390625, %v51_v27 }
 0x133   :  { %v55_v30 = vadd.f32 1e-06, %v53_v29 }
 0x135   :  { %762 = vrsqrt.f32 %v55_v30 }
 0x13b   :  { %v761_v35 = vpop.eup %760 }
 0x13c   :  { %v59_v36 = vmul.f32 %v761_v35, %v938_v51  ;;  %v58_v40 = vmul.f32 %v761_v35, %v935_v50  ;;  %v172_v50 = vsub.s32 2, %v65_v31 }
 0x13e   :  { %v75_v45 = vmul.f32 %v71_v38, %v59_v36  ;;  %v74_v49 = vmul.f32 %v67_v37, %v58_v40 }
 0x13f   :  { %v763_v41 = vpop.eup %762 }
 0x140   :  { %v61_v44 = vmul.f32 %v763_v41, %v932_v47  ;;  %v60_v48 = vmul.f32 %v763_v41, %v929_v46  ;;  %v91_v51 = vadd.f32 %v87_v43, %v75_v45  ;;  %v90_v55 = vadd.f32 %v83_v42, %v74_v49  ;;  %v160_v47 = vld [vmem:[%s1075_s4] sm:$0xf] }
 0x141   :  { %v165_v46 = vrot.slane %v160_v47, %v66_v32  ;;  %v173_v60 = vrot.slane %v160_v47, %v172_v50  ;;  %v169_v61 = vrot.slane %v160_v47, %v70_v33  ;;  %v177_v62 = vrot.slane %v160_v47, %v176_v59 }
 0x142   :  { %v77_v52 = vmul.f32 %v71_v38, %v61_v44  ;;  %v76_v53 = vmul.f32 %v67_v37, %v60_v48 }
 0x144   :  { %v93_v54 = vadd.f32 %v87_v43, %v77_v52  ;;  %v92_v56 = vadd.f32 %v83_v42, %v76_v53 }
 0x146   :  { %v95_v57 = vpack.c.bf16 %v93_v54, %v91_v51  ;;  %v94_v58 = vpack.c.bf16 %v92_v56, %v90_v55 }
 0x148   :  { %534 = vmatprep.mubr.bf16.mxu0 %v95_v57  ;;  %577 = vmatprep.mubr.bf16.mxu1 %v95_v57 }
 0x149   :  { %535 = vmatmul.mubr.bf16.vlgmr.msra.gmra.mrb[0].mxu0 %v94_v58  ;;  %578 = vmatmul.mubr.bf16.vlgmr.msra.gmra.mrb[0].mxu1 %v94_v58 }
 0x21c   :  { %v536_v63 = vpop.f32.mrb[0].mxu0  ;;  %v579_v0 = vpop.f32.mrb[0].mxu1 }
 0x21d   :  { %v537_v1 = vadd.f32 %v536_v63, %v165_v46  ;;  %v580_v2 = vadd.f32 %v579_v0, %v173_v60  ;;  %v538_v3 = vpop.f32.mrb[1].mxu0  ;;  %v581_v4 = vpop.f32.mrb[1].mxu1 }
 0x21e   :  { %v539_v5 = vadd.f32 %v538_v3, %v169_v61  ;;  %v582_v6 = vadd.f32 %v581_v4, %v177_v62  ;;  %v540_v7 = vpop.f32.mrb[2].mxu0  ;;  %v583_v8 = vpop.f32.mrb[2].mxu1 }
 0x21f   :  { %588 = vst [vmem:[%s1076_s5] sm:$0xff] %v537_v1  ;;  %590 = vst [vmem:[%s1076_s5 + $0x10] sm:$0xff] %v580_v2  ;;  %v541_v9 = vadd.f32 %v540_v7, %v165_v46  ;;  %v584_v10 = vadd.f32 %v583_v8, %v173_v60  ;;  %v542_v11 = vpop.f32.mrb[3].mxu0  ;;  %v585_v12 = vpop.f32.mrb[3].mxu1 }
 0x220   :  { %589 = vst [vmem:[%s1076_s5 + $0x8] sm:$0xff] %v539_v5  ;;  %591 = vst [vmem:[%s1076_s5 + $0x18] sm:$0xff] %v582_v6  ;;  %v543_v13 = vadd.f32 %v542_v11, %v169_v61  ;;  %v586_v14 = vadd.f32 %v585_v12, %v177_v62 }
 0x221   :  { %592 = vst [vmem:[%s1076_s5 + $0x20] sm:$0x3] %v541_v9  ;;  %594 = vst [vmem:[%s1076_s5 + $0x30] sm:$0x3] %v584_v10 }
 0x222   :  { %593 = vst [vmem:[%s1076_s5 + $0x28] sm:$0x3] %v543_v13  ;;  %595 = vst [vmem:[%s1076_s5 + $0x38] sm:$0x3] %v586_v14 }

// kernel: image_encoder_forward.46
= control target key start
LH: loop header
LB: loop body
LE: loop exit
PB: predicated region body
PF: predicated region fallthrough
CT: control target
= control target key end

     0   :  { %vm15_vm0 = vcmask 1041408   ;;  %s87_s0 = inlined_call_operand.vmem [shape: f32[2,128], index: 0, kind: input, shape index: {}]   ;;  %s88_s1 = inlined_call_operand.vmem [shape: f32[1,128], index: 1, kind: input, shape index: {}]   ;;  %s89_s2 = inlined_call_operand.vmem [shape: f32[1,128], index: 2, kind: input, shape index: {}]   ;;  %s90_s3 = inlined_call_operand.vmem [shape: f32[2,128], index: 3, kind: output, shape index: {}]  }
   0x1   :  { %v14_v0 = vld [vmem:[%s87_s0] sm:$0x3] }
   0x2   :  { %v16_v1 = vsel %vm15_vm0, %v14_v0, 0.0  ;;  %v51_v11 = vld [vmem:[%s88_s1] ss:$0 sm:$0xff] }
   0x3   :  { %17 = vadd.xlane.f32.xlu0 %v16_v1  ;;  %v52_v13 = vld [vmem:[%s89_s2] ss:$0 sm:$0xff] }
  0x90   :  { %v18_v2 = vpop.xlane.xlu0 %17 }
  0x91   :  { %v20_v3 = vmul.f32 0.0078125, %v18_v2 }
  0x93   :  { %v21_v4 = vsub.f32 %v14_v0, %v20_v3 }
  0x95   :  { %v22_v5 = vmul.f32 %v21_v4, %v21_v4 }
  0x97   :  { %v23_v6 = vsel %vm15_vm0, %v22_v5, 0.0 }
  0x98   :  { %24 = vadd.xlane.f32.xlu0 %v23_v6 }
 0x125   :  { %v25_v7 = vpop.xlane.xlu0 %24 }
 0x126   :  { %v26_v8 = vmul.f32 0.0078125, %v25_v7 }
 0x128   :  { %v27_v9 = vadd.f32 1e-06, %v26_v8 }
 0x12a   :  { %53 = vrsqrt.f32 %v27_v9 }
 0x134   :  { %v54_v10 = vpop.eup %53 }
 0x135   :  { %v29_v12 = vmul.f32 %v54_v10, %v21_v4 }
 0x137   :  { %v37_v14 = vmul.f32 %v51_v11, %v29_v12 }
 0x139   :  { %v45_v15 = vadd.f32 %v52_v13, %v37_v14 }
 0x13b   :  { %46 = vst [vmem:[%s90_s3] sm:$0x3] %v45_v15 }

// kernel: image_encoder_forward.38
= control target key start
LH: loop header
LB: loop body
LE: loop exit
PB: predicated region body
PF: predicated region fallthrough
CT: control target
= control target key end

     0   :  { %s1424_s9 = smov 0   ;;  %s1617_s0 = inlined_call_operand.vmem [shape: f32[2,1,256], index: 0, kind: input, shape index: {}]   ;;  %s1618_s1 = inlined_call_operand.vmem [shape: f32[2,5,512], index: 1, kind: input, shape index: {}]   ;;  %s1619_s2 = inlined_call_operand.vmem [shape: f32[2,1,256], index: 2, kind: output, shape index: {}]  }
   0x1 LB: > { %s1191_s10 = sadd.s32 4294967295, %s1400_s9   ;;  %p1195_p0 = scmp.ge.s32.totalorder %s1400_s9, 1  ;;  %s1400_s9 = sphi %s1424_s9, %s12_s9  }
   0x2   : > { %p121_p1 = scmp.lt.s32.totalorder %s1400_s9, 3 }
   0x4   : > { %p122_p2 = pnand %p1195_p0, %p121_p1 }
   0x5   : > { %p146_p3 = scmp.lt.s32.totalorder (!%p122_p2), %s1191_s10, 1  ;;  %v1402_v0 = vmov (!%p122_p2), 0.0   ;;  %vm1403_vm0 = vmmov (!%p122_p2), 0   ;;  %vm168_vm1 = vcmask (!%p122_p2), 261120   ;;  %vm216_vm2 = vcmask (!%p122_p2), 32768   ;;  %s1404_s19 = smov (!%p122_p2), 96  }
   0x6   : > { %125 = sbr.rel (%p122_p2) target bundleno = 1523 (0x5f3), region = 28  ;;  %1251 = vmatprep.subr.bf16.mxu0 (!%p122_p2), %v1402_v0  ;;  %1253 = vmatprep.mubr.msk.bf16.mxu0 (!%p122_p2), %vm1403_vm0, %v1402_v0  ;;  %s1405_s20 = smov (!%p122_p2), 64   ;;  %v617_v12 = vlaneseq (!%p122_p2)  ;;  %vm233_vm3 = vcmask (!%p122_p2), 1041408   ;;  %vm234_vm4 = vcmask (!%p122_p2), 1042432   ;;  %v1407_v25 = vmov (!%p122_p2), 65535  }
   0x7   : > { %1257 = vmatprep.subr.bf16.mxu1 (!%p122_p2), %v1402_v0  ;;  %1259 = vmatprep.mubr.msk.bf16.mxu1 (!%p122_p2), %vm1403_vm0, %v1402_v0  ;;  %s1406_s21 = smov (!%p122_p2), 32   ;;  %v235_v26 = vsel (!%p122_p2), %vm233_vm3, 4294967295, %v1407_v25  ;;  %vm229_vm5 = vcmask (!%p122_p2), 39936   ;;  %vm1096_vm6 = vcmask (!%p122_p2), 523264   ;;  %vm1098_vm7 = vcmask (!%p122_p2), 785408  }
   0x8   : > { %v1465_v14 = vshrl.u32 (!%p122_p2), %v617_v12, 7  ;;  %v1477_v27 = vsel (!%p122_p2), %vm234_vm4, %v235_v26, 0  ;;  %vm1123_vm8 = vcmp.lt.s32.totalorder (!%p122_p2), %v617_v12, 256 }
   0xa   : > { %v619_v16 = vsub.s32 (!%p122_p2), 1, %v1465_v14 }
   0xd   : > { %s1621_s10 = smov (!%p146_p3, %s1191_s10), 1 }
   0xe   : > { %s1218_s11 = sshll.u32 %s1621_s10, 5  ;;  %s1196_s12 = sshll.u32 %s1621_s10, 1 }
   0xf   : > { %s1445_s15 = scalar_lea.vmem %s1618_s1, %s1218_s11  ;;  %s149_s18 = scalar_lea.vmem %s1617_s0, %s1196_s12 }
  0x10   : > { %v161_v1 = vld [vmem:[%s1445_s15] sm:$0x1f]  ;;  %v162_v13 = vld [vmem:[%s1445_s15 + $0x8] sm:$0x1f]  ;;  %v163_v23 = vld [vmem:[%s1445_s15 + $0x10] sm:$0x1f]  ;;  %s158_s24 = scalar_lea.vmem %s1619_s2, %s1196_s12 }
  0x11   : > { %v166_v2 = vpack.c.bf16 %v161_v1, %v161_v1  ;;  %v160_v4 = vld [vmem:[%s149_s18] sm:$0x3]  ;;  %v623_v15 = vpack.c.bf16 %v162_v13, %v162_v13  ;;  %v1475_v24 = vpack.c.bf16 %v163_v23, %v163_v23 }
  0x12   : > { %v165_v5 = vpack.c.bf16 %v160_v4, %v160_v4  ;;  %v620_v17 = vrot.slane %v160_v4, %v619_v16 }
  0x13   : > { %v173_v3 = vsel %vm168_vm1, %v166_v2, 0  ;;  %284 = vrot.lane.b32.xlu1 %v166_v2, %s1404_s19  ;;  %v238_v28 = vand.u32 %v1477_v27, %v1475_v24  ;;  %v629_v42 = vsel %vm168_vm1, %v623_v15, 0 }
  0x14   : > { %1252 = vmatpush3.bf16.xpose.msra.mxu0 %v173_v3  ;;  %v622_v44 = vpack.c.bf16 %v620_v17, %v620_v17 }
  0x15   : > { %1269 = vmatprep.subr.bf16.mxu0 %v1402_v0  ;;  %1258 = vmatpush3.bf16.msra.mxu1 %v238_v28 }
  0x16   : > { %1263 = vmatprep.subr.bf16.mxu1 %v1402_v0 }
  0x17   : > { %281 = vrot.lane.b32.xlu1 %v165_v5, %s1404_s19 }
  0x1b   : > { %1254 = vmatmul.mubr.msk.bf16.vlgmr.msra.gmra.mrb[0].mxu0 %vm168_vm1, %v165_v5  ;;  %394 = vrot.lane.b32.xlu1 %v165_v5, %s1405_s20 }
  0x1c   : > { %1271 = vmatprep.mubr.msk.bf16.mxu0 %vm1403_vm0, %v1402_v0 }
  0x1f   : > { %507 = vrot.lane.b32.xlu1 %v166_v2, %s1406_s21 }
  0x23   : > { %505 = vrot.lane.b32.xlu1 %v165_v5, %s1406_s21 }
  0x27   : > { %735 = vrot.lane.b32.xlu1 %v623_v15, %s1404_s19 }
  0x2b   : > { %730 = vrot.lane.b32.xlu1 %v620_v17, %s1404_s19 }
  0x2f   : > { %849 = vrot.lane.b32.xlu1 %v623_v15, %s1405_s20 }
  0x33   : > { %962 = vrot.lane.b32.xlu1 %v623_v15, %s1406_s21 }
  0x85   : > { %v285_v31 = vpop.permute.xlu1 %284 }
  0x86   : > { %v290_v33 = vsel %vm168_vm1, %v285_v31, 0 }
  0x89   : > { %v282_v35 = vpop.permute.xlu1 %281 }
  0x8d   : > { %v395_v37 = vpop.permute.xlu1 %394 }
  0x91   : > { %v508_v39 = vpop.permute.xlu1 %507 }
  0x92   : > { %v513_v40 = vsel %vm168_vm1, %v508_v39, 0 }
  0x95   : > { %v506_v41 = vpop.permute.xlu1 %505 }
  0x99   : > { %v736_v43 = vpop.permute.xlu1 %735 }
  0x9a   : > { %v741_v46 = vsel %vm168_vm1, %v736_v43, 0 }
  0x9d   : > { %v731_v45 = vpop.permute.xlu1 %730 }
  0x9e   : > { %v733_v48 = vpack.c.bf16 %v731_v45, %v731_v45 }
  0xa1   : > { %v850_v47 = vpop.permute.xlu1 %849 }
  0xa2   : > { %v855_v49 = vsel %vm168_vm1, %v850_v47, 0 }
  0xa5   : > { %v963_v51 = vpop.permute.xlu1 %962 }
  0xa6   : > { %v968_v53 = vsel %vm168_vm1, %v963_v51, 0 }
  0xee   : > { %v209_v6 = vpop.f32.mrb[0].mxu0 }
  0xef   : > { %v215_v7 = vmul.f32 0.17677669, %v209_v6  ;;  %v1255_v8 = vpop.f32.mrb[1].mxu0 }
  0xf0   : > { %v212_v9 = vpop.f32.mrb[2].mxu0 }
  0xf1   : > { %v1256_v10 = vpop.f32.mrb[3].mxu0  ;;  %v217_v11 = vsel %vm216_vm2, %v215_v7, -inf }
  0xf2   : > { %218 = vmax.xlane.f32.xlu0 %v217_v11 }
 0x17f   : > { %v219_v18 = vpop.xlane.xlu0 %218 }
 0x180   : > { %v220_v19 = vsub.f32 %v215_v7, %v219_v18 }
 0x182   : > { %v221_v20 = vmul.f32 1.442695, %v220_v19 }
 0x184   : > { %1362 = vpow2.f32 %v221_v20 }
 0x18e   : > { %v1363_v21 = vpop.eup %1362 }
 0x18f   : > { %v223_v22 = vsel %vm216_vm2, %v1363_v21, 0.0 }
 0x190   : > { %224 = vadd.xlane.f32.xlu0 %v223_v22 }
 0x1a6   : > { %396 = vrot.lane.b32.xlu0 %v166_v2, %s1405_s20 }
 0x1aa   : > { %845 = vrot.lane.b32.xlu0 %v620_v17, %s1405_s20 }
 0x1ae   : > { %958 = vrot.lane.b32.xlu0 %v620_v17, %s1406_s21 }
 0x21d   : > { %v225_v29 = vpop.xlane.xlu0 %224 }
 0x21e   : > { %1364 = vrcp.f32 %v225_v29 }
 0x221   : > { %v397_v36 = vpop.permute.xlu0 %396 }
 0x222   : > { %v402_v38 = vsel %vm168_vm1, %v397_v36, 0 }
 0x225   : > { %v846_v50 = vpop.permute.xlu0 %845 }
 0x226   : > { %v848_v52 = vpack.c.bf16 %v846_v50, %v846_v50 }
 0x228   : > { %v1365_v30 = vpop.eup %1364 }
 0x229   : > { %v227_v32 = vmul.f32 %v1365_v30, %v1363_v21  ;;  %v959_v54 = vpop.permute.xlu0 %958 }
 0x22a   : > { %v961_v55 = vpack.c.bf16 %v959_v54, %v959_v54 }
 0x22b   : > { %v228_v34 = vpack.c.bf16 %v227_v32, %v227_v32 }
 0x22d   : > { %1260 = vmatmul.mubr.msk.bf16.vlgmr.msra.gmra.mrb[0].mxu1 %vm229_vm5, %v228_v34 }
 0x22e   : > { %1264 = vmatpush3.bf16.xpose.msra.mxu1 %v290_v33  ;;  %1265 = vmatprep.mubr.msk.bf16.mxu1 %vm1403_vm0, %v1402_v0 }
 0x22f   : > { %1275 = vmatprep.subr.bf16.mxu1 %v1402_v0 }
 0x235   : > { %1266 = vmatmul.mubr.msk.bf16.vlgmr.msra.gmra.mrb[4].mxu1 %vm168_vm1, %v282_v35 }
 0x236   : > { %1276 = vmatpush3.bf16.xpose.msra.mxu1 %v402_v38  ;;  %1277 = vmatprep.mubr.msk.bf16.mxu1 %vm1403_vm0, %v1402_v0 }
 0x237   : > { %1287 = vmatprep.subr.bf16.mxu1 %v1402_v0 }
 0x23d   : > { %1278 = vmatmul.mubr.msk.bf16.vlgmr.msra.gmra.mrb[8].mxu1 %vm168_vm1, %v395_v37 }
 0x23e   : > { %1288 = vmatpush3.bf16.xpose.msra.mxu1 %v513_v40  ;;  %1289 = vmatprep.mubr.msk.bf16.mxu1 %vm1403_vm0, %v1402_v0 }
 0x23f   : > { %1299 = vmatprep.subr.bf16.mxu1 %v1402_v0 }
 0x245   : > { %1290 = vmatmul.mubr.msk.bf16.vlgmr.msra.gmra.mrb[12].mxu1 %vm168_vm1, %v506_v41 }
 0x246   : > { %1300 = vmatpush3.bf16.xpose.msra.mxu1 %v629_v42  ;;  %1301 = vmatprep.mubr.msk.bf16.mxu1 %vm1403_vm0, %v1402_v0 }
 0x247   : > { %1311 = vmatprep.subr.bf16.mxu1 %v1402_v0 }
 0x24d   : > { %1302 = vmatmul.mubr.msk.bf16.vlgmr.msra.gmra.mrb[16].mxu1 %vm168_vm1, %v622_v44 }
 0x24e   : > { %1312 = vmatpush3.bf16.xpose.msra.mxu1 %v741_v46  ;;  %1313 = vmatprep.mubr.msk.bf16.mxu1 %vm1403_vm0, %v1402_v0 }
 0x24f   : > { %1323 = vmatprep.subr.bf16.mxu1 %v1402_v0 }
 0x255   : > { %1314 = vmatmul.mubr.msk.bf16.vlgmr.msra.gmra.mrb[20].mxu1 %vm168_vm1, %v733_v48 }
 0x256   : > { %1324 = vmatpush3.bf16.xpose.msra.mxu1 %v855_v49  ;;  %1325 = vmatprep.mubr.msk.bf16.mxu1 %vm1403_vm0, %v1402_v0 }
 0x257   : > { %1335 = vmatprep.subr.bf16.mxu1 %v1402_v0 }
 0x25d   : > { %1326 = vmatmul.mubr.msk.bf16.vlgmr.msra.gmra.mrb[24].mxu1 %vm168_vm1, %v848_v52 }
 0x25e   : > { %1336 = vmatpush3.bf16.xpose.msra.mxu1 %v968_v53  ;;  %1337 = vmatprep.mubr.msk.bf16.mxu1 %vm1403_vm0, %v1402_v0 }
 0x265   : > { %1338 = vmatmul.mubr.msk.bf16.vlgmr.msra.gmra.mrb[28].mxu1 %vm168_vm1, %v961_v55 }
 0x300   : > { %v1520_v56 = vpop.f32.mrb[0].mxu1 }
 0x301   : > { %v1261_v57 = vpop.f32.mrb[1].mxu1 }
 0x302   : > { %v277_v58 = vpop.f32.mrb[2].mxu1 }
 0x303   : > { %v1262_v59 = vpop.f32.mrb[3].mxu1 }
 0x308   : > { %v326_v60 = vpop.f32.mrb[4].mxu1 }
 0x309   : > { %v332_v61 = vmul.f32 0.17677669, %v326_v60  ;;  %v1267_v62 = vpop.f32.mrb[5].mxu1 }
 0x30a   : > { %v329_v63 = vpop.f32.mrb[6].mxu1 }
 0x30b   : > { %v1268_v1 = vpop.f32.mrb[7].mxu1  ;;  %v333_v2 = vsel %vm216_vm2, %v332_v61, -inf }
 0x30c   : > { %334 = vmax.xlane.f32.xlu1 %v333_v2 }
 0x310   : > { %v438_v3 = vpop.f32.mrb[8].mxu1 }
 0x311   : > { %v444_v4 = vmul.f32 0.17677669, %v438_v3  ;;  %v1279_v5 = vpop.f32.mrb[9].mxu1 }
 0x312   : > { %v441_v6 = vpop.f32.mrb[10].mxu1 }
 0x313   : > { %v1280_v7 = vpop.f32.mrb[11].mxu1  ;;  %v445_v8 = vsel %vm216_vm2, %v444_v4, -inf  ;;  %v164_v6 = vld [vmem:[%s1445_s15 + $0x18] sm:$0x1f] }
 0x314   : > { %446 = vmax.xlane.f32.xlu0 %v445_v8  ;;  %v624_v8 = vpack.c.bf16 %v164_v6, %v164_v6 }
 0x318   : > { %v549_v9 = vpop.f32.mrb[12].mxu1 }
 0x319   : > { %v555_v10 = vmul.f32 0.17677669, %v549_v9  ;;  %v1291_v11 = vpop.f32.mrb[13].mxu1 }
 0x31a   : > { %v552_v13 = vpop.f32.mrb[14].mxu1 }
 0x31b   : > { %v1292_v15 = vpop.f32.mrb[15].mxu1  ;;  %v556_v16 = vsel %vm216_vm2, %v555_v10, -inf }
 0x31c   : > { %557 = vmax.xlane.f32.xlu0 %v556_v16 }
 0x320   : > { %v665_v17 = vpop.f32.mrb[16].mxu1 }
 0x321   : > { %v1525_v18 = vmul.f32 0.17677669, %v665_v17  ;;  %v1303_v19 = vpop.f32.mrb[17].mxu1 }
 0x322   : > { %v668_v20 = vpop.f32.mrb[18].mxu1 }
 0x323   : > { %v672_v21 = vsel %vm216_vm2, %v1525_v18, -inf  ;;  %v1304_v22 = vpop.f32.mrb[19].mxu1 }
 0x324   : > { %673 = vmax.xlane.f32.xlu1 %v672_v21 }
 0x328   : > { %v777_v23 = vpop.f32.mrb[20].mxu1 }
 0x329   : > { %v783_v25 = vmul.f32 0.17677669, %v777_v23  ;;  %v1315_v26 = vpop.f32.mrb[21].mxu1 }
 0x32a   : > { %v780_v28 = vpop.f32.mrb[22].mxu1 }
 0x32b   : > { %v784_v29 = vsel %vm216_vm2, %v783_v25, -inf  ;;  %v1316_v30 = vpop.f32.mrb[23].mxu1 }
 0x32c   : > { %785 = vmax.xlane.f32.xlu0 %v784_v29 }
 0x330   : > { %v891_v31 = vpop.f32.mrb[24].mxu1 }
 0x331   : > { %v897_v32 = vmul.f32 0.17677669, %v891_v31  ;;  %v1327_v33 = vpop.f32.mrb[25].mxu1 }
 0x332   : > { %v894_v34 = vpop.f32.mrb[26].mxu1 }
 0x333   : > { %v898_v35 = vsel %vm216_vm2, %v897_v32, -inf  ;;  %v1328_v36 = vpop.f32.mrb[27].mxu1 }
 0x334   : > { %899 = vmax.xlane.f32.xlu1 %v898_v35 }
 0x338   : > { %v1004_v37 = vpop.f32.mrb[28].mxu1 }
 0x339   : > { %v1010_v38 = vmul.f32 0.17677669, %v1004_v37  ;;  %v1339_v39 = vpop.f32.mrb[29].mxu1 }
 0x33a   : > { %v1007_v40 = vpop.f32.mrb[30].mxu1 }
 0x33b   : > { %v1011_v41 = vsel %vm216_vm2, %v1010_v38, -inf  ;;  %v1340_v42 = vpop.f32.mrb[31].mxu1 }
 0x33c   : > { %1012 = vmax.xlane.f32.xlu0 %v1011_v41 }
 0x345   : > { %457 = vrot.lane.b32.xlu1 %v1475_v24, %s1405_s20 }
 0x352   : > { %346 = vrot.lane.b32.xlu0 %v1475_v24, %s1404_s19 }
 0x399   : > { %v335_v43 = vpop.xlane.xlu1 %334 }
 0x39a   : > { %v336_v44 = vsub.f32 %v332_v61, %v335_v43 }
 0x39c   : > { %v337_v45 = vmul.f32 1.442695, %v336_v44 }
 0x39e   : > { %1366 = vpow2.f32 %v337_v45 }
 0x3a1   : > { %v447_v46 = vpop.xlane.xlu0 %446 }
 0x3a2   : > { %v448_v47 = vsub.f32 %v444_v4, %v447_v46 }
 0x3a4   : > { %v449_v48 = vmul.f32 1.442695, %v448_v47 }
 0x3a6   : > { %1368 = vpow2.f32 %v449_v48 }
 0x3a8   : > { %v1367_v49 = vpop.eup %1366 }
 0x3a9   : > { %v558_v50 = vpop.xlane.xlu0 %557  ;;  %v339_v51 = vsel %vm216_vm2, %v1367_v49, 0.0 }
 0x3aa   : > { %v559_v52 = vsub.f32 %v555_v10, %v558_v50  ;;  %340 = vadd.xlane.f32.xlu1 %v339_v51 }
 0x3ac   : > { %v560_v53 = vmul.f32 1.442695, %v559_v52 }
 0x3ae   : > { %1370 = vpow2.f32 %v560_v53 }
 0x3b0   : > { %v1369_v54 = vpop.eup %1368 }
 0x3b1   : > { %v451_v55 = vsel %vm216_vm2, %v1369_v54, 0.0  ;;  %v674_v4 = vpop.xlane.xlu1 %673 }
 0x3b2   : > { %452 = vadd.xlane.f32.xlu0 %v451_v55  ;;  %v675_v5 = vsub.f32 %v1525_v18, %v674_v4 }
 0x3b4   : > { %v676_v9 = vmul.f32 1.442695, %v675_v5 }
 0x3b8   : > { %v1538_v57 = vpop.eup %1370 }
 0x3b9   : > { %v786_v58 = vpop.xlane.xlu0 %785  ;;  %v562_v59 = vsel %vm216_vm2, %v1538_v57, 0.0 }
 0x3ba   : > { %v787_v60 = vsub.f32 %v783_v25, %v786_v58  ;;  %563 = vadd.xlane.f32.xlu1 %v562_v59 }
 0x3bc   : > { %v788_v61 = vmul.f32 1.442695, %v787_v60 }
 0x3be   : > { %1372 = vpow2.f32 %v788_v61 }
 0x3bf   : > { %1374 = vpow2.f32 %v676_v9 }
 0x3c1   : > { %v900_v7 = vpop.xlane.xlu1 %899 }
 0x3c2   : > { %v901_v10 = vsub.f32 %v897_v32, %v900_v7 }
 0x3c4   : > { %v902_v11 = vmul.f32 1.442695, %v901_v10 }
 0x3c5   : > { %v458_v21 = vpop.permute.xlu1 %457 }
 0x3c6   : > { %1376 = vpow2.f32 %v902_v11  ;;  %v463_v29 = vand.u32 %v458_v21, %v1477_v27 }
 0x3c8   : > { %v1542_v62 = vpop.eup %1372 }
 0x3c9   : > { %v1013_v63 = vpop.xlane.xlu0 %1012  ;;  %v790_v1 = vsel %vm216_vm2, %v1542_v62, 0.0  ;;  %v1375_v13 = vpop.eup %1374 }
 0x3ca   : > { %791 = vadd.xlane.f32.xlu0 %v790_v1  ;;  %v678_v16 = vsel %vm216_vm2, %v1375_v13, 0.0 }
 0x3cb   : > { %568 = vrot.lane.b32.xlu1 %v1475_v24, %s1406_s21  ;;  %v1014_v24 = vsub.f32 %v1010_v38, %v1013_v63  ;;  %v688_v38 = vand.u32 %v624_v8, %v1477_v27 }
 0x3cd   : > { %v347_v2 = vpop.permute.xlu0 %346  ;;  %v1015_v15 = vmul.f32 1.442695, %v1014_v24 }
 0x3ce   : > { %v352_v3 = vand.u32 %v347_v2, %v1477_v27 }
 0x3cf   : > { %1378 = vpow2.f32 %v1015_v15 }
 0x3d0   : > { %1270 = vmatpush3.bf16.msra.mxu0 %v352_v3  ;;  %v1554_v17 = vpop.eup %1376 }
 0x3d1   : > { %1281 = vmatprep.subr.bf16.mxu0 %v1402_v0  ;;  %v904_v18 = vsel %vm216_vm2, %v1554_v17, 0.0 }
 0x3d9   : > { %v1558_v19 = vpop.eup %1378 }
 0x3da   : > { %v1017_v20 = vsel %vm216_vm2, %v1558_v19, 0.0 }
 0x3e0   : > { %797 = vrot.lane.b32.xlu0 %v624_v8, %s1404_s19 }
 0x3ef   : > { %679 = vadd.xlane.f32.xlu1 %v678_v16 }
 0x3f3   : > { %905 = vadd.xlane.f32.xlu1 %v904_v18 }
 0x3ff   : > { %1018 = vadd.xlane.f32.xlu0 %v1017_v20 }
 0x404   : > { %910 = vrot.lane.b32.xlu1 %v624_v8, %s1405_s20 }
 0x415   : > { %1023 = vrot.lane.b32.xlu0 %v624_v8, %s1406_s21 }
 0x437   : > { %v341_v22 = vpop.xlane.xlu1 %340 }
 0x438   : > { %1380 = vrcp.f32 %v341_v22 }
 0x43f   : > { %v453_v23 = vpop.xlane.xlu0 %452 }
 0x440   : > { %1382 = vrcp.f32 %v453_v23 }
 0x442   : > { %v1381_v25 = vpop.eup %1380 }
 0x443   : > { %v343_v26 = vmul.f32 %v1381_v25, %v1367_v49 }
 0x445   : > { %v344_v28 = vpack.c.bf16 %v343_v26, %v343_v26 }
 0x447   : > { %v564_v30 = vpop.xlane.xlu1 %563  ;;  %1272 = vmatmul.mubr.msk.bf16.vlgmr.msra.gmra.mrb[4].mxu0 %vm229_vm5, %v344_v28 }
 0x448   : > { %1384 = vrcp.f32 %v564_v30  ;;  %1282 = vmatpush3.bf16.msra.mxu0 %v463_v29  ;;  %1283 = vmatprep.mubr.msk.bf16.mxu0 %vm1403_vm0, %v1402_v0 }
 0x449   : > { %1293 = vmatprep.subr.bf16.mxu0 %v1402_v0 }
 0x44a   : > { %v1383_v31 = vpop.eup %1382 }
 0x44b   : > { %v455_v32 = vmul.f32 %v1383_v31, %v1369_v54  ;;  %v569_v33 = vpop.permute.xlu1 %568  ;;  %v1408_v31 = vmov 1966171168  }
 0x44c   : > { %v574_v34 = vand.u32 %v569_v33, %v1477_v27 }
 0x44d   : > { %v456_v35 = vpack.c.bf16 %v455_v32, %v455_v32  ;;  %v1107_v32 = vunpack.c.l.s4 %v1408_v31 }
 0x44f   : > { %1284 = vmatmul.mubr.msk.bf16.vlgmr.msra.gmra.mrb[8].mxu0 %vm229_vm5, %v456_v35  ;;  %v1108_v35 = vunpack.c.0.s8 %v1107_v32 }
 0x450   : > { %1294 = vmatpush3.bf16.msra.mxu0 %v574_v34  ;;  %1295 = vmatprep.mubr.msk.bf16.mxu0 %vm1403_vm0, %v1402_v0 }
 0x451   : > { %1305 = vmatprep.subr.bf16.mxu0 %v1402_v0 }
 0x452   : > { %v1385_v36 = vpop.eup %1384 }
 0x453   : > { %v566_v37 = vmul.f32 %v1385_v36, %v1538_v57 }
 0x455   : > { %v567_v39 = vpack.c.bf16 %v566_v37, %v566_v37 }
 0x457   : > { %1296 = vmatmul.mubr.msk.bf16.vlgmr.msra.gmra.mrb[12].mxu0 %vm229_vm5, %v567_v39  ;;  %v792_v41 = vpop.xlane.xlu0 %791 }
 0x458   : > { %1306 = vmatpush3.bf16.msra.mxu0 %v688_v38  ;;  %1307 = vmatprep.mubr.msk.bf16.mxu0 %vm1403_vm0, %v1402_v0 }
 0x459   : > { %1317 = vmatprep.subr.bf16.mxu0 %v1402_v0 }
 0x45b   : > { %v798_v44 = vpop.permute.xlu0 %797 }
 0x45c   : > { %v803_v48 = vand.u32 %v798_v44, %v1477_v27 }
 0x47c   : > { %v680_v40 = vpop.xlane.xlu1 %679 }
 0x47d   : > { %1386 = vrcp.f32 %v680_v40 }
 0x47e   : > { %1388 = vrcp.f32 %v792_v41  ;;  %v1111_v41 = vsub.s32 %v1108_v35, %v1465_v14 }
 0x480   : > { %v906_v42 = vpop.xlane.xlu1 %905 }
 0x481   : > { %1390 = vrcp.f32 %v906_v42 }
 0x484   : > { %v911_v51 = vpop.permute.xlu1 %910 }
 0x485   : > { %v916_v52 = vand.u32 %v911_v51, %v1477_v27 }
 0x487   : > { %v1387_v43 = vpop.eup %1386 }
 0x488   : > { %v682_v45 = vmul.f32 %v1387_v43, %v1375_v13  ;;  %v1389_v47 = vpop.eup %1388 }
 0x489   : > { %v794_v49 = vmul.f32 %v1389_v47, %v1542_v62 }
 0x48a   : > { %v683_v46 = vpack.c.bf16 %v682_v45, %v682_v45 }
 0x48b   : > { %v795_v53 = vpack.c.bf16 %v794_v49, %v794_v49  ;;  %v1391_v54 = vpop.eup %1390 }
 0x48c   : > { %1308 = vmatmul.mubr.msk.bf16.vlgmr.msra.gmra.mrb[16].mxu0 %vm229_vm5, %v683_v46  ;;  %v1019_v50 = vpop.xlane.xlu0 %1018  ;;  %v908_v55 = vmul.f32 %v1391_v54, %v1554_v17 }
 0x48d   : > { %1318 = vmatpush3.bf16.msra.mxu0 %v803_v48  ;;  %1319 = vmatprep.mubr.msk.bf16.mxu0 %vm1403_vm0, %v1402_v0  ;;  %1392 = vrcp.f32 %v1019_v50 }
 0x48e   : > { %1329 = vmatprep.subr.bf16.mxu0 %v1402_v0  ;;  %v909_v59 = vpack.c.bf16 %v908_v55, %v908_v55 }
 0x490   : > { %v1024_v57 = vpop.permute.xlu0 %1023 }
 0x491   : > { %v1029_v58 = vand.u32 %v1024_v57, %v1477_v27 }
 0x494   : > { %1320 = vmatmul.mubr.msk.bf16.vlgmr.msra.gmra.mrb[20].mxu0 %vm229_vm5, %v795_v53 }
 0x495   : > { %1330 = vmatpush3.bf16.msra.mxu0 %v916_v52  ;;  %1331 = vmatprep.mubr.msk.bf16.mxu0 %vm1403_vm0, %v1402_v0 }
 0x496   : > { %1341 = vmatprep.subr.bf16.mxu0 %v1402_v0 }
 0x497   : > { %v1393_v60 = vpop.eup %1392 }
 0x498   : > { %v1021_v61 = vmul.f32 %v1393_v60, %v1558_v19 }
 0x49a   : > { %v1022_v62 = vpack.c.bf16 %v1021_v61, %v1021_v61 }
 0x49c   : > { %1332 = vmatmul.mubr.msk.bf16.vlgmr.msra.gmra.mrb[24].mxu0 %vm229_vm5, %v909_v59 }
 0x49d   : > { %1342 = vmatpush3.bf16.msra.mxu0 %v1029_v58  ;;  %1343 = vmatprep.mubr.msk.bf16.mxu0 %vm1403_vm0, %v1402_v0 }
 0x4a4   : > { %1344 = vmatmul.mubr.msk.bf16.vlgmr.msra.gmra.mrb[28].mxu0 %vm229_vm5, %v1022_v62 }
 0x51a   : > { %v388_v63 = vpop.f32.mrb[4].mxu0 }
 0x51b   : > { %1072 = vrot.lane.b32.xlu1 %v388_v63, %s1406_s21  ;;  %v1273_v1 = vpop.f32.mrb[5].mxu0 }
 0x51c   : > { %v391_v2 = vpop.f32.mrb[6].mxu0 }
 0x51d   : > { %v1274_v3 = vpop.f32.mrb[7].mxu0 }
 0x522   : > { %v499_v27 = vpop.f32.mrb[8].mxu0 }
 0x523   : > { %1076 = vrot.lane.b32.xlu0 %v499_v27, %s1405_s20  ;;  %v1285_v4 = vpop.f32.mrb[9].mxu0 }
 0x524   : > { %v502_v5 = vpop.f32.mrb[10].mxu0 }
 0x525   : > { %v1286_v6 = vpop.f32.mrb[11].mxu0 }
 0x52a   : > { %v610_v7 = vpop.f32.mrb[12].mxu0 }
 0x52b   : > { %1080 = vrot.lane.b32.xlu1 %v610_v7, %s1404_s19  ;;  %v1297_v0 = vpop.f32.mrb[13].mxu0 }
 0x52c   : > { %v613_v8 = vpop.f32.mrb[14].mxu0 }
 0x52d   : > { %v1298_v9 = vpop.f32.mrb[15].mxu0 }
 0x55f   : > { %v724_v10 = vpop.f32.mrb[16].mxu0 }
 0x560   : > { %v1309_v11 = vpop.f32.mrb[17].mxu0 }
 0x561   : > { %v727_v24 = vpop.f32.mrb[18].mxu0 }
 0x562   : > { %v1310_v13 = vpop.f32.mrb[19].mxu0 }
 0x567   : > { %v839_v15 = vpop.f32.mrb[20].mxu0 }
 0x568   : > { %1084 = vrot.lane.b32.xlu0 %v839_v15, %s1406_s21  ;;  %v1321_v16 = vpop.f32.mrb[21].mxu0 }
 0x569   : > { %v842_v17 = vpop.f32.mrb[22].mxu0 }
 0x56a   : > { %v1322_v18 = vpop.f32.mrb[23].mxu0 }
 0x56f   : > { %v952_v19 = vpop.f32.mrb[24].mxu0 }
 0x570   : > { %1088 = vrot.lane.b32.xlu1 %v952_v19, %s1405_s20  ;;  %v1333_v20 = vpop.f32.mrb[25].mxu0 }
 0x571   : > { %v955_v21 = vpop.f32.mrb[26].mxu0 }
 0x572   : > { %v1334_v22 = vpop.f32.mrb[27].mxu0 }
 0x577   : > { %v1065_v23 = vpop.f32.mrb[28].mxu0 }
 0x578   : > { %1092 = vrot.lane.b32.xlu0 %v1065_v23, %s1404_s19  ;;  %v1345_v25 = vpop.f32.mrb[29].mxu0 }
 0x579   : > { %v1068_v26 = vpop.f32.mrb[30].mxu0 }
 0x57a   : > { %v1346_v28 = vpop.f32.mrb[31].mxu0 }
 0x58d   : > { %v1073_v29 = vpop.permute.xlu1 %1072 }
 0x58e   : > { %v1095_v37 = vsel %vm168_vm1, %v1520_v56, %v1073_v29 }
 0x595   : > { %v1077_v30 = vpop.permute.xlu0 %1076 }
 0x596   : > { %v1097_v39 = vsel %vm1096_vm6, %v1095_v37, %v1077_v30 }
 0x59d   : > { %v1081_v33 = vpop.permute.xlu1 %1080 }
 0x59e   : > { %v1099_v43 = vsel %vm1098_vm7, %v1097_v39, %v1081_v33 }
 0x5da   : > { %v1085_v34 = vpop.permute.xlu0 %1084 }
 0x5db   : > { %v1100_v38 = vsel %vm168_vm1, %v724_v10, %v1085_v34 }
 0x5e2   : > { %v1089_v36 = vpop.permute.xlu1 %1088 }
 0x5e3   : > { %v1101_v40 = vsel %vm1096_vm6, %v1100_v38, %v1089_v36 }
 0x5ea   : > { %v1093_v42 = vpop.permute.xlu0 %1092 }
 0x5eb   : > { %v1102_v44 = vsel %vm1098_vm7, %v1101_v40, %v1093_v42 }
 0x5ec   : > { %v1105_v45 = vcombine.low %v1099_v43, %v1102_v44 }
 0x5ee   : > { %v1112_v46 = vrot.slane %v1105_v45, %v1111_v41 }
 0x5f0   : > { %v1119_v47 = vrot.slane %v1112_v46, %v1111_v41 }
 0x5f2   : > { %1125 = vst.msk [vmem:[%s158_s24] sm:$0x3] %vm1123_vm8, %v1119_v47 }
 0x5f3 PF: > { %s12_s9 = sadd.s32 1, %s1400_s9  }
 0x5f4   : > { %p9_p4 = scmp.ge.s32.totalorder %s12_s9, 4  }
 0x5f6   :  { %11 = sbr.rel (!%p9_p4) target bundleno = 1 (0x1), region = 61 }

</bundles_post_ra>
